<compile_context>
chip_gen: v7x
topology: tpu7x:2x2x1
jax: 0.10.0
libtpu: 0.0.40
codegen_flags: <defaults>
</compile_context>

<pallas_src>
import functools

import jax
import jax.numpy as jnp
from jax import lax
from jax.experimental import pallas as pl
from jax.experimental.pallas import tpu as pltpu

FEAT = 512  # resnet18 feature dim == self.rnn.input_size


def _round_up(x, m):
    return ((x + m - 1) // m) * m


# ----------------------------------------------------------------------------
# CNN feature extractor + fused LSTM layer-0 input projection
#   conv3x3 (im2col matmul, bf16 MXU) + ReLU + global SUM pool (1/P folded into
#   the projection weights), then feat @ (W_ih0^T / P) -> (N, 4*hp) bf16.
#   Layer-0 bias is added later (f32) inside the LSTM kernel.
# ----------------------------------------------------------------------------
def _cnn_proj_kernel(patch_ref, cw_ref, cb_ref, wih_ref, out_ref, *,
                     frames_per_block, pix):
    # conv3x3 as im2col matmul: (FB*P, K) bf16 @ (K, 512) bf16 -> f32
    conv = jnp.dot(patch_ref[...], cw_ref[...],
                   preferred_element_type=jnp.float32)
    act = jnp.maximum(conv + cb_ref[...], 0.0)                        # ReLU
    # global sum pool over the spatial axis (1/P pre-folded into wih weights)
    feat = jnp.sum(act.reshape(frames_per_block, pix, FEAT), axis=1)  # (FB,512) f32
    # fused LSTM layer-0 input projection (hoisted out of the recurrence)
    out_ref[...] = jnp.dot(feat.astype(jnp.bfloat16), wih_ref[...],
                           preferred_element_type=jnp.float32).astype(jnp.bfloat16)


def cnn_proj(patches, conv_w, conv_b, wih0_scaled):
    # patches: (N, P, K) bf16;  returns layer-0 gate inputs (N, 4*hp) bf16
    N, P, K = patches.shape
    four_hp = wih0_scaled.shape[1]
    # fb: multiple of 8, >= 8 (sublane-dense output stores, M = fb*P per weight load)
    fb = min(_round_up(N, 8), 16)
    n_pad = _round_up(N, fb)
    if n_pad != N:
        patches = jnp.pad(patches, ((0, n_pad - N), (0, 0), (0, 0)))
    patches_flat = patches.reshape(n_pad * P, K)
    kernel = functools.partial(_cnn_proj_kernel, frames_per_block=fb, pix=P)
    # TODO(synk): for realistic image sizes add spatial tiling (pixel-chunk grid axis
    # with an (fb, FEAT) GAP-sum accumulator) and build im2col patches in-kernel from
    # the raw padded frame instead of the 9x-expanded HBM tensor; derive fb and
    # vmem_limit_bytes per generation (64 MiB v7x vs 128 MiB v5e/v6e).
    out = pl.pallas_call(
        kernel,
        out_shape=jax.ShapeDtypeStruct((n_pad, four_hp), jnp.bfloat16),
        grid_spec=pltpu.PrefetchScalarGridSpec(
            num_scalar_prefetch=0,
            grid=(n_pad // fb,),
            in_specs=[
                pl.BlockSpec((fb * P, K), lambda n: (n, 0)),
                pl.BlockSpec((K, FEAT), lambda n: (0, 0)),
                pl.BlockSpec((1, FEAT), lambda n: (0, 0)),
                pl.BlockSpec((FEAT, four_hp), lambda n: (0, 0)),
            ],
            out_specs=pl.BlockSpec((fb, four_hp), lambda n: (n, 0)),
        ),
        compiler_params=pltpu.CompilerParams(dimension_semantics=("parallel",)),
    )(patches_flat, conv_w, conv_b, wih0_scaled)
    return out[:N] if n_pad != N else out


def im2col_3x3(frames):
    # frames: (N, C, H, W) -> patches (N, H*W, C*9), stride 1, padding 1
    # column ordering matches torch conv weight flatten: index = c*9 + ky*3 + kx
    N, C, H, W = frames.shape
    xp = jnp.pad(frames, ((0, 0), (0, 0), (1, 1), (1, 1)))
    cols = [xp[:, :, dy:dy + H, dx:dx + W] for dy in range(3) for dx in range(3)]
    patches = jnp.stack(cols, axis=2)                      # (N, C, 9, H, W)
    patches = patches.transpose(0, 3, 4, 1, 2).reshape(N, H * W, C * 9)
    return patches


# ----------------------------------------------------------------------------
# Fused multi-layer LSTM (PyTorch gate order i, f, g, o) + final FC.
# Grid over TIME CHUNKS (serial).  Layer-0 gate input (x @ Wih0/P) precomputed.
# hidden padded to hp (multiple of 128) so all gate slices / state tiles are
# lane-aligned; padded lanes of h/c provably stay zero (zero weight/bias cols).
# ----------------------------------------------------------------------------
def _lstm_fc_kernel(*refs, num_layers, hp, tq, num_chunks):
    xproj_ref, whh0_ref, b0_ref = refs[0], refs[1], refs[2]
    idx = 3
    upper = []                                   # (wcat_ref, b_ref) for layers 1..L-1
    for _ in range(num_layers - 1):
        upper.append((refs[idx], refs[idx + 1]))
        idx += 2
    fc_w_ref, fc_b_ref = refs[idx], refs[idx + 1]
    idx += 2
    out_ref = refs[idx]
    idx += 1
    state = []                                   # (h bf16, c f32) scratch per layer
    for _ in range(num_layers):
        state.append((refs[idx], refs[idx + 1]))
        idx += 2

    tc = pl.program_id(0)

    @pl.when(tc == 0)
    def _init():
        for h_ref, c_ref in state:
            h_ref[...] = jnp.zeros(h_ref.shape, h_ref.dtype)
            c_ref[...] = jnp.zeros(c_ref.shape, c_ref.dtype)

    # hoist grid-invariant weight/bias loads out of the unrolled time loop
    whh0 = whh0_ref[...]
    b0 = b0_ref[...]
    wcats = [w_ref[...] for w_ref, _ in upper]
    biases = [b_ref[...] for _, b_ref in upper]

    carry0 = []
    for h_ref, c_ref in state:
        carry0 += [h_ref[...], c_ref[...]]
    carry0 = tuple(carry0)

    def step(ti, carry):
        new = list(carry)
        x_g = xproj_ref[ti].astype(jnp.float32) + b0        # layer-0 bias in f32
        layer_in = None
        for l in range(num_layers):
            h_prev = new[2 * l]                              # (B, hp) bf16 shadow
            c_prev = new[2 * l + 1]                          # (B, hp) f32
            if l == 0:
                gates = x_g + jnp.dot(h_prev, whh0,
                                      preferred_element_type=jnp.float32)
            else:
                # fused input+recurrent matmul: [x | h] @ [Wih ; Whh]
                zin = jnp.concatenate([layer_in, h_prev], axis=-1)   # (B, 2*hp) bf16
                gates = (jnp.dot(zin, wcats[l - 1],
                                 preferred_element_type=jnp.float32)
                         + biases[l - 1])
            i_f = jax.nn.sigmoid(gates[:, :2 * hp])          # merged i|f sigmoid
            g = jnp.tanh(gates[:, 2 * hp:3 * hp])
            o = jax.nn.sigmoid(gates[:, 3 * hp:])
            c = i_f[:, hp:] * c_prev + i_f[:, :hp] * g
            h = (o * jnp.tanh(c)).astype(jnp.bfloat16)
            new[2 * l] = h
            new[2 * l + 1] = c
            layer_in = h
        return tuple(new)

    carry = lax.fori_loop(0, tq, step, carry0, unroll=True)

    # persist chunk-final state for the next grid step
    for l, (h_ref, c_ref) in enumerate(state):
        h_ref[...] = carry[2 * l]
        c_ref[...] = carry[2 * l + 1]

    @pl.when(tc == num_chunks - 1)
    def _final():
        # fused fc(out[:, -1, :]): only this (B, num_classes) block hits HBM
        h_last = carry[2 * (num_layers - 1)]
        out_ref[...] = (jnp.dot(h_last, fc_w_ref[...],
                                preferred_element_type=jnp.float32)
                        + fc_b_ref[...])


def _pick_time_chunk(t, cap=16):
    tq = min(t, cap)
    while t % tq:
        tq -= 1
    # TODO(synk): for large prime-ish T add a masked tail chunk instead of shrinking tq.
    return tq


def lstm_fc(xproj_tm, lstm_params, fc_w, fc_b):
    # xproj_tm: (T, B, 4*hp) bf16, time-major
    T, B, four_hp = xproj_tm.shape
    hp = four_hp // 4
    L = len(lstm_params)
    num_classes = fc_w.shape[1]
    tq = _pick_time_chunk(T)
    num_chunks = T // tq

    inputs = [xproj_tm, lstm_params[0]["whh_t"], lstm_params[0]["b"]]
    in_specs = [
        pl.BlockSpec((tq, B, four_hp), lambda t: (t, 0, 0)),
        pl.BlockSpec((hp, four_hp), lambda t: (0, 0)),
        pl.BlockSpec((1, four_hp), lambda t: (0, 0)),
    ]
    for l in range(1, L):
        inputs += [lstm_params[l]["wcat"], lstm_params[l]["b"]]
        in_specs += [
            pl.BlockSpec((2 * hp, four_hp), lambda t: (0, 0)),
            pl.BlockSpec((1, four_hp), lambda t: (0, 0)),
        ]
    inputs += [fc_w, fc_b]
    in_specs += [
        pl.BlockSpec((hp, num_classes), lambda t: (0, 0)),
        pl.BlockSpec((1, num_classes), lambda t: (0, 0)),
    ]

    scratch = []
    for _ in range(L):
        scratch += [pltpu.VMEM((B, hp), jnp.bfloat16),   # h state (bf16 shadow)
                    pltpu.VMEM((B, hp), jnp.float32)]    # c state (f32)

    kernel = functools.partial(_lstm_fc_kernel, num_layers=L, hp=hp,
                               tq=tq, num_chunks=num_chunks)
    # TODO(synk): on v7x add a leading "parallel" batch-tile grid axis (2 TensorCores)
    # with per-tile h/c scratch, and single-buffer the grid-invariant weight BlockSpecs
    # (pipeline_mode=pl.Buffered(1)) when hidden sizes push weight VMEM past 32 MiB.
    return pl.pallas_call(
        kernel,
        out_shape=jax.ShapeDtypeStruct((B, num_classes), jnp.float32),
        grid_spec=pltpu.PrefetchScalarGridSpec(
            num_scalar_prefetch=0,
            grid=(num_chunks,),
            in_specs=in_specs,
            out_specs=pl.BlockSpec((B, num_classes), lambda t: (0, 0)),
            scratch_shapes=scratch,
        ),
        compiler_params=pltpu.CompilerParams(dimension_semantics=("arbitrary",)),
    )(*inputs)


# ----------------------------------------------------------------------------
# Parameter init (deterministic, in-script, padded/transposed kernel layout)
# ----------------------------------------------------------------------------
def _pack_gate_cols(w_t, rows_pad, hp, hidden):
    """(rows, 4*hidden) torch-gate-ordered (i,f,g,o) -> zero-padded (rows_pad, 4*hp)."""
    rows = w_t.shape[0]
    w4 = w_t.reshape(rows, 4, hidden)
    out = jnp.zeros((rows_pad, 4, hp), jnp.float32)
    out = out.at[:rows, :, :hidden].set(w4)
    return out.reshape(rows_pad, 4 * hp)


def init_params(key, num_classes, lstm_layers, hidden_size, in_channels=3):
    hp = _round_up(hidden_size, 128)
    kconv, klstm, kfc = jax.random.split(key, 3)
    params = {}

    # synthetic conv3x3 backbone: torch (512, C, 3, 3) -> stored flattened/transposed
    kdim = in_channels * 9
    conv_w = jax.random.normal(kconv, (kdim, FEAT), jnp.float32) * jnp.sqrt(2.0 / kdim)
    params["conv_w"] = conv_w.astype(jnp.bfloat16)
    params["conv_b"] = jnp.zeros((1, FEAT), jnp.float32)

    bound = 1.0 / (hidden_size ** 0.5)
    lstm_params = []
    for l in range(lstm_layers):
        in_dim = FEAT if l == 0 else hidden_size
        k1, k2, k3, k4, klstm = jax.random.split(klstm, 5)
        if l == 0 and 4 * hidden_size <= in_dim:
            # nn.init.orthogonal_(weight_ih_l0): orthonormal rows of (4H, in) ==
            # orthonormal columns of the transposed (in, 4H) layout we store.
            a = jax.random.normal(k1, (in_dim, 4 * hidden_size), jnp.float32)
            q, _ = jnp.linalg.qr(a)
            wih_t = q
            b_ih = jnp.zeros((4 * hidden_size,), jnp.float32)  # constant_(bias_ih_l0, 0)
        else:
            wih_t = jax.random.uniform(k1, (in_dim, 4 * hidden_size), jnp.float32,
                                       -bound, bound)
            b_ih = jax.random.uniform(k3, (4 * hidden_size,), jnp.float32, -bound, bound)
        whh_t = jax.random.uniform(k2, (hidden_size, 4 * hidden_size), jnp.float32,
                                   -bound, bound)
        b_hh = jax.random.uniform(k4, (4 * hidden_size,), jnp.float32, -bound, bound)
        b = _pack_gate_cols((b_ih + b_hh)[None, :], 1, hp, hidden_size)   # f32
        whh_pad = _pack_gate_cols(whh_t, hp, hp, hidden_size).astype(jnp.bfloat16)
        if l == 0:
            wih_pad = _pack_gate_cols(wih_t, FEAT, hp, hidden_size).astype(jnp.bfloat16)
            lstm_params.append({"wih_t": wih_pad, "whh_t": whh_pad, "b": b})
        else:
            wih_pad = _pack_gate_cols(wih_t, hp, hp, hidden_size).astype(jnp.bfloat16)
            # pre-concatenated [Wih ; Whh] for the fused per-layer matmul
            lstm_params.append({"wcat": jnp.concatenate([wih_pad, whh_pad], axis=0),
                                "b": b})
    params["lstm"] = lstm_params

    # fc: kaiming_normal_(fan_in, relu): std = sqrt(2/hidden); torch (C, H) -> (hp, C)
    kw, kb = jax.random.split(kfc)
    fc_w = (jax.random.normal(kw, (hidden_size, num_classes), jnp.float32)
            * jnp.sqrt(2.0 / hidden_size))
    fc_w_pad = jnp.zeros((hp, num_classes), jnp.float32).at[:hidden_size].set(fc_w)
    params["fc_w"] = fc_w_pad.astype(jnp.bfloat16)
    params["fc_b"] = jax.random.uniform(kb, (1, num_classes), jnp.float32, -bound, bound)
    return params


# ----------------------------------------------------------------------------
# Forward wrapper
# ----------------------------------------------------------------------------
def cnn_lstm_rgb_forward(params, x):
    # x: (B, T, C, H, W) float32
    B, T, C, H, W = x.shape
    P = H * W
    hp = params["lstm"][0]["whh_t"].shape[0]
    four_hp = 4 * hp
    # time-major frame ordering: the reorder fuses into the im2col copy that is
    # materialized anyway, so xproj comes out (T, B, 4*hp) with no extra transpose.
    frames = x.transpose(1, 0, 2, 3, 4).reshape(T * B, C, H, W)
    patches = im2col_3x3(frames).astype(jnp.bfloat16)               # (T*B, H*W, C*9)
    # fold the global-average-pool 1/P into the layer-0 projection weights
    wih0_scaled = (params["lstm"][0]["wih_t"].astype(jnp.float32)
                   * (1.0 / P)).astype(jnp.bfloat16)
    xproj = cnn_proj(patches, params["conv_w"], params["conv_b"],
                     wih0_scaled)                                   # (T*B, 4*hp) bf16
    xproj_tm = xproj.reshape(T, B, four_hp)                         # already time-major
    return lstm_fc(xproj_tm, params["lstm"], params["fc_w"], params["fc_b"])


if __name__ == "__main__":
    B, T, C, H, W = 2, 4, 3, 16, 16
    num_classes, lstm_layers, hidden_size = 5, 2, 32

    key = jax.random.PRNGKey(0)
    kx, kp = jax.random.split(key)
    x = jax.random.normal(kx, (B, T, C, H, W), jnp.float32)
    params = init_params(kp, num_classes, lstm_layers, hidden_size, in_channels=C)

    out = cnn_lstm_rgb_forward(params, x)
    out = jax.block_until_ready(out)
    assert out.shape == (B, num_classes) and out.dtype == jnp.float32
    print("KERNEL_OK")
</pallas_src>

<mosaic_0001>
module attributes {stable_mosaic.version = 11 : i64} {
  func.func @_cnn_proj_kernel(%arg0: i32, %arg1: memref<2048x27xbf16, #tpu.memory_space<vmem>>, %arg2: memref<27x512xbf16, #tpu.memory_space<vmem>>, %arg3: memref<1x512xf32, #tpu.memory_space<vmem>>, %arg4: memref<512x512xbf16, #tpu.memory_space<vmem>>, %arg5: memref<8x512xbf16, #tpu.memory_space<vmem>>) attributes {dimension_semantics = [#tpu.dimension_semantics<parallel>], iteration_bounds = array<i64: 1>, scalar_prefetch = 0 : i64, scratch_operands = 0 : i64, tpu.core_type = #tpu.core_type<tc>, window_params = [{transform_indices = @transform_0, window_bounds = array<i64: 2048, 27>}, {pipeline_mode = #tpu.pipeline_mode<synchronous>, transform_indices = @transform_1, window_bounds = array<i64: 27, 512>}, {pipeline_mode = #tpu.pipeline_mode<synchronous>, transform_indices = @transform_2, window_bounds = array<i64: 1, 512>}, {pipeline_mode = #tpu.pipeline_mode<synchronous>, transform_indices = @transform_3, window_bounds = array<i64: 512, 512>}, {transform_indices = @transform_4, window_bounds = array<i64: 8, 512>}]} {
    %c0 = arith.constant 0 : index
    %c0_0 = arith.constant 0 : index
    %0 = vector.load %arg1[%c0, %c0_0] : memref<2048x27xbf16, #tpu.memory_space<vmem>>, vector<2048x27xbf16>
    %c0_1 = arith.constant 0 : index
    %c0_2 = arith.constant 0 : index
    %1 = vector.load %arg2[%c0_1, %c0_2] : memref<27x512xbf16, #tpu.memory_space<vmem>>, vector<27x512xbf16>
    %cst = arith.constant dense<0.000000e+00> : vector<2048x512xf32>
    %2 = tpu.matmul %0, %1, %cst {dimension_numbers = #tpu.dot_dimension_numbers<[1], [0], [0], [1], [0, 0, 1, 1], [], []>} : vector<2048x27xbf16>, vector<27x512xbf16>, vector<2048x512xf32> -> vector<2048x512xf32>
    %c0_3 = arith.constant 0 : index
    %c0_4 = arith.constant 0 : index
    %3 = vector.load %arg3[%c0_3, %c0_4] : memref<1x512xf32, #tpu.memory_space<vmem>>, vector<1x512xf32>
    %4 = vector.broadcast %3 : vector<1x512xf32> to vector<2048x512xf32>
    %5 = arith.addf %2, %4 : vector<2048x512xf32>
    %cst_5 = arith.constant 0.000000e+00 : f32
    %6 = vector.broadcast %cst_5 : f32 to vector<2048x512xf32>
    %7 = arith.maximumf %5, %6 : vector<2048x512xf32>
    %8 = vector.shape_cast %7 : vector<2048x512xf32> to vector<8x256x512xf32>
    %cst_6 = arith.constant dense<0.000000e+00> : vector<8x512xf32>
    %9 = vector.multi_reduction <add>, %8, %cst_6 [1] : vector<8x256x512xf32> to vector<8x512xf32>
    %10 = arith.truncf %9 : vector<8x512xf32> to vector<8x512xbf16>
    %c0_7 = arith.constant 0 : index
    %c0_8 = arith.constant 0 : index
    %11 = vector.load %arg4[%c0_7, %c0_8] : memref<512x512xbf16, #tpu.memory_space<vmem>>, vector<512x512xbf16>
    %cst_9 = arith.constant dense<0.000000e+00> : vector<8x512xf32>
    %12 = tpu.matmul %10, %11, %cst_9 {dimension_numbers = #tpu.dot_dimension_numbers<[1], [0], [0], [1], [0, 0, 1, 1], [], []>} : vector<8x512xbf16>, vector<512x512xbf16>, vector<8x512xf32> -> vector<8x512xf32>
    %13 = arith.truncf %12 : vector<8x512xf32> to vector<8x512xbf16>
    %c0_10 = arith.constant 0 : index
    %c0_11 = arith.constant 0 : index
    %14 = vector.load %arg5[%c0_10, %c0_11] : memref<8x512xbf16, #tpu.memory_space<vmem>>, vector<8x512xbf16>
    tpu.vector_store %arg5[%c0_10, %c0_11], %13 {strides = array<i32>} : memref<8x512xbf16, #tpu.memory_space<vmem>>, vector<8x512xbf16>,
    return
  }
  func.func @transform_0(%arg0: i32) -> (i32, i32) {
    %c0_i32 = arith.constant 0 : i32
    %c0_i32_0 = arith.constant 0 : i32
    return %arg0, %c0_i32 : i32, i32
  }
  func.func @transform_1(%arg0: i32) -> (i32, i32) {
    %c0_i32 = arith.constant 0 : i32
    %c0_i32_0 = arith.constant 0 : i32
    %c0_i32_1 = arith.constant 0 : i32
    return %c0_i32, %c0_i32_0 : i32, i32
  }
  func.func @transform_2(%arg0: i32) -> (i32, i32) {
    %c0_i32 = arith.constant 0 : i32
    %c0_i32_0 = arith.constant 0 : i32
    %c0_i32_1 = arith.constant 0 : i32
    return %c0_i32, %c0_i32_0 : i32, i32
  }
  func.func @transform_3(%arg0: i32) -> (i32, i32) {
    %c0_i32 = arith.constant 0 : i32
    %c0_i32_0 = arith.constant 0 : i32
    %c0_i32_1 = arith.constant 0 : i32
    return %c0_i32, %c0_i32_0 : i32, i32
  }
  func.func @transform_4(%arg0: i32) -> (i32, i32) {
    %c0_i32 = arith.constant 0 : i32
    %c0_i32_0 = arith.constant 0 : i32
    return %arg0, %c0_i32 : i32, i32
  }
}

</mosaic_0001>

<bundles_post_ra>
// kernel: tpu_custom_call.1
= control target key start
LH: loop header
LB: loop body
LE: loop exit
PB: predicated region body
PF: predicated region fallthrough
CT: control target
= control target key end

     0   :  { %vm1366_vm0 = vcmask 1044480   ;;  %vm1367_vm1 = vcmask 1045504   ;;  %v8210_v4 = vmov 65535   ;;  %v8211_v6 = vmov 0   ;;  %s10829_s0 = inlined_call_operand.vmem [shape: bf16[2048,27], index: 0, kind: input, shape index: {}]   ;;  %s10830_s1 = inlined_call_operand.vmem [shape: bf16[27,512], index: 1, kind: input, shape index: {}]   ;;  %s10831_s2 = inlined_call_operand.vmem [shape: f32[1,512], index: 2, kind: input, shape index: {}]   ;;  %s10832_s3 = inlined_call_operand.vmem [shape: bf16[512,512], index: 3, kind: input, shape index: {}]   ;;  %s10833_s4 = inlined_call_operand.hbm [shape: bf16[8,512], index: 4, kind: output, shape index: {}]  }
   0x1   :  { %v7854_v0 = vld [vmem:[%s10830_s1 + $0x4] ss:$16 sps:$4 sm:$0xff]   ;;  %v7856_v1 = vld [vmem:[%s10830_s1 + $0xc] ss:$16 sps:$4 sm:$0xff]   ;;  %v7858_v2 = vld [vmem:[%s10830_s1] ss:$16 sps:$4 sm:$0xff]   ;;  %1414 = vmatprep.mubr.bf16.mxu0 %v8211_v6  ;;  %2727 = vmatprep.mubr.bf16.mxu1 %v8211_v6 }
   0x2   :  { %1382 = vmatprep.subr.bf16.mxu0 %v7854_v0  ;;  %v7859_v3 = vld [vmem:[%s10830_s1 + $0x8] ss:$16 sps:$4 sm:$0xff]   ;;  %v1368_v5 = vsel %vm1366_vm0, 4294967295, %v8210_v4  ;;  %2695 = vmatprep.subr.bf16.mxu1 %v7856_v1  ;;  %v7860_v7 = vld [vmem:[%s10830_s1 + $0x24] ss:$16 sps:$4 sm:$0x3f]  }
   0x3   :  { %v1369_v8 = vsel %vm1367_vm1, %v1368_v5, 0  ;;  %1383 = vmatpush1.bf16.msra.mxu0 %v7858_v2  ;;  %2696 = vmatpush1.bf16.msra.mxu1 %v7859_v3  ;;  %v7862_v9 = vld [vmem:[%s10830_s1 + $0x2c] ss:$16 sps:$4 sm:$0x3f]   ;;  %v7866_v16 = vld [vmem:[%s10829_s0] sm:$0xff]   ;;  %vm981_vm2 = vcmask 220160  }
   0x4   :  { %v1374_v10 = vand.u32 %v7860_v7, %v1369_v8  ;;  %v7864_v11 = vld [vmem:[%s10830_s1 + $0x20] ss:$16 sps:$4 sm:$0x3f]   ;;  %v7865_v12 = vld [vmem:[%s10830_s1 + $0x28] ss:$16 sps:$4 sm:$0x3f]   ;;  %v1380_v13 = vand.u32 %v7862_v9, %v1369_v8 }
   0x5   :  { %v1371_v14 = vand.u32 %v7864_v11, %v1369_v8  ;;  %v1377_v15 = vand.u32 %v7865_v12, %v1369_v8  ;;  %v7867_v17 = vld [vmem:[%s10829_s0 + $0x8] sm:$0xff]   ;;  %v7868_v18 = vld [vmem:[%s10829_s0 + $0x10] sm:$0xff]   ;;  %v7869_v19 = vld [vmem:[%s10829_s0 + $0x18] sm:$0xff]  }
   0x6   :  { %1384 = vmatprep.subr.bf16.mxu0 %v1374_v10  ;;  %2697 = vmatprep.subr.bf16.mxu1 %v1380_v13  ;;  %v7870_v20 = vld [vmem:[%s10829_s0 + $0x20] sm:$0xff]   ;;  %v7871_v21 = vld [vmem:[%s10829_s0 + $0x28] sm:$0xff]   ;;  %v7872_v22 = vld [vmem:[%s10829_s0 + $0x30] sm:$0xff]  }
   0x7   :  { %1385 = vmatpush1.bf16.msra.mxu0 %v1371_v14  ;;  %2698 = vmatpush1.bf16.msra.mxu1 %v1377_v15  ;;  %v7873_v23 = vld [vmem:[%s10829_s0 + $0x38] sm:$0xff]   ;;  %v7874_v24 = vld [vmem:[%s10829_s0 + $0x40] sm:$0xff]   ;;  %v7875_v25 = vld [vmem:[%s10829_s0 + $0x48] sm:$0xff]  }
   0x8   :  { %v7876_v26 = vld [vmem:[%s10829_s0 + $0x50] sm:$0xff]   ;;  %v7877_v27 = vld [vmem:[%s10829_s0 + $0x58] sm:$0xff]   ;;  %v7878_v28 = vld [vmem:[%s10829_s0 + $0x60] sm:$0xff]  }
   0x9   :  { %v7879_v29 = vld [vmem:[%s10829_s0 + $0x68] sm:$0xff]   ;;  %v7880_v30 = vld [vmem:[%s10829_s0 + $0x70] sm:$0xff]   ;;  %v7881_v35 = vld [vmem:[%s10829_s0 + $0x78] sm:$0xff]  }
   0xa   :  { %7455 = vmatmul.mubr.msk.bf16.vlgmr.msra.gmra.mrb[0].mxu0 %vm981_vm2, %v7866_v16  ;;  %7583 = vmatmul.mubr.msk.bf16.vlgmr.msra.gmra.mrb[0].mxu1 %vm981_vm2, %v7866_v16  ;;  %v7896_v31 = vld [vmem:[%s10832_s3] ss:$16 sps:$4 sm:$0xff]   ;;  %v7898_v32 = vld [vmem:[%s10832_s3 + $0x4] ss:$16 sps:$4 sm:$0xff]   ;;  %v7899_v33 = vld [vmem:[%s10832_s3 + $0x8] ss:$16 sps:$4 sm:$0xff]  }
   0xb   :  { %1424 = vmatprep.mubr.bf16.mxu0 %v8211_v6  ;;  %2737 = vmatprep.mubr.bf16.mxu1 %v8211_v6  ;;  %v7901_v34 = vld [vmem:[%s10832_s3 + $0xc] ss:$16 sps:$4 sm:$0xff]   ;;  %v7882_v36 = vld [vmem:[%s10829_s0 + $0x80] sm:$0xff]  }
   0xc   :  { %7123 = vmatprep.subr.bf16.mxu0 %v7898_v32  ;;  %7205 = vmatprep.subr.bf16.mxu1 %v7901_v34  ;;  %v7883_v37 = vld [vmem:[%s10829_s0 + $0x88] sm:$0xff]  }
   0xd   :  { %7124 = vmatpush1.bf16.msra.mxu0 %v7896_v31  ;;  %7206 = vmatpush1.bf16.msra.mxu1 %v7899_v33 }
  0x12   :  { %7456 = vmatmul.mubr.msk.bf16.gmra.mrb[4].mxu0 %vm981_vm2, %v7867_v17  ;;  %7584 = vmatmul.mubr.msk.bf16.gmra.mrb[4].mxu1 %vm981_vm2, %v7867_v17 }
  0x13   :  { %1434 = vmatprep.mubr.bf16.mxu0 %v8211_v6  ;;  %2747 = vmatprep.mubr.bf16.mxu1 %v8211_v6 }
  0x1a   :  { %7457 = vmatmul.mubr.msk.bf16.gmra.mrb[8].mxu0 %vm981_vm2, %v7868_v18  ;;  %7585 = vmatmul.mubr.msk.bf16.gmra.mrb[8].mxu1 %vm981_vm2, %v7868_v18 }
  0x1b   :  { %1444 = vmatprep.mubr.bf16.mxu0 %v8211_v6  ;;  %2757 = vmatprep.mubr.bf16.mxu1 %v8211_v6 }
  0x22   :  { %7458 = vmatmul.mubr.msk.bf16.gmra.mrb[12].mxu0 %vm981_vm2, %v7869_v19  ;;  %7586 = vmatmul.mubr.msk.bf16.gmra.mrb[12].mxu1 %vm981_vm2, %v7869_v19 }
  0x23   :  { %1454 = vmatprep.mubr.bf16.mxu0 %v8211_v6  ;;  %2767 = vmatprep.mubr.bf16.mxu1 %v8211_v6 }
  0x2a   :  { %7459 = vmatmul.mubr.msk.bf16.gmra.mrb[16].mxu0 %vm981_vm2, %v7870_v20  ;;  %7587 = vmatmul.mubr.msk.bf16.gmra.mrb[16].mxu1 %vm981_vm2, %v7870_v20 }
  0x2b   :  { %1464 = vmatprep.mubr.bf16.mxu0 %v8211_v6  ;;  %2777 = vmatprep.mubr.bf16.mxu1 %v8211_v6 }
  0x32   :  { %7460 = vmatmul.mubr.msk.bf16.gmra.mrb[20].mxu0 %vm981_vm2, %v7871_v21  ;;  %7588 = vmatmul.mubr.msk.bf16.gmra.mrb[20].mxu1 %vm981_vm2, %v7871_v21 }
  0x33   :  { %1474 = vmatprep.mubr.bf16.mxu0 %v8211_v6  ;;  %2787 = vmatprep.mubr.bf16.mxu1 %v8211_v6 }
  0x3a   :  { %7461 = vmatmul.mubr.msk.bf16.gmra.mrb[24].mxu0 %vm981_vm2, %v7872_v22  ;;  %7589 = vmatmul.mubr.msk.bf16.gmra.mrb[24].mxu1 %vm981_vm2, %v7872_v22 }
  0x3b   :  { %1484 = vmatprep.mubr.bf16.mxu0 %v8211_v6  ;;  %2797 = vmatprep.mubr.bf16.mxu1 %v8211_v6 }
  0x42   :  { %7462 = vmatmul.mubr.msk.bf16.gmra.mrb[28].mxu0 %vm981_vm2, %v7873_v23  ;;  %7590 = vmatmul.mubr.msk.bf16.gmra.mrb[28].mxu1 %vm981_vm2, %v7873_v23 }
  0x43   :  { %1494 = vmatprep.mubr.bf16.mxu0 %v8211_v6  ;;  %2807 = vmatprep.mubr.bf16.mxu1 %v8211_v6 }
  0x4a   :  { %7463 = vmatmul.mubr.msk.bf16.gmra.mrb[32].mxu0 %vm981_vm2, %v7874_v24  ;;  %7591 = vmatmul.mubr.msk.bf16.gmra.mrb[32].mxu1 %vm981_vm2, %v7874_v24 }
  0x4b   :  { %1504 = vmatprep.mubr.bf16.mxu0 %v8211_v6  ;;  %2817 = vmatprep.mubr.bf16.mxu1 %v8211_v6 }
  0x52   :  { %7464 = vmatmul.mubr.msk.bf16.gmra.mrb[36].mxu0 %vm981_vm2, %v7875_v25  ;;  %7592 = vmatmul.mubr.msk.bf16.gmra.mrb[36].mxu1 %vm981_vm2, %v7875_v25 }
  0x53   :  { %1514 = vmatprep.mubr.bf16.mxu0 %v8211_v6  ;;  %2827 = vmatprep.mubr.bf16.mxu1 %v8211_v6 }
  0x5a   :  { %7465 = vmatmul.mubr.msk.bf16.gmra.mrb[40].mxu0 %vm981_vm2, %v7876_v26  ;;  %7593 = vmatmul.mubr.msk.bf16.gmra.mrb[40].mxu1 %vm981_vm2, %v7876_v26 }
  0x5b   :  { %1524 = vmatprep.mubr.bf16.mxu0 %v8211_v6  ;;  %2837 = vmatprep.mubr.bf16.mxu1 %v8211_v6 }
  0x62   :  { %7466 = vmatmul.mubr.msk.bf16.gmra.mrb[44].mxu0 %vm981_vm2, %v7877_v27  ;;  %7594 = vmatmul.mubr.msk.bf16.gmra.mrb[44].mxu1 %vm981_vm2, %v7877_v27 }
  0x63   :  { %1534 = vmatprep.mubr.bf16.mxu0 %v8211_v6  ;;  %2847 = vmatprep.mubr.bf16.mxu1 %v8211_v6 }
  0x6a   :  { %7467 = vmatmul.mubr.msk.bf16.gmra.mrb[48].mxu0 %vm981_vm2, %v7878_v28  ;;  %7595 = vmatmul.mubr.msk.bf16.gmra.mrb[48].mxu1 %vm981_vm2, %v7878_v28 }
  0x6b   :  { %1544 = vmatprep.mubr.bf16.mxu0 %v8211_v6  ;;  %2857 = vmatprep.mubr.bf16.mxu1 %v8211_v6 }
  0x72   :  { %7468 = vmatmul.mubr.msk.bf16.gmra.mrb[52].mxu0 %vm981_vm2, %v7879_v29  ;;  %7596 = vmatmul.mubr.msk.bf16.gmra.mrb[52].mxu1 %vm981_vm2, %v7879_v29 }
  0x73   :  { %1554 = vmatprep.mubr.bf16.mxu0 %v8211_v6  ;;  %2867 = vmatprep.mubr.bf16.mxu1 %v8211_v6 }
  0x7a   :  { %7469 = vmatmul.mubr.msk.bf16.gmra.mrb[56].mxu0 %vm981_vm2, %v7880_v30  ;;  %7597 = vmatmul.mubr.msk.bf16.gmra.mrb[56].mxu1 %vm981_vm2, %v7880_v30 }
  0x7b   :  { %1564 = vmatprep.mubr.bf16.mxu0 %v8211_v6  ;;  %2877 = vmatprep.mubr.bf16.mxu1 %v8211_v6 }
  0x82   :  { %7470 = vmatmul.mubr.msk.bf16.gmra.mrb[60].mxu0 %vm981_vm2, %v7881_v35  ;;  %7598 = vmatmul.mubr.msk.bf16.gmra.mrb[60].mxu1 %vm981_vm2, %v7881_v35 }
  0x83   :  { %1574 = vmatprep.mubr.bf16.mxu0 %v8211_v6  ;;  %2887 = vmatprep.mubr.bf16.mxu1 %v8211_v6 }
  0x8a   :  { %7471 = vmatmul.mubr.msk.bf16.gmra.mrb[64].mxu0 %vm981_vm2, %v7882_v36  ;;  %7599 = vmatmul.mubr.msk.bf16.gmra.mrb[64].mxu1 %vm981_vm2, %v7882_v36 }
  0x8b   :  { %1584 = vmatprep.mubr.bf16.mxu0 %v8211_v6  ;;  %2897 = vmatprep.mubr.bf16.mxu1 %v8211_v6 }
  0x8c   :  { %9 = vsyncpa [#allocation3], 0  ;;  %v285_v38 = vlaneseq  ;;  %v7884_v39 = vld [vmem:[%s10829_s0 + $0x90] sm:$0xff]   ;;  %v283_v42 = vld [vmem:[%s10831_s2] sm:$0xf]  ;;  %vm6440_vm3 = vcmask 1041409  }
  0x8d   :  { %v7885_v44 = vld [vmem:[%s10829_s0 + $0x98] sm:$0xff]   ;;  %v7886_v45 = vld [vmem:[%s10829_s0 + $0xa0] sm:$0xff]   ;;  %v7887_v46 = vld [vmem:[%s10829_s0 + $0xa8] sm:$0xff]   ;;  %vm6442_vm4 = vcmask 1042434   ;;  %vm6444_vm5 = vcmask 1043459   ;;  %vm6446_vm6 = vcmask 1044484  }
  0x8e   :  { %v286_v40 = vshrl.u32 %v285_v38, 7  ;;  %v7910_v47 = vld [vmem:[%s10832_s3 + $0x20] ss:$16 sps:$4 sm:$0xff]   ;;  %v7912_v48 = vld [vmem:[%s10832_s3 + $0x24] ss:$16 sps:$4 sm:$0xff]   ;;  %v7889_v52 = vld [vmem:[%s10829_s0 + $0xb8] sm:$0xff]  }
  0x8f   :  { %v7913_v49 = vld [vmem:[%s10832_s3 + $0x28] ss:$16 sps:$4 sm:$0xff]   ;;  %v7888_v50 = vld [vmem:[%s10829_s0 + $0xb0] sm:$0xff]   ;;  %v7915_v51 = vld [vmem:[%s10832_s3 + $0x2c] ss:$16 sps:$4 sm:$0xff]   ;;  %7125 = vmatprep.subr.bf16.mxu0 %v7912_v48  ;;  %vm6448_vm7 = vcmask 1045509  }
  0x90   :  { %v295_v41 = vsub.s32 2, %v286_v40  ;;  %7207 = vmatprep.subr.bf16.mxu1 %v7915_v51  ;;  %7126 = vmatpush1.bf16.msra.mxu0 %v7910_v47  ;;  %v7890_v53 = vld [vmem:[%s10829_s0 + $0xc0] sm:$0xff]   ;;  %v7891_v54 = vld [vmem:[%s10829_s0 + $0xc8] sm:$0xff]   ;;  %v7892_v55 = vld [vmem:[%s10829_s0 + $0xd0] sm:$0xff]   ;;  %v287_v56 = vsub.s32 0, %v286_v40  ;;  %v291_v57 = vsub.s32 1, %v286_v40 }
  0x91   :  { %7208 = vmatpush1.bf16.msra.mxu1 %v7913_v49  ;;  %v299_v58 = vsub.s32 3, %v286_v40  ;;  %v7893_v2 = vld [vmem:[%s10829_s0 + $0xd8] sm:$0xff]   ;;  %v7894_v32 = vld [vmem:[%s10829_s0 + $0xe0] sm:$0xff]   ;;  %vm6450_vm8 = vcmask 1046534   ;;  %vm6452_vm9 = vcmask 1047559   ;;  %s8212_s10 = smov [#allocation2]  }
  0x92   :  { %7472 = vmatmul.mubr.msk.bf16.gmra.mrb[68].mxu0 %vm981_vm2, %v7883_v37  ;;  %7600 = vmatmul.mubr.msk.bf16.gmra.mrb[68].mxu1 %vm981_vm2, %v7883_v37  ;;  %v8410_v43 = vrot.slane %v283_v42, %v295_v41  ;;  %v8480_v59 = vrot.slane %v283_v42, %v287_v56  ;;  %v8482_v60 = vrot.slane %v283_v42, %v291_v57  ;;  %s7311_s11 = sshll.u32 %s8212_s10, 4  ;;  %s7312_s11 = int_to_ptr.vmem [resolvable:$true] %s7311_s11 }
  0x93   :  { %1594 = vmatprep.mubr.bf16.mxu0 %v8211_v6  ;;  %2907 = vmatprep.mubr.bf16.mxu1 %v8211_v6  ;;  %v8486_v61 = vrot.slane %v283_v42, %v299_v58  ;;  %p8191_p1 = scmp.lt.s32.totalorder %s7312_s11, %s7312_s11 }
  0x9a   :  { %7473 = vmatmul.mubr.msk.bf16.gmra.mrb[72].mxu0 %vm981_vm2, %v7884_v39  ;;  %7601 = vmatmul.mubr.msk.bf16.gmra.mrb[72].mxu1 %vm981_vm2, %v7884_v39 }
  0x9b   :  { %1604 = vmatprep.mubr.bf16.mxu0 %v8211_v6  ;;  %2917 = vmatprep.mubr.bf16.mxu1 %v8211_v6 }
  0xa2   :  { %7474 = vmatmul.mubr.msk.bf16.gmra.mrb[76].mxu0 %vm981_vm2, %v7885_v44  ;;  %7602 = vmatmul.mubr.msk.bf16.gmra.mrb[76].mxu1 %vm981_vm2, %v7885_v44 }
  0xa3   :  { %1614 = vmatprep.mubr.bf16.mxu0 %v8211_v6  ;;  %2927 = vmatprep.mubr.bf16.mxu1 %v8211_v6 }
  0xaa   :  { %7475 = vmatmul.mubr.msk.bf16.gmra.mrb[80].mxu0 %vm981_vm2, %v7886_v45  ;;  %7603 = vmatmul.mubr.msk.bf16.gmra.mrb[80].mxu1 %vm981_vm2, %v7886_v45 }
  0xab   :  { %1624 = vmatprep.mubr.bf16.mxu0 %v8211_v6  ;;  %2937 = vmatprep.mubr.bf16.mxu1 %v8211_v6 }
  0xb2   :  { %7476 = vmatmul.mubr.msk.bf16.gmra.mrb[84].mxu0 %vm981_vm2, %v7887_v46  ;;  %7604 = vmatmul.mubr.msk.bf16.gmra.mrb[84].mxu1 %vm981_vm2, %v7887_v46 }
  0xb3   :  { %1634 = vmatprep.mubr.bf16.mxu0 %v8211_v6  ;;  %2947 = vmatprep.mubr.bf16.mxu1 %v8211_v6 }
  0xba   :  { %7477 = vmatmul.mubr.msk.bf16.gmra.mrb[88].mxu0 %vm981_vm2, %v7888_v50  ;;  %7605 = vmatmul.mubr.msk.bf16.gmra.mrb[88].mxu1 %vm981_vm2, %v7888_v50 }
  0xbb   :  { %1644 = vmatprep.mubr.bf16.mxu0 %v8211_v6  ;;  %2957 = vmatprep.mubr.bf16.mxu1 %v8211_v6 }
  0xc2   :  { %7478 = vmatmul.mubr.msk.bf16.gmra.mrb[92].mxu0 %vm981_vm2, %v7889_v52  ;;  %7606 = vmatmul.mubr.msk.bf16.gmra.mrb[92].mxu1 %vm981_vm2, %v7889_v52 }
  0xc3   :  { %1654 = vmatprep.mubr.bf16.mxu0 %v8211_v6  ;;  %2967 = vmatprep.mubr.bf16.mxu1 %v8211_v6 }
  0xca   :  { %7479 = vmatmul.mubr.msk.bf16.gmra.mrb[96].mxu0 %vm981_vm2, %v7890_v53  ;;  %7607 = vmatmul.mubr.msk.bf16.gmra.mrb[96].mxu1 %vm981_vm2, %v7890_v53 }
  0xcb   :  { %1664 = vmatprep.mubr.bf16.mxu0 %v8211_v6  ;;  %2977 = vmatprep.mubr.bf16.mxu1 %v8211_v6 }
  0xd2   :  { %7480 = vmatmul.mubr.msk.bf16.gmra.mrb[100].mxu0 %vm981_vm2, %v7891_v54  ;;  %7608 = vmatmul.mubr.msk.bf16.gmra.mrb[100].mxu1 %vm981_vm2, %v7891_v54 }
  0xd3   :  { %1674 = vmatprep.mubr.bf16.mxu0 %v8211_v6  ;;  %2987 = vmatprep.mubr.bf16.mxu1 %v8211_v6 }
  0xda   :  { %7481 = vmatmul.mubr.msk.bf16.gmra.mrb[104].mxu0 %vm981_vm2, %v7892_v55  ;;  %7609 = vmatmul.mubr.msk.bf16.gmra.mrb[104].mxu1 %vm981_vm2, %v7892_v55 }
  0xdb   :  { %1684 = vmatprep.mubr.bf16.mxu0 %v8211_v6  ;;  %2997 = vmatprep.mubr.bf16.mxu1 %v8211_v6 }
  0xdd   :  { %v1416_v62 = vpop.f32.mrb[0].mxu0  ;;  %v2729_v63 = vpop.f32.mrb[0].mxu1 }
  0xde   :  { %v1417_v0 = vadd.f32 %v1416_v62, %v8480_v59  ;;  %v1418_v1 = vpop.f32.mrb[1].mxu0  ;;  %v2730_v3 = vadd.f32 %v2729_v63, %v8410_v43  ;;  %v2731_v4 = vpop.f32.mrb[1].mxu1 }
  0xdf   :  { %v1419_v5 = vadd.f32 %v1418_v1, %v8482_v60  ;;  %v1420_v7 = vpop.f32.mrb[2].mxu0  ;;  %v2732_v8 = vadd.f32 %v2731_v4, %v8486_v61  ;;  %v2733_v9 = vpop.f32.mrb[2].mxu1 }
  0xe0   :  { %v1421_v10 = vadd.f32 %v1420_v7, %v8480_v59  ;;  %v1422_v11 = vpop.f32.mrb[3].mxu0  ;;  %v4010_v12 = vmax.f32 %v2730_v3, 0.0  ;;  %v2734_v13 = vadd.f32 %v2733_v9, %v8410_v43  ;;  %v2735_v14 = vpop.f32.mrb[3].mxu1  ;;  %v4008_v18 = vmax.f32 %v1417_v0, 0.0 }
  0xe1   :  { %v1423_v15 = vadd.f32 %v1422_v11, %v8482_v60  ;;  %v4011_v16 = vmax.f32 %v2732_v8, 0.0  ;;  %v2736_v17 = vadd.f32 %v2735_v14, %v8486_v61  ;;  %v4009_v21 = vmax.f32 %v1419_v5, 0.0  ;;  %v7895_v5 = vld [vmem:[%s10829_s0 + $0xe8] sm:$0xff]  }
  0xe2   :  { %v4012_v19 = vmax.f32 %v1421_v10, 0.0  ;;  %7482 = vmatmul.mubr.msk.bf16.gmra.mrb[108].mxu0 %vm981_vm2, %v7893_v2  ;;  %7610 = vmatmul.mubr.msk.bf16.gmra.mrb[108].mxu1 %vm981_vm2, %v7893_v2  ;;  %v4014_v20 = vmax.f32 %v2734_v13, 0.0 }
  0xe3   :  { %v4013_v22 = vmax.f32 %v1423_v15, 0.0  ;;  %1694 = vmatprep.mubr.bf16.mxu0 %v8211_v6  ;;  %3007 = vmatprep.mubr.bf16.mxu1 %v8211_v6  ;;  %v4015_v23 = vmax.f32 %v2736_v17, 0.0 }
  0xe4   :  { %v5032_v24 = vadd.f32 %v4012_v19, %v4008_v18  ;;  %v5106_v25 = vadd.f32 %v4014_v20, %v4010_v12 }
  0xe5   :  { %v5069_v26 = vadd.f32 %v4013_v22, %v4009_v21  ;;  %v1426_v27 = vpop.f32.mrb[4].mxu0  ;;  %v5143_v28 = vadd.f32 %v4015_v23, %v4011_v16  ;;  %v2739_v29 = vpop.f32.mrb[4].mxu1 }
  0xe6   :  { %v1427_v30 = vadd.f32 %v1426_v27, %v8480_v59  ;;  %v1428_v31 = vpop.f32.mrb[5].mxu0  ;;  %v2740_v33 = vadd.f32 %v2739_v29, %v8410_v43  ;;  %v2741_v34 = vpop.f32.mrb[5].mxu1 }
  0xe7   :  { %v1429_v35 = vadd.f32 %v1428_v31, %v8482_v60  ;;  %v1430_v36 = vpop.f32.mrb[6].mxu0  ;;  %v2742_v37 = vadd.f32 %v2741_v34, %v8486_v61  ;;  %v2743_v38 = vpop.f32.mrb[6].mxu1 }
  0xe8   :  { %v4016_v39 = vmax.f32 %v1427_v30, 0.0  ;;  %v1431_v40 = vadd.f32 %v1430_v36, %v8480_v59  ;;  %v1432_v41 = vpop.f32.mrb[7].mxu0  ;;  %v4018_v42 = vmax.f32 %v2740_v33, 0.0  ;;  %v2744_v44 = vadd.f32 %v2743_v38, %v8410_v43  ;;  %v2745_v45 = vpop.f32.mrb[7].mxu1  ;;  %v7924_v38 = vld [vmem:[%s10832_s3 + $0x40] ss:$16 sps:$4 sm:$0xff]  }
  0xe9   :  { %v4017_v46 = vmax.f32 %v1429_v35, 0.0  ;;  %v1433_v47 = vadd.f32 %v1432_v41, %v8482_v60  ;;  %v4019_v48 = vmax.f32 %v2742_v37, 0.0  ;;  %v2746_v49 = vadd.f32 %v2745_v45, %v8486_v61  ;;  %v7927_v45 = vld [vmem:[%s10832_s3 + $0x48] ss:$16 sps:$4 sm:$0xff]  }
  0xea   :  { %v5033_v50 = vadd.f32 %v5032_v24, %v4016_v39  ;;  %v4020_v51 = vmax.f32 %v1431_v40, 0.0  ;;  %7483 = vmatmul.mubr.msk.bf16.gmra.mrb[112].mxu0 %vm981_vm2, %v7894_v32  ;;  %7611 = vmatmul.mubr.msk.bf16.gmra.mrb[112].mxu1 %vm981_vm2, %v7894_v32  ;;  %v5107_v52 = vadd.f32 %v5106_v25, %v4018_v42  ;;  %v4022_v53 = vmax.f32 %v2744_v44, 0.0  ;;  %v7902_v32 = vld [vmem:[%s10829_s0 + $0xf0] sm:$0xff]  }
  0xeb   :  { %v5070_v54 = vadd.f32 %v5069_v26, %v4017_v46  ;;  %v4021_v55 = vmax.f32 %v1433_v47, 0.0  ;;  %1704 = vmatprep.mubr.bf16.mxu0 %v8211_v6  ;;  %3017 = vmatprep.mubr.bf16.mxu1 %v8211_v6  ;;  %v5144_v56 = vadd.f32 %v5143_v28, %v4019_v48  ;;  %v4023_v57 = vmax.f32 %v2746_v49, 0.0  ;;  %v7926_v39 = vld [vmem:[%s10832_s3 + $0x44] ss:$16 sps:$4 sm:$0xff]   ;;  %v7929_v46 = vld [vmem:[%s10832_s3 + $0x4c] ss:$16 sps:$4 sm:$0xff]  }
  0xec   :  { %v5034_v58 = vadd.f32 %v5033_v50, %v4020_v51  ;;  %v5108_v62 = vadd.f32 %v5107_v52, %v4022_v53  ;;  %7127 = vmatprep.subr.bf16.mxu0 %v7926_v39  ;;  %7209 = vmatprep.subr.bf16.mxu1 %v7929_v46 }
  0xed   :  { %v5071_v63 = vadd.f32 %v5070_v54, %v4021_v55  ;;  %v1436_v0 = vpop.f32.mrb[8].mxu0  ;;  %v5145_v1 = vadd.f32 %v5144_v56, %v4023_v57  ;;  %v2749_v2 = vpop.f32.mrb[8].mxu1  ;;  %7128 = vmatpush1.bf16.msra.mxu0 %v7924_v38  ;;  %7210 = vmatpush1.bf16.msra.mxu1 %v7927_v45 }
  0xee   :  { %v1437_v3 = vadd.f32 %v1436_v0, %v8480_v59  ;;  %v1438_v4 = vpop.f32.mrb[9].mxu0  ;;  %v2750_v7 = vadd.f32 %v2749_v2, %v8410_v43  ;;  %v2751_v8 = vpop.f32.mrb[9].mxu1 }
  0xef   :  { %v1439_v9 = vadd.f32 %v1438_v4, %v8482_v60  ;;  %v1440_v10 = vpop.f32.mrb[10].mxu0  ;;  %v2752_v11 = vadd.f32 %v2751_v8, %v8486_v61  ;;  %v2753_v12 = vpop.f32.mrb[10].mxu1 }
  0xf0   :  { %v4024_v13 = vmax.f32 %v1437_v3, 0.0  ;;  %v1441_v14 = vadd.f32 %v1440_v10, %v8480_v59  ;;  %v1442_v15 = vpop.f32.mrb[11].mxu0  ;;  %v4026_v16 = vmax.f32 %v2750_v7, 0.0  ;;  %v2754_v17 = vadd.f32 %v2753_v12, %v8410_v43  ;;  %v2755_v18 = vpop.f32.mrb[11].mxu1 }
  0xf1   :  { %v4025_v19 = vmax.f32 %v1439_v9, 0.0  ;;  %v1443_v20 = vadd.f32 %v1442_v15, %v8482_v60  ;;  %v4027_v21 = vmax.f32 %v2752_v11, 0.0  ;;  %v2756_v22 = vadd.f32 %v2755_v18, %v8486_v61 }
  0xf2   :  { %v5035_v23 = vadd.f32 %v5034_v58, %v4024_v13  ;;  %v4028_v24 = vmax.f32 %v1441_v14, 0.0  ;;  %7484 = vmatmul.mubr.msk.bf16.gmra.mrb[116].mxu0 %vm981_vm2, %v7895_v5  ;;  %7612 = vmatmul.mubr.msk.bf16.gmra.mrb[116].mxu1 %vm981_vm2, %v7895_v5  ;;  %v5109_v25 = vadd.f32 %v5108_v62, %v4026_v16  ;;  %v4030_v26 = vmax.f32 %v2754_v17, 0.0  ;;  %v7903_v17 = vld [vmem:[%s10829_s0 + $0xf8] sm:$0xff]  }
  0xf3   :  { %v5072_v27 = vadd.f32 %v5071_v63, %v4025_v19  ;;  %v4029_v28 = vmax.f32 %v1443_v20, 0.0  ;;  %1714 = vmatprep.mubr.bf16.mxu0 %v8211_v6  ;;  %3027 = vmatprep.mubr.bf16.mxu1 %v8211_v6  ;;  %v5146_v29 = vadd.f32 %v5145_v1, %v4027_v21  ;;  %v4031_v30 = vmax.f32 %v2756_v22, 0.0 }
  0xf4   :  { %v5036_v31 = vadd.f32 %v5035_v23, %v4028_v24  ;;  %v5110_v33 = vadd.f32 %v5109_v25, %v4030_v26 }
  0xf5   :  { %v5073_v34 = vadd.f32 %v5072_v27, %v4029_v28  ;;  %v1446_v35 = vpop.f32.mrb[12].mxu0  ;;  %v5147_v36 = vadd.f32 %v5146_v29, %v4031_v30  ;;  %v2759_v37 = vpop.f32.mrb[12].mxu1 }
  0xf6   :  { %v1447_v40 = vadd.f32 %v1446_v35, %v8480_v59  ;;  %v1448_v41 = vpop.f32.mrb[13].mxu0  ;;  %v2760_v42 = vadd.f32 %v2759_v37, %v8410_v43  ;;  %v2761_v44 = vpop.f32.mrb[13].mxu1 }
  0xf7   :  { %v1449_v47 = vadd.f32 %v1448_v41, %v8482_v60  ;;  %v1450_v48 = vpop.f32.mrb[14].mxu0  ;;  %v2762_v49 = vadd.f32 %v2761_v44, %v8486_v61  ;;  %v2763_v50 = vpop.f32.mrb[14].mxu1 }
  0xf8   :  { %v4032_v51 = vmax.f32 %v1447_v40, 0.0  ;;  %v1451_v52 = vadd.f32 %v1450_v48, %v8480_v59  ;;  %v1452_v53 = vpop.f32.mrb[15].mxu0  ;;  %v4034_v54 = vmax.f32 %v2760_v42, 0.0  ;;  %v2764_v55 = vadd.f32 %v2763_v50, %v8410_v43  ;;  %v2765_v56 = vpop.f32.mrb[15].mxu1 }
  0xf9   :  { %v4033_v57 = vmax.f32 %v1449_v47, 0.0  ;;  %v1453_v58 = vadd.f32 %v1452_v53, %v8482_v60  ;;  %v4035_v62 = vmax.f32 %v2762_v49, 0.0  ;;  %v2766_v63 = vadd.f32 %v2765_v56, %v8486_v61 }
  0xfa   :  { %v5037_v0 = vadd.f32 %v5036_v31, %v4032_v51  ;;  %v4036_v1 = vmax.f32 %v1451_v52, 0.0  ;;  %7485 = vmatmul.mubr.msk.bf16.gmra.mrb[120].mxu0 %vm981_vm2, %v7902_v32  ;;  %7613 = vmatmul.mubr.msk.bf16.gmra.mrb[120].mxu1 %vm981_vm2, %v7902_v32  ;;  %v5111_v2 = vadd.f32 %v5110_v33, %v4034_v54  ;;  %v4038_v3 = vmax.f32 %v2764_v55, 0.0  ;;  %v7904_v51 = vld [vmem:[%s10829_s0 + $0x100] sm:$0xff]  }
  0xfb   :  { %v5074_v4 = vadd.f32 %v5073_v34, %v4033_v57  ;;  %v4037_v5 = vmax.f32 %v1453_v58, 0.0  ;;  %1724 = vmatprep.mubr.bf16.mxu0 %v8211_v6  ;;  %3037 = vmatprep.mubr.bf16.mxu1 %v8211_v6  ;;  %v5148_v7 = vadd.f32 %v5147_v36, %v4035_v62  ;;  %v4039_v8 = vmax.f32 %v2766_v63, 0.0 }
  0xfc   :  { %v5038_v9 = vadd.f32 %v5037_v0, %v4036_v1  ;;  %v5112_v10 = vadd.f32 %v5111_v2, %v4038_v3 }
  0xfd   :  { %v5075_v11 = vadd.f32 %v5074_v4, %v4037_v5  ;;  %v1456_v12 = vpop.f32.mrb[16].mxu0  ;;  %v5149_v13 = vadd.f32 %v5148_v7, %v4039_v8  ;;  %v2769_v14 = vpop.f32.mrb[16].mxu1 }
  0xfe   :  { %v1457_v15 = vadd.f32 %v1456_v12, %v8480_v59  ;;  %v1458_v16 = vpop.f32.mrb[17].mxu0  ;;  %v2770_v18 = vadd.f32 %v2769_v14, %v8410_v43  ;;  %v2771_v19 = vpop.f32.mrb[17].mxu1 }
  0xff   :  { %v1459_v20 = vadd.f32 %v1458_v16, %v8482_v60  ;;  %v1460_v21 = vpop.f32.mrb[18].mxu0  ;;  %v2772_v22 = vadd.f32 %v2771_v19, %v8486_v61  ;;  %v2773_v23 = vpop.f32.mrb[18].mxu1 }
 0x100   :  { %v4040_v24 = vmax.f32 %v1457_v15, 0.0  ;;  %v1461_v25 = vadd.f32 %v1460_v21, %v8480_v59  ;;  %v1462_v26 = vpop.f32.mrb[19].mxu0  ;;  %v4042_v27 = vmax.f32 %v2770_v18, 0.0  ;;  %v2774_v28 = vadd.f32 %v2773_v23, %v8410_v43  ;;  %v2775_v29 = vpop.f32.mrb[19].mxu1 }
 0x101   :  { %v4041_v30 = vmax.f32 %v1459_v20, 0.0  ;;  %v1463_v31 = vadd.f32 %v1462_v26, %v8482_v60  ;;  %v4043_v32 = vmax.f32 %v2772_v22, 0.0  ;;  %v2776_v33 = vadd.f32 %v2775_v29, %v8486_v61 }
 0x102   :  { %v5039_v34 = vadd.f32 %v5038_v9, %v4040_v24  ;;  %v4044_v35 = vmax.f32 %v1461_v25, 0.0  ;;  %7486 = vmatmul.mubr.msk.bf16.gmra.mrb[124].mxu0 %vm981_vm2, %v7903_v17  ;;  %7614 = vmatmul.mubr.msk.bf16.gmra.mrb[124].mxu1 %vm981_vm2, %v7903_v17  ;;  %v5113_v36 = vadd.f32 %v5112_v10, %v4042_v27  ;;  %v4046_v37 = vmax.f32 %v2774_v28, 0.0  ;;  %v7905_v24 = vld [vmem:[%s10829_s0 + $0x108] sm:$0xff]  }
 0x103   :  { %v5076_v38 = vadd.f32 %v5075_v11, %v4041_v30  ;;  %v4045_v39 = vmax.f32 %v1463_v31, 0.0  ;;  %1734 = vmatprep.mubr.bf16.mxu0 %v8211_v6  ;;  %3047 = vmatprep.mubr.bf16.mxu1 %v8211_v6  ;;  %v5150_v40 = vadd.f32 %v5149_v13, %v4043_v32  ;;  %v4047_v41 = vmax.f32 %v2776_v33, 0.0 }
 0x104   :  { %v5040_v42 = vadd.f32 %v5039_v34, %v4044_v35  ;;  %v5114_v44 = vadd.f32 %v5113_v36, %v4046_v37 }
 0x105   :  { %v5077_v45 = vadd.f32 %v5076_v38, %v4045_v39  ;;  %v1466_v46 = vpop.f32.mrb[20].mxu0  ;;  %v5151_v47 = vadd.f32 %v5150_v40, %v4047_v41  ;;  %v2779_v48 = vpop.f32.mrb[20].mxu1 }
 0x106   :  { %v1467_v49 = vadd.f32 %v1466_v46, %v8480_v59  ;;  %v1468_v50 = vpop.f32.mrb[21].mxu0  ;;  %v2780_v52 = vadd.f32 %v2779_v48, %v8410_v43  ;;  %v2781_v53 = vpop.f32.mrb[21].mxu1 }
 0x107   :  { %v1469_v54 = vadd.f32 %v1468_v50, %v8482_v60  ;;  %v1470_v55 = vpop.f32.mrb[22].mxu0  ;;  %v2782_v56 = vadd.f32 %v2781_v53, %v8486_v61  ;;  %v2783_v57 = vpop.f32.mrb[22].mxu1 }
 0x108   :  { %v4048_v58 = vmax.f32 %v1467_v49, 0.0  ;;  %v1471_v62 = vadd.f32 %v1470_v55, %v8480_v59  ;;  %v1472_v63 = vpop.f32.mrb[23].mxu0  ;;  %v4050_v0 = vmax.f32 %v2780_v52, 0.0  ;;  %v2784_v1 = vadd.f32 %v2783_v57, %v8410_v43  ;;  %v2785_v2 = vpop.f32.mrb[23].mxu1 }
 0x109   :  { %v4049_v3 = vmax.f32 %v1469_v54, 0.0  ;;  %v1473_v4 = vadd.f32 %v1472_v63, %v8482_v60  ;;  %v4051_v5 = vmax.f32 %v2782_v56, 0.0  ;;  %v2786_v7 = vadd.f32 %v2785_v2, %v8486_v61 }
 0x10a   :  { %v5041_v8 = vadd.f32 %v5040_v42, %v4048_v58  ;;  %v4052_v9 = vmax.f32 %v1471_v62, 0.0  ;;  %7487 = vmatmul.mubr.msk.bf16.gmra.mrb[128].mxu0 %vm981_vm2, %v7904_v51  ;;  %7615 = vmatmul.mubr.msk.bf16.gmra.mrb[128].mxu1 %vm981_vm2, %v7904_v51  ;;  %v5115_v10 = vadd.f32 %v5114_v44, %v4050_v0  ;;  %v4054_v11 = vmax.f32 %v2784_v1, 0.0  ;;  %v7906_v58 = vld [vmem:[%s10829_s0 + $0x110] sm:$0xff]  }
 0x10b   :  { %v5078_v12 = vadd.f32 %v5077_v45, %v4049_v3  ;;  %v4053_v13 = vmax.f32 %v1473_v4, 0.0  ;;  %1744 = vmatprep.mubr.bf16.mxu0 %v8211_v6  ;;  %3057 = vmatprep.mubr.bf16.mxu1 %v8211_v6  ;;  %v5152_v14 = vadd.f32 %v5151_v47, %v4051_v5  ;;  %v4055_v15 = vmax.f32 %v2786_v7, 0.0 }
 0x10c   :  { %v5042_v16 = vadd.f32 %v5041_v8, %v4052_v9  ;;  %v5116_v17 = vadd.f32 %v5115_v10, %v4054_v11 }
 0x10d   :  { %v5079_v18 = vadd.f32 %v5078_v12, %v4053_v13  ;;  %v1476_v19 = vpop.f32.mrb[24].mxu0  ;;  %v5153_v20 = vadd.f32 %v5152_v14, %v4055_v15  ;;  %v2789_v21 = vpop.f32.mrb[24].mxu1 }
 0x10e   :  { %v1477_v22 = vadd.f32 %v1476_v19, %v8480_v59  ;;  %v1478_v23 = vpop.f32.mrb[25].mxu0  ;;  %v2790_v25 = vadd.f32 %v2789_v21, %v8410_v43  ;;  %v2791_v26 = vpop.f32.mrb[25].mxu1 }
 0x10f   :  { %v1479_v27 = vadd.f32 %v1478_v23, %v8482_v60  ;;  %v1480_v28 = vpop.f32.mrb[26].mxu0  ;;  %v2792_v29 = vadd.f32 %v2791_v26, %v8486_v61  ;;  %v2793_v30 = vpop.f32.mrb[26].mxu1 }
 0x110   :  { %v4056_v31 = vmax.f32 %v1477_v22, 0.0  ;;  %v1481_v32 = vadd.f32 %v1480_v28, %v8480_v59  ;;  %v1482_v33 = vpop.f32.mrb[27].mxu0  ;;  %v4058_v34 = vmax.f32 %v2790_v25, 0.0  ;;  %v2794_v35 = vadd.f32 %v2793_v30, %v8410_v43  ;;  %v2795_v36 = vpop.f32.mrb[27].mxu1 }
 0x111   :  { %v4057_v37 = vmax.f32 %v1479_v27, 0.0  ;;  %v1483_v38 = vadd.f32 %v1482_v33, %v8482_v60  ;;  %v4059_v39 = vmax.f32 %v2792_v29, 0.0  ;;  %v2796_v40 = vadd.f32 %v2795_v36, %v8486_v61 }
 0x112   :  { %v5043_v41 = vadd.f32 %v5042_v16, %v4056_v31  ;;  %v4060_v42 = vmax.f32 %v1481_v32, 0.0  ;;  %7488 = vmatmul.mubr.msk.bf16.gmra.mrb[132].mxu0 %vm981_vm2, %v7905_v24  ;;  %7616 = vmatmul.mubr.msk.bf16.gmra.mrb[132].mxu1 %vm981_vm2, %v7905_v24  ;;  %v5117_v44 = vadd.f32 %v5116_v17, %v4058_v34  ;;  %v4062_v45 = vmax.f32 %v2794_v35, 0.0  ;;  %v7907_v31 = vld [vmem:[%s10829_s0 + $0x118] sm:$0xff]  }
 0x113   :  { %v5080_v46 = vadd.f32 %v5079_v18, %v4057_v37  ;;  %v4061_v47 = vmax.f32 %v1483_v38, 0.0  ;;  %1754 = vmatprep.mubr.bf16.mxu0 %v8211_v6  ;;  %3067 = vmatprep.mubr.bf16.mxu1 %v8211_v6  ;;  %v5154_v48 = vadd.f32 %v5153_v20, %v4059_v39  ;;  %v4063_v49 = vmax.f32 %v2796_v40, 0.0 }
 0x114   :  { %v5044_v50 = vadd.f32 %v5043_v41, %v4060_v42  ;;  %v5118_v51 = vadd.f32 %v5117_v44, %v4062_v45 }
 0x115   :  { %v5081_v52 = vadd.f32 %v5080_v46, %v4061_v47  ;;  %v1486_v53 = vpop.f32.mrb[28].mxu0  ;;  %v5155_v54 = vadd.f32 %v5154_v48, %v4063_v49  ;;  %v2799_v55 = vpop.f32.mrb[28].mxu1 }
 0x116   :  { %v1487_v56 = vadd.f32 %v1486_v53, %v8480_v59  ;;  %v1488_v57 = vpop.f32.mrb[29].mxu0  ;;  %v2800_v62 = vadd.f32 %v2799_v55, %v8410_v43  ;;  %v2801_v63 = vpop.f32.mrb[29].mxu1 }
 0x117   :  { %v1489_v0 = vadd.f32 %v1488_v57, %v8482_v60  ;;  %v1490_v1 = vpop.f32.mrb[30].mxu0  ;;  %v2802_v2 = vadd.f32 %v2801_v63, %v8486_v61  ;;  %v2803_v3 = vpop.f32.mrb[30].mxu1 }
 0x118   :  { %v4064_v4 = vmax.f32 %v1487_v56, 0.0  ;;  %v1491_v5 = vadd.f32 %v1490_v1, %v8480_v59  ;;  %v1492_v7 = vpop.f32.mrb[31].mxu0  ;;  %v4066_v8 = vmax.f32 %v2800_v62, 0.0  ;;  %v2804_v9 = vadd.f32 %v2803_v3, %v8410_v43  ;;  %v2805_v10 = vpop.f32.mrb[31].mxu1 }
 0x119   :  { %v4065_v11 = vmax.f32 %v1489_v0, 0.0  ;;  %v1493_v12 = vadd.f32 %v1492_v7, %v8482_v60  ;;  %v4067_v13 = vmax.f32 %v2802_v2, 0.0  ;;  %v2806_v14 = vadd.f32 %v2805_v10, %v8486_v61 }
 0x11a   :  { %v5045_v15 = vadd.f32 %v5044_v50, %v4064_v4  ;;  %v4068_v16 = vmax.f32 %v1491_v5, 0.0  ;;  %7489 = vmatmul.mubr.msk.bf16.gmra.mrb[136].mxu0 %vm981_vm2, %v7906_v58  ;;  %7617 = vmatmul.mubr.msk.bf16.gmra.mrb[136].mxu1 %vm981_vm2, %v7906_v58  ;;  %v5119_v17 = vadd.f32 %v5118_v51, %v4066_v8  ;;  %v4070_v18 = vmax.f32 %v2804_v9, 0.0  ;;  %v7908_v4 = vld [vmem:[%s10829_s0 + $0x120] sm:$0xff]  }
 0x11b   :  { %v5082_v19 = vadd.f32 %v5081_v52, %v4065_v11  ;;  %v4069_v20 = vmax.f32 %v1493_v12, 0.0  ;;  %1764 = vmatprep.mubr.bf16.mxu0 %v8211_v6  ;;  %3077 = vmatprep.mubr.bf16.mxu1 %v8211_v6  ;;  %v5156_v21 = vadd.f32 %v5155_v54, %v4067_v13  ;;  %v4071_v22 = vmax.f32 %v2806_v14, 0.0 }
 0x11c   :  { %v5046_v23 = vadd.f32 %v5045_v15, %v4068_v16  ;;  %v5120_v24 = vadd.f32 %v5119_v17, %v4070_v18 }
 0x11d   :  { %v5083_v25 = vadd.f32 %v5082_v19, %v4069_v20  ;;  %v1496_v26 = vpop.f32.mrb[32].mxu0  ;;  %v5157_v27 = vadd.f32 %v5156_v21, %v4071_v22  ;;  %v2809_v28 = vpop.f32.mrb[32].mxu1 }
 0x11e   :  { %v1497_v29 = vadd.f32 %v1496_v26, %v8480_v59  ;;  %v1498_v30 = vpop.f32.mrb[33].mxu0  ;;  %v2810_v32 = vadd.f32 %v2809_v28, %v8410_v43  ;;  %v2811_v33 = vpop.f32.mrb[33].mxu1 }
 0x11f   :  { %v1499_v34 = vadd.f32 %v1498_v30, %v8482_v60  ;;  %v1500_v35 = vpop.f32.mrb[34].mxu0  ;;  %v2812_v36 = vadd.f32 %v2811_v33, %v8486_v61  ;;  %v2813_v37 = vpop.f32.mrb[34].mxu1 }
 0x120   :  { %v4072_v38 = vmax.f32 %v1497_v29, 0.0  ;;  %v1501_v39 = vadd.f32 %v1500_v35, %v8480_v59  ;;  %v1502_v40 = vpop.f32.mrb[35].mxu0  ;;  %v4074_v41 = vmax.f32 %v2810_v32, 0.0  ;;  %v2814_v42 = vadd.f32 %v2813_v37, %v8410_v43  ;;  %v2815_v44 = vpop.f32.mrb[35].mxu1 }
 0x121   :  { %v4073_v45 = vmax.f32 %v1499_v34, 0.0  ;;  %v1503_v46 = vadd.f32 %v1502_v40, %v8482_v60  ;;  %v4075_v47 = vmax.f32 %v2812_v36, 0.0  ;;  %v2816_v48 = vadd.f32 %v2815_v44, %v8486_v61 }
 0x122   :  { %v5047_v49 = vadd.f32 %v5046_v23, %v4072_v38  ;;  %v4076_v50 = vmax.f32 %v1501_v39, 0.0  ;;  %7490 = vmatmul.mubr.msk.bf16.gmra.mrb[140].mxu0 %vm981_vm2, %v7907_v31  ;;  %7618 = vmatmul.mubr.msk.bf16.gmra.mrb[140].mxu1 %vm981_vm2, %v7907_v31  ;;  %v5121_v51 = vadd.f32 %v5120_v24, %v4074_v41  ;;  %v4078_v52 = vmax.f32 %v2814_v42, 0.0  ;;  %v7909_v38 = vld [vmem:[%s10829_s0 + $0x128] sm:$0xff]  }
 0x123   :  { %v5084_v53 = vadd.f32 %v5083_v25, %v4073_v45  ;;  %v4077_v54 = vmax.f32 %v1503_v46, 0.0  ;;  %1774 = vmatprep.mubr.bf16.mxu0 %v8211_v6  ;;  %3087 = vmatprep.mubr.bf16.mxu1 %v8211_v6  ;;  %v5158_v55 = vadd.f32 %v5157_v27, %v4075_v47  ;;  %v4079_v56 = vmax.f32 %v2816_v48, 0.0 }
 0x124   :  { %v5048_v57 = vadd.f32 %v5047_v49, %v4076_v50  ;;  %v5122_v58 = vadd.f32 %v5121_v51, %v4078_v52 }
 0x125   :  { %v5085_v62 = vadd.f32 %v5084_v53, %v4077_v54  ;;  %v1506_v63 = vpop.f32.mrb[36].mxu0  ;;  %v5159_v0 = vadd.f32 %v5158_v55, %v4079_v56  ;;  %v2819_v1 = vpop.f32.mrb[36].mxu1 }
 0x126   :  { %v1507_v2 = vadd.f32 %v1506_v63, %v8480_v59  ;;  %v1508_v3 = vpop.f32.mrb[37].mxu0  ;;  %v2820_v5 = vadd.f32 %v2819_v1, %v8410_v43  ;;  %v2821_v7 = vpop.f32.mrb[37].mxu1 }
 0x127   :  { %v1509_v8 = vadd.f32 %v1508_v3, %v8482_v60  ;;  %v1510_v9 = vpop.f32.mrb[38].mxu0  ;;  %v2822_v10 = vadd.f32 %v2821_v7, %v8486_v61  ;;  %v2823_v11 = vpop.f32.mrb[38].mxu1 }
 0x128   :  { %v4080_v12 = vmax.f32 %v1507_v2, 0.0  ;;  %v1511_v13 = vadd.f32 %v1510_v9, %v8480_v59  ;;  %v1512_v14 = vpop.f32.mrb[39].mxu0  ;;  %v4082_v15 = vmax.f32 %v2820_v5, 0.0  ;;  %v2824_v16 = vadd.f32 %v2823_v11, %v8410_v43  ;;  %v2825_v17 = vpop.f32.mrb[39].mxu1  ;;  %v7938_v11 = vld [vmem:[%s10832_s3 + $0x60] ss:$16 sps:$4 sm:$0xff]  }
 0x129   :  { %v4081_v18 = vmax.f32 %v1509_v8, 0.0  ;;  %v1513_v19 = vadd.f32 %v1512_v14, %v8482_v60  ;;  %v4083_v20 = vmax.f32 %v2822_v10, 0.0  ;;  %v2826_v21 = vadd.f32 %v2825_v17, %v8486_v61  ;;  %v7941_v17 = vld [vmem:[%s10832_s3 + $0x68] ss:$16 sps:$4 sm:$0xff]  }
 0x12a   :  { %v5049_v22 = vadd.f32 %v5048_v57, %v4080_v12  ;;  %v4084_v23 = vmax.f32 %v1511_v13, 0.0  ;;  %7491 = vmatmul.mubr.msk.bf16.gmra.mrb[144].mxu0 %vm981_vm2, %v7908_v4  ;;  %7619 = vmatmul.mubr.msk.bf16.gmra.mrb[144].mxu1 %vm981_vm2, %v7908_v4  ;;  %v5123_v24 = vadd.f32 %v5122_v58, %v4082_v15  ;;  %v4086_v25 = vmax.f32 %v2824_v16, 0.0  ;;  %v7916_v4 = vld [vmem:[%s10829_s0 + $0x130] sm:$0xff]  }
 0x12b   :  { %v5086_v26 = vadd.f32 %v5085_v62, %v4081_v18  ;;  %v4085_v27 = vmax.f32 %v1513_v19, 0.0  ;;  %1784 = vmatprep.mubr.bf16.mxu0 %v8211_v6  ;;  %3097 = vmatprep.mubr.bf16.mxu1 %v8211_v6  ;;  %v5160_v28 = vadd.f32 %v5159_v0, %v4083_v20  ;;  %v4087_v29 = vmax.f32 %v2826_v21, 0.0  ;;  %v7940_v12 = vld [vmem:[%s10832_s3 + $0x64] ss:$16 sps:$4 sm:$0xff]   ;;  %v7943_v18 = vld [vmem:[%s10832_s3 + $0x6c] ss:$16 sps:$4 sm:$0xff]  }
 0x12c   :  { %v5050_v30 = vadd.f32 %v5049_v22, %v4084_v23  ;;  %v5124_v31 = vadd.f32 %v5123_v24, %v4086_v25  ;;  %7129 = vmatprep.subr.bf16.mxu0 %v7940_v12  ;;  %7211 = vmatprep.subr.bf16.mxu1 %v7943_v18 }
 0x12d   :  { %v5087_v32 = vadd.f32 %v5086_v26, %v4085_v27  ;;  %v1516_v33 = vpop.f32.mrb[40].mxu0  ;;  %v5161_v34 = vadd.f32 %v5160_v28, %v4087_v29  ;;  %v2829_v35 = vpop.f32.mrb[40].mxu1  ;;  %7130 = vmatpush1.bf16.msra.mxu0 %v7938_v11  ;;  %7212 = vmatpush1.bf16.msra.mxu1 %v7941_v17 }
 0x12e   :  { %v1517_v36 = vadd.f32 %v1516_v33, %v8480_v59  ;;  %v1518_v37 = vpop.f32.mrb[41].mxu0  ;;  %v2830_v39 = vadd.f32 %v2829_v35, %v8410_v43  ;;  %v2831_v40 = vpop.f32.mrb[41].mxu1 }
 0x12f   :  { %v1519_v41 = vadd.f32 %v1518_v37, %v8482_v60  ;;  %v1520_v42 = vpop.f32.mrb[42].mxu0  ;;  %v2832_v44 = vadd.f32 %v2831_v40, %v8486_v61  ;;  %v2833_v45 = vpop.f32.mrb[42].mxu1 }
 0x130   :  { %v4088_v46 = vmax.f32 %v1517_v36, 0.0  ;;  %v1521_v47 = vadd.f32 %v1520_v42, %v8480_v59  ;;  %v1522_v48 = vpop.f32.mrb[43].mxu0  ;;  %v4090_v49 = vmax.f32 %v2830_v39, 0.0  ;;  %v2834_v50 = vadd.f32 %v2833_v45, %v8410_v43  ;;  %v2835_v51 = vpop.f32.mrb[43].mxu1 }
 0x131   :  { %v4089_v52 = vmax.f32 %v1519_v41, 0.0  ;;  %v1523_v53 = vadd.f32 %v1522_v48, %v8482_v60  ;;  %v4091_v54 = vmax.f32 %v2832_v44, 0.0  ;;  %v2836_v55 = vadd.f32 %v2835_v51, %v8486_v61 }
 0x132   :  { %v5051_v56 = vadd.f32 %v5050_v30, %v4088_v46  ;;  %v4092_v57 = vmax.f32 %v1521_v47, 0.0  ;;  %7492 = vmatmul.mubr.msk.bf16.gmra.mrb[148].mxu0 %vm981_vm2, %v7909_v38  ;;  %7620 = vmatmul.mubr.msk.bf16.gmra.mrb[148].mxu1 %vm981_vm2, %v7909_v38  ;;  %v5125_v58 = vadd.f32 %v5124_v31, %v4090_v49  ;;  %v4094_v62 = vmax.f32 %v2834_v50, 0.0  ;;  %v7917_v50 = vld [vmem:[%s10829_s0 + $0x138] sm:$0xff]  }
 0x133   :  { %v5088_v63 = vadd.f32 %v5087_v32, %v4089_v52  ;;  %v4093_v0 = vmax.f32 %v1523_v53, 0.0  ;;  %1794 = vmatprep.mubr.bf16.mxu0 %v8211_v6  ;;  %3107 = vmatprep.mubr.bf16.mxu1 %v8211_v6  ;;  %v5162_v1 = vadd.f32 %v5161_v34, %v4091_v54  ;;  %v4095_v2 = vmax.f32 %v2836_v55, 0.0 }
 0x134   :  { %v5052_v3 = vadd.f32 %v5051_v56, %v4092_v57  ;;  %v5126_v5 = vadd.f32 %v5125_v58, %v4094_v62 }
 0x135   :  { %v5089_v7 = vadd.f32 %v5088_v63, %v4093_v0  ;;  %v1526_v8 = vpop.f32.mrb[44].mxu0  ;;  %v5163_v9 = vadd.f32 %v5162_v1, %v4095_v2  ;;  %v2839_v10 = vpop.f32.mrb[44].mxu1 }
 0x136   :  { %v1527_v13 = vadd.f32 %v1526_v8, %v8480_v59  ;;  %v1528_v14 = vpop.f32.mrb[45].mxu0  ;;  %v2840_v15 = vadd.f32 %v2839_v10, %v8410_v43  ;;  %v2841_v16 = vpop.f32.mrb[45].mxu1 }
 0x137   :  { %v1529_v19 = vadd.f32 %v1528_v14, %v8482_v60  ;;  %v1530_v20 = vpop.f32.mrb[46].mxu0  ;;  %v2842_v21 = vadd.f32 %v2841_v16, %v8486_v61  ;;  %v2843_v22 = vpop.f32.mrb[46].mxu1 }
 0x138   :  { %v4096_v23 = vmax.f32 %v1527_v13, 0.0  ;;  %v1531_v24 = vadd.f32 %v1530_v20, %v8480_v59  ;;  %v1532_v25 = vpop.f32.mrb[47].mxu0  ;;  %v4098_v26 = vmax.f32 %v2840_v15, 0.0  ;;  %v2844_v27 = vadd.f32 %v2843_v22, %v8410_v43  ;;  %v2845_v28 = vpop.f32.mrb[47].mxu1 }
 0x139   :  { %v4097_v29 = vmax.f32 %v1529_v19, 0.0  ;;  %v1533_v30 = vadd.f32 %v1532_v25, %v8482_v60  ;;  %v4099_v31 = vmax.f32 %v2842_v21, 0.0  ;;  %v2846_v32 = vadd.f32 %v2845_v28, %v8486_v61 }
 0x13a   :  { %v5053_v33 = vadd.f32 %v5052_v3, %v4096_v23  ;;  %v4100_v34 = vmax.f32 %v1531_v24, 0.0  ;;  %7493 = vmatmul.mubr.msk.bf16.gmra.mrb[152].mxu0 %vm981_vm2, %v7916_v4  ;;  %7621 = vmatmul.mubr.msk.bf16.gmra.mrb[152].mxu1 %vm981_vm2, %v7916_v4  ;;  %v5127_v35 = vadd.f32 %v5126_v5, %v4098_v26  ;;  %v4102_v36 = vmax.f32 %v2844_v27, 0.0  ;;  %v7918_v23 = vld [vmem:[%s10829_s0 + $0x140] sm:$0xff]  }
 0x13b   :  { %v5090_v37 = vadd.f32 %v5089_v7, %v4097_v29  ;;  %v4101_v38 = vmax.f32 %v1533_v30, 0.0  ;;  %1804 = vmatprep.mubr.bf16.mxu0 %v8211_v6  ;;  %3117 = vmatprep.mubr.bf16.mxu1 %v8211_v6  ;;  %v5164_v39 = vadd.f32 %v5163_v9, %v4099_v31  ;;  %v4103_v40 = vmax.f32 %v2846_v32, 0.0 }
 0x13c   :  { %v5054_v41 = vadd.f32 %v5053_v33, %v4100_v34  ;;  %v5128_v42 = vadd.f32 %v5127_v35, %v4102_v36 }
 0x13d   :  { %v5091_v44 = vadd.f32 %v5090_v37, %v4101_v38  ;;  %v1536_v45 = vpop.f32.mrb[48].mxu0  ;;  %v5165_v46 = vadd.f32 %v5164_v39, %v4103_v40  ;;  %v2849_v47 = vpop.f32.mrb[48].mxu1 }
 0x13e   :  { %v1537_v48 = vadd.f32 %v1536_v45, %v8480_v59  ;;  %v1538_v49 = vpop.f32.mrb[49].mxu0  ;;  %v2850_v51 = vadd.f32 %v2849_v47, %v8410_v43  ;;  %v2851_v52 = vpop.f32.mrb[49].mxu1 }
 0x13f   :  { %v1539_v53 = vadd.f32 %v1538_v49, %v8482_v60  ;;  %v1540_v54 = vpop.f32.mrb[50].mxu0  ;;  %v2852_v55 = vadd.f32 %v2851_v52, %v8486_v61  ;;  %v2853_v56 = vpop.f32.mrb[50].mxu1 }
 0x140   :  { %v4104_v57 = vmax.f32 %v1537_v48, 0.0  ;;  %v1541_v58 = vadd.f32 %v1540_v54, %v8480_v59  ;;  %v1542_v62 = vpop.f32.mrb[51].mxu0  ;;  %v4106_v63 = vmax.f32 %v2850_v51, 0.0  ;;  %v2854_v0 = vadd.f32 %v2853_v56, %v8410_v43  ;;  %v2855_v1 = vpop.f32.mrb[51].mxu1 }
 0x141   :  { %v4105_v2 = vmax.f32 %v1539_v53, 0.0  ;;  %v1543_v3 = vadd.f32 %v1542_v62, %v8482_v60  ;;  %v4107_v4 = vmax.f32 %v2852_v55, 0.0  ;;  %v2856_v5 = vadd.f32 %v2855_v1, %v8486_v61 }
 0x142   :  { %v5055_v7 = vadd.f32 %v5054_v41, %v4104_v57  ;;  %v4108_v8 = vmax.f32 %v1541_v58, 0.0  ;;  %7494 = vmatmul.mubr.msk.bf16.gmra.mrb[156].mxu0 %vm981_vm2, %v7917_v50  ;;  %7622 = vmatmul.mubr.msk.bf16.gmra.mrb[156].mxu1 %vm981_vm2, %v7917_v50  ;;  %v5129_v9 = vadd.f32 %v5128_v42, %v4106_v63  ;;  %v4110_v10 = vmax.f32 %v2854_v0, 0.0  ;;  %v7919_v58 = vld [vmem:[%s10829_s0 + $0x148] sm:$0xff]  }
 0x143   :  { %v5092_v11 = vadd.f32 %v5091_v44, %v4105_v2  ;;  %v4109_v12 = vmax.f32 %v1543_v3, 0.0  ;;  %1814 = vmatprep.mubr.bf16.mxu0 %v8211_v6  ;;  %3127 = vmatprep.mubr.bf16.mxu1 %v8211_v6  ;;  %v5166_v13 = vadd.f32 %v5165_v46, %v4107_v4  ;;  %v4111_v14 = vmax.f32 %v2856_v5, 0.0 }
 0x144   :  { %v5056_v15 = vadd.f32 %v5055_v7, %v4108_v8  ;;  %v5130_v16 = vadd.f32 %v5129_v9, %v4110_v10 }
 0x145   :  { %v5093_v17 = vadd.f32 %v5092_v11, %v4109_v12  ;;  %v1546_v18 = vpop.f32.mrb[52].mxu0  ;;  %v5167_v19 = vadd.f32 %v5166_v13, %v4111_v14  ;;  %v2859_v20 = vpop.f32.mrb[52].mxu1 }
 0x146   :  { %v1547_v21 = vadd.f32 %v1546_v18, %v8480_v59  ;;  %v1548_v22 = vpop.f32.mrb[53].mxu0  ;;  %v2860_v24 = vadd.f32 %v2859_v20, %v8410_v43  ;;  %v2861_v25 = vpop.f32.mrb[53].mxu1 }
 0x147   :  { %v1549_v26 = vadd.f32 %v1548_v22, %v8482_v60  ;;  %v1550_v27 = vpop.f32.mrb[54].mxu0  ;;  %v2862_v28 = vadd.f32 %v2861_v25, %v8486_v61  ;;  %v2863_v29 = vpop.f32.mrb[54].mxu1 }
 0x148   :  { %v4112_v30 = vmax.f32 %v1547_v21, 0.0  ;;  %v1551_v31 = vadd.f32 %v1550_v27, %v8480_v59  ;;  %v1552_v32 = vpop.f32.mrb[55].mxu0  ;;  %v4114_v33 = vmax.f32 %v2860_v24, 0.0  ;;  %v2864_v34 = vadd.f32 %v2863_v29, %v8410_v43  ;;  %v2865_v35 = vpop.f32.mrb[55].mxu1 }
 0x149   :  { %v4113_v36 = vmax.f32 %v1549_v26, 0.0  ;;  %v1553_v37 = vadd.f32 %v1552_v32, %v8482_v60  ;;  %v4115_v38 = vmax.f32 %v2862_v28, 0.0  ;;  %v2866_v39 = vadd.f32 %v2865_v35, %v8486_v61  ;;  %v7920_v32 = vld [vmem:[%s10829_s0 + $0x150] sm:$0xff]  }
 0x14a   :  { %v5057_v40 = vadd.f32 %v5056_v15, %v4112_v30  ;;  %v4116_v41 = vmax.f32 %v1551_v31, 0.0  ;;  %7495 = vmatmul.mubr.msk.bf16.gmra.mrb[160].mxu0 %vm981_vm2, %v7918_v23  ;;  %7623 = vmatmul.mubr.msk.bf16.gmra.mrb[160].mxu1 %vm981_vm2, %v7918_v23  ;;  %v5131_v42 = vadd.f32 %v5130_v16, %v4114_v33  ;;  %v4118_v44 = vmax.f32 %v2864_v34, 0.0 }
 0x14b   :  { %v5094_v45 = vadd.f32 %v5093_v17, %v4113_v36  ;;  %v4117_v46 = vmax.f32 %v1553_v37, 0.0  ;;  %v5168_v47 = vadd.f32 %v5167_v19, %v4115_v38  ;;  %v4119_v48 = vmax.f32 %v2866_v39, 0.0  ;;  %1824 = vmatprep.mubr.bf16.mxu0 %v8211_v6  ;;  %3137 = vmatprep.mubr.bf16.mxu1 %v8211_v6 }
 0x14c   :  { %v5058_v49 = vadd.f32 %v5057_v40, %v4116_v41  ;;  %v5132_v50 = vadd.f32 %v5131_v42, %v4118_v44 }
 0x14d   :  { %v5095_v51 = vadd.f32 %v5094_v45, %v4117_v46  ;;  %v1556_v52 = vpop.f32.mrb[56].mxu0  ;;  %v5169_v53 = vadd.f32 %v5168_v47, %v4119_v48  ;;  %v2869_v54 = vpop.f32.mrb[56].mxu1 }
 0x14e   :  { %v1557_v55 = vadd.f32 %v1556_v52, %v8480_v59  ;;  %v1558_v56 = vpop.f32.mrb[57].mxu0  ;;  %v2870_v57 = vadd.f32 %v2869_v54, %v8410_v43  ;;  %v2871_v62 = vpop.f32.mrb[57].mxu1 }
 0x14f   :  { %v1559_v63 = vadd.f32 %v1558_v56, %v8482_v60  ;;  %v1560_v0 = vpop.f32.mrb[58].mxu0  ;;  %v2872_v1 = vadd.f32 %v2871_v62, %v8486_v61  ;;  %v2873_v2 = vpop.f32.mrb[58].mxu1 }
 0x150   :  { %v4120_v3 = vmax.f32 %v1557_v55, 0.0  ;;  %v1561_v4 = vadd.f32 %v1560_v0, %v8480_v59  ;;  %v1562_v5 = vpop.f32.mrb[59].mxu0  ;;  %v4122_v7 = vmax.f32 %v2870_v57, 0.0  ;;  %v2874_v8 = vadd.f32 %v2873_v2, %v8410_v43  ;;  %v2875_v9 = vpop.f32.mrb[59].mxu1 }
 0x151   :  { %v4121_v10 = vmax.f32 %v1559_v63, 0.0  ;;  %v1563_v11 = vadd.f32 %v1562_v5, %v8482_v60  ;;  %v4123_v12 = vmax.f32 %v2872_v1, 0.0  ;;  %v2876_v13 = vadd.f32 %v2875_v9, %v8486_v61 }
 0x152   :  { %v5059_v14 = vadd.f32 %v5058_v49, %v4120_v3  ;;  %v4124_v15 = vmax.f32 %v1561_v4, 0.0  ;;  %v5133_v16 = vadd.f32 %v5132_v50, %v4122_v7  ;;  %7496 = vmatmul.mubr.msk.bf16.gmra.mrb[164].mxu0 %vm981_vm2, %v7919_v58  ;;  %7624 = vmatmul.mubr.msk.bf16.gmra.mrb[164].mxu1 %vm981_vm2, %v7919_v58  ;;  %v4126_v17 = vmax.f32 %v2874_v8, 0.0  ;;  %v7921_v3 = vld [vmem:[%s10829_s0 + $0x158] sm:$0xff]  }
 0x153   :  { %v5096_v18 = vadd.f32 %v5095_v51, %v4121_v10  ;;  %v4125_v19 = vmax.f32 %v1563_v11, 0.0  ;;  %v5170_v20 = vadd.f32 %v5169_v53, %v4123_v12  ;;  %v4127_v21 = vmax.f32 %v2876_v13, 0.0  ;;  %1834 = vmatprep.mubr.bf16.mxu0 %v8211_v6  ;;  %3147 = vmatprep.mubr.bf16.mxu1 %v8211_v6 }
 0x154   :  { %v5060_v22 = vadd.f32 %v5059_v14, %v4124_v15  ;;  %v5134_v23 = vadd.f32 %v5133_v16, %v4126_v17 }
 0x155   :  { %v5097_v24 = vadd.f32 %v5096_v18, %v4125_v19  ;;  %v5171_v25 = vadd.f32 %v5170_v20, %v4127_v21  ;;  %v1566_v26 = vpop.f32.mrb[60].mxu0  ;;  %v2879_v27 = vpop.f32.mrb[60].mxu1 }
 0x156   :  { %v1567_v28 = vadd.f32 %v1566_v26, %v8480_v59  ;;  %v2880_v29 = vadd.f32 %v2879_v27, %v8410_v43  ;;  %v1568_v30 = vpop.f32.mrb[61].mxu0  ;;  %v2881_v31 = vpop.f32.mrb[61].mxu1  ;;  %v7922_v27 = vld [vmem:[%s10829_s0 + $0x160] sm:$0xff]  }
 0x157   :  { %v1569_v33 = vadd.f32 %v1568_v30, %v8482_v60  ;;  %v2882_v34 = vadd.f32 %v2881_v31, %v8486_v61  ;;  %v1570_v35 = vpop.f32.mrb[62].mxu0  ;;  %v2883_v36 = vpop.f32.mrb[62].mxu1 }
 0x158   :  { %v4128_v37 = vmax.f32 %v1567_v28, 0.0  ;;  %v4130_v38 = vmax.f32 %v2880_v29, 0.0  ;;  %v1571_v39 = vadd.f32 %v1570_v35, %v8480_v59  ;;  %v2884_v40 = vadd.f32 %v2883_v36, %v8410_v43  ;;  %v1572_v41 = vpop.f32.mrb[63].mxu0  ;;  %v2885_v42 = vpop.f32.mrb[63].mxu1 }
 0x159   :  { %v4129_v44 = vmax.f32 %v1569_v33, 0.0  ;;  %v4131_v45 = vmax.f32 %v2882_v34, 0.0  ;;  %v1573_v46 = vadd.f32 %v1572_v41, %v8482_v60  ;;  %v2886_v47 = vadd.f32 %v2885_v42, %v8486_v61 }
 0x15a   :  { %v5061_v48 = vadd.f32 %v5060_v22, %v4128_v37  ;;  %v5135_v49 = vadd.f32 %v5134_v23, %v4130_v38  ;;  %v4132_v50 = vmax.f32 %v1571_v39, 0.0  ;;  %v4134_v51 = vmax.f32 %v2884_v40, 0.0  ;;  %7497 = vmatmul.mubr.msk.bf16.gmra.mrb[168].mxu0 %vm981_vm2, %v7920_v32  ;;  %7625 = vmatmul.mubr.msk.bf16.gmra.mrb[168].mxu1 %vm981_vm2, %v7920_v32 }
 0x15b   :  { %v5098_v52 = vadd.f32 %v5097_v24, %v4129_v44  ;;  %v5172_v53 = vadd.f32 %v5171_v25, %v4131_v45  ;;  %v4133_v54 = vmax.f32 %v1573_v46, 0.0  ;;  %v4135_v55 = vmax.f32 %v2886_v47, 0.0  ;;  %1844 = vmatprep.mubr.bf16.mxu0 %v8211_v6  ;;  %3157 = vmatprep.mubr.bf16.mxu1 %v8211_v6 }
 0x15c   :  { %v8752_v56 = vadd.f32 %v5061_v48, %v4132_v50  ;;  %v8754_v57 = vadd.f32 %v5135_v49, %v4134_v51 }
 0x15d   :  { %v8756_v58 = vadd.f32 %v5098_v52, %v4133_v54  ;;  %v8758_v62 = vadd.f32 %v5172_v53, %v4135_v55  ;;  %v1576_v63 = vpop.f32.mrb[64].mxu0  ;;  %v2889_v0 = vpop.f32.mrb[64].mxu1  ;;  %v7923_v55 = vld [vmem:[%s10829_s0 + $0x168] sm:$0xff]  }
 0x15e   :  { %v1577_v1 = vadd.f32 %v1576_v63, %v8480_v59  ;;  %v1578_v2 = vpop.f32.mrb[65].mxu0  ;;  %v2891_v4 = vpop.f32.mrb[65].mxu1  ;;  %v2890_v18 = vadd.f32 %v2889_v0, %v8410_v43 }
 0x15f   :  { %v1579_v5 = vadd.f32 %v1578_v2, %v8482_v60  ;;  %v1580_v7 = vpop.f32.mrb[66].mxu0  ;;  %v2893_v8 = vpop.f32.mrb[66].mxu1  ;;  %v2892_v22 = vadd.f32 %v2891_v4, %v8486_v61 }
 0x160   :  { %v1581_v9 = vadd.f32 %v1580_v7, %v8480_v59  ;;  %v1582_v10 = vpop.f32.mrb[67].mxu0  ;;  %v2895_v11 = vpop.f32.mrb[67].mxu1  ;;  %v4136_v13 = vmax.f32 %v1577_v1, 0.0  ;;  %v2894_v19 = vadd.f32 %v2893_v8, %v8410_v43  ;;  %v4138_v35 = vmax.f32 %v2890_v18, 0.0 }
 0x161   :  { %v1583_v12 = vadd.f32 %v1582_v10, %v8482_v60  ;;  %v4137_v15 = vmax.f32 %v1579_v5, 0.0  ;;  %v2896_v23 = vadd.f32 %v2895_v11, %v8486_v61  ;;  %v4139_v40 = vmax.f32 %v2892_v22, 0.0 }
 0x162   :  { %v4140_v14 = vmax.f32 %v1581_v9, 0.0  ;;  %7498 = vmatmul.mubr.msk.bf16.gmra.mrb[172].mxu0 %vm981_vm2, %v7921_v3  ;;  %7626 = vmatmul.mubr.msk.bf16.gmra.mrb[172].mxu1 %vm981_vm2, %v7921_v3  ;;  %v4142_v36 = vmax.f32 %v2894_v19, 0.0 }
 0x163   :  { %v4141_v16 = vmax.f32 %v1583_v12, 0.0  ;;  %1854 = vmatprep.mubr.bf16.mxu0 %v8211_v6  ;;  %3167 = vmatprep.mubr.bf16.mxu1 %v8211_v6  ;;  %v4143_v41 = vmax.f32 %v2896_v23, 0.0 }
 0x164   :  { %v5180_v17 = vadd.f32 %v4140_v14, %v4136_v13  ;;  %v5254_v48 = vadd.f32 %v4142_v36, %v4138_v35  ;;  %v7952_v36 = vld [vmem:[%s10832_s3 + $0x80] ss:$16 sps:$4 sm:$0xff]  }
 0x165   :  { %v5217_v20 = vadd.f32 %v4141_v16, %v4137_v15  ;;  %v1586_v21 = vpop.f32.mrb[68].mxu0  ;;  %v2899_v24 = vpop.f32.mrb[68].mxu1  ;;  %v5291_v51 = vadd.f32 %v4143_v41, %v4139_v40 }
 0x166   :  { %v1587_v25 = vadd.f32 %v1586_v21, %v8480_v59  ;;  %v1588_v26 = vpop.f32.mrb[69].mxu0  ;;  %v2901_v28 = vpop.f32.mrb[69].mxu1  ;;  %v2900_v63 = vadd.f32 %v2899_v24, %v8410_v43 }
 0x167   :  { %v1589_v29 = vadd.f32 %v1588_v26, %v8482_v60  ;;  %v1590_v30 = vpop.f32.mrb[70].mxu0  ;;  %v2903_v31 = vpop.f32.mrb[70].mxu1  ;;  %v2902_v0 = vadd.f32 %v2901_v28, %v8486_v61 }
 0x168   :  { %v4144_v32 = vmax.f32 %v1587_v25, 0.0  ;;  %v1591_v33 = vadd.f32 %v1590_v30, %v8480_v59  ;;  %v1592_v34 = vpop.f32.mrb[71].mxu0  ;;  %v2905_v37 = vpop.f32.mrb[71].mxu1  ;;  %v2904_v1 = vadd.f32 %v2903_v31, %v8410_v43  ;;  %v4146_v13 = vmax.f32 %v2900_v63, 0.0 }
 0x169   :  { %v4145_v38 = vmax.f32 %v1589_v29, 0.0  ;;  %v1593_v39 = vadd.f32 %v1592_v34, %v8482_v60  ;;  %v2906_v5 = vadd.f32 %v2905_v37, %v8486_v61  ;;  %v4147_v14 = vmax.f32 %v2902_v0, 0.0 }
 0x16a   :  { %v5181_v42 = vadd.f32 %v5180_v17, %v4144_v32  ;;  %v4148_v44 = vmax.f32 %v1591_v33, 0.0  ;;  %7499 = vmatmul.mubr.msk.bf16.gmra.mrb[176].mxu0 %vm981_vm2, %v7922_v27  ;;  %7627 = vmatmul.mubr.msk.bf16.gmra.mrb[176].mxu1 %vm981_vm2, %v7922_v27  ;;  %v4150_v18 = vmax.f32 %v2904_v1, 0.0  ;;  %v5255_v22 = vadd.f32 %v5254_v48, %v4146_v13  ;;  %v7957_v1 = vld [vmem:[%s10832_s3 + $0x8c] ss:$16 sps:$4 sm:$0xff]  }
 0x16b   :  { %v5218_v45 = vadd.f32 %v5217_v20, %v4145_v38  ;;  %v4149_v46 = vmax.f32 %v1593_v39, 0.0  ;;  %1864 = vmatprep.mubr.bf16.mxu0 %v8211_v6  ;;  %3177 = vmatprep.mubr.bf16.mxu1 %v8211_v6  ;;  %v4151_v19 = vmax.f32 %v2906_v5, 0.0  ;;  %v5292_v23 = vadd.f32 %v5291_v51, %v4147_v14  ;;  %v7930_v39 = vld [vmem:[%s10829_s0 + $0x170] sm:$0xff]  }
 0x16c   :  { %v5182_v47 = vadd.f32 %v5181_v42, %v4148_v44  ;;  %v5256_v29 = vadd.f32 %v5255_v22, %v4150_v18  ;;  %7213 = vmatprep.subr.bf16.mxu1 %v7957_v1 }
 0x16d   :  { %v5219_v49 = vadd.f32 %v5218_v45, %v4149_v46  ;;  %v1596_v50 = vpop.f32.mrb[72].mxu0  ;;  %v2909_v52 = vpop.f32.mrb[72].mxu1  ;;  %v5293_v30 = vadd.f32 %v5292_v23, %v4151_v19  ;;  %v7954_v45 = vld [vmem:[%s10832_s3 + $0x84] ss:$16 sps:$4 sm:$0xff]  }
 0x16e   :  { %v1597_v53 = vadd.f32 %v1596_v50, %v8480_v59  ;;  %v1598_v54 = vpop.f32.mrb[73].mxu0  ;;  %v2911_v2 = vpop.f32.mrb[73].mxu1  ;;  %v2910_v7 = vadd.f32 %v2909_v52, %v8410_v43  ;;  %7131 = vmatprep.subr.bf16.mxu0 %v7954_v45 }
 0x16f   :  { %v1599_v3 = vadd.f32 %v1598_v54, %v8482_v60  ;;  %v1600_v4 = vpop.f32.mrb[74].mxu0  ;;  %v2912_v8 = vadd.f32 %v2911_v2, %v8486_v61  ;;  %v2913_v9 = vpop.f32.mrb[74].mxu1  ;;  %7132 = vmatpush1.bf16.msra.mxu0 %v7952_v36 }
 0x170   :  { %v4152_v10 = vmax.f32 %v1597_v53, 0.0  ;;  %v1601_v11 = vadd.f32 %v1600_v4, %v8480_v59  ;;  %v1602_v12 = vpop.f32.mrb[75].mxu0  ;;  %v2915_v15 = vpop.f32.mrb[75].mxu1  ;;  %v4154_v26 = vmax.f32 %v2910_v7, 0.0  ;;  %v2914_v31 = vadd.f32 %v2913_v9, %v8410_v43  ;;  %v7955_v7 = vld [vmem:[%s10832_s3 + $0x88] ss:$16 sps:$4 sm:$0xff]  }
 0x171   :  { %v4153_v16 = vmax.f32 %v1599_v3, 0.0  ;;  %v1603_v17 = vadd.f32 %v1602_v12, %v8482_v60  ;;  %v4155_v27 = vmax.f32 %v2912_v8, 0.0  ;;  %v2916_v34 = vadd.f32 %v2915_v15, %v8486_v61  ;;  %7214 = vmatpush1.bf16.msra.mxu1 %v7955_v7 }
 0x172   :  { %v5183_v20 = vadd.f32 %v5182_v47, %v4152_v10  ;;  %v4156_v21 = vmax.f32 %v1601_v11, 0.0  ;;  %7500 = vmatmul.mubr.msk.bf16.gmra.mrb[180].mxu0 %vm981_vm2, %v7923_v55  ;;  %7628 = vmatmul.mubr.msk.bf16.gmra.mrb[180].mxu1 %vm981_vm2, %v7923_v55  ;;  %v5257_v40 = vadd.f32 %v5256_v29, %v4154_v26  ;;  %v4158_v42 = vmax.f32 %v2914_v31, 0.0 }
 0x173   :  { %v5220_v24 = vadd.f32 %v5219_v49, %v4153_v16  ;;  %v4157_v25 = vmax.f32 %v1603_v17, 0.0  ;;  %1874 = vmatprep.mubr.bf16.mxu0 %v8211_v6  ;;  %3187 = vmatprep.mubr.bf16.mxu1 %v8211_v6  ;;  %v5294_v41 = vadd.f32 %v5293_v30, %v4155_v27  ;;  %v4159_v48 = vmax.f32 %v2916_v34, 0.0 }
 0x174   :  { %v5184_v28 = vadd.f32 %v5183_v20, %v4156_v21  ;;  %v5258_v55 = vadd.f32 %v5257_v40, %v4158_v42 }
 0x175   :  { %v5221_v32 = vadd.f32 %v5220_v24, %v4157_v25  ;;  %v1606_v33 = vpop.f32.mrb[76].mxu0  ;;  %v2919_v35 = vpop.f32.mrb[76].mxu1  ;;  %v5295_v4 = vadd.f32 %v5294_v41, %v4159_v48  ;;  %v7931_v25 = vld [vmem:[%s10829_s0 + $0x178] sm:$0xff]  }
 0x176   :  { %v1607_v37 = vadd.f32 %v1606_v33, %v8480_v59  ;;  %v1608_v38 = vpop.f32.mrb[77].mxu0  ;;  %v2921_v44 = vpop.f32.mrb[77].mxu1  ;;  %v2920_v49 = vadd.f32 %v2919_v35, %v8410_v43 }
 0x177   :  { %v1609_v46 = vadd.f32 %v1608_v38, %v8482_v60  ;;  %v1610_v47 = vpop.f32.mrb[78].mxu0  ;;  %v2922_v50 = vadd.f32 %v2921_v44, %v8486_v61  ;;  %v2923_v51 = vpop.f32.mrb[78].mxu1 }
 0x178   :  { %v4160_v52 = vmax.f32 %v1607_v37, 0.0  ;;  %v1611_v53 = vadd.f32 %v1610_v47, %v8480_v59  ;;  %v1612_v54 = vpop.f32.mrb[79].mxu0  ;;  %v2924_v63 = vadd.f32 %v2923_v51, %v8410_v43  ;;  %v2925_v0 = vpop.f32.mrb[79].mxu1  ;;  %v4162_v5 = vmax.f32 %v2920_v49, 0.0 }
 0x179   :  { %v4161_v2 = vmax.f32 %v1609_v46, 0.0  ;;  %v1613_v3 = vadd.f32 %v1612_v54, %v8482_v60  ;;  %v4163_v10 = vmax.f32 %v2922_v50, 0.0  ;;  %v2926_v15 = vadd.f32 %v2925_v0, %v8486_v61 }
 0x17a   :  { %v5185_v8 = vadd.f32 %v5184_v28, %v4160_v52  ;;  %v4164_v9 = vmax.f32 %v1611_v53, 0.0  ;;  %7501 = vmatmul.mubr.msk.bf16.gmra.mrb[184].mxu0 %vm981_vm2, %v7930_v39  ;;  %7629 = vmatmul.mubr.msk.bf16.gmra.mrb[184].mxu1 %vm981_vm2, %v7930_v39  ;;  %v4166_v11 = vmax.f32 %v2924_v63, 0.0  ;;  %v5259_v14 = vadd.f32 %v5258_v55, %v4162_v5 }
 0x17b   :  { %v5222_v12 = vadd.f32 %v5221_v32, %v4161_v2  ;;  %v4165_v13 = vmax.f32 %v1613_v3, 0.0  ;;  %1884 = vmatprep.mubr.bf16.mxu0 %v8211_v6  ;;  %3197 = vmatprep.mubr.bf16.mxu1 %v8211_v6  ;;  %v5296_v17 = vadd.f32 %v5295_v4, %v4163_v10  ;;  %v4167_v21 = vmax.f32 %v2926_v15, 0.0  ;;  %v7932_v3 = vld [vmem:[%s10829_s0 + $0x180] sm:$0xff]  }
 0x17c   :  { %v5186_v16 = vadd.f32 %v5185_v8, %v4164_v9  ;;  %v5260_v20 = vadd.f32 %v5259_v14, %v4166_v11 }
 0x17d   :  { %v5223_v18 = vadd.f32 %v5222_v12, %v4165_v13  ;;  %v1616_v19 = vpop.f32.mrb[80].mxu0  ;;  %v2929_v22 = vpop.f32.mrb[80].mxu1  ;;  %v5297_v30 = vadd.f32 %v5296_v17, %v4167_v21 }
 0x17e   :  { %v1617_v23 = vadd.f32 %v1616_v19, %v8480_v59  ;;  %v1618_v24 = vpop.f32.mrb[81].mxu0  ;;  %v2930_v26 = vadd.f32 %v2929_v22, %v8410_v43  ;;  %v2931_v27 = vpop.f32.mrb[81].mxu1 }
 0x17f   :  { %v1619_v28 = vadd.f32 %v1618_v24, %v8482_v60  ;;  %v1620_v29 = vpop.f32.mrb[82].mxu0  ;;  %v2932_v31 = vadd.f32 %v2931_v27, %v8486_v61  ;;  %v2933_v32 = vpop.f32.mrb[82].mxu1 }
 0x180   :  { %v4168_v33 = vmax.f32 %v1617_v23, 0.0  ;;  %v1621_v34 = vadd.f32 %v1620_v29, %v8480_v59  ;;  %v1622_v35 = vpop.f32.mrb[83].mxu0  ;;  %v4170_v36 = vmax.f32 %v2930_v26, 0.0  ;;  %v2934_v37 = vadd.f32 %v2933_v32, %v8410_v43  ;;  %v2935_v38 = vpop.f32.mrb[83].mxu1 }
 0x181   :  { %v4169_v39 = vmax.f32 %v1619_v28, 0.0  ;;  %v1623_v40 = vadd.f32 %v1622_v35, %v8482_v60  ;;  %v4171_v41 = vmax.f32 %v2932_v31, 0.0  ;;  %v2936_v42 = vadd.f32 %v2935_v38, %v8486_v61 }
 0x182   :  { %v5187_v44 = vadd.f32 %v5186_v16, %v4168_v33  ;;  %v4172_v45 = vmax.f32 %v1621_v34, 0.0  ;;  %7502 = vmatmul.mubr.msk.bf16.gmra.mrb[188].mxu0 %vm981_vm2, %v7931_v25  ;;  %7630 = vmatmul.mubr.msk.bf16.gmra.mrb[188].mxu1 %vm981_vm2, %v7931_v25  ;;  %v5261_v46 = vadd.f32 %v5260_v20, %v4170_v36  ;;  %v4174_v47 = vmax.f32 %v2934_v37, 0.0  ;;  %v7933_v37 = vld [vmem:[%s10829_s0 + $0x188] sm:$0xff]  }
 0x183   :  { %v5224_v48 = vadd.f32 %v5223_v18, %v4169_v39  ;;  %v4173_v49 = vmax.f32 %v1623_v40, 0.0  ;;  %1894 = vmatprep.mubr.bf16.mxu0 %v8211_v6  ;;  %3207 = vmatprep.mubr.bf16.mxu1 %v8211_v6  ;;  %v5298_v50 = vadd.f32 %v5297_v30, %v4171_v41  ;;  %v4175_v51 = vmax.f32 %v2936_v42, 0.0 }
 0x184   :  { %v5188_v52 = vadd.f32 %v5187_v44, %v4172_v45  ;;  %v5262_v53 = vadd.f32 %v5261_v46, %v4174_v47 }
 0x185   :  { %v5225_v54 = vadd.f32 %v5224_v48, %v4173_v49  ;;  %v1626_v55 = vpop.f32.mrb[84].mxu0  ;;  %v5299_v63 = vadd.f32 %v5298_v50, %v4175_v51  ;;  %v2939_v0 = vpop.f32.mrb[84].mxu1 }
 0x186   :  { %v1627_v1 = vadd.f32 %v1626_v55, %v8480_v59  ;;  %v1628_v2 = vpop.f32.mrb[85].mxu0  ;;  %v2940_v4 = vadd.f32 %v2939_v0, %v8410_v43  ;;  %v2941_v5 = vpop.f32.mrb[85].mxu1 }
 0x187   :  { %v1629_v7 = vadd.f32 %v1628_v2, %v8482_v60  ;;  %v1630_v8 = vpop.f32.mrb[86].mxu0  ;;  %v2942_v9 = vadd.f32 %v2941_v5, %v8486_v61  ;;  %v2943_v10 = vpop.f32.mrb[86].mxu1 }
 0x188   :  { %v4176_v11 = vmax.f32 %v1627_v1, 0.0  ;;  %v1631_v12 = vadd.f32 %v1630_v8, %v8480_v59  ;;  %v1632_v13 = vpop.f32.mrb[87].mxu0  ;;  %v4178_v14 = vmax.f32 %v2940_v4, 0.0  ;;  %v2944_v15 = vadd.f32 %v2943_v10, %v8410_v43  ;;  %v2945_v16 = vpop.f32.mrb[87].mxu1 }
 0x189   :  { %v4177_v17 = vmax.f32 %v1629_v7, 0.0  ;;  %v1633_v18 = vadd.f32 %v1632_v13, %v8482_v60  ;;  %v4179_v19 = vmax.f32 %v2942_v9, 0.0  ;;  %v2946_v20 = vadd.f32 %v2945_v16, %v8486_v61 }
 0x18a   :  { %v5189_v21 = vadd.f32 %v5188_v52, %v4176_v11  ;;  %v4180_v22 = vmax.f32 %v1631_v12, 0.0  ;;  %7503 = vmatmul.mubr.msk.bf16.gmra.mrb[192].mxu0 %vm981_vm2, %v7932_v3  ;;  %7631 = vmatmul.mubr.msk.bf16.gmra.mrb[192].mxu1 %vm981_vm2, %v7932_v3  ;;  %v5263_v23 = vadd.f32 %v5262_v53, %v4178_v14  ;;  %v4182_v24 = vmax.f32 %v2944_v15, 0.0  ;;  %v7934_v15 = vld [vmem:[%s10829_s0 + $0x190] sm:$0xff]  }
 0x18b   :  { %v5226_v25 = vadd.f32 %v5225_v54, %v4177_v17  ;;  %v4181_v26 = vmax.f32 %v1633_v18, 0.0  ;;  %1904 = vmatprep.mubr.bf16.mxu0 %v8211_v6  ;;  %3217 = vmatprep.mubr.bf16.mxu1 %v8211_v6  ;;  %v5300_v27 = vadd.f32 %v5299_v63, %v4179_v19  ;;  %v4183_v28 = vmax.f32 %v2946_v20, 0.0 }
 0x18c   :  { %v5190_v29 = vadd.f32 %v5189_v21, %v4180_v22  ;;  %v5264_v30 = vadd.f32 %v5263_v23, %v4182_v24 }
 0x18d   :  { %v5227_v31 = vadd.f32 %v5226_v25, %v4181_v26  ;;  %v1636_v32 = vpop.f32.mrb[88].mxu0  ;;  %v5301_v33 = vadd.f32 %v5300_v27, %v4183_v28  ;;  %v2949_v34 = vpop.f32.mrb[88].mxu1 }
 0x18e   :  { %v1637_v35 = vadd.f32 %v1636_v32, %v8480_v59  ;;  %v1638_v36 = vpop.f32.mrb[89].mxu0  ;;  %v2950_v38 = vadd.f32 %v2949_v34, %v8410_v43  ;;  %v2951_v39 = vpop.f32.mrb[89].mxu1 }
 0x18f   :  { %v1639_v40 = vadd.f32 %v1638_v36, %v8482_v60  ;;  %v1640_v41 = vpop.f32.mrb[90].mxu0  ;;  %v2952_v42 = vadd.f32 %v2951_v39, %v8486_v61  ;;  %v2953_v44 = vpop.f32.mrb[90].mxu1 }
 0x190   :  { %v4184_v45 = vmax.f32 %v1637_v35, 0.0  ;;  %v1641_v46 = vadd.f32 %v1640_v41, %v8480_v59  ;;  %v1642_v47 = vpop.f32.mrb[91].mxu0  ;;  %v4186_v48 = vmax.f32 %v2950_v38, 0.0  ;;  %v2954_v49 = vadd.f32 %v2953_v44, %v8410_v43  ;;  %v2955_v50 = vpop.f32.mrb[91].mxu1 }
 0x191   :  { %v4185_v51 = vmax.f32 %v1639_v40, 0.0  ;;  %v1643_v52 = vadd.f32 %v1642_v47, %v8482_v60  ;;  %v4187_v53 = vmax.f32 %v2952_v42, 0.0  ;;  %v2956_v54 = vadd.f32 %v2955_v50, %v8486_v61 }
 0x192   :  { %v5191_v55 = vadd.f32 %v5190_v29, %v4184_v45  ;;  %v4188_v63 = vmax.f32 %v1641_v46, 0.0  ;;  %7504 = vmatmul.mubr.msk.bf16.gmra.mrb[196].mxu0 %vm981_vm2, %v7933_v37  ;;  %7632 = vmatmul.mubr.msk.bf16.gmra.mrb[196].mxu1 %vm981_vm2, %v7933_v37  ;;  %v5265_v0 = vadd.f32 %v5264_v30, %v4186_v48  ;;  %v4190_v1 = vmax.f32 %v2954_v49, 0.0  ;;  %v7935_v49 = vld [vmem:[%s10829_s0 + $0x198] sm:$0xff]  }
 0x193   :  { %v5228_v2 = vadd.f32 %v5227_v31, %v4185_v51  ;;  %v4189_v3 = vmax.f32 %v1643_v52, 0.0  ;;  %1914 = vmatprep.mubr.bf16.mxu0 %v8211_v6  ;;  %3227 = vmatprep.mubr.bf16.mxu1 %v8211_v6  ;;  %v5302_v4 = vadd.f32 %v5301_v33, %v4187_v53  ;;  %v4191_v5 = vmax.f32 %v2956_v54, 0.0 }
 0x194   :  { %v5192_v7 = vadd.f32 %v5191_v55, %v4188_v63  ;;  %v5266_v8 = vadd.f32 %v5265_v0, %v4190_v1 }
 0x195   :  { %v5229_v9 = vadd.f32 %v5228_v2, %v4189_v3  ;;  %v1646_v10 = vpop.f32.mrb[92].mxu0  ;;  %v5303_v11 = vadd.f32 %v5302_v4, %v4191_v5  ;;  %v2959_v12 = vpop.f32.mrb[92].mxu1 }
 0x196   :  { %v1647_v13 = vadd.f32 %v1646_v10, %v8480_v59  ;;  %v1648_v14 = vpop.f32.mrb[93].mxu0  ;;  %v2960_v16 = vadd.f32 %v2959_v12, %v8410_v43  ;;  %v2961_v17 = vpop.f32.mrb[93].mxu1 }
 0x197   :  { %v1649_v18 = vadd.f32 %v1648_v14, %v8482_v60  ;;  %v1650_v19 = vpop.f32.mrb[94].mxu0  ;;  %v2962_v20 = vadd.f32 %v2961_v17, %v8486_v61  ;;  %v2963_v21 = vpop.f32.mrb[94].mxu1 }
 0x198   :  { %v4192_v22 = vmax.f32 %v1647_v13, 0.0  ;;  %v1651_v23 = vadd.f32 %v1650_v19, %v8480_v59  ;;  %v1652_v24 = vpop.f32.mrb[95].mxu0  ;;  %v4194_v25 = vmax.f32 %v2960_v16, 0.0  ;;  %v2964_v26 = vadd.f32 %v2963_v21, %v8410_v43  ;;  %v2965_v27 = vpop.f32.mrb[95].mxu1 }
 0x199   :  { %v4193_v28 = vmax.f32 %v1649_v18, 0.0  ;;  %v1653_v29 = vadd.f32 %v1652_v24, %v8482_v60  ;;  %v4195_v30 = vmax.f32 %v2962_v20, 0.0  ;;  %v2966_v31 = vadd.f32 %v2965_v27, %v8486_v61 }
 0x19a   :  { %v5193_v32 = vadd.f32 %v5192_v7, %v4192_v22  ;;  %v4196_v33 = vmax.f32 %v1651_v23, 0.0  ;;  %7505 = vmatmul.mubr.msk.bf16.gmra.mrb[200].mxu0 %vm981_vm2, %v7934_v15  ;;  %7633 = vmatmul.mubr.msk.bf16.gmra.mrb[200].mxu1 %vm981_vm2, %v7934_v15  ;;  %v5267_v34 = vadd.f32 %v5266_v8, %v4194_v25  ;;  %v4198_v35 = vmax.f32 %v2964_v26, 0.0 }
 0x19b   :  { %v5230_v36 = vadd.f32 %v5229_v9, %v4193_v28  ;;  %v4197_v37 = vmax.f32 %v1653_v29, 0.0  ;;  %1924 = vmatprep.mubr.bf16.mxu0 %v8211_v6  ;;  %3237 = vmatprep.mubr.bf16.mxu1 %v8211_v6  ;;  %v5304_v38 = vadd.f32 %v5303_v11, %v4195_v30  ;;  %v4199_v39 = vmax.f32 %v2966_v31, 0.0  ;;  %v7936_v28 = vld [vmem:[%s10829_s0 + $0x1a0] sm:$0xff]  }
 0x19c   :  { %v5194_v40 = vadd.f32 %v5193_v32, %v4196_v33  ;;  %v5268_v41 = vadd.f32 %v5267_v34, %v4198_v35  ;;  %v5063_v24 = vrot.slane %v8752_v56, 4  ;;  %v5137_v25 = vrot.slane %v8754_v57, 4 }
 0x19d   :  { %v5231_v42 = vadd.f32 %v5230_v36, %v4197_v37  ;;  %v1656_v44 = vpop.f32.mrb[96].mxu0  ;;  %v5305_v45 = vadd.f32 %v5304_v38, %v4199_v39  ;;  %v2969_v46 = vpop.f32.mrb[96].mxu1  ;;  %v5100_v31 = vrot.slane %v8756_v58, 4  ;;  %v5174_v32 = vrot.slane %v8758_v62, 4 }
 0x19e   :  { %v1657_v47 = vadd.f32 %v1656_v44, %v8480_v59  ;;  %v1658_v48 = vpop.f32.mrb[97].mxu0  ;;  %v2970_v50 = vadd.f32 %v2969_v46, %v8410_v43  ;;  %v2971_v51 = vpop.f32.mrb[97].mxu1 }
 0x19f   :  { %v1659_v52 = vadd.f32 %v1658_v48, %v8482_v60  ;;  %v1660_v53 = vpop.f32.mrb[98].mxu0  ;;  %v2972_v54 = vadd.f32 %v2971_v51, %v8486_v61  ;;  %v2973_v55 = vpop.f32.mrb[98].mxu1 }
 0x1a0   :  { %v4200_v63 = vmax.f32 %v1657_v47, 0.0  ;;  %v1661_v0 = vadd.f32 %v1660_v53, %v8480_v59  ;;  %v1662_v1 = vpop.f32.mrb[99].mxu0  ;;  %v4202_v2 = vmax.f32 %v2970_v50, 0.0  ;;  %v2974_v3 = vadd.f32 %v2973_v55, %v8410_v43  ;;  %v2975_v4 = vpop.f32.mrb[99].mxu1 }
 0x1a1   :  { %v4201_v5 = vmax.f32 %v1659_v52, 0.0  ;;  %v1663_v7 = vadd.f32 %v1662_v1, %v8482_v60  ;;  %v4203_v8 = vmax.f32 %v2972_v54, 0.0  ;;  %v2976_v9 = vadd.f32 %v2975_v4, %v8486_v61 }
 0x1a2   :  { %v5195_v10 = vadd.f32 %v5194_v40, %v4200_v63  ;;  %v4204_v11 = vmax.f32 %v1661_v0, 0.0  ;;  %7506 = vmatmul.mubr.msk.bf16.gmra.mrb[204].mxu0 %vm981_vm2, %v7935_v49  ;;  %7634 = vmatmul.mubr.msk.bf16.gmra.mrb[204].mxu1 %vm981_vm2, %v7935_v49  ;;  %v5269_v12 = vadd.f32 %v5268_v41, %v4202_v2  ;;  %v4206_v13 = vmax.f32 %v2974_v3, 0.0 }
 0x1a3   :  { %v5232_v14 = vadd.f32 %v5231_v42, %v4201_v5  ;;  %v4205_v15 = vmax.f32 %v1663_v7, 0.0  ;;  %1934 = vmatprep.mubr.bf16.mxu0 %v8211_v6  ;;  %3247 = vmatprep.mubr.bf16.mxu1 %v8211_v6  ;;  %v5306_v16 = vadd.f32 %v5305_v45, %v4203_v8  ;;  %v4207_v17 = vmax.f32 %v2976_v9, 0.0 }
 0x1a4   :  { %v5196_v18 = vadd.f32 %v5195_v10, %v4204_v11  ;;  %v5270_v19 = vadd.f32 %v5269_v12, %v4206_v13  ;;  %v8927_v5 = vadd.f32 %v5063_v24, %v8752_v56  ;;  %v8930_v7 = vadd.f32 %v5137_v25, %v8754_v57  ;;  %v7937_v10 = vld [vmem:[%s10829_s0 + $0x1a8] sm:$0xff]  }
 0x1a5   :  { %v5233_v20 = vadd.f32 %v5232_v14, %v4205_v15  ;;  %v1666_v21 = vpop.f32.mrb[100].mxu0  ;;  %v5307_v22 = vadd.f32 %v5306_v16, %v4207_v17  ;;  %v2979_v23 = vpop.f32.mrb[100].mxu1  ;;  %v8938_v13 = vadd.f32 %v5100_v31, %v8756_v58  ;;  %v8941_v14 = vadd.f32 %v5174_v32, %v8758_v62 }
 0x1a6   :  { %v1667_v26 = vadd.f32 %v1666_v21, %v8480_v59  ;;  %v1668_v27 = vpop.f32.mrb[101].mxu0  ;;  %v2980_v29 = vadd.f32 %v2979_v23, %v8410_v43  ;;  %v2981_v30 = vpop.f32.mrb[101].mxu1 }
 0x1a7   :  { %v1669_v33 = vadd.f32 %v1668_v27, %v8482_v60  ;;  %v1670_v34 = vpop.f32.mrb[102].mxu0  ;;  %v2982_v35 = vadd.f32 %v2981_v30, %v8486_v61  ;;  %v2983_v36 = vpop.f32.mrb[102].mxu1 }
 0x1a8   :  { %v4208_v37 = vmax.f32 %v1667_v26, 0.0  ;;  %v1671_v38 = vadd.f32 %v1670_v34, %v8480_v59  ;;  %v1672_v39 = vpop.f32.mrb[103].mxu0  ;;  %v4210_v40 = vmax.f32 %v2980_v29, 0.0  ;;  %v2984_v41 = vadd.f32 %v2983_v36, %v8410_v43  ;;  %v2985_v42 = vpop.f32.mrb[103].mxu1  ;;  %v7944_v36 = vld [vmem:[%s10829_s0 + $0x1b0] sm:$0xff]  }
 0x1a9   :  { %v4209_v44 = vmax.f32 %v1669_v33, 0.0  ;;  %v1673_v45 = vadd.f32 %v1672_v39, %v8482_v60  ;;  %v4211_v46 = vmax.f32 %v2982_v35, 0.0  ;;  %v2986_v47 = vadd.f32 %v2985_v42, %v8486_v61  ;;  %v7966_v42 = vld [vmem:[%s10832_s3 + $0xa0] ss:$16 sps:$4 sm:$0xff]  }
 0x1aa   :  { %v5197_v48 = vadd.f32 %v5196_v18, %v4208_v37  ;;  %v4212_v49 = vmax.f32 %v1671_v38, 0.0  ;;  %7507 = vmatmul.mubr.msk.bf16.gmra.mrb[208].mxu0 %vm981_vm2, %v7936_v28  ;;  %7635 = vmatmul.mubr.msk.bf16.gmra.mrb[208].mxu1 %vm981_vm2, %v7936_v28  ;;  %v5271_v50 = vadd.f32 %v5270_v19, %v4210_v40  ;;  %v4214_v51 = vmax.f32 %v2984_v41, 0.0 }
 0x1ab   :  { %v5234_v52 = vadd.f32 %v5233_v20, %v4209_v44  ;;  %v4213_v53 = vmax.f32 %v1673_v45, 0.0  ;;  %1944 = vmatprep.mubr.bf16.mxu0 %v8211_v6  ;;  %3257 = vmatprep.mubr.bf16.mxu1 %v8211_v6  ;;  %v5308_v54 = vadd.f32 %v5307_v22, %v4211_v46  ;;  %v4215_v55 = vmax.f32 %v2986_v47, 0.0  ;;  %v7968_v44 = vld [vmem:[%s10832_s3 + $0xa4] ss:$16 sps:$4 sm:$0xff]  }
 0x1ac   :  { %v5198_v63 = vadd.f32 %v5197_v48, %v4212_v49  ;;  %v5272_v0 = vadd.f32 %v5271_v50, %v4214_v51  ;;  %v5065_v33 = vrot.slane %v8927_v5, 2  ;;  %v5139_v34 = vrot.slane %v8930_v7, 2  ;;  %v7969_v49 = vld [vmem:[%s10832_s3 + $0xa8] ss:$16 sps:$4 sm:$0xff]   ;;  %v7971_v50 = vld [vmem:[%s10832_s3 + $0xac] ss:$16 sps:$4 sm:$0xff]   ;;  %7133 = vmatprep.subr.bf16.mxu0 %v7968_v44 }
 0x1ad   :  { %v5235_v1 = vadd.f32 %v5234_v52, %v4213_v53  ;;  %v1676_v2 = vpop.f32.mrb[104].mxu0  ;;  %v5309_v3 = vadd.f32 %v5308_v54, %v4215_v55  ;;  %v2989_v4 = vpop.f32.mrb[104].mxu1  ;;  %v5102_v51 = vrot.slane %v8938_v13, 2  ;;  %v5176_v52 = vrot.slane %v8941_v14, 2  ;;  %7215 = vmatprep.subr.bf16.mxu1 %v7971_v50  ;;  %7134 = vmatpush1.bf16.msra.mxu0 %v7966_v42 }
 0x1ae   :  { %v1677_v8 = vadd.f32 %v1676_v2, %v8480_v59  ;;  %v1678_v9 = vpop.f32.mrb[105].mxu0  ;;  %v2990_v11 = vadd.f32 %v2989_v4, %v8410_v43  ;;  %v2991_v12 = vpop.f32.mrb[105].mxu1  ;;  %7216 = vmatpush1.bf16.msra.mxu1 %v7969_v49 }
 0x1af   :  { %v1679_v56 = vadd.f32 %v1678_v9, %v8482_v60  ;;  %v1680_v57 = vpop.f32.mrb[106].mxu0  ;;  %v2992_v15 = vadd.f32 %v2991_v12, %v8486_v61  ;;  %v2993_v16 = vpop.f32.mrb[106].mxu1 }
 0x1b0   :  { %v4216_v17 = vmax.f32 %v1677_v8, 0.0  ;;  %v1681_v18 = vadd.f32 %v1680_v57, %v8480_v59  ;;  %v1682_v19 = vpop.f32.mrb[107].mxu0  ;;  %v4218_v20 = vmax.f32 %v2990_v11, 0.0  ;;  %v2994_v21 = vadd.f32 %v2993_v16, %v8410_v43  ;;  %v2995_v22 = vpop.f32.mrb[107].mxu1 }
 0x1b1   :  { %v4217_v23 = vmax.f32 %v1679_v56, 0.0  ;;  %v1683_v58 = vadd.f32 %v1682_v19, %v8482_v60  ;;  %v4219_v24 = vmax.f32 %v2992_v15, 0.0  ;;  %v2996_v62 = vadd.f32 %v2995_v22, %v8486_v61 }
 0x1b2   :  { %v5199_v25 = vadd.f32 %v5198_v63, %v4216_v17  ;;  %v4220_v26 = vmax.f32 %v1681_v18, 0.0  ;;  %7508 = vmatmul.mubr.msk.bf16.gmra.mrb[212].mxu0 %vm981_vm2, %v7937_v10  ;;  %7636 = vmatmul.mubr.msk.bf16.gmra.mrb[212].mxu1 %vm981_vm2, %v7937_v10  ;;  %v5273_v27 = vadd.f32 %v5272_v0, %v4218_v20  ;;  %v4222_v28 = vmax.f32 %v2994_v21, 0.0 }
 0x1b3   :  { %v5236_v29 = vadd.f32 %v5235_v1, %v4217_v23  ;;  %v4221_v30 = vmax.f32 %v1683_v58, 0.0  ;;  %1954 = vmatprep.mubr.bf16.mxu0 %v8211_v6  ;;  %3267 = vmatprep.mubr.bf16.mxu1 %v8211_v6  ;;  %v5310_v31 = vadd.f32 %v5309_v3, %v4219_v24  ;;  %v4223_v32 = vmax.f32 %v2996_v62, 0.0 }
 0x1b4   :  { %v5200_v35 = vadd.f32 %v5199_v25, %v4220_v26  ;;  %v5274_v37 = vadd.f32 %v5273_v27, %v4222_v28  ;;  %v8985_v25 = vadd.f32 %v5065_v33, %v8927_v5  ;;  %v8988_v26 = vadd.f32 %v5139_v34, %v8930_v7 }
 0x1b5   :  { %v5237_v38 = vadd.f32 %v5236_v29, %v4221_v30  ;;  %v1686_v39 = vpop.f32.mrb[108].mxu0  ;;  %v5311_v40 = vadd.f32 %v5310_v31, %v4223_v32  ;;  %v2999_v41 = vpop.f32.mrb[108].mxu1  ;;  %v7945_v29 = vld [vmem:[%s10829_s0 + $0x1b8] sm:$0xff]   ;;  %v8996_v32 = vadd.f32 %v5102_v51, %v8938_v13 }
 0x1b6   :  { %v1687_v45 = vadd.f32 %v1686_v39, %v8480_v59  ;;  %v1688_v46 = vpop.f32.mrb[109].mxu0  ;;  %v3000_v47 = vadd.f32 %v2999_v41, %v8410_v43  ;;  %v3001_v48 = vpop.f32.mrb[109].mxu1 }
 0x1b7   :  { %v1689_v53 = vadd.f32 %v1688_v46, %v8482_v60  ;;  %v1690_v54 = vpop.f32.mrb[110].mxu0  ;;  %v3002_v55 = vadd.f32 %v3001_v48, %v8486_v61  ;;  %v3003_v63 = vpop.f32.mrb[110].mxu1 }
 0x1b8   :  { %v4224_v0 = vmax.f32 %v1687_v45, 0.0  ;;  %v1691_v1 = vadd.f32 %v1690_v54, %v8480_v59  ;;  %v1692_v2 = vpop.f32.mrb[111].mxu0  ;;  %v4226_v3 = vmax.f32 %v3000_v47, 0.0  ;;  %v3004_v4 = vadd.f32 %v3003_v63, %v8410_v43  ;;  %v3005_v8 = vpop.f32.mrb[111].mxu1 }
 0x1b9   :  { %v4225_v9 = vmax.f32 %v1689_v53, 0.0  ;;  %v1693_v10 = vadd.f32 %v1692_v2, %v8482_v60  ;;  %v4227_v11 = vmax.f32 %v3002_v55, 0.0  ;;  %v3006_v12 = vadd.f32 %v3005_v8, %v8486_v61 }
 0x1ba   :  { %v5201_v56 = vadd.f32 %v5200_v35, %v4224_v0  ;;  %v4228_v57 = vmax.f32 %v1691_v1, 0.0  ;;  %7509 = vmatmul.mubr.msk.bf16.gmra.mrb[216].mxu0 %vm981_vm2, %v7944_v36  ;;  %7637 = vmatmul.mubr.msk.bf16.gmra.mrb[216].mxu1 %vm981_vm2, %v7944_v36  ;;  %v5275_v15 = vadd.f32 %v5274_v37, %v4226_v3  ;;  %v4230_v16 = vmax.f32 %v3004_v4, 0.0 }
 0x1bb   :  { %v5238_v17 = vadd.f32 %v5237_v38, %v4225_v9  ;;  %v4229_v18 = vmax.f32 %v1693_v10, 0.0  ;;  %1964 = vmatprep.mubr.bf16.mxu0 %v8211_v6  ;;  %3277 = vmatprep.mubr.bf16.mxu1 %v8211_v6  ;;  %v5312_v19 = vadd.f32 %v5311_v40, %v4227_v11  ;;  %v4231_v20 = vmax.f32 %v3006_v12, 0.0  ;;  %v7946_v9 = vld [vmem:[%s10829_s0 + $0x1c0] sm:$0xff]  }
 0x1bc   :  { %v5202_v21 = vadd.f32 %v5201_v56, %v4228_v57  ;;  %v5276_v22 = vadd.f32 %v5275_v15, %v4230_v16  ;;  %v8999_v35 = vadd.f32 %v5176_v52, %v8941_v14  ;;  %v5067_v2 = vrot.slane %v8985_v25, 1 }
 0x1bd   :  { %v5239_v23 = vadd.f32 %v5238_v17, %v4229_v18  ;;  %v1696_v58 = vpop.f32.mrb[112].mxu0  ;;  %v5313_v24 = vadd.f32 %v5312_v19, %v4231_v20  ;;  %v3009_v62 = vpop.f32.mrb[112].mxu1  ;;  %v5141_v3 = vrot.slane %v8988_v26, 1  ;;  %v5104_v12 = vrot.slane %v8996_v32, 1 }
 0x1be   :  { %v1697_v27 = vadd.f32 %v1696_v58, %v8480_v59  ;;  %v1698_v28 = vpop.f32.mrb[113].mxu0  ;;  %v3010_v30 = vadd.f32 %v3009_v62, %v8410_v43  ;;  %v3011_v31 = vpop.f32.mrb[113].mxu1  ;;  %v5178_v56 = vrot.slane %v8999_v35, 1 }
 0x1bf   :  { %v1699_v5 = vadd.f32 %v1698_v28, %v8482_v60  ;;  %v1700_v7 = vpop.f32.mrb[114].mxu0  ;;  %v3012_v33 = vadd.f32 %v3011_v31, %v8486_v61  ;;  %v3013_v34 = vpop.f32.mrb[114].mxu1 }
 0x1c0   :  { %v4232_v36 = vmax.f32 %v1697_v27, 0.0  ;;  %v1701_v37 = vadd.f32 %v1700_v7, %v8480_v59  ;;  %v1702_v38 = vpop.f32.mrb[115].mxu0  ;;  %v4234_v39 = vmax.f32 %v3010_v30, 0.0  ;;  %v3014_v40 = vadd.f32 %v3013_v34, %v8410_v43  ;;  %v3015_v41 = vpop.f32.mrb[115].mxu1 }
 0x1c1   :  { %v4233_v42 = vmax.f32 %v1699_v5, 0.0  ;;  %v1703_v13 = vadd.f32 %v1702_v38, %v8482_v60  ;;  %v4235_v44 = vmax.f32 %v3012_v33, 0.0  ;;  %v3016_v14 = vadd.f32 %v3015_v41, %v8486_v61 }
 0x1c2   :  { %v5203_v45 = vadd.f32 %v5202_v21, %v4232_v36  ;;  %v4236_v46 = vmax.f32 %v1701_v37, 0.0  ;;  %7510 = vmatmul.mubr.msk.bf16.gmra.mrb[220].mxu0 %vm981_vm2, %v7945_v29  ;;  %7638 = vmatmul.mubr.msk.bf16.gmra.mrb[220].mxu1 %vm981_vm2, %v7945_v29  ;;  %v5277_v47 = vadd.f32 %v5276_v22, %v4234_v39  ;;  %v4238_v48 = vmax.f32 %v3014_v40, 0.0 }
 0x1c3   :  { %v5240_v49 = vadd.f32 %v5239_v23, %v4233_v42  ;;  %v4237_v50 = vmax.f32 %v1703_v13, 0.0  ;;  %1974 = vmatprep.mubr.bf16.mxu0 %v8211_v6  ;;  %3287 = vmatprep.mubr.bf16.mxu1 %v8211_v6  ;;  %v5314_v51 = vadd.f32 %v5313_v24, %v4235_v44  ;;  %v4239_v52 = vmax.f32 %v3016_v14, 0.0 }
 0x1c4   :  { %v5204_v53 = vadd.f32 %v5203_v45, %v4236_v46  ;;  %v5278_v54 = vadd.f32 %v5277_v47, %v4238_v48  ;;  %v9031_v42 = vadd.f32 %v5067_v2, %v8985_v25  ;;  %v9034_v13 = vadd.f32 %v5141_v3, %v8988_v26  ;;  %v7947_v46 = vld [vmem:[%s10829_s0 + $0x1c8] sm:$0xff]  }
 0x1c5   :  { %v5241_v55 = vadd.f32 %v5240_v49, %v4237_v50  ;;  %v1706_v63 = vpop.f32.mrb[116].mxu0  ;;  %v5315_v0 = vadd.f32 %v5314_v51, %v4239_v52  ;;  %v3019_v1 = vpop.f32.mrb[116].mxu1  ;;  %v9042_v48 = vadd.f32 %v5104_v12, %v8996_v32  ;;  %v9045_v49 = vadd.f32 %v5178_v56, %v8999_v35 }
 0x1c6   :  { %v1707_v4 = vadd.f32 %v1706_v63, %v8480_v59  ;;  %v1708_v8 = vpop.f32.mrb[117].mxu0  ;;  %v3020_v10 = vadd.f32 %v3019_v1, %v8410_v43  ;;  %v3021_v11 = vpop.f32.mrb[117].mxu1 }
 0x1c7   :  { %v1709_v57 = vadd.f32 %v1708_v8, %v8482_v60  ;;  %v1710_v15 = vpop.f32.mrb[118].mxu0  ;;  %v3022_v16 = vadd.f32 %v3021_v11, %v8486_v61  ;;  %v3023_v17 = vpop.f32.mrb[118].mxu1 }
 0x1c8   :  { %v4240_v18 = vmax.f32 %v1707_v4, 0.0  ;;  %v1711_v19 = vadd.f32 %v1710_v15, %v8480_v59  ;;  %v1712_v20 = vpop.f32.mrb[119].mxu0  ;;  %v4242_v21 = vmax.f32 %v3020_v10, 0.0  ;;  %v3024_v22 = vadd.f32 %v3023_v17, %v8410_v43  ;;  %v3025_v23 = vpop.f32.mrb[119].mxu1 }
 0x1c9   :  { %v4241_v58 = vmax.f32 %v1709_v57, 0.0  ;;  %v1713_v24 = vadd.f32 %v1712_v20, %v8482_v60  ;;  %v4243_v62 = vmax.f32 %v3022_v16, 0.0  ;;  %v3026_v27 = vadd.f32 %v3025_v23, %v8486_v61 }
 0x1ca   :  { %v5205_v28 = vadd.f32 %v5204_v53, %v4240_v18  ;;  %v4244_v29 = vmax.f32 %v1711_v19, 0.0  ;;  %7511 = vmatmul.mubr.msk.bf16.gmra.mrb[224].mxu0 %vm981_vm2, %v7946_v9  ;;  %7639 = vmatmul.mubr.msk.bf16.gmra.mrb[224].mxu1 %vm981_vm2, %v7946_v9  ;;  %v5279_v30 = vadd.f32 %v5278_v54, %v4242_v21  ;;  %v4246_v31 = vmax.f32 %v3024_v22, 0.0 }
 0x1cb   :  { %v5242_v5 = vadd.f32 %v5241_v55, %v4241_v58  ;;  %v4245_v7 = vmax.f32 %v1713_v24, 0.0  ;;  %v5316_v33 = vadd.f32 %v5315_v0, %v4243_v62  ;;  %v4247_v34 = vmax.f32 %v3026_v27, 0.0  ;;  %1984 = vmatprep.mubr.bf16.mxu0 %v8211_v6  ;;  %3297 = vmatprep.mubr.bf16.mxu1 %v8211_v6  ;;  %v7948_v62 = vld [vmem:[%s10829_s0 + $0x1d0] sm:$0xff]  }
 0x1cc   :  { %v5206_v36 = vadd.f32 %v5205_v28, %v4244_v29  ;;  %v5280_v37 = vadd.f32 %v5279_v30, %v4246_v31  ;;  %v6216_v20 = vpack.c.bf16 %v9031_v42, %v9031_v42  ;;  %v6218_v21 = vpack.c.bf16 %v9034_v13, %v9034_v13 }
 0x1cd   :  { %v5243_v38 = vadd.f32 %v5242_v5, %v4245_v7  ;;  %v1716_v39 = vpop.f32.mrb[120].mxu0  ;;  %v5317_v40 = vadd.f32 %v5316_v33, %v4247_v34  ;;  %v3029_v41 = vpop.f32.mrb[120].mxu1  ;;  %v6217_v27 = vpack.c.bf16 %v9042_v48, %v9042_v48  ;;  %v6219_v28 = vpack.c.bf16 %v9045_v49, %v9045_v49 }
 0x1ce   :  { %v1717_v44 = vadd.f32 %v1716_v39, %v8480_v59  ;;  %v1718_v14 = vpop.f32.mrb[121].mxu0  ;;  %v3030_v45 = vadd.f32 %v3029_v41, %v8410_v43  ;;  %v3031_v47 = vpop.f32.mrb[121].mxu1 }
 0x1cf   :  { %v1719_v25 = vadd.f32 %v1718_v14, %v8482_v60  ;;  %v1720_v26 = vpop.f32.mrb[122].mxu0  ;;  %v3032_v50 = vadd.f32 %v3031_v47, %v8486_v61  ;;  %v3033_v51 = vpop.f32.mrb[122].mxu1 }
 0x1d0   :  { %v4248_v52 = vmax.f32 %v1717_v44, 0.0  ;;  %v1721_v53 = vadd.f32 %v1720_v26, %v8480_v59  ;;  %v1722_v54 = vpop.f32.mrb[123].mxu0  ;;  %v4250_v55 = vmax.f32 %v3030_v45, 0.0  ;;  %v3034_v63 = vadd.f32 %v3033_v51, %v8410_v43  ;;  %v3035_v0 = vpop.f32.mrb[123].mxu1 }
 0x1d1   :  { %v4249_v1 = vmax.f32 %v1719_v25, 0.0  ;;  %v1723_v32 = vadd.f32 %v1722_v54, %v8482_v60  ;;  %v4251_v2 = vmax.f32 %v3032_v50, 0.0  ;;  %v3036_v35 = vadd.f32 %v3035_v0, %v8486_v61 }
 0x1d2   :  { %v5207_v3 = vadd.f32 %v5206_v36, %v4248_v52  ;;  %v4252_v4 = vmax.f32 %v1721_v53, 0.0  ;;  %v5281_v8 = vadd.f32 %v5280_v37, %v4250_v55  ;;  %7512 = vmatmul.mubr.msk.bf16.gmra.mrb[228].mxu0 %vm981_vm2, %v7947_v46  ;;  %7640 = vmatmul.mubr.msk.bf16.gmra.mrb[228].mxu1 %vm981_vm2, %v7947_v46  ;;  %v4254_v9 = vmax.f32 %v3034_v63, 0.0 }
 0x1d3   :  { %v5244_v10 = vadd.f32 %v5243_v38, %v4249_v1  ;;  %v4253_v11 = vmax.f32 %v1723_v32, 0.0  ;;  %v5318_v12 = vadd.f32 %v5317_v40, %v4251_v2  ;;  %v4255_v56 = vmax.f32 %v3036_v35, 0.0  ;;  %1994 = vmatprep.mubr.bf16.mxu0 %v8211_v6  ;;  %3307 = vmatprep.mubr.bf16.mxu1 %v8211_v6 }
 0x1d4   :  { %v5208_v57 = vadd.f32 %v5207_v3, %v4252_v4  ;;  %v5282_v15 = vadd.f32 %v5281_v8, %v4254_v9  ;;  %v9080_v25 = vunpack.c.l.b16 %v6216_v20  ;;  %v9082_v26 = vunpack.c.l.b16 %v6218_v21  ;;  %v7949_v3 = vld [vmem:[%s10829_s0 + $0x1d8] sm:$0xff]  }
 0x1d5   :  { %v5245_v16 = vadd.f32 %v5244_v10, %v4253_v11  ;;  %v5319_v17 = vadd.f32 %v5318_v12, %v4255_v56  ;;  %v1726_v18 = vpop.f32.mrb[124].mxu0  ;;  %v3039_v19 = vpop.f32.mrb[124].mxu1  ;;  %v9084_v52 = vunpack.c.l.b16 %v6217_v27  ;;  %v9086_v53 = vunpack.c.l.b16 %v6219_v28 }
 0x1d6   :  { %v1727_v22 = vadd.f32 %v1726_v18, %v8480_v59  ;;  %v3040_v23 = vadd.f32 %v3039_v19, %v8410_v43  ;;  %v1728_v58 = vpop.f32.mrb[125].mxu0  ;;  %v3041_v24 = vpop.f32.mrb[125].mxu1 }
 0x1d7   :  { %v1729_v29 = vadd.f32 %v1728_v58, %v8482_v60  ;;  %v3042_v30 = vadd.f32 %v3041_v24, %v8486_v61  ;;  %v1730_v31 = vpop.f32.mrb[126].mxu0  ;;  %v3043_v5 = vpop.f32.mrb[126].mxu1 }
 0x1d8   :  { %v4256_v7 = vmax.f32 %v1727_v22, 0.0  ;;  %v4258_v33 = vmax.f32 %v3040_v23, 0.0  ;;  %v1731_v34 = vadd.f32 %v1730_v31, %v8480_v59  ;;  %v3044_v36 = vadd.f32 %v3043_v5, %v8410_v43  ;;  %v1732_v37 = vpop.f32.mrb[127].mxu0  ;;  %v3045_v38 = vpop.f32.mrb[127].mxu1 }
 0x1d9   :  { %v4257_v39 = vmax.f32 %v1729_v29, 0.0  ;;  %v4259_v40 = vmax.f32 %v3042_v30, 0.0  ;;  %v1733_v41 = vadd.f32 %v1732_v37, %v8482_v60  ;;  %v3046_v42 = vadd.f32 %v3045_v38, %v8486_v61 }
 0x1da   :  { %v5209_v13 = vadd.f32 %v5208_v57, %v4256_v7  ;;  %v5283_v44 = vadd.f32 %v5282_v15, %v4258_v33  ;;  %v4260_v14 = vmax.f32 %v1731_v34, 0.0  ;;  %v4262_v45 = vmax.f32 %v3044_v36, 0.0  ;;  %7513 = vmatmul.mubr.msk.bf16.gmra.mrb[232].mxu0 %vm981_vm2, %v7948_v62  ;;  %7641 = vmatmul.mubr.msk.bf16.gmra.mrb[232].mxu1 %vm981_vm2, %v7948_v62 }
 0x1db   :  { %v5246_v46 = vadd.f32 %v5245_v16, %v4257_v39  ;;  %v5320_v47 = vadd.f32 %v5319_v17, %v4259_v40  ;;  %v4261_v48 = vmax.f32 %v1733_v41, 0.0  ;;  %v4263_v49 = vmax.f32 %v3046_v42, 0.0  ;;  %2004 = vmatprep.mubr.bf16.mxu0 %v8211_v6  ;;  %3317 = vmatprep.mubr.bf16.mxu1 %v8211_v6 }
 0x1dc   :  { %v5210_v50 = vadd.f32 %v5209_v13, %v4260_v14  ;;  %v5284_v51 = vadd.f32 %v5283_v44, %v4262_v45 }
 0x1dd   :  { %v5247_v54 = vadd.f32 %v5246_v46, %v4261_v48  ;;  %v5321_v55 = vadd.f32 %v5320_v47, %v4263_v49  ;;  %v1736_v63 = vpop.f32.mrb[128].mxu0  ;;  %v3049_v0 = vpop.f32.mrb[128].mxu1  ;;  %v7950_v46 = vld [vmem:[%s10829_s0 + $0x1e0] sm:$0xff]  }
 0x1de   :  { %v5211_v1 = vrot.slane %v5210_v50, 4  ;;  %v5285_v32 = vrot.slane %v5284_v51, 4  ;;  %v1737_v2 = vadd.f32 %v1736_v63, %v8480_v59  ;;  %v1738_v35 = vpop.f32.mrb[129].mxu0  ;;  %v9093_v4 = vadd.f32 %v3049_v0, %v8410_v43  ;;  %v3051_v8 = vpop.f32.mrb[129].mxu1 }
 0x1df   :  { %v5248_v9 = vrot.slane %v5247_v54, 4  ;;  %v5322_v10 = vrot.slane %v5321_v55, 4  ;;  %v1739_v11 = vadd.f32 %v1738_v35, %v8482_v60  ;;  %v1740_v12 = vpop.f32.mrb[130].mxu0  ;;  %v9097_v56 = vadd.f32 %v3051_v8, %v8486_v61  ;;  %v3053_v57 = vpop.f32.mrb[130].mxu1 }
 0x1e0   :  { %v5212_v15 = vadd.f32 %v5211_v1, %v5210_v50  ;;  %v5286_v16 = vadd.f32 %v5285_v32, %v5284_v51  ;;  %v4264_v17 = vmax.f32 %v1737_v2, 0.0  ;;  %v1741_v18 = vadd.f32 %v1740_v12, %v8480_v59  ;;  %v1742_v19 = vpop.f32.mrb[131].mxu0  ;;  %v3055_v20 = vpop.f32.mrb[131].mxu1 }
 0x1e1   :  { %v5249_v21 = vadd.f32 %v5248_v9, %v5247_v54  ;;  %v5323_v22 = vadd.f32 %v5322_v10, %v5321_v55  ;;  %v4265_v23 = vmax.f32 %v1739_v11, 0.0  ;;  %v1743_v58 = vadd.f32 %v1742_v19, %v8482_v60 }
 0x1e2   :  { %v5213_v24 = vrot.slane %v5212_v15, 2  ;;  %v5287_v62 = vrot.slane %v5286_v16, 2  ;;  %v4268_v27 = vmax.f32 %v1741_v18, 0.0  ;;  %7514 = vmatmul.mubr.msk.bf16.gmra.mrb[236].mxu0 %vm981_vm2, %v7949_v3  ;;  %7642 = vmatmul.mubr.msk.bf16.gmra.mrb[236].mxu1 %vm981_vm2, %v7949_v3  ;;  %v4266_v28 = vmax.f32 %v9093_v4, 0.0 }
 0x1e3   :  { %v5250_v29 = vrot.slane %v5249_v21, 2  ;;  %v5324_v30 = vrot.slane %v5323_v22, 2  ;;  %v4269_v31 = vmax.f32 %v1743_v58, 0.0  ;;  %2014 = vmatprep.mubr.bf16.mxu0 %v8211_v6  ;;  %3327 = vmatprep.mubr.bf16.mxu1 %v8211_v6  ;;  %v4267_v5 = vmax.f32 %v9097_v56, 0.0 }
 0x1e4   :  { %v5214_v7 = vadd.f32 %v5213_v24, %v5212_v15  ;;  %v5288_v33 = vadd.f32 %v5287_v62, %v5286_v16  ;;  %v5328_v34 = vadd.f32 %v4268_v27, %v4264_v17  ;;  %v3054_v36 = vadd.f32 %v3053_v57, %v8410_v43 }
 0x1e5   :  { %v5251_v37 = vadd.f32 %v5250_v29, %v5249_v21  ;;  %v5325_v38 = vadd.f32 %v5324_v30, %v5323_v22  ;;  %v5365_v39 = vadd.f32 %v4269_v31, %v4265_v23  ;;  %v1746_v40 = vpop.f32.mrb[132].mxu0  ;;  %v3056_v41 = vadd.f32 %v3055_v20, %v8486_v61  ;;  %v3059_v42 = vpop.f32.mrb[132].mxu1 }
 0x1e6   :  { %v5215_v13 = vrot.slane %v5214_v7, 1  ;;  %v5289_v44 = vrot.slane %v5288_v33, 1  ;;  %v1747_v14 = vadd.f32 %v1746_v40, %v8480_v59  ;;  %v1748_v45 = vpop.f32.mrb[133].mxu0  ;;  %v4270_v47 = vmax.f32 %v3054_v36, 0.0  ;;  %v3061_v48 = vpop.f32.mrb[133].mxu1 }
 0x1e7   :  { %v5252_v49 = vrot.slane %v5251_v37, 1  ;;  %v5326_v50 = vrot.slane %v5325_v38, 1  ;;  %v1749_v51 = vadd.f32 %v1748_v45, %v8482_v60  ;;  %v1750_v54 = vpop.f32.mrb[134].mxu0  ;;  %v4271_v55 = vmax.f32 %v3056_v41, 0.0  ;;  %v3063_v63 = vpop.f32.mrb[134].mxu1 }
 0x1e8   :  { %v5216_v0 = vadd.f32 %v5215_v13, %v5214_v7  ;;  %v5290_v1 = vadd.f32 %v5289_v44, %v5288_v33  ;;  %v4272_v32 = vmax.f32 %v1747_v14, 0.0  ;;  %v1751_v2 = vadd.f32 %v1750_v54, %v8480_v59  ;;  %v1752_v35 = vpop.f32.mrb[135].mxu0  ;;  %v3065_v3 = vpop.f32.mrb[135].mxu1 }
 0x1e9   :  { %v5253_v4 = vadd.f32 %v5252_v49, %v5251_v37  ;;  %v5327_v8 = vadd.f32 %v5326_v50, %v5325_v38  ;;  %v4273_v9 = vmax.f32 %v1749_v51, 0.0  ;;  %v1753_v10 = vadd.f32 %v1752_v35, %v8482_v60 }
 0x1ea   :  { %v6220_v11 = vpack.c.bf16 %v5216_v0, %v5216_v0  ;;  %v6222_v12 = vpack.c.bf16 %v5290_v1, %v5290_v1  ;;  %v5329_v56 = vadd.f32 %v5328_v34, %v4272_v32  ;;  %v4276_v57 = vmax.f32 %v1751_v2, 0.0  ;;  %7515 = vmatmul.mubr.msk.bf16.gmra.mrb[240].mxu0 %vm981_vm2, %v7950_v46  ;;  %7643 = vmatmul.mubr.msk.bf16.gmra.mrb[240].mxu1 %vm981_vm2, %v7950_v46 }
 0x1eb   :  { %v6221_v15 = vpack.c.bf16 %v5253_v4, %v5253_v4  ;;  %v6223_v16 = vpack.c.bf16 %v5327_v8, %v5327_v8  ;;  %v5366_v17 = vadd.f32 %v5365_v39, %v4273_v9  ;;  %v4277_v18 = vmax.f32 %v1753_v10, 0.0  ;;  %2024 = vmatprep.mubr.bf16.mxu0 %v8211_v6  ;;  %3337 = vmatprep.mubr.bf16.mxu1 %v8211_v6 }
 0x1ec   :  { %v6412_v19 = vunpack.c.l.b16 %v6220_v11  ;;  %v6414_v20 = vunpack.c.l.b16 %v6222_v12  ;;  %v5330_v21 = vadd.f32 %v5329_v56, %v4276_v57  ;;  %v5402_v22 = vadd.f32 %v4270_v47, %v4266_v28  ;;  %v7951_v28 = vld [vmem:[%s10829_s0 + $0x1e8] sm:$0xff]   ;;  %v7980_v11 = vld [vmem:[%s10832_s3 + $0xc0] ss:$16 sps:$4 sm:$0xff]   ;;  %v7982_v12 = vld [vmem:[%s10832_s3 + $0xc4] ss:$16 sps:$4 sm:$0xff]  }
 0x1ed   :  { %v6413_v23 = vunpack.c.l.b16 %v6221_v15  ;;  %v6415_v58 = vunpack.c.l.b16 %v6223_v16  ;;  %v5367_v24 = vadd.f32 %v5366_v17, %v4277_v18  ;;  %v1756_v62 = vpop.f32.mrb[136].mxu0  ;;  %v5439_v27 = vadd.f32 %v4271_v55, %v4267_v5  ;;  %v3069_v29 = vpop.f32.mrb[136].mxu1  ;;  %v7958_v15 = vld [vmem:[%s10829_s0 + $0x1f0] sm:$0xff]   ;;  %7135 = vmatprep.subr.bf16.mxu0 %v7982_v12 }
 0x1ee   :  { %v9122_v30 = vsel %vm6440_vm3, %v6412_v19, %v9080_v25  ;;  %v9126_v31 = vsel %vm6440_vm3, %v6414_v20, %v9082_v26  ;;  %v1757_v7 = vadd.f32 %v1756_v62, %v8480_v59  ;;  %v1758_v33 = vpop.f32.mrb[137].mxu0  ;;  %v3060_v34 = vadd.f32 %v3059_v42, %v8410_v43  ;;  %v3071_v36 = vpop.f32.mrb[137].mxu1  ;;  %v7985_v62 = vld [vmem:[%s10832_s3 + $0xcc] ss:$16 sps:$4 sm:$0xff]   ;;  %7136 = vmatpush1.bf16.msra.mxu0 %v7980_v11 }
 0x1ef   :  { %v9135_v5 = vsel %vm6440_vm3, %v6413_v23, %v9084_v52  ;;  %v9139_v25 = vsel %vm6440_vm3, %v6415_v58, %v9086_v53  ;;  %v1759_v26 = vadd.f32 %v1758_v33, %v8482_v60  ;;  %v1760_v37 = vpop.f32.mrb[138].mxu0  ;;  %v3062_v38 = vadd.f32 %v3061_v48, %v8486_v61  ;;  %v3073_v39 = vpop.f32.mrb[138].mxu1  ;;  %7217 = vmatprep.subr.bf16.mxu1 %v7985_v62 }
 0x1f0   :  { %v4280_v40 = vmax.f32 %v1757_v7, 0.0  ;;  %v1761_v41 = vadd.f32 %v1760_v37, %v8480_v59  ;;  %v1762_v13 = vpop.f32.mrb[139].mxu0  ;;  %v4274_v42 = vmax.f32 %v3060_v34, 0.0  ;;  %v3064_v44 = vadd.f32 %v3063_v63, %v8410_v43  ;;  %v3075_v14 = vpop.f32.mrb[139].mxu1 }
 0x1f1   :  { %v4281_v52 = vmax.f32 %v1759_v26, 0.0  ;;  %v1763_v45 = vadd.f32 %v1762_v13, %v8482_v60  ;;  %v4275_v46 = vmax.f32 %v3062_v38, 0.0  ;;  %v3066_v53 = vadd.f32 %v3065_v3, %v8486_v61 }
 0x1f2   :  { %v5331_v47 = vadd.f32 %v5330_v21, %v4280_v40  ;;  %v4284_v49 = vmax.f32 %v1761_v41, 0.0  ;;  %7516 = vmatmul.mubr.msk.bf16.gmra.mrb[244].mxu0 %vm981_vm2, %v7951_v28  ;;  %7644 = vmatmul.mubr.msk.bf16.gmra.mrb[244].mxu1 %vm981_vm2, %v7951_v28  ;;  %v5403_v48 = vadd.f32 %v5402_v22, %v4274_v42  ;;  %v4278_v50 = vmax.f32 %v3064_v44, 0.0 }
 0x1f3   :  { %v5368_v51 = vadd.f32 %v5367_v24, %v4281_v52  ;;  %v4285_v54 = vmax.f32 %v1763_v45, 0.0  ;;  %2034 = vmatprep.mubr.bf16.mxu0 %v8211_v6  ;;  %3347 = vmatprep.mubr.bf16.mxu1 %v8211_v6  ;;  %v5440_v55 = vadd.f32 %v5439_v27, %v4275_v46  ;;  %v4279_v63 = vmax.f32 %v3066_v53, 0.0 }
 0x1f4   :  { %v5332_v0 = vadd.f32 %v5331_v47, %v4284_v49  ;;  %v5404_v1 = vadd.f32 %v5403_v48, %v4278_v50  ;;  %v3070_v32 = vadd.f32 %v3069_v29, %v8410_v43  ;;  %v3072_v2 = vadd.f32 %v3071_v36, %v8486_v61  ;;  %v7983_v36 = vld [vmem:[%s10832_s3 + $0xc8] ss:$16 sps:$4 sm:$0xff]  }
 0x1f5   :  { %v5369_v35 = vadd.f32 %v5368_v51, %v4285_v54  ;;  %v1766_v3 = vpop.f32.mrb[140].mxu0  ;;  %v5441_v4 = vadd.f32 %v5440_v55, %v4279_v63  ;;  %v3074_v8 = vadd.f32 %v3073_v39, %v8410_v43  ;;  %v3076_v9 = vadd.f32 %v3075_v14, %v8486_v61  ;;  %v3079_v10 = vpop.f32.mrb[140].mxu1  ;;  %7218 = vmatpush1.bf16.msra.mxu1 %v7983_v36 }
 0x1f6   :  { %v1767_v56 = vadd.f32 %v1766_v3, %v8480_v59  ;;  %v1768_v57 = vpop.f32.mrb[141].mxu0  ;;  %v4282_v16 = vmax.f32 %v3070_v32, 0.0  ;;  %v4283_v17 = vmax.f32 %v3072_v2, 0.0  ;;  %v3080_v18 = vadd.f32 %v3079_v10, %v8410_v43  ;;  %v3081_v19 = vpop.f32.mrb[141].mxu1 }
 0x1f7   :  { %v1769_v20 = vadd.f32 %v1768_v57, %v8482_v60  ;;  %v1770_v21 = vpop.f32.mrb[142].mxu0  ;;  %v4286_v22 = vmax.f32 %v3074_v8, 0.0  ;;  %v4287_v23 = vmax.f32 %v3076_v9, 0.0  ;;  %v3082_v58 = vadd.f32 %v3081_v19, %v8486_v61  ;;  %v3083_v24 = vpop.f32.mrb[142].mxu1 }
 0x1f8   :  { %v4288_v27 = vmax.f32 %v1767_v56, 0.0  ;;  %v1771_v29 = vadd.f32 %v1770_v21, %v8480_v59  ;;  %v1772_v7 = vpop.f32.mrb[143].mxu0  ;;  %v5405_v33 = vadd.f32 %v5404_v1, %v4282_v16  ;;  %v5442_v28 = vadd.f32 %v5441_v4, %v4283_v17  ;;  %v3085_v34 = vpop.f32.mrb[143].mxu1 }
 0x1f9   :  { %v4289_v26 = vmax.f32 %v1769_v20, 0.0  ;;  %v1773_v37 = vadd.f32 %v1772_v7, %v8482_v60  ;;  %v4290_v38 = vmax.f32 %v3080_v18, 0.0  ;;  %v4291_v39 = vmax.f32 %v3082_v58, 0.0 }
 0x1fa   :  { %v5333_v40 = vadd.f32 %v5332_v0, %v4288_v27  ;;  %v4292_v41 = vmax.f32 %v1771_v29, 0.0  ;;  %7517 = vmatmul.mubr.msk.bf16.gmra.mrb[248].mxu0 %vm981_vm2, %v7958_v15  ;;  %7645 = vmatmul.mubr.msk.bf16.gmra.mrb[248].mxu1 %vm981_vm2, %v7958_v15  ;;  %v5406_v13 = vadd.f32 %v5405_v33, %v4286_v22  ;;  %v5443_v42 = vadd.f32 %v5442_v28, %v4287_v23  ;;  %v7959_v0 = vld [vmem:[%s10829_s0 + $0x1f8] sm:$0xff]  }
 0x1fb   :  { %v5370_v44 = vadd.f32 %v5369_v35, %v4289_v26  ;;  %v4293_v14 = vmax.f32 %v1773_v37, 0.0  ;;  %2044 = vmatprep.mubr.bf16.mxu0 %v8211_v6  ;;  %3357 = vmatprep.mubr.bf16.mxu1 %v8211_v6  ;;  %v3084_v52 = vadd.f32 %v3083_v24, %v8410_v43  ;;  %v3086_v45 = vadd.f32 %v3085_v34, %v8486_v61 }
 0x1fc   :  { %v5334_v46 = vadd.f32 %v5333_v40, %v4292_v41  ;;  %v5407_v53 = vadd.f32 %v5406_v13, %v4290_v38  ;;  %v5444_v47 = vadd.f32 %v5443_v42, %v4291_v39  ;;  %v7960_v38 = vld [vmem:[%s10829_s0 + $0x200] sm:$0xff]  }
 0x1fd   :  { %v5371_v49 = vadd.f32 %v5370_v44, %v4293_v14  ;;  %v1776_v48 = vpop.f32.mrb[144].mxu0  ;;  %v4294_v50 = vmax.f32 %v3084_v52, 0.0  ;;  %v4295_v51 = vmax.f32 %v3086_v45, 0.0  ;;  %v3089_v54 = vpop.f32.mrb[144].mxu1 }
 0x1fe   :  { %v1777_v55 = vadd.f32 %v1776_v48, %v8480_v59  ;;  %v1778_v63 = vpop.f32.mrb[145].mxu0  ;;  %v3090_v1 = vadd.f32 %v3089_v54, %v8410_v43  ;;  %v3091_v32 = vpop.f32.mrb[145].mxu1 }
 0x1ff   :  { %v1779_v2 = vadd.f32 %v1778_v63, %v8482_v60  ;;  %v1780_v35 = vpop.f32.mrb[146].mxu0  ;;  %v5408_v3 = vadd.f32 %v5407_v53, %v4294_v50  ;;  %v5445_v4 = vadd.f32 %v5444_v47, %v4295_v51  ;;  %v3092_v8 = vadd.f32 %v3091_v32, %v8486_v61  ;;  %v3093_v9 = vpop.f32.mrb[146].mxu1 }
 0x200   :  { %v4296_v10 = vmax.f32 %v1777_v55, 0.0  ;;  %v1781_v11 = vadd.f32 %v1780_v35, %v8480_v59  ;;  %v1782_v12 = vpop.f32.mrb[147].mxu0  ;;  %v4298_v56 = vmax.f32 %v3090_v1, 0.0  ;;  %v3094_v57 = vadd.f32 %v3093_v9, %v8410_v43  ;;  %v3095_v15 = vpop.f32.mrb[147].mxu1 }
 0x201   :  { %v4297_v16 = vmax.f32 %v1779_v2, 0.0  ;;  %v1783_v17 = vadd.f32 %v1782_v12, %v8482_v60  ;;  %v4299_v18 = vmax.f32 %v3092_v8, 0.0  ;;  %v3096_v19 = vadd.f32 %v3095_v15, %v8486_v61 }
 0x202   :  { %v5335_v20 = vadd.f32 %v5334_v46, %v4296_v10  ;;  %v4300_v21 = vmax.f32 %v1781_v11, 0.0  ;;  %7518 = vmatmul.mubr.msk.bf16.gmra.mrb[252].mxu0 %vm981_vm2, %v7959_v0  ;;  %7646 = vmatmul.mubr.msk.bf16.gmra.mrb[252].mxu1 %vm981_vm2, %v7959_v0  ;;  %v5409_v22 = vadd.f32 %v5408_v3, %v4298_v56  ;;  %v4302_v23 = vmax.f32 %v3094_v57, 0.0  ;;  %v7961_v57 = vld [vmem:[%s10829_s0 + $0x208] sm:$0xff]  }
 0x203   :  { %v5372_v58 = vadd.f32 %v5371_v49, %v4297_v16  ;;  %v4301_v24 = vmax.f32 %v1783_v17, 0.0  ;;  %2054 = vmatprep.mubr.bf16.mxu0 %v8211_v6  ;;  %3367 = vmatprep.mubr.bf16.mxu1 %v8211_v6  ;;  %v5446_v62 = vadd.f32 %v5445_v4, %v4299_v18  ;;  %v4303_v27 = vmax.f32 %v3096_v19, 0.0 }
 0x204   :  { %v5336_v29 = vadd.f32 %v5335_v20, %v4300_v21  ;;  %v5410_v7 = vadd.f32 %v5409_v22, %v4302_v23 }
 0x205   :  { %v5373_v33 = vadd.f32 %v5372_v58, %v4301_v24  ;;  %v1786_v28 = vpop.f32.mrb[148].mxu0  ;;  %v5447_v34 = vadd.f32 %v5446_v62, %v4303_v27  ;;  %v3099_v36 = vpop.f32.mrb[148].mxu1 }
 0x206   :  { %v1787_v26 = vadd.f32 %v1786_v28, %v8480_v59  ;;  %v1788_v37 = vpop.f32.mrb[149].mxu0  ;;  %v3100_v39 = vadd.f32 %v3099_v36, %v8410_v43  ;;  %v3101_v40 = vpop.f32.mrb[149].mxu1 }
 0x207   :  { %v1789_v41 = vadd.f32 %v1788_v37, %v8482_v60  ;;  %v1790_v13 = vpop.f32.mrb[150].mxu0  ;;  %v3102_v42 = vadd.f32 %v3101_v40, %v8486_v61  ;;  %v3103_v44 = vpop.f32.mrb[150].mxu1 }
 0x208   :  { %v4304_v14 = vmax.f32 %v1787_v26, 0.0  ;;  %v1791_v52 = vadd.f32 %v1790_v13, %v8480_v59  ;;  %v1792_v45 = vpop.f32.mrb[151].mxu0  ;;  %v4306_v46 = vmax.f32 %v3100_v39, 0.0  ;;  %v3104_v53 = vadd.f32 %v3103_v44, %v8410_v43  ;;  %v3105_v47 = vpop.f32.mrb[151].mxu1 }
 0x209   :  { %v4305_v49 = vmax.f32 %v1789_v41, 0.0  ;;  %v1793_v48 = vadd.f32 %v1792_v45, %v8482_v60  ;;  %v4307_v50 = vmax.f32 %v3102_v42, 0.0  ;;  %v3106_v51 = vadd.f32 %v3105_v47, %v8486_v61 }
 0x20a   :  { %v5337_v54 = vadd.f32 %v5336_v29, %v4304_v14  ;;  %v4308_v55 = vmax.f32 %v1791_v52, 0.0  ;;  %7519 = vmatmul.mubr.msk.bf16.gmra.mrb[0].mxu0 %vm981_vm2, %v7960_v38  ;;  %7647 = vmatmul.mubr.msk.bf16.gmra.mrb[0].mxu1 %vm981_vm2, %v7960_v38  ;;  %v5411_v63 = vadd.f32 %v5410_v7, %v4306_v46  ;;  %v4310_v0 = vmax.f32 %v3104_v53, 0.0  ;;  %v7962_v53 = vld [vmem:[%s10829_s0 + $0x210] sm:$0xff]  }
 0x20b   :  { %v5374_v1 = vadd.f32 %v5373_v33, %v4305_v49  ;;  %v4309_v32 = vmax.f32 %v1793_v48, 0.0  ;;  %2064 = vmatprep.mubr.bf16.mxu0 %v8211_v6  ;;  %3377 = vmatprep.mubr.bf16.mxu1 %v8211_v6  ;;  %v5448_v2 = vadd.f32 %v5447_v34, %v4307_v50  ;;  %v4311_v35 = vmax.f32 %v3106_v51, 0.0 }
 0x20c   :  { %v5338_v3 = vadd.f32 %v5337_v54, %v4308_v55  ;;  %v5412_v4 = vadd.f32 %v5411_v63, %v4310_v0 }
 0x20d   :  { %v5375_v8 = vadd.f32 %v5374_v1, %v4309_v32  ;;  %v1796_v9 = vpop.f32.mrb[152].mxu0  ;;  %v5449_v10 = vadd.f32 %v5448_v2, %v4311_v35  ;;  %v3109_v11 = vpop.f32.mrb[152].mxu1 }
 0x20e   :  { %v1797_v12 = vadd.f32 %v1796_v9, %v8480_v59  ;;  %v1798_v56 = vpop.f32.mrb[153].mxu0  ;;  %v3110_v15 = vadd.f32 %v3109_v11, %v8410_v43  ;;  %v3111_v16 = vpop.f32.mrb[153].mxu1 }
 0x20f   :  { %v1799_v17 = vadd.f32 %v1798_v56, %v8482_v60  ;;  %v1800_v18 = vpop.f32.mrb[154].mxu0  ;;  %v3112_v19 = vadd.f32 %v3111_v16, %v8486_v61  ;;  %v3113_v20 = vpop.f32.mrb[154].mxu1 }
 0x210   :  { %v4312_v21 = vmax.f32 %v1797_v12, 0.0  ;;  %v1801_v22 = vadd.f32 %v1800_v18, %v8480_v59  ;;  %v1802_v23 = vpop.f32.mrb[155].mxu0  ;;  %v4314_v58 = vmax.f32 %v3110_v15, 0.0  ;;  %v3114_v24 = vadd.f32 %v3113_v20, %v8410_v43  ;;  %v3115_v62 = vpop.f32.mrb[155].mxu1 }
 0x211   :  { %v4313_v27 = vmax.f32 %v1799_v17, 0.0  ;;  %v1803_v29 = vadd.f32 %v1802_v23, %v8482_v60  ;;  %v4315_v7 = vmax.f32 %v3112_v19, 0.0  ;;  %v3116_v33 = vadd.f32 %v3115_v62, %v8486_v61 }
 0x212   :  { %v5339_v28 = vadd.f32 %v5338_v3, %v4312_v21  ;;  %v4316_v34 = vmax.f32 %v1801_v22, 0.0  ;;  %7520 = vmatmul.mubr.msk.bf16.gmra.mrb[4].mxu0 %vm981_vm2, %v7961_v57  ;;  %7648 = vmatmul.mubr.msk.bf16.gmra.mrb[4].mxu1 %vm981_vm2, %v7961_v57  ;;  %v5413_v36 = vadd.f32 %v5412_v4, %v4314_v58  ;;  %v4318_v26 = vmax.f32 %v3114_v24, 0.0  ;;  %v7963_v24 = vld [vmem:[%s10829_s0 + $0x218] sm:$0xff]  }
 0x213   :  { %v5376_v37 = vadd.f32 %v5375_v8, %v4313_v27  ;;  %v4317_v38 = vmax.f32 %v1803_v29, 0.0  ;;  %2074 = vmatprep.mubr.bf16.mxu0 %v8211_v6  ;;  %3387 = vmatprep.mubr.bf16.mxu1 %v8211_v6  ;;  %v5450_v39 = vadd.f32 %v5449_v10, %v4315_v7  ;;  %v4319_v40 = vmax.f32 %v3116_v33, 0.0 }
 0x214   :  { %v5340_v41 = vadd.f32 %v5339_v28, %v4316_v34  ;;  %v5414_v13 = vadd.f32 %v5413_v36, %v4318_v26 }
 0x215   :  { %v5377_v42 = vadd.f32 %v5376_v37, %v4317_v38  ;;  %v1806_v44 = vpop.f32.mrb[156].mxu0  ;;  %v5451_v14 = vadd.f32 %v5450_v39, %v4319_v40  ;;  %v3119_v52 = vpop.f32.mrb[156].mxu1 }
 0x216   :  { %v1807_v45 = vadd.f32 %v1806_v44, %v8480_v59  ;;  %v1808_v46 = vpop.f32.mrb[157].mxu0  ;;  %v3120_v47 = vadd.f32 %v3119_v52, %v8410_v43  ;;  %v3121_v49 = vpop.f32.mrb[157].mxu1 }
 0x217   :  { %v1809_v48 = vadd.f32 %v1808_v46, %v8482_v60  ;;  %v1810_v50 = vpop.f32.mrb[158].mxu0  ;;  %v3122_v51 = vadd.f32 %v3121_v49, %v8486_v61  ;;  %v3123_v54 = vpop.f32.mrb[158].mxu1 }
 0x218   :  { %v4320_v55 = vmax.f32 %v1807_v45, 0.0  ;;  %v1811_v63 = vadd.f32 %v1810_v50, %v8480_v59  ;;  %v1812_v0 = vpop.f32.mrb[159].mxu0  ;;  %v4322_v1 = vmax.f32 %v3120_v47, 0.0  ;;  %v3124_v32 = vadd.f32 %v3123_v54, %v8410_v43  ;;  %v3125_v2 = vpop.f32.mrb[159].mxu1 }
 0x219   :  { %v4321_v35 = vmax.f32 %v1809_v48, 0.0  ;;  %v1813_v3 = vadd.f32 %v1812_v0, %v8482_v60  ;;  %v4323_v4 = vmax.f32 %v3122_v51, 0.0  ;;  %v3126_v8 = vadd.f32 %v3125_v2, %v8486_v61 }
 0x21a   :  { %v5341_v9 = vadd.f32 %v5340_v41, %v4320_v55  ;;  %v4324_v10 = vmax.f32 %v1811_v63, 0.0  ;;  %7521 = vmatmul.mubr.msk.bf16.gmra.mrb[8].mxu0 %vm981_vm2, %v7962_v53  ;;  %7649 = vmatmul.mubr.msk.bf16.gmra.mrb[8].mxu1 %vm981_vm2, %v7962_v53  ;;  %v5415_v11 = vadd.f32 %v5414_v13, %v4322_v1  ;;  %v4326_v12 = vmax.f32 %v3124_v32, 0.0  ;;  %v7964_v32 = vld [vmem:[%s10829_s0 + $0x220] sm:$0xff]  }
 0x21b   :  { %v5378_v56 = vadd.f32 %v5377_v42, %v4321_v35  ;;  %v4325_v57 = vmax.f32 %v1813_v3, 0.0  ;;  %2084 = vmatprep.mubr.bf16.mxu0 %v8211_v6  ;;  %3397 = vmatprep.mubr.bf16.mxu1 %v8211_v6  ;;  %v5452_v15 = vadd.f32 %v5451_v14, %v4323_v4  ;;  %v4327_v16 = vmax.f32 %v3126_v8, 0.0 }
 0x21c   :  { %v5342_v17 = vadd.f32 %v5341_v9, %v4324_v10  ;;  %v5416_v18 = vadd.f32 %v5415_v11, %v4326_v12 }
 0x21d   :  { %v5379_v19 = vadd.f32 %v5378_v56, %v4325_v57  ;;  %v1816_v20 = vpop.f32.mrb[160].mxu0  ;;  %v5453_v21 = vadd.f32 %v5452_v15, %v4327_v16  ;;  %v3129_v22 = vpop.f32.mrb[160].mxu1 }
 0x21e   :  { %v1817_v23 = vadd.f32 %v1816_v20, %v8480_v59  ;;  %v1818_v58 = vpop.f32.mrb[161].mxu0  ;;  %v3130_v62 = vadd.f32 %v3129_v22, %v8410_v43  ;;  %v3131_v27 = vpop.f32.mrb[161].mxu1 }
 0x21f   :  { %v1819_v29 = vadd.f32 %v1818_v58, %v8482_v60  ;;  %v1820_v7 = vpop.f32.mrb[162].mxu0  ;;  %v3132_v33 = vadd.f32 %v3131_v27, %v8486_v61  ;;  %v3133_v28 = vpop.f32.mrb[162].mxu1 }
 0x220   :  { %v4328_v34 = vmax.f32 %v1817_v23, 0.0  ;;  %v1821_v36 = vadd.f32 %v1820_v7, %v8480_v59  ;;  %v1822_v26 = vpop.f32.mrb[163].mxu0  ;;  %v4330_v37 = vmax.f32 %v3130_v62, 0.0  ;;  %v3134_v38 = vadd.f32 %v3133_v28, %v8410_v43  ;;  %v3135_v39 = vpop.f32.mrb[163].mxu1 }
 0x221   :  { %v4329_v40 = vmax.f32 %v1819_v29, 0.0  ;;  %v1823_v41 = vadd.f32 %v1822_v26, %v8482_v60  ;;  %v4331_v13 = vmax.f32 %v3132_v33, 0.0  ;;  %v3136_v42 = vadd.f32 %v3135_v39, %v8486_v61 }
 0x222   :  { %v5343_v44 = vadd.f32 %v5342_v17, %v4328_v34  ;;  %v4332_v14 = vmax.f32 %v1821_v36, 0.0  ;;  %7522 = vmatmul.mubr.msk.bf16.gmra.mrb[12].mxu0 %vm981_vm2, %v7963_v24  ;;  %7650 = vmatmul.mubr.msk.bf16.gmra.mrb[12].mxu1 %vm981_vm2, %v7963_v24  ;;  %v5417_v52 = vadd.f32 %v5416_v18, %v4330_v37  ;;  %v4334_v45 = vmax.f32 %v3134_v38, 0.0  ;;  %v7965_v38 = vld [vmem:[%s10829_s0 + $0x228] sm:$0xff]  }
 0x223   :  { %v5380_v46 = vadd.f32 %v5379_v19, %v4329_v40  ;;  %v4333_v53 = vmax.f32 %v1823_v41, 0.0  ;;  %2094 = vmatprep.mubr.bf16.mxu0 %v8211_v6  ;;  %3407 = vmatprep.mubr.bf16.mxu1 %v8211_v6  ;;  %v5454_v47 = vadd.f32 %v5453_v21, %v4331_v13  ;;  %v4335_v49 = vmax.f32 %v3136_v42, 0.0 }
 0x224   :  { %v5344_v48 = vadd.f32 %v5343_v44, %v4332_v14  ;;  %v5418_v50 = vadd.f32 %v5417_v52, %v4334_v45 }
 0x225   :  { %v5381_v51 = vadd.f32 %v5380_v46, %v4333_v53  ;;  %v1826_v54 = vpop.f32.mrb[164].mxu0  ;;  %v5455_v55 = vadd.f32 %v5454_v47, %v4335_v49  ;;  %v3139_v63 = vpop.f32.mrb[164].mxu1 }
 0x226   :  { %v1827_v0 = vadd.f32 %v1826_v54, %v8480_v59  ;;  %v1828_v1 = vpop.f32.mrb[165].mxu0  ;;  %v3140_v2 = vadd.f32 %v3139_v63, %v8410_v43  ;;  %v3141_v35 = vpop.f32.mrb[165].mxu1 }
 0x227   :  { %v1829_v3 = vadd.f32 %v1828_v1, %v8482_v60  ;;  %v1830_v4 = vpop.f32.mrb[166].mxu0  ;;  %v3142_v8 = vadd.f32 %v3141_v35, %v8486_v61  ;;  %v3143_v9 = vpop.f32.mrb[166].mxu1 }
 0x228   :  { %v4336_v10 = vmax.f32 %v1827_v0, 0.0  ;;  %v1831_v11 = vadd.f32 %v1830_v4, %v8480_v59  ;;  %v1832_v12 = vpop.f32.mrb[167].mxu0  ;;  %v4338_v56 = vmax.f32 %v3140_v2, 0.0  ;;  %v3144_v57 = vadd.f32 %v3143_v9, %v8410_v43  ;;  %v3145_v15 = vpop.f32.mrb[167].mxu1  ;;  %v7972_v4 = vld [vmem:[%s10829_s0 + $0x230] sm:$0xff]  }
 0x229   :  { %v4337_v16 = vmax.f32 %v1829_v3, 0.0  ;;  %v1833_v17 = vadd.f32 %v1832_v12, %v8482_v60  ;;  %v4339_v18 = vmax.f32 %v3142_v8, 0.0  ;;  %v3146_v19 = vadd.f32 %v3145_v15, %v8486_v61 }
 0x22a   :  { %v5345_v20 = vadd.f32 %v5344_v48, %v4336_v10  ;;  %v4340_v21 = vmax.f32 %v1831_v11, 0.0  ;;  %7523 = vmatmul.mubr.msk.bf16.gmra.mrb[16].mxu0 %vm981_vm2, %v7964_v32  ;;  %7651 = vmatmul.mubr.msk.bf16.gmra.mrb[16].mxu1 %vm981_vm2, %v7964_v32  ;;  %v5419_v22 = vadd.f32 %v5418_v50, %v4338_v56  ;;  %v4342_v23 = vmax.f32 %v3144_v57, 0.0  ;;  %v7994_v56 = vld [vmem:[%s10832_s3 + $0xe0] ss:$16 sps:$4 sm:$0xff]   ;;  %v7996_v57 = vld [vmem:[%s10832_s3 + $0xe4] ss:$16 sps:$4 sm:$0xff]  }
 0x22b   :  { %v5382_v58 = vadd.f32 %v5381_v51, %v4337_v16  ;;  %v4341_v24 = vmax.f32 %v1833_v17, 0.0  ;;  %2104 = vmatprep.mubr.bf16.mxu0 %v8211_v6  ;;  %3417 = vmatprep.mubr.bf16.mxu1 %v8211_v6  ;;  %v5456_v62 = vadd.f32 %v5455_v55, %v4339_v18  ;;  %v4343_v27 = vmax.f32 %v3146_v19, 0.0  ;;  %v7997_v19 = vld [vmem:[%s10832_s3 + $0xe8] ss:$16 sps:$4 sm:$0xff]  }
 0x22c   :  { %v5346_v29 = vadd.f32 %v5345_v20, %v4340_v21  ;;  %v5420_v7 = vadd.f32 %v5419_v22, %v4342_v23  ;;  %v7999_v20 = vld [vmem:[%s10832_s3 + $0xec] ss:$16 sps:$4 sm:$0xff]   ;;  %7137 = vmatprep.subr.bf16.mxu0 %v7996_v57 }
 0x22d   :  { %v5383_v33 = vadd.f32 %v5382_v58, %v4341_v24  ;;  %v1836_v28 = vpop.f32.mrb[168].mxu0  ;;  %v5457_v34 = vadd.f32 %v5456_v62, %v4343_v27  ;;  %v3149_v36 = vpop.f32.mrb[168].mxu1  ;;  %7219 = vmatprep.subr.bf16.mxu1 %v7999_v20  ;;  %7138 = vmatpush1.bf16.msra.mxu0 %v7994_v56 }
 0x22e   :  { %v1837_v26 = vadd.f32 %v1836_v28, %v8480_v59  ;;  %v1838_v37 = vpop.f32.mrb[169].mxu0  ;;  %v3150_v39 = vadd.f32 %v3149_v36, %v8410_v43  ;;  %v3151_v40 = vpop.f32.mrb[169].mxu1  ;;  %7220 = vmatpush1.bf16.msra.mxu1 %v7997_v19 }
 0x22f   :  { %v1839_v41 = vadd.f32 %v1838_v37, %v8482_v60  ;;  %v1840_v13 = vpop.f32.mrb[170].mxu0  ;;  %v3152_v42 = vadd.f32 %v3151_v40, %v8486_v61  ;;  %v3153_v44 = vpop.f32.mrb[170].mxu1 }
 0x230   :  { %v4344_v14 = vmax.f32 %v1837_v26, 0.0  ;;  %v1841_v52 = vadd.f32 %v1840_v13, %v8480_v59  ;;  %v1842_v45 = vpop.f32.mrb[171].mxu0  ;;  %v4346_v46 = vmax.f32 %v3150_v39, 0.0  ;;  %v3154_v53 = vadd.f32 %v3153_v44, %v8410_v43  ;;  %v3155_v47 = vpop.f32.mrb[171].mxu1 }
 0x231   :  { %v4345_v49 = vmax.f32 %v1839_v41, 0.0  ;;  %v1843_v48 = vadd.f32 %v1842_v45, %v8482_v60  ;;  %v4347_v50 = vmax.f32 %v3152_v42, 0.0  ;;  %v3156_v51 = vadd.f32 %v3155_v47, %v8486_v61 }
 0x232   :  { %v5347_v54 = vadd.f32 %v5346_v29, %v4344_v14  ;;  %v4348_v55 = vmax.f32 %v1841_v52, 0.0  ;;  %7524 = vmatmul.mubr.msk.bf16.gmra.mrb[20].mxu0 %vm981_vm2, %v7965_v38  ;;  %7652 = vmatmul.mubr.msk.bf16.gmra.mrb[20].mxu1 %vm981_vm2, %v7965_v38  ;;  %v5421_v63 = vadd.f32 %v5420_v7, %v4346_v46  ;;  %v4350_v0 = vmax.f32 %v3154_v53, 0.0 }
 0x233   :  { %v5384_v1 = vadd.f32 %v5383_v33, %v4345_v49  ;;  %v4349_v32 = vmax.f32 %v1843_v48, 0.0  ;;  %2114 = vmatprep.mubr.bf16.mxu0 %v8211_v6  ;;  %3427 = vmatprep.mubr.bf16.mxu1 %v8211_v6  ;;  %v5458_v2 = vadd.f32 %v5457_v34, %v4347_v50  ;;  %v4351_v35 = vmax.f32 %v3156_v51, 0.0  ;;  %v7973_v50 = vld [vmem:[%s10829_s0 + $0x238] sm:$0xff]  }
 0x234   :  { %v5348_v3 = vadd.f32 %v5347_v54, %v4348_v55  ;;  %v5422_v8 = vadd.f32 %v5421_v63, %v4350_v0 }
 0x235   :  { %v5385_v9 = vadd.f32 %v5384_v1, %v4349_v32  ;;  %v1846_v10 = vpop.f32.mrb[172].mxu0  ;;  %v5459_v11 = vadd.f32 %v5458_v2, %v4351_v35  ;;  %v3159_v12 = vpop.f32.mrb[172].mxu1 }
 0x236   :  { %v1847_v15 = vadd.f32 %v1846_v10, %v8480_v59  ;;  %v1848_v16 = vpop.f32.mrb[173].mxu0  ;;  %v3160_v17 = vadd.f32 %v3159_v12, %v8410_v43  ;;  %v3161_v18 = vpop.f32.mrb[173].mxu1 }
 0x237   :  { %v1849_v21 = vadd.f32 %v1848_v16, %v8482_v60  ;;  %v1850_v22 = vpop.f32.mrb[174].mxu0  ;;  %v3162_v23 = vadd.f32 %v3161_v18, %v8486_v61  ;;  %v3163_v58 = vpop.f32.mrb[174].mxu1 }
 0x238   :  { %v4352_v24 = vmax.f32 %v1847_v15, 0.0  ;;  %v1851_v62 = vadd.f32 %v1850_v22, %v8480_v59  ;;  %v1852_v27 = vpop.f32.mrb[175].mxu0  ;;  %v4354_v29 = vmax.f32 %v3160_v17, 0.0  ;;  %v3164_v7 = vadd.f32 %v3163_v58, %v8410_v43  ;;  %v3165_v33 = vpop.f32.mrb[175].mxu1 }
 0x239   :  { %v4353_v28 = vmax.f32 %v1849_v21, 0.0  ;;  %v1853_v34 = vadd.f32 %v1852_v27, %v8482_v60  ;;  %v4355_v36 = vmax.f32 %v3162_v23, 0.0  ;;  %v3166_v26 = vadd.f32 %v3165_v33, %v8486_v61 }
 0x23a   :  { %v5349_v37 = vadd.f32 %v5348_v3, %v4352_v24  ;;  %v4356_v38 = vmax.f32 %v1851_v62, 0.0  ;;  %7525 = vmatmul.mubr.msk.bf16.gmra.mrb[24].mxu0 %vm981_vm2, %v7972_v4  ;;  %7653 = vmatmul.mubr.msk.bf16.gmra.mrb[24].mxu1 %vm981_vm2, %v7972_v4  ;;  %v5423_v39 = vadd.f32 %v5422_v8, %v4354_v29  ;;  %v4358_v40 = vmax.f32 %v3164_v7, 0.0  ;;  %v7974_v7 = vld [vmem:[%s10829_s0 + $0x240] sm:$0xff]  }
 0x23b   :  { %v5386_v41 = vadd.f32 %v5385_v9, %v4353_v28  ;;  %v4357_v13 = vmax.f32 %v1853_v34, 0.0  ;;  %2124 = vmatprep.mubr.bf16.mxu0 %v8211_v6  ;;  %3437 = vmatprep.mubr.bf16.mxu1 %v8211_v6  ;;  %v5460_v42 = vadd.f32 %v5459_v11, %v4355_v36  ;;  %v4359_v44 = vmax.f32 %v3166_v26, 0.0 }
 0x23c   :  { %v5350_v14 = vadd.f32 %v5349_v37, %v4356_v38  ;;  %v5424_v52 = vadd.f32 %v5423_v39, %v4358_v40 }
 0x23d   :  { %v5387_v45 = vadd.f32 %v5386_v41, %v4357_v13  ;;  %v1856_v46 = vpop.f32.mrb[176].mxu0  ;;  %v5461_v53 = vadd.f32 %v5460_v42, %v4359_v44  ;;  %v3169_v47 = vpop.f32.mrb[176].mxu1 }
 0x23e   :  { %v1857_v49 = vadd.f32 %v1856_v46, %v8480_v59  ;;  %v1858_v48 = vpop.f32.mrb[177].mxu0  ;;  %v3170_v51 = vadd.f32 %v3169_v47, %v8410_v43  ;;  %v3171_v54 = vpop.f32.mrb[177].mxu1 }
 0x23f   :  { %v1859_v55 = vadd.f32 %v1858_v48, %v8482_v60  ;;  %v1860_v63 = vpop.f32.mrb[178].mxu0  ;;  %v3172_v0 = vadd.f32 %v3171_v54, %v8486_v61  ;;  %v3173_v1 = vpop.f32.mrb[178].mxu1 }
 0x240   :  { %v4360_v32 = vmax.f32 %v1857_v49, 0.0  ;;  %v1861_v2 = vadd.f32 %v1860_v63, %v8480_v59  ;;  %v1862_v35 = vpop.f32.mrb[179].mxu0  ;;  %v4362_v3 = vmax.f32 %v3170_v51, 0.0  ;;  %v3174_v4 = vadd.f32 %v3173_v1, %v8410_v43  ;;  %v3175_v8 = vpop.f32.mrb[179].mxu1 }
 0x241   :  { %v4361_v9 = vmax.f32 %v1859_v55, 0.0  ;;  %v1863_v10 = vadd.f32 %v1862_v35, %v8482_v60  ;;  %v4363_v11 = vmax.f32 %v3172_v0, 0.0  ;;  %v3176_v12 = vadd.f32 %v3175_v8, %v8486_v61  ;;  %v7975_v8 = vld [vmem:[%s10829_s0 + $0x248] sm:$0xff]  }
 0x242   :  { %v5351_v56 = vadd.f32 %v5350_v14, %v4360_v32  ;;  %v4364_v57 = vmax.f32 %v1861_v2, 0.0  ;;  %7526 = vmatmul.mubr.msk.bf16.gmra.mrb[28].mxu0 %vm981_vm2, %v7973_v50  ;;  %7654 = vmatmul.mubr.msk.bf16.gmra.mrb[28].mxu1 %vm981_vm2, %v7973_v50  ;;  %v5425_v15 = vadd.f32 %v5424_v52, %v4362_v3  ;;  %v4366_v16 = vmax.f32 %v3174_v4, 0.0 }
 0x243   :  { %v5388_v17 = vadd.f32 %v5387_v45, %v4361_v9  ;;  %v4365_v18 = vmax.f32 %v1863_v10, 0.0  ;;  %2134 = vmatprep.mubr.bf16.mxu0 %v8211_v6  ;;  %3447 = vmatprep.mubr.bf16.mxu1 %v8211_v6  ;;  %v5462_v19 = vadd.f32 %v5461_v53, %v4363_v11  ;;  %v4367_v20 = vmax.f32 %v3176_v12, 0.0 }
 0x244   :  { %v5352_v21 = vadd.f32 %v5351_v56, %v4364_v57  ;;  %v5426_v22 = vadd.f32 %v5425_v15, %v4366_v16 }
 0x245   :  { %v5389_v23 = vadd.f32 %v5388_v17, %v4365_v18  ;;  %v1866_v58 = vpop.f32.mrb[180].mxu0  ;;  %v5463_v24 = vadd.f32 %v5462_v19, %v4367_v20  ;;  %v3179_v62 = vpop.f32.mrb[180].mxu1 }
 0x246   :  { %v1867_v27 = vadd.f32 %v1866_v58, %v8480_v59  ;;  %v1868_v29 = vpop.f32.mrb[181].mxu0  ;;  %v3180_v33 = vadd.f32 %v3179_v62, %v8410_v43  ;;  %v3181_v28 = vpop.f32.mrb[181].mxu1 }
 0x247   :  { %v1869_v34 = vadd.f32 %v1868_v29, %v8482_v60  ;;  %v1870_v36 = vpop.f32.mrb[182].mxu0  ;;  %v3182_v26 = vadd.f32 %v3181_v28, %v8486_v61  ;;  %v3183_v37 = vpop.f32.mrb[182].mxu1 }
 0x248   :  { %v4368_v38 = vmax.f32 %v1867_v27, 0.0  ;;  %v1871_v39 = vadd.f32 %v1870_v36, %v8480_v59  ;;  %v1872_v40 = vpop.f32.mrb[183].mxu0  ;;  %v4370_v41 = vmax.f32 %v3180_v33, 0.0  ;;  %v3184_v13 = vadd.f32 %v3183_v37, %v8410_v43  ;;  %v3185_v42 = vpop.f32.mrb[183].mxu1 }
 0x249   :  { %v4369_v44 = vmax.f32 %v1869_v34, 0.0  ;;  %v1873_v14 = vadd.f32 %v1872_v40, %v8482_v60  ;;  %v4371_v52 = vmax.f32 %v3182_v26, 0.0  ;;  %v3186_v45 = vadd.f32 %v3185_v42, %v8486_v61 }
 0x24a   :  { %v5353_v46 = vadd.f32 %v5352_v21, %v4368_v38  ;;  %v4372_v53 = vmax.f32 %v1871_v39, 0.0  ;;  %7527 = vmatmul.mubr.msk.bf16.gmra.mrb[32].mxu0 %vm981_vm2, %v7974_v7  ;;  %7655 = vmatmul.mubr.msk.bf16.gmra.mrb[32].mxu1 %vm981_vm2, %v7974_v7  ;;  %v5427_v47 = vadd.f32 %v5426_v22, %v4370_v41  ;;  %v4374_v49 = vmax.f32 %v3184_v13, 0.0 }
 0x24b   :  { %v5390_v48 = vadd.f32 %v5389_v23, %v4369_v44  ;;  %v4373_v50 = vmax.f32 %v1873_v14, 0.0  ;;  %v5464_v51 = vadd.f32 %v5463_v24, %v4371_v52  ;;  %v4375_v54 = vmax.f32 %v3186_v45, 0.0  ;;  %2144 = vmatprep.mubr.bf16.mxu0 %v8211_v6  ;;  %3457 = vmatprep.mubr.bf16.mxu1 %v8211_v6  ;;  %v7976_v44 = vld [vmem:[%s10829_s0 + $0x250] sm:$0xff]  }
 0x24c   :  { %v5354_v55 = vadd.f32 %v5353_v46, %v4372_v53  ;;  %v5428_v63 = vadd.f32 %v5427_v47, %v4374_v49 }
 0x24d   :  { %v5391_v0 = vadd.f32 %v5390_v48, %v4373_v50  ;;  %v1876_v1 = vpop.f32.mrb[184].mxu0  ;;  %v5465_v32 = vadd.f32 %v5464_v51, %v4375_v54  ;;  %v3189_v2 = vpop.f32.mrb[184].mxu1 }
 0x24e   :  { %v1877_v35 = vadd.f32 %v1876_v1, %v8480_v59  ;;  %v1878_v3 = vpop.f32.mrb[185].mxu0  ;;  %v3190_v4 = vadd.f32 %v3189_v2, %v8410_v43  ;;  %v3191_v9 = vpop.f32.mrb[185].mxu1 }
 0x24f   :  { %v1879_v10 = vadd.f32 %v1878_v3, %v8482_v60  ;;  %v1880_v11 = vpop.f32.mrb[186].mxu0  ;;  %v3192_v12 = vadd.f32 %v3191_v9, %v8486_v61  ;;  %v3193_v56 = vpop.f32.mrb[186].mxu1 }
 0x250   :  { %v4376_v57 = vmax.f32 %v1877_v35, 0.0  ;;  %v1881_v15 = vadd.f32 %v1880_v11, %v8480_v59  ;;  %v1882_v16 = vpop.f32.mrb[187].mxu0  ;;  %v4378_v17 = vmax.f32 %v3190_v4, 0.0  ;;  %v3194_v18 = vadd.f32 %v3193_v56, %v8410_v43  ;;  %v3195_v19 = vpop.f32.mrb[187].mxu1 }
 0x251   :  { %v4377_v20 = vmax.f32 %v1879_v10, 0.0  ;;  %v1883_v21 = vadd.f32 %v1882_v16, %v8482_v60  ;;  %v4379_v22 = vmax.f32 %v3192_v12, 0.0  ;;  %v3196_v23 = vadd.f32 %v3195_v19, %v8486_v61 }
 0x252   :  { %v5355_v58 = vadd.f32 %v5354_v55, %v4376_v57  ;;  %v4380_v24 = vmax.f32 %v1881_v15, 0.0  ;;  %v5429_v62 = vadd.f32 %v5428_v63, %v4378_v17  ;;  %7528 = vmatmul.mubr.msk.bf16.gmra.mrb[36].mxu0 %vm981_vm2, %v7975_v8  ;;  %7656 = vmatmul.mubr.msk.bf16.gmra.mrb[36].mxu1 %vm981_vm2, %v7975_v8  ;;  %v4382_v27 = vmax.f32 %v3194_v18, 0.0 }
 0x253   :  { %v5392_v29 = vadd.f32 %v5391_v0, %v4377_v20  ;;  %v4381_v7 = vmax.f32 %v1883_v21, 0.0  ;;  %v5466_v33 = vadd.f32 %v5465_v32, %v4379_v22  ;;  %v4383_v28 = vmax.f32 %v3196_v23, 0.0  ;;  %2154 = vmatprep.mubr.bf16.mxu0 %v8211_v6  ;;  %3467 = vmatprep.mubr.bf16.mxu1 %v8211_v6  ;;  %v7977_v20 = vld [vmem:[%s10829_s0 + $0x258] sm:$0xff]  }
 0x254   :  { %v5356_v34 = vadd.f32 %v5355_v58, %v4380_v24  ;;  %v5430_v36 = vadd.f32 %v5429_v62, %v4382_v27 }
 0x255   :  { %v5393_v26 = vadd.f32 %v5392_v29, %v4381_v7  ;;  %v5467_v37 = vadd.f32 %v5466_v33, %v4383_v28  ;;  %v1886_v38 = vpop.f32.mrb[188].mxu0  ;;  %v3199_v39 = vpop.f32.mrb[188].mxu1 }
 0x256   :  { %v1887_v40 = vadd.f32 %v1886_v38, %v8480_v59  ;;  %v3200_v41 = vadd.f32 %v3199_v39, %v8410_v43  ;;  %v1888_v13 = vpop.f32.mrb[189].mxu0  ;;  %v3201_v42 = vpop.f32.mrb[189].mxu1 }
 0x257   :  { %v1889_v14 = vadd.f32 %v1888_v13, %v8482_v60  ;;  %v3202_v52 = vadd.f32 %v3201_v42, %v8486_v61  ;;  %v1890_v45 = vpop.f32.mrb[190].mxu0  ;;  %v3203_v46 = vpop.f32.mrb[190].mxu1 }
 0x258   :  { %v4384_v53 = vmax.f32 %v1887_v40, 0.0  ;;  %v4386_v47 = vmax.f32 %v3200_v41, 0.0  ;;  %v1891_v49 = vadd.f32 %v1890_v45, %v8480_v59  ;;  %v3204_v48 = vadd.f32 %v3203_v46, %v8410_v43  ;;  %v1892_v50 = vpop.f32.mrb[191].mxu0  ;;  %v3205_v51 = vpop.f32.mrb[191].mxu1 }
 0x259   :  { %v4385_v54 = vmax.f32 %v1889_v14, 0.0  ;;  %v4387_v55 = vmax.f32 %v3202_v52, 0.0  ;;  %v1893_v63 = vadd.f32 %v1892_v50, %v8482_v60  ;;  %v3206_v0 = vadd.f32 %v3205_v51, %v8486_v61 }
 0x25a   :  { %v5357_v1 = vadd.f32 %v5356_v34, %v4384_v53  ;;  %v5431_v32 = vadd.f32 %v5430_v36, %v4386_v47  ;;  %v4388_v2 = vmax.f32 %v1891_v49, 0.0  ;;  %v4390_v35 = vmax.f32 %v3204_v48, 0.0  ;;  %7529 = vmatmul.mubr.msk.bf16.gmra.mrb[40].mxu0 %vm981_vm2, %v7976_v44  ;;  %7657 = vmatmul.mubr.msk.bf16.gmra.mrb[40].mxu1 %vm981_vm2, %v7976_v44 }
 0x25b   :  { %v5394_v3 = vadd.f32 %v5393_v26, %v4385_v54  ;;  %v5468_v4 = vadd.f32 %v5467_v37, %v4387_v55  ;;  %v4389_v8 = vmax.f32 %v1893_v63, 0.0  ;;  %v4391_v9 = vmax.f32 %v3206_v0, 0.0  ;;  %2164 = vmatprep.mubr.bf16.mxu0 %v8211_v6  ;;  %3477 = vmatprep.mubr.bf16.mxu1 %v8211_v6 }
 0x25c   :  { %v5358_v10 = vadd.f32 %v5357_v1, %v4388_v2  ;;  %v5432_v11 = vadd.f32 %v5431_v32, %v4390_v35 }
 0x25d   :  { %v5395_v12 = vadd.f32 %v5394_v3, %v4389_v8  ;;  %v5469_v56 = vadd.f32 %v5468_v4, %v4391_v9  ;;  %v1896_v57 = vpop.f32.mrb[192].mxu0  ;;  %v3209_v15 = vpop.f32.mrb[192].mxu1  ;;  %v7978_v3 = vld [vmem:[%s10829_s0 + $0x260] sm:$0xff]  }
 0x25e   :  { %v5359_v16 = vrot.slane %v5358_v10, 4  ;;  %v5433_v17 = vrot.slane %v5432_v11, 4  ;;  %v1897_v18 = vadd.f32 %v1896_v57, %v8480_v59  ;;  %v1898_v19 = vpop.f32.mrb[193].mxu0  ;;  %v9379_v21 = vadd.f32 %v3209_v15, %v8410_v43  ;;  %v3211_v22 = vpop.f32.mrb[193].mxu1 }
 0x25f   :  { %v5396_v23 = vrot.slane %v5395_v12, 4  ;;  %v5470_v58 = vrot.slane %v5469_v56, 4  ;;  %v1899_v24 = vadd.f32 %v1898_v19, %v8482_v60  ;;  %v1900_v62 = vpop.f32.mrb[194].mxu0  ;;  %v9383_v27 = vadd.f32 %v3211_v22, %v8486_v61  ;;  %v3213_v29 = vpop.f32.mrb[194].mxu1 }
 0x260   :  { %v5360_v7 = vadd.f32 %v5359_v16, %v5358_v10  ;;  %v5434_v33 = vadd.f32 %v5433_v17, %v5432_v11  ;;  %v4392_v28 = vmax.f32 %v1897_v18, 0.0  ;;  %v1901_v34 = vadd.f32 %v1900_v62, %v8480_v59  ;;  %v1902_v36 = vpop.f32.mrb[195].mxu0  ;;  %v3215_v26 = vpop.f32.mrb[195].mxu1 }
 0x261   :  { %v5397_v37 = vadd.f32 %v5396_v23, %v5395_v12  ;;  %v5471_v38 = vadd.f32 %v5470_v58, %v5469_v56  ;;  %v4393_v39 = vmax.f32 %v1899_v24, 0.0  ;;  %v1903_v40 = vadd.f32 %v1902_v36, %v8482_v60 }
 0x262   :  { %v5361_v41 = vrot.slane %v5360_v7, 2  ;;  %v5435_v13 = vrot.slane %v5434_v33, 2  ;;  %v4396_v42 = vmax.f32 %v1901_v34, 0.0  ;;  %7530 = vmatmul.mubr.msk.bf16.gmra.mrb[44].mxu0 %vm981_vm2, %v7977_v20  ;;  %7658 = vmatmul.mubr.msk.bf16.gmra.mrb[44].mxu1 %vm981_vm2, %v7977_v20  ;;  %v4394_v44 = vmax.f32 %v9379_v21, 0.0 }
 0x263   :  { %v5398_v14 = vrot.slane %v5397_v37, 2  ;;  %v5472_v52 = vrot.slane %v5471_v38, 2  ;;  %v4397_v45 = vmax.f32 %v1903_v40, 0.0  ;;  %2174 = vmatprep.mubr.bf16.mxu0 %v8211_v6  ;;  %3487 = vmatprep.mubr.bf16.mxu1 %v8211_v6  ;;  %v4395_v46 = vmax.f32 %v9383_v27, 0.0 }
 0x264   :  { %v5362_v53 = vadd.f32 %v5361_v41, %v5360_v7  ;;  %v5436_v47 = vadd.f32 %v5435_v13, %v5434_v33  ;;  %v5476_v49 = vadd.f32 %v4396_v42, %v4392_v28  ;;  %v3214_v48 = vadd.f32 %v3213_v29, %v8410_v43 }
 0x265   :  { %v5399_v50 = vadd.f32 %v5398_v14, %v5397_v37  ;;  %v5473_v51 = vadd.f32 %v5472_v52, %v5471_v38  ;;  %v5513_v54 = vadd.f32 %v4397_v45, %v4393_v39  ;;  %v1906_v55 = vpop.f32.mrb[196].mxu0  ;;  %v3216_v63 = vadd.f32 %v3215_v26, %v8486_v61  ;;  %v3219_v0 = vpop.f32.mrb[196].mxu1 }
 0x266   :  { %v5363_v1 = vrot.slane %v5362_v53, 1  ;;  %v5437_v32 = vrot.slane %v5436_v47, 1  ;;  %v1907_v2 = vadd.f32 %v1906_v55, %v8480_v59  ;;  %v1908_v35 = vpop.f32.mrb[197].mxu0  ;;  %v4398_v4 = vmax.f32 %v3214_v48, 0.0  ;;  %v3221_v8 = vpop.f32.mrb[197].mxu1 }
 0x267   :  { %v5400_v9 = vrot.slane %v5399_v50, 1  ;;  %v5474_v10 = vrot.slane %v5473_v51, 1  ;;  %v1909_v11 = vadd.f32 %v1908_v35, %v8482_v60  ;;  %v1910_v12 = vpop.f32.mrb[198].mxu0  ;;  %v4399_v56 = vmax.f32 %v3216_v63, 0.0  ;;  %v3223_v57 = vpop.f32.mrb[198].mxu1 }
 0x268   :  { %v5364_v15 = vadd.f32 %v5363_v1, %v5362_v53  ;;  %v5438_v16 = vadd.f32 %v5437_v32, %v5436_v47  ;;  %v4400_v17 = vmax.f32 %v1907_v2, 0.0  ;;  %v1911_v18 = vadd.f32 %v1910_v12, %v8480_v59  ;;  %v1912_v19 = vpop.f32.mrb[199].mxu0  ;;  %v3225_v20 = vpop.f32.mrb[199].mxu1 }
 0x269   :  { %v5401_v21 = vadd.f32 %v5400_v9, %v5399_v50  ;;  %v5475_v22 = vadd.f32 %v5474_v10, %v5473_v51  ;;  %v4401_v23 = vmax.f32 %v1909_v11, 0.0  ;;  %v1913_v58 = vadd.f32 %v1912_v19, %v8482_v60 }
 0x26a   :  { %v6224_v24 = vpack.c.bf16 %v5364_v15, %v5364_v15  ;;  %v6226_v62 = vpack.c.bf16 %v5438_v16, %v5438_v16  ;;  %v5477_v27 = vadd.f32 %v5476_v49, %v4400_v17  ;;  %v4404_v29 = vmax.f32 %v1911_v18, 0.0  ;;  %7531 = vmatmul.mubr.msk.bf16.gmra.mrb[48].mxu0 %vm981_vm2, %v7978_v3  ;;  %7659 = vmatmul.mubr.msk.bf16.gmra.mrb[48].mxu1 %vm981_vm2, %v7978_v3 }
 0x26b   :  { %v6225_v7 = vpack.c.bf16 %v5401_v21, %v5401_v21  ;;  %v6227_v33 = vpack.c.bf16 %v5475_v22, %v5475_v22  ;;  %v5514_v28 = vadd.f32 %v5513_v54, %v4401_v23  ;;  %v4405_v34 = vmax.f32 %v1913_v58, 0.0  ;;  %2184 = vmatprep.mubr.bf16.mxu0 %v8211_v6  ;;  %3497 = vmatprep.mubr.bf16.mxu1 %v8211_v6 }
 0x26c   :  { %v6416_v36 = vunpack.c.l.b16 %v6224_v24  ;;  %v6418_v26 = vunpack.c.l.b16 %v6226_v62  ;;  %v5478_v37 = vadd.f32 %v5477_v27, %v4404_v29  ;;  %v5550_v38 = vadd.f32 %v4398_v4, %v4394_v44  ;;  %v7979_v44 = vld [vmem:[%s10829_s0 + $0x268] sm:$0xff]   ;;  %v8008_v62 = vld [vmem:[%s10832_s3 + $0x100] ss:$16 sps:$4 sm:$0xff]   ;;  %v8010_v27 = vld [vmem:[%s10832_s3 + $0x104] ss:$16 sps:$4 sm:$0xff]  }
 0x26d   :  { %v6417_v39 = vunpack.c.l.b16 %v6225_v7  ;;  %v9406_v40 = vunpack.c.l.b16 %v6227_v33  ;;  %v5515_v41 = vadd.f32 %v5514_v28, %v4405_v34  ;;  %v1916_v13 = vpop.f32.mrb[200].mxu0  ;;  %v5587_v42 = vadd.f32 %v4399_v56, %v4395_v46  ;;  %v3229_v14 = vpop.f32.mrb[200].mxu1  ;;  %v7986_v28 = vld [vmem:[%s10829_s0 + $0x270] sm:$0xff]   ;;  %7139 = vmatprep.subr.bf16.mxu0 %v8010_v27 }
 0x26e   :  { %v9410_v52 = vsel %vm6442_vm4, %v6416_v36, %v9122_v30  ;;  %v9414_v45 = vsel %vm6442_vm4, %v6418_v26, %v9126_v31  ;;  %v1917_v53 = vadd.f32 %v1916_v13, %v8480_v59  ;;  %v1918_v47 = vpop.f32.mrb[201].mxu0  ;;  %v3220_v49 = vadd.f32 %v3219_v0, %v8410_v43  ;;  %v3231_v48 = vpop.f32.mrb[201].mxu1  ;;  %7140 = vmatpush1.bf16.msra.mxu0 %v8008_v62 }
 0x26f   :  { %v1919_v46 = vadd.f32 %v1918_v47, %v8482_v60  ;;  %v1920_v50 = vpop.f32.mrb[202].mxu0  ;;  %v3222_v30 = vadd.f32 %v3221_v8, %v8486_v61  ;;  %v3224_v51 = vadd.f32 %v3223_v57, %v8410_v43  ;;  %v3226_v31 = vadd.f32 %v3225_v20, %v8486_v61  ;;  %v3233_v54 = vpop.f32.mrb[202].mxu1 }
 0x270   :  { %v4408_v55 = vmax.f32 %v1917_v53, 0.0  ;;  %v1921_v63 = vadd.f32 %v1920_v50, %v8480_v59  ;;  %v1922_v1 = vpop.f32.mrb[203].mxu0  ;;  %v4402_v32 = vmax.f32 %v3220_v49, 0.0  ;;  %v3230_v2 = vadd.f32 %v3229_v14, %v8410_v43  ;;  %v3235_v35 = vpop.f32.mrb[203].mxu1  ;;  %v8013_v14 = vld [vmem:[%s10832_s3 + $0x10c] ss:$16 sps:$4 sm:$0xff]  }
 0x271   :  { %v4409_v0 = vmax.f32 %v1919_v46, 0.0  ;;  %v1923_v3 = vadd.f32 %v1922_v1, %v8482_v60  ;;  %v4403_v4 = vmax.f32 %v3222_v30, 0.0  ;;  %v4406_v9 = vmax.f32 %v3224_v51, 0.0  ;;  %v8011_v50 = vld [vmem:[%s10832_s3 + $0x108] ss:$16 sps:$4 sm:$0xff]   ;;  %7221 = vmatprep.subr.bf16.mxu1 %v8013_v14 }
 0x272   :  { %v5479_v10 = vadd.f32 %v5478_v37, %v4408_v55  ;;  %v4412_v8 = vmax.f32 %v1921_v63, 0.0  ;;  %7532 = vmatmul.mubr.msk.bf16.gmra.mrb[52].mxu0 %vm981_vm2, %v7979_v44  ;;  %7660 = vmatmul.mubr.msk.bf16.gmra.mrb[52].mxu1 %vm981_vm2, %v7979_v44  ;;  %v5551_v11 = vadd.f32 %v5550_v38, %v4402_v32  ;;  %v4407_v12 = vmax.f32 %v3226_v31, 0.0 }
 0x273   :  { %v5516_v56 = vadd.f32 %v5515_v41, %v4409_v0  ;;  %v4413_v57 = vmax.f32 %v1923_v3, 0.0  ;;  %2194 = vmatprep.mubr.bf16.mxu0 %v8211_v6  ;;  %3507 = vmatprep.mubr.bf16.mxu1 %v8211_v6  ;;  %v5588_v15 = vadd.f32 %v5587_v42, %v4403_v4  ;;  %v4410_v16 = vmax.f32 %v3230_v2, 0.0 }
 0x274   :  { %v5480_v17 = vadd.f32 %v5479_v10, %v4412_v8  ;;  %v5552_v18 = vadd.f32 %v5551_v11, %v4406_v9  ;;  %v3232_v19 = vadd.f32 %v3231_v48, %v8486_v61  ;;  %v3234_v20 = vadd.f32 %v3233_v54, %v8410_v43  ;;  %7222 = vmatpush1.bf16.msra.mxu1 %v8011_v50 }
 0x275   :  { %v5517_v21 = vadd.f32 %v5516_v56, %v4413_v57  ;;  %v1926_v22 = vpop.f32.mrb[204].mxu0  ;;  %v5589_v23 = vadd.f32 %v5588_v15, %v4407_v12  ;;  %v3236_v58 = vadd.f32 %v3235_v35, %v8486_v61  ;;  %v3239_v24 = vpop.f32.mrb[204].mxu1  ;;  %v9443_v29 = vsel %vm6442_vm4, %v6417_v39, %v9135_v5 }
 0x276   :  { %v1927_v7 = vadd.f32 %v1926_v22, %v8480_v59  ;;  %v1928_v33 = vpop.f32.mrb[205].mxu0  ;;  %v5553_v34 = vadd.f32 %v5552_v18, %v4410_v16  ;;  %v4411_v36 = vmax.f32 %v3232_v19, 0.0  ;;  %v4414_v26 = vmax.f32 %v3234_v20, 0.0  ;;  %v3241_v37 = vpop.f32.mrb[205].mxu1 }
 0x277   :  { %v1929_v38 = vadd.f32 %v1928_v33, %v8482_v60  ;;  %v1930_v41 = vpop.f32.mrb[206].mxu0  ;;  %v4415_v13 = vmax.f32 %v3236_v58, 0.0  ;;  %v3240_v42 = vadd.f32 %v3239_v24, %v8410_v43  ;;  %v3242_v5 = vadd.f32 %v3241_v37, %v8486_v61  ;;  %v3243_v39 = vpop.f32.mrb[206].mxu1 }
 0x278   :  { %v4416_v53 = vmax.f32 %v1927_v7, 0.0  ;;  %v1931_v47 = vadd.f32 %v1930_v41, %v8480_v59  ;;  %v1932_v44 = vpop.f32.mrb[207].mxu0  ;;  %v5590_v49 = vadd.f32 %v5589_v23, %v4411_v36  ;;  %v5554_v48 = vadd.f32 %v5553_v34, %v4414_v26  ;;  %v3245_v46 = vpop.f32.mrb[207].mxu1 }
 0x279   :  { %v4417_v30 = vmax.f32 %v1929_v38, 0.0  ;;  %v1933_v51 = vadd.f32 %v1932_v44, %v8482_v60  ;;  %v4418_v31 = vmax.f32 %v3240_v42, 0.0  ;;  %v4419_v54 = vmax.f32 %v3242_v5, 0.0 }
 0x27a   :  { %v5481_v55 = vadd.f32 %v5480_v17, %v4416_v53  ;;  %v4420_v63 = vmax.f32 %v1931_v47, 0.0  ;;  %7533 = vmatmul.mubr.msk.bf16.gmra.mrb[56].mxu0 %vm981_vm2, %v7986_v28  ;;  %7661 = vmatmul.mubr.msk.bf16.gmra.mrb[56].mxu1 %vm981_vm2, %v7986_v28  ;;  %v5591_v1 = vadd.f32 %v5590_v49, %v4415_v13  ;;  %v3244_v32 = vadd.f32 %v3243_v39, %v8410_v43  ;;  %v7987_v17 = vld [vmem:[%s10829_s0 + $0x278] sm:$0xff]  }
 0x27b   :  { %v5518_v2 = vadd.f32 %v5517_v21, %v4417_v30  ;;  %v4421_v35 = vmax.f32 %v1933_v51, 0.0  ;;  %2204 = vmatprep.mubr.bf16.mxu0 %v8211_v6  ;;  %3517 = vmatprep.mubr.bf16.mxu1 %v8211_v6  ;;  %v5555_v0 = vadd.f32 %v5554_v48, %v4418_v31  ;;  %v3246_v3 = vadd.f32 %v3245_v46, %v8486_v61  ;;  %v7988_v51 = vld [vmem:[%s10829_s0 + $0x280] sm:$0xff]  }
 0x27c   :  { %v5482_v4 = vadd.f32 %v5481_v55, %v4420_v63  ;;  %v5592_v9 = vadd.f32 %v5591_v1, %v4419_v54  ;;  %v4422_v10 = vmax.f32 %v3244_v32, 0.0  ;;  %v9469_v57 = vsel %vm6442_vm4, %v9406_v40, %v9139_v25 }
 0x27d   :  { %v5519_v8 = vadd.f32 %v5518_v2, %v4421_v35  ;;  %v1936_v11 = vpop.f32.mrb[208].mxu0  ;;  %v4423_v12 = vmax.f32 %v3246_v3, 0.0  ;;  %v3249_v56 = vpop.f32.mrb[208].mxu1 }
 0x27e   :  { %v1937_v15 = vadd.f32 %v1936_v11, %v8480_v59  ;;  %v1938_v16 = vpop.f32.mrb[209].mxu0  ;;  %v5556_v18 = vadd.f32 %v5555_v0, %v4422_v10  ;;  %v3250_v19 = vadd.f32 %v3249_v56, %v8410_v43  ;;  %v3251_v20 = vpop.f32.mrb[209].mxu1 }
 0x27f   :  { %v1939_v21 = vadd.f32 %v1938_v16, %v8482_v60  ;;  %v1940_v22 = vpop.f32.mrb[210].mxu0  ;;  %v5593_v23 = vadd.f32 %v5592_v9, %v4423_v12  ;;  %v3252_v58 = vadd.f32 %v3251_v20, %v8486_v61  ;;  %v3253_v24 = vpop.f32.mrb[210].mxu1 }
 0x280   :  { %v4424_v25 = vmax.f32 %v1937_v15, 0.0  ;;  %v1941_v40 = vadd.f32 %v1940_v22, %v8480_v59  ;;  %v1942_v62 = vpop.f32.mrb[211].mxu0  ;;  %v4426_v27 = vmax.f32 %v3250_v19, 0.0  ;;  %v3254_v7 = vadd.f32 %v3253_v24, %v8410_v43  ;;  %v3255_v33 = vpop.f32.mrb[211].mxu1 }
 0x281   :  { %v4425_v28 = vmax.f32 %v1939_v21, 0.0  ;;  %v1943_v34 = vadd.f32 %v1942_v62, %v8482_v60  ;;  %v4427_v36 = vmax.f32 %v3252_v58, 0.0  ;;  %v3256_v26 = vadd.f32 %v3255_v33, %v8486_v61 }
 0x282   :  { %v5483_v37 = vadd.f32 %v5482_v4, %v4424_v25  ;;  %v4428_v38 = vmax.f32 %v1941_v40, 0.0  ;;  %7534 = vmatmul.mubr.msk.bf16.gmra.mrb[60].mxu0 %vm981_vm2, %v7987_v17  ;;  %7662 = vmatmul.mubr.msk.bf16.gmra.mrb[60].mxu1 %vm981_vm2, %v7987_v17  ;;  %v5557_v41 = vadd.f32 %v5556_v18, %v4426_v27  ;;  %v4430_v13 = vmax.f32 %v3254_v7, 0.0  ;;  %v7989_v7 = vld [vmem:[%s10829_s0 + $0x288] sm:$0xff]  }
 0x283   :  { %v5520_v42 = vadd.f32 %v5519_v8, %v4425_v28  ;;  %v4429_v5 = vmax.f32 %v1943_v34, 0.0  ;;  %2214 = vmatprep.mubr.bf16.mxu0 %v8211_v6  ;;  %3527 = vmatprep.mubr.bf16.mxu1 %v8211_v6  ;;  %v5594_v39 = vadd.f32 %v5593_v23, %v4427_v36  ;;  %v4431_v14 = vmax.f32 %v3256_v26, 0.0 }
 0x284   :  { %v5484_v53 = vadd.f32 %v5483_v37, %v4428_v38  ;;  %v5558_v47 = vadd.f32 %v5557_v41, %v4430_v13 }
 0x285   :  { %v5521_v44 = vadd.f32 %v5520_v42, %v4429_v5  ;;  %v1946_v49 = vpop.f32.mrb[212].mxu0  ;;  %v5595_v48 = vadd.f32 %v5594_v39, %v4431_v14  ;;  %v3259_v46 = vpop.f32.mrb[212].mxu1 }
 0x286   :  { %v1947_v50 = vadd.f32 %v1946_v49, %v8480_v59  ;;  %v1948_v30 = vpop.f32.mrb[213].mxu0  ;;  %v3260_v31 = vadd.f32 %v3259_v46, %v8410_v43  ;;  %v3261_v54 = vpop.f32.mrb[213].mxu1 }
 0x287   :  { %v1949_v55 = vadd.f32 %v1948_v30, %v8482_v60  ;;  %v1950_v63 = vpop.f32.mrb[214].mxu0  ;;  %v3262_v1 = vadd.f32 %v3261_v54, %v8486_v61  ;;  %v3263_v32 = vpop.f32.mrb[214].mxu1 }
 0x288   :  { %v4432_v2 = vmax.f32 %v1947_v50, 0.0  ;;  %v1951_v35 = vadd.f32 %v1950_v63, %v8480_v59  ;;  %v1952_v0 = vpop.f32.mrb[215].mxu0  ;;  %v4434_v3 = vmax.f32 %v3260_v31, 0.0  ;;  %v3264_v4 = vadd.f32 %v3263_v32, %v8410_v43  ;;  %v3265_v9 = vpop.f32.mrb[215].mxu1 }
 0x289   :  { %v4433_v10 = vmax.f32 %v1949_v55, 0.0  ;;  %v1953_v8 = vadd.f32 %v1952_v0, %v8482_v60  ;;  %v4435_v11 = vmax.f32 %v3262_v1, 0.0  ;;  %v3266_v12 = vadd.f32 %v3265_v9, %v8486_v61 }
 0x28a   :  { %v5485_v56 = vadd.f32 %v5484_v53, %v4432_v2  ;;  %v4436_v15 = vmax.f32 %v1951_v35, 0.0  ;;  %7535 = vmatmul.mubr.msk.bf16.gmra.mrb[64].mxu0 %vm981_vm2, %v7988_v51  ;;  %7663 = vmatmul.mubr.msk.bf16.gmra.mrb[64].mxu1 %vm981_vm2, %v7988_v51  ;;  %v5559_v16 = vadd.f32 %v5558_v47, %v4434_v3  ;;  %v4438_v17 = vmax.f32 %v3264_v4, 0.0  ;;  %v7990_v4 = vld [vmem:[%s10829_s0 + $0x290] sm:$0xff]  }
 0x28b   :  { %v5522_v18 = vadd.f32 %v5521_v44, %v4433_v10  ;;  %v4437_v19 = vmax.f32 %v1953_v8, 0.0  ;;  %2224 = vmatprep.mubr.bf16.mxu0 %v8211_v6  ;;  %3537 = vmatprep.mubr.bf16.mxu1 %v8211_v6  ;;  %v5596_v20 = vadd.f32 %v5595_v48, %v4435_v11  ;;  %v4439_v21 = vmax.f32 %v3266_v12, 0.0 }
 0x28c   :  { %v5486_v22 = vadd.f32 %v5485_v56, %v4436_v15  ;;  %v5560_v23 = vadd.f32 %v5559_v16, %v4438_v17 }
 0x28d   :  { %v5523_v58 = vadd.f32 %v5522_v18, %v4437_v19  ;;  %v1956_v24 = vpop.f32.mrb[216].mxu0  ;;  %v5597_v25 = vadd.f32 %v5596_v20, %v4439_v21  ;;  %v3269_v40 = vpop.f32.mrb[216].mxu1 }
 0x28e   :  { %v1957_v62 = vadd.f32 %v1956_v24, %v8480_v59  ;;  %v1958_v27 = vpop.f32.mrb[217].mxu0  ;;  %v3270_v33 = vadd.f32 %v3269_v40, %v8410_v43  ;;  %v3271_v28 = vpop.f32.mrb[217].mxu1 }
 0x28f   :  { %v1959_v34 = vadd.f32 %v1958_v27, %v8482_v60  ;;  %v1960_v36 = vpop.f32.mrb[218].mxu0  ;;  %v3272_v26 = vadd.f32 %v3271_v28, %v8486_v61  ;;  %v3273_v37 = vpop.f32.mrb[218].mxu1 }
 0x290   :  { %v4440_v38 = vmax.f32 %v1957_v62, 0.0  ;;  %v1961_v41 = vadd.f32 %v1960_v36, %v8480_v59  ;;  %v1962_v13 = vpop.f32.mrb[219].mxu0  ;;  %v4442_v42 = vmax.f32 %v3270_v33, 0.0  ;;  %v3274_v5 = vadd.f32 %v3273_v37, %v8410_v43  ;;  %v3275_v39 = vpop.f32.mrb[219].mxu1 }
 0x291   :  { %v4441_v14 = vmax.f32 %v1959_v34, 0.0  ;;  %v1963_v53 = vadd.f32 %v1962_v13, %v8482_v60  ;;  %v4443_v47 = vmax.f32 %v3272_v26, 0.0  ;;  %v3276_v44 = vadd.f32 %v3275_v39, %v8486_v61 }
 0x292   :  { %v5487_v49 = vadd.f32 %v5486_v22, %v4440_v38  ;;  %v4444_v48 = vmax.f32 %v1961_v41, 0.0  ;;  %7536 = vmatmul.mubr.msk.bf16.gmra.mrb[68].mxu0 %vm981_vm2, %v7989_v7  ;;  %7664 = vmatmul.mubr.msk.bf16.gmra.mrb[68].mxu1 %vm981_vm2, %v7989_v7  ;;  %v5561_v46 = vadd.f32 %v5560_v23, %v4442_v42  ;;  %v4446_v50 = vmax.f32 %v3274_v5, 0.0  ;;  %v7991_v5 = vld [vmem:[%s10829_s0 + $0x298] sm:$0xff]  }
 0x293   :  { %v5524_v30 = vadd.f32 %v5523_v58, %v4441_v14  ;;  %v4445_v51 = vmax.f32 %v1963_v53, 0.0  ;;  %2234 = vmatprep.mubr.bf16.mxu0 %v8211_v6  ;;  %3547 = vmatprep.mubr.bf16.mxu1 %v8211_v6  ;;  %v5598_v31 = vadd.f32 %v5597_v25, %v4443_v47  ;;  %v4447_v54 = vmax.f32 %v3276_v44, 0.0 }
 0x294   :  { %v5488_v55 = vadd.f32 %v5487_v49, %v4444_v48  ;;  %v5562_v63 = vadd.f32 %v5561_v46, %v4446_v50 }
 0x295   :  { %v5525_v1 = vadd.f32 %v5524_v30, %v4445_v51  ;;  %v1966_v32 = vpop.f32.mrb[220].mxu0  ;;  %v5599_v2 = vadd.f32 %v5598_v31, %v4447_v54  ;;  %v3279_v35 = vpop.f32.mrb[220].mxu1 }
 0x296   :  { %v1967_v0 = vadd.f32 %v1966_v32, %v8480_v59  ;;  %v1968_v3 = vpop.f32.mrb[221].mxu0  ;;  %v3280_v9 = vadd.f32 %v3279_v35, %v8410_v43  ;;  %v3281_v10 = vpop.f32.mrb[221].mxu1 }
 0x297   :  { %v1969_v8 = vadd.f32 %v1968_v3, %v8482_v60  ;;  %v1970_v11 = vpop.f32.mrb[222].mxu0  ;;  %v3282_v12 = vadd.f32 %v3281_v10, %v8486_v61  ;;  %v3283_v56 = vpop.f32.mrb[222].mxu1 }
 0x298   :  { %v4448_v15 = vmax.f32 %v1967_v0, 0.0  ;;  %v1971_v16 = vadd.f32 %v1970_v11, %v8480_v59  ;;  %v1972_v17 = vpop.f32.mrb[223].mxu0  ;;  %v4450_v18 = vmax.f32 %v3280_v9, 0.0  ;;  %v3284_v19 = vadd.f32 %v3283_v56, %v8410_v43  ;;  %v3285_v20 = vpop.f32.mrb[223].mxu1 }
 0x299   :  { %v4449_v21 = vmax.f32 %v1969_v8, 0.0  ;;  %v1973_v22 = vadd.f32 %v1972_v17, %v8482_v60  ;;  %v4451_v23 = vmax.f32 %v3282_v12, 0.0  ;;  %v3286_v58 = vadd.f32 %v3285_v20, %v8486_v61 }
 0x29a   :  { %v5489_v24 = vadd.f32 %v5488_v55, %v4448_v15  ;;  %v4452_v25 = vmax.f32 %v1971_v16, 0.0  ;;  %7537 = vmatmul.mubr.msk.bf16.gmra.mrb[72].mxu0 %vm981_vm2, %v7990_v4  ;;  %7665 = vmatmul.mubr.msk.bf16.gmra.mrb[72].mxu1 %vm981_vm2, %v7990_v4  ;;  %v5563_v40 = vadd.f32 %v5562_v63, %v4450_v18  ;;  %v4454_v62 = vmax.f32 %v3284_v19, 0.0  ;;  %v7992_v19 = vld [vmem:[%s10829_s0 + $0x2a0] sm:$0xff]  }
 0x29b   :  { %v5526_v27 = vadd.f32 %v5525_v1, %v4449_v21  ;;  %v4453_v7 = vmax.f32 %v1973_v22, 0.0  ;;  %2244 = vmatprep.mubr.bf16.mxu0 %v8211_v6  ;;  %3557 = vmatprep.mubr.bf16.mxu1 %v8211_v6  ;;  %v5600_v33 = vadd.f32 %v5599_v2, %v4451_v23  ;;  %v4455_v28 = vmax.f32 %v3286_v58, 0.0 }
 0x29c   :  { %v5490_v34 = vadd.f32 %v5489_v24, %v4452_v25  ;;  %v5564_v36 = vadd.f32 %v5563_v40, %v4454_v62 }
 0x29d   :  { %v5527_v26 = vadd.f32 %v5526_v27, %v4453_v7  ;;  %v1976_v37 = vpop.f32.mrb[224].mxu0  ;;  %v5601_v38 = vadd.f32 %v5600_v33, %v4455_v28  ;;  %v3289_v41 = vpop.f32.mrb[224].mxu1 }
 0x29e   :  { %v1977_v13 = vadd.f32 %v1976_v37, %v8480_v59  ;;  %v1978_v42 = vpop.f32.mrb[225].mxu0  ;;  %v3290_v39 = vadd.f32 %v3289_v41, %v8410_v43  ;;  %v3291_v14 = vpop.f32.mrb[225].mxu1 }
 0x29f   :  { %v1979_v53 = vadd.f32 %v1978_v42, %v8482_v60  ;;  %v1980_v47 = vpop.f32.mrb[226].mxu0  ;;  %v3292_v44 = vadd.f32 %v3291_v14, %v8486_v61  ;;  %v3293_v49 = vpop.f32.mrb[226].mxu1 }
 0x2a0   :  { %v4456_v48 = vmax.f32 %v1977_v13, 0.0  ;;  %v1981_v46 = vadd.f32 %v1980_v47, %v8480_v59  ;;  %v1982_v50 = vpop.f32.mrb[227].mxu0  ;;  %v4458_v30 = vmax.f32 %v3290_v39, 0.0  ;;  %v3294_v51 = vadd.f32 %v3293_v49, %v8410_v43  ;;  %v3295_v31 = vpop.f32.mrb[227].mxu1 }
 0x2a1   :  { %v4457_v54 = vmax.f32 %v1979_v53, 0.0  ;;  %v1983_v55 = vadd.f32 %v1982_v50, %v8482_v60  ;;  %v4459_v63 = vmax.f32 %v3292_v44, 0.0  ;;  %v3296_v1 = vadd.f32 %v3295_v31, %v8486_v61 }
 0x2a2   :  { %v5491_v32 = vadd.f32 %v5490_v34, %v4456_v48  ;;  %v4460_v2 = vmax.f32 %v1981_v46, 0.0  ;;  %7538 = vmatmul.mubr.msk.bf16.gmra.mrb[76].mxu0 %vm981_vm2, %v7991_v5  ;;  %7666 = vmatmul.mubr.msk.bf16.gmra.mrb[76].mxu1 %vm981_vm2, %v7991_v5  ;;  %v5565_v35 = vadd.f32 %v5564_v36, %v4458_v30  ;;  %v4462_v0 = vmax.f32 %v3294_v51, 0.0  ;;  %v7993_v51 = vld [vmem:[%s10829_s0 + $0x2a8] sm:$0xff]  }
 0x2a3   :  { %v5528_v3 = vadd.f32 %v5527_v26, %v4457_v54  ;;  %v4461_v4 = vmax.f32 %v1983_v55, 0.0  ;;  %2254 = vmatprep.mubr.bf16.mxu0 %v8211_v6  ;;  %3567 = vmatprep.mubr.bf16.mxu1 %v8211_v6  ;;  %v5602_v9 = vadd.f32 %v5601_v38, %v4459_v63  ;;  %v4463_v10 = vmax.f32 %v3296_v1, 0.0 }
 0x2a4   :  { %v5492_v8 = vadd.f32 %v5491_v32, %v4460_v2  ;;  %v5566_v11 = vadd.f32 %v5565_v35, %v4462_v0 }
 0x2a5   :  { %v5529_v12 = vadd.f32 %v5528_v3, %v4461_v4  ;;  %v1986_v56 = vpop.f32.mrb[228].mxu0  ;;  %v5603_v15 = vadd.f32 %v5602_v9, %v4463_v10  ;;  %v3299_v16 = vpop.f32.mrb[228].mxu1 }
 0x2a6   :  { %v1987_v17 = vadd.f32 %v1986_v56, %v8480_v59  ;;  %v1988_v18 = vpop.f32.mrb[229].mxu0  ;;  %v3300_v20 = vadd.f32 %v3299_v16, %v8410_v43  ;;  %v3301_v21 = vpop.f32.mrb[229].mxu1 }
 0x2a7   :  { %v1989_v22 = vadd.f32 %v1988_v18, %v8482_v60  ;;  %v1990_v23 = vpop.f32.mrb[230].mxu0  ;;  %v3302_v58 = vadd.f32 %v3301_v21, %v8486_v61  ;;  %v3303_v24 = vpop.f32.mrb[230].mxu1 }
 0x2a8   :  { %v4464_v25 = vmax.f32 %v1987_v17, 0.0  ;;  %v1991_v40 = vadd.f32 %v1990_v23, %v8480_v59  ;;  %v1992_v62 = vpop.f32.mrb[231].mxu0  ;;  %v4466_v27 = vmax.f32 %v3300_v20, 0.0  ;;  %v3304_v7 = vadd.f32 %v3303_v24, %v8410_v43  ;;  %v3305_v33 = vpop.f32.mrb[231].mxu1  ;;  %v8000_v23 = vld [vmem:[%s10829_s0 + $0x2b0] sm:$0xff]  }
 0x2a9   :  { %v4465_v28 = vmax.f32 %v1989_v22, 0.0  ;;  %v1993_v34 = vadd.f32 %v1992_v62, %v8482_v60  ;;  %v4467_v36 = vmax.f32 %v3302_v58, 0.0  ;;  %v3306_v26 = vadd.f32 %v3305_v33, %v8486_v61 }
 0x2aa   :  { %v5493_v37 = vadd.f32 %v5492_v8, %v4464_v25  ;;  %v4468_v38 = vmax.f32 %v1991_v40, 0.0  ;;  %7539 = vmatmul.mubr.msk.bf16.gmra.mrb[80].mxu0 %vm981_vm2, %v7992_v19  ;;  %7667 = vmatmul.mubr.msk.bf16.gmra.mrb[80].mxu1 %vm981_vm2, %v7992_v19  ;;  %v5567_v41 = vadd.f32 %v5566_v11, %v4466_v27  ;;  %v4470_v13 = vmax.f32 %v3304_v7, 0.0  ;;  %v8022_v27 = vld [vmem:[%s10832_s3 + $0x120] ss:$16 sps:$4 sm:$0xff]   ;;  %v8024_v7 = vld [vmem:[%s10832_s3 + $0x124] ss:$16 sps:$4 sm:$0xff]  }
 0x2ab   :  { %v5530_v42 = vadd.f32 %v5529_v12, %v4465_v28  ;;  %v4469_v5 = vmax.f32 %v1993_v34, 0.0  ;;  %2264 = vmatprep.mubr.bf16.mxu0 %v8211_v6  ;;  %3577 = vmatprep.mubr.bf16.mxu1 %v8211_v6  ;;  %v5604_v39 = vadd.f32 %v5603_v15, %v4467_v36  ;;  %v4471_v14 = vmax.f32 %v3306_v26, 0.0  ;;  %v8025_v26 = vld [vmem:[%s10832_s3 + $0x128] ss:$16 sps:$4 sm:$0xff]  }
 0x2ac   :  { %v5494_v53 = vadd.f32 %v5493_v37, %v4468_v38  ;;  %v5568_v47 = vadd.f32 %v5567_v41, %v4470_v13  ;;  %v8027_v37 = vld [vmem:[%s10832_s3 + $0x12c] ss:$16 sps:$4 sm:$0xff]   ;;  %7141 = vmatprep.subr.bf16.mxu0 %v8024_v7 }
 0x2ad   :  { %v5531_v44 = vadd.f32 %v5530_v42, %v4469_v5  ;;  %v1996_v49 = vpop.f32.mrb[232].mxu0  ;;  %v5605_v48 = vadd.f32 %v5604_v39, %v4471_v14  ;;  %v3309_v46 = vpop.f32.mrb[232].mxu1  ;;  %7223 = vmatprep.subr.bf16.mxu1 %v8027_v37  ;;  %7142 = vmatpush1.bf16.msra.mxu0 %v8022_v27 }
 0x2ae   :  { %v1997_v50 = vadd.f32 %v1996_v49, %v8480_v59  ;;  %v1998_v30 = vpop.f32.mrb[233].mxu0  ;;  %v3310_v31 = vadd.f32 %v3309_v46, %v8410_v43  ;;  %v3311_v54 = vpop.f32.mrb[233].mxu1  ;;  %7224 = vmatpush1.bf16.msra.mxu1 %v8025_v26 }
 0x2af   :  { %v1999_v55 = vadd.f32 %v1998_v30, %v8482_v60  ;;  %v2000_v63 = vpop.f32.mrb[234].mxu0  ;;  %v3312_v1 = vadd.f32 %v3311_v54, %v8486_v61  ;;  %v3313_v32 = vpop.f32.mrb[234].mxu1 }
 0x2b0   :  { %v4472_v2 = vmax.f32 %v1997_v50, 0.0  ;;  %v2001_v35 = vadd.f32 %v2000_v63, %v8480_v59  ;;  %v2002_v0 = vpop.f32.mrb[235].mxu0  ;;  %v4474_v3 = vmax.f32 %v3310_v31, 0.0  ;;  %v3314_v4 = vadd.f32 %v3313_v32, %v8410_v43  ;;  %v3315_v9 = vpop.f32.mrb[235].mxu1 }
 0x2b1   :  { %v4473_v10 = vmax.f32 %v1999_v55, 0.0  ;;  %v2003_v8 = vadd.f32 %v2002_v0, %v8482_v60  ;;  %v4475_v11 = vmax.f32 %v3312_v1, 0.0  ;;  %v3316_v12 = vadd.f32 %v3315_v9, %v8486_v61 }
 0x2b2   :  { %v5495_v56 = vadd.f32 %v5494_v53, %v4472_v2  ;;  %v4476_v15 = vmax.f32 %v2001_v35, 0.0  ;;  %7540 = vmatmul.mubr.msk.bf16.gmra.mrb[84].mxu0 %vm981_vm2, %v7993_v51  ;;  %7668 = vmatmul.mubr.msk.bf16.gmra.mrb[84].mxu1 %vm981_vm2, %v7993_v51  ;;  %v5569_v16 = vadd.f32 %v5568_v47, %v4474_v3  ;;  %v4478_v17 = vmax.f32 %v3314_v4, 0.0 }
 0x2b3   :  { %v5532_v18 = vadd.f32 %v5531_v44, %v4473_v10  ;;  %v4477_v19 = vmax.f32 %v2003_v8, 0.0  ;;  %2274 = vmatprep.mubr.bf16.mxu0 %v8211_v6  ;;  %3587 = vmatprep.mubr.bf16.mxu1 %v8211_v6  ;;  %v5606_v20 = vadd.f32 %v5605_v48, %v4475_v11  ;;  %v4479_v21 = vmax.f32 %v3316_v12, 0.0  ;;  %v8001_v11 = vld [vmem:[%s10829_s0 + $0x2b8] sm:$0xff]  }
 0x2b4   :  { %v5496_v22 = vadd.f32 %v5495_v56, %v4476_v15  ;;  %v5570_v58 = vadd.f32 %v5569_v16, %v4478_v17 }
 0x2b5   :  { %v5533_v24 = vadd.f32 %v5532_v18, %v4477_v19  ;;  %v2006_v25 = vpop.f32.mrb[236].mxu0  ;;  %v5607_v40 = vadd.f32 %v5606_v20, %v4479_v21  ;;  %v3319_v62 = vpop.f32.mrb[236].mxu1 }
 0x2b6   :  { %v2007_v33 = vadd.f32 %v2006_v25, %v8480_v59  ;;  %v2008_v28 = vpop.f32.mrb[237].mxu0  ;;  %v3320_v34 = vadd.f32 %v3319_v62, %v8410_v43  ;;  %v3321_v36 = vpop.f32.mrb[237].mxu1 }
 0x2b7   :  { %v2009_v38 = vadd.f32 %v2008_v28, %v8482_v60  ;;  %v2010_v41 = vpop.f32.mrb[238].mxu0  ;;  %v3322_v13 = vadd.f32 %v3321_v36, %v8486_v61  ;;  %v3323_v42 = vpop.f32.mrb[238].mxu1 }
 0x2b8   :  { %v4480_v5 = vmax.f32 %v2007_v33, 0.0  ;;  %v2011_v39 = vadd.f32 %v2010_v41, %v8480_v59  ;;  %v2012_v14 = vpop.f32.mrb[239].mxu0  ;;  %v4482_v53 = vmax.f32 %v3320_v34, 0.0  ;;  %v3324_v47 = vadd.f32 %v3323_v42, %v8410_v43  ;;  %v3325_v44 = vpop.f32.mrb[239].mxu1 }
 0x2b9   :  { %v4481_v49 = vmax.f32 %v2009_v38, 0.0  ;;  %v2013_v48 = vadd.f32 %v2012_v14, %v8482_v60  ;;  %v4483_v46 = vmax.f32 %v3322_v13, 0.0  ;;  %v3326_v50 = vadd.f32 %v3325_v44, %v8486_v61 }
 0x2ba   :  { %v5497_v30 = vadd.f32 %v5496_v22, %v4480_v5  ;;  %v4484_v51 = vmax.f32 %v2011_v39, 0.0  ;;  %7541 = vmatmul.mubr.msk.bf16.gmra.mrb[88].mxu0 %vm981_vm2, %v8000_v23  ;;  %7669 = vmatmul.mubr.msk.bf16.gmra.mrb[88].mxu1 %vm981_vm2, %v8000_v23  ;;  %v5571_v31 = vadd.f32 %v5570_v58, %v4482_v53  ;;  %v4486_v54 = vmax.f32 %v3324_v47, 0.0  ;;  %v8002_v47 = vld [vmem:[%s10829_s0 + $0x2c0] sm:$0xff]  }
 0x2bb   :  { %v5534_v55 = vadd.f32 %v5533_v24, %v4481_v49  ;;  %v4485_v63 = vmax.f32 %v2013_v48, 0.0  ;;  %2284 = vmatprep.mubr.bf16.mxu0 %v8211_v6  ;;  %3597 = vmatprep.mubr.bf16.mxu1 %v8211_v6  ;;  %v5608_v1 = vadd.f32 %v5607_v40, %v4483_v46  ;;  %v4487_v32 = vmax.f32 %v3326_v50, 0.0 }
 0x2bc   :  { %v5498_v2 = vadd.f32 %v5497_v30, %v4484_v51  ;;  %v5572_v35 = vadd.f32 %v5571_v31, %v4486_v54 }
 0x2bd   :  { %v5535_v0 = vadd.f32 %v5534_v55, %v4485_v63  ;;  %v2016_v3 = vpop.f32.mrb[240].mxu0  ;;  %v5609_v4 = vadd.f32 %v5608_v1, %v4487_v32  ;;  %v3329_v9 = vpop.f32.mrb[240].mxu1 }
 0x2be   :  { %v2017_v10 = vadd.f32 %v2016_v3, %v8480_v59  ;;  %v2018_v8 = vpop.f32.mrb[241].mxu0  ;;  %v3330_v12 = vadd.f32 %v3329_v9, %v8410_v43  ;;  %v3331_v56 = vpop.f32.mrb[241].mxu1 }
 0x2bf   :  { %v2019_v15 = vadd.f32 %v2018_v8, %v8482_v60  ;;  %v2020_v16 = vpop.f32.mrb[242].mxu0  ;;  %v3332_v17 = vadd.f32 %v3331_v56, %v8486_v61  ;;  %v3333_v18 = vpop.f32.mrb[242].mxu1 }
 0x2c0   :  { %v4488_v19 = vmax.f32 %v2017_v10, 0.0  ;;  %v2021_v20 = vadd.f32 %v2020_v16, %v8480_v59  ;;  %v2022_v21 = vpop.f32.mrb[243].mxu0  ;;  %v4490_v22 = vmax.f32 %v3330_v12, 0.0  ;;  %v3334_v23 = vadd.f32 %v3333_v18, %v8410_v43  ;;  %v3335_v58 = vpop.f32.mrb[243].mxu1 }
 0x2c1   :  { %v4489_v24 = vmax.f32 %v2019_v15, 0.0  ;;  %v2023_v25 = vadd.f32 %v2022_v21, %v8482_v60  ;;  %v4491_v40 = vmax.f32 %v3332_v17, 0.0  ;;  %v3336_v62 = vadd.f32 %v3335_v58, %v8486_v61  ;;  %v8003_v58 = vld [vmem:[%s10829_s0 + $0x2c8] sm:$0xff]  }
 0x2c2   :  { %v5499_v27 = vadd.f32 %v5498_v2, %v4488_v19  ;;  %v4492_v7 = vmax.f32 %v2021_v20, 0.0  ;;  %7542 = vmatmul.mubr.msk.bf16.gmra.mrb[92].mxu0 %vm981_vm2, %v8001_v11  ;;  %7670 = vmatmul.mubr.msk.bf16.gmra.mrb[92].mxu1 %vm981_vm2, %v8001_v11  ;;  %v5573_v33 = vadd.f32 %v5572_v35, %v4490_v22  ;;  %v4494_v28 = vmax.f32 %v3334_v23, 0.0 }
 0x2c3   :  { %v5536_v34 = vadd.f32 %v5535_v0, %v4489_v24  ;;  %v4493_v36 = vmax.f32 %v2023_v25, 0.0  ;;  %2294 = vmatprep.mubr.bf16.mxu0 %v8211_v6  ;;  %3607 = vmatprep.mubr.bf16.mxu1 %v8211_v6  ;;  %v5610_v26 = vadd.f32 %v5609_v4, %v4491_v40  ;;  %v4495_v37 = vmax.f32 %v3336_v62, 0.0 }
 0x2c4   :  { %v5500_v38 = vadd.f32 %v5499_v27, %v4492_v7  ;;  %v5574_v41 = vadd.f32 %v5573_v33, %v4494_v28 }
 0x2c5   :  { %v5537_v13 = vadd.f32 %v5536_v34, %v4493_v36  ;;  %v2026_v42 = vpop.f32.mrb[244].mxu0  ;;  %v5611_v5 = vadd.f32 %v5610_v26, %v4495_v37  ;;  %v3339_v39 = vpop.f32.mrb[244].mxu1 }
 0x2c6   :  { %v2027_v14 = vadd.f32 %v2026_v42, %v8480_v59  ;;  %v2028_v53 = vpop.f32.mrb[245].mxu0  ;;  %v3340_v44 = vadd.f32 %v3339_v39, %v8410_v43  ;;  %v3341_v49 = vpop.f32.mrb[245].mxu1 }
 0x2c7   :  { %v2029_v48 = vadd.f32 %v2028_v53, %v8482_v60  ;;  %v2030_v46 = vpop.f32.mrb[246].mxu0  ;;  %v3342_v50 = vadd.f32 %v3341_v49, %v8486_v61  ;;  %v3343_v30 = vpop.f32.mrb[246].mxu1 }
 0x2c8   :  { %v4496_v51 = vmax.f32 %v2027_v14, 0.0  ;;  %v2031_v31 = vadd.f32 %v2030_v46, %v8480_v59  ;;  %v2032_v54 = vpop.f32.mrb[247].mxu0  ;;  %v4498_v55 = vmax.f32 %v3340_v44, 0.0  ;;  %v3344_v63 = vadd.f32 %v3343_v30, %v8410_v43  ;;  %v3345_v1 = vpop.f32.mrb[247].mxu1 }
 0x2c9   :  { %v4497_v32 = vmax.f32 %v2029_v48, 0.0  ;;  %v2033_v2 = vadd.f32 %v2032_v54, %v8482_v60  ;;  %v4499_v35 = vmax.f32 %v3342_v50, 0.0  ;;  %v3346_v0 = vadd.f32 %v3345_v1, %v8486_v61 }
 0x2ca   :  { %v5501_v3 = vadd.f32 %v5500_v38, %v4496_v51  ;;  %v4500_v4 = vmax.f32 %v2031_v31, 0.0  ;;  %7543 = vmatmul.mubr.msk.bf16.gmra.mrb[96].mxu0 %vm981_vm2, %v8002_v47  ;;  %7671 = vmatmul.mubr.msk.bf16.gmra.mrb[96].mxu1 %vm981_vm2, %v8002_v47  ;;  %v5575_v9 = vadd.f32 %v5574_v41, %v4498_v55  ;;  %v4502_v10 = vmax.f32 %v3344_v63, 0.0 }
 0x2cb   :  { %v5538_v8 = vadd.f32 %v5537_v13, %v4497_v32  ;;  %v4501_v11 = vmax.f32 %v2033_v2, 0.0  ;;  %v5612_v12 = vadd.f32 %v5611_v5, %v4499_v35  ;;  %v4503_v56 = vmax.f32 %v3346_v0, 0.0  ;;  %2304 = vmatprep.mubr.bf16.mxu0 %v8211_v6  ;;  %3617 = vmatprep.mubr.bf16.mxu1 %v8211_v6  ;;  %v8004_v32 = vld [vmem:[%s10829_s0 + $0x2d0] sm:$0xff]  }
 0x2cc   :  { %v5502_v15 = vadd.f32 %v5501_v3, %v4500_v4  ;;  %v5576_v16 = vadd.f32 %v5575_v9, %v4502_v10 }
 0x2cd   :  { %v5539_v17 = vadd.f32 %v5538_v8, %v4501_v11  ;;  %v2036_v18 = vpop.f32.mrb[248].mxu0  ;;  %v5613_v19 = vadd.f32 %v5612_v12, %v4503_v56  ;;  %v3349_v20 = vpop.f32.mrb[248].mxu1 }
 0x2ce   :  { %v2037_v21 = vadd.f32 %v2036_v18, %v8480_v59  ;;  %v2038_v22 = vpop.f32.mrb[249].mxu0  ;;  %v3350_v23 = vadd.f32 %v3349_v20, %v8410_v43  ;;  %v3351_v24 = vpop.f32.mrb[249].mxu1 }
 0x2cf   :  { %v2039_v25 = vadd.f32 %v2038_v22, %v8482_v60  ;;  %v2040_v40 = vpop.f32.mrb[250].mxu0  ;;  %v3352_v62 = vadd.f32 %v3351_v24, %v8486_v61  ;;  %v3353_v27 = vpop.f32.mrb[250].mxu1 }
 0x2d0   :  { %v4504_v7 = vmax.f32 %v2037_v21, 0.0  ;;  %v2041_v33 = vadd.f32 %v2040_v40, %v8480_v59  ;;  %v2042_v28 = vpop.f32.mrb[251].mxu0  ;;  %v4506_v34 = vmax.f32 %v3350_v23, 0.0  ;;  %v3354_v36 = vadd.f32 %v3353_v27, %v8410_v43  ;;  %v3355_v26 = vpop.f32.mrb[251].mxu1 }
 0x2d1   :  { %v4505_v37 = vmax.f32 %v2039_v25, 0.0  ;;  %v2043_v38 = vadd.f32 %v2042_v28, %v8482_v60  ;;  %v4507_v41 = vmax.f32 %v3352_v62, 0.0  ;;  %v3356_v13 = vadd.f32 %v3355_v26, %v8486_v61 }
 0x2d2   :  { %v5503_v42 = vadd.f32 %v5502_v15, %v4504_v7  ;;  %v4508_v5 = vmax.f32 %v2041_v33, 0.0  ;;  %v5577_v39 = vadd.f32 %v5576_v16, %v4506_v34  ;;  %7544 = vmatmul.mubr.msk.bf16.gmra.mrb[100].mxu0 %vm981_vm2, %v8003_v58  ;;  %7672 = vmatmul.mubr.msk.bf16.gmra.mrb[100].mxu1 %vm981_vm2, %v8003_v58  ;;  %v4510_v14 = vmax.f32 %v3354_v36, 0.0 }
 0x2d3   :  { %v5540_v53 = vadd.f32 %v5539_v17, %v4505_v37  ;;  %v4509_v47 = vmax.f32 %v2043_v38, 0.0  ;;  %v5614_v44 = vadd.f32 %v5613_v19, %v4507_v41  ;;  %v4511_v49 = vmax.f32 %v3356_v13, 0.0  ;;  %2314 = vmatprep.mubr.bf16.mxu0 %v8211_v6  ;;  %3627 = vmatprep.mubr.bf16.mxu1 %v8211_v6  ;;  %v8005_v37 = vld [vmem:[%s10829_s0 + $0x2d8] sm:$0xff]  }
 0x2d4   :  { %v5504_v48 = vadd.f32 %v5503_v42, %v4508_v5  ;;  %v5578_v46 = vadd.f32 %v5577_v39, %v4510_v14 }
 0x2d5   :  { %v5541_v50 = vadd.f32 %v5540_v53, %v4509_v47  ;;  %v5615_v30 = vadd.f32 %v5614_v44, %v4511_v49  ;;  %v2046_v51 = vpop.f32.mrb[252].mxu0  ;;  %v3359_v31 = vpop.f32.mrb[252].mxu1 }
 0x2d6   :  { %v2047_v54 = vadd.f32 %v2046_v51, %v8480_v59  ;;  %v3360_v55 = vadd.f32 %v3359_v31, %v8410_v43  ;;  %v2048_v63 = vpop.f32.mrb[253].mxu0  ;;  %v3361_v1 = vpop.f32.mrb[253].mxu1 }
 0x2d7   :  { %v2049_v2 = vadd.f32 %v2048_v63, %v8482_v60  ;;  %v3362_v35 = vadd.f32 %v3361_v1, %v8486_v61  ;;  %v2050_v0 = vpop.f32.mrb[254].mxu0  ;;  %v3363_v3 = vpop.f32.mrb[254].mxu1 }
 0x2d8   :  { %v4512_v4 = vmax.f32 %v2047_v54, 0.0  ;;  %v4514_v9 = vmax.f32 %v3360_v55, 0.0  ;;  %v2051_v10 = vadd.f32 %v2050_v0, %v8480_v59  ;;  %v3364_v8 = vadd.f32 %v3363_v3, %v8410_v43  ;;  %v2052_v11 = vpop.f32.mrb[255].mxu0  ;;  %v3365_v12 = vpop.f32.mrb[255].mxu1 }
 0x2d9   :  { %v4513_v56 = vmax.f32 %v2049_v2, 0.0  ;;  %v4515_v15 = vmax.f32 %v3362_v35, 0.0  ;;  %v2053_v16 = vadd.f32 %v2052_v11, %v8482_v60  ;;  %v3366_v17 = vadd.f32 %v3365_v12, %v8486_v61 }
 0x2da   :  { %v5505_v18 = vadd.f32 %v5504_v48, %v4512_v4  ;;  %v5579_v19 = vadd.f32 %v5578_v46, %v4514_v9  ;;  %v4516_v20 = vmax.f32 %v2051_v10, 0.0  ;;  %v4518_v21 = vmax.f32 %v3364_v8, 0.0  ;;  %7545 = vmatmul.mubr.msk.bf16.gmra.mrb[104].mxu0 %vm981_vm2, %v8004_v32  ;;  %7673 = vmatmul.mubr.msk.bf16.gmra.mrb[104].mxu1 %vm981_vm2, %v8004_v32 }
 0x2db   :  { %v5542_v22 = vadd.f32 %v5541_v50, %v4513_v56  ;;  %v5616_v23 = vadd.f32 %v5615_v30, %v4515_v15  ;;  %v4517_v58 = vmax.f32 %v2053_v16, 0.0  ;;  %v4519_v24 = vmax.f32 %v3366_v17, 0.0  ;;  %2324 = vmatprep.mubr.bf16.mxu0 %v8211_v6  ;;  %3637 = vmatprep.mubr.bf16.mxu1 %v8211_v6 }
 0x2dc   :  { %v5506_v25 = vadd.f32 %v5505_v18, %v4516_v20  ;;  %v5580_v40 = vadd.f32 %v5579_v19, %v4518_v21 }
 0x2dd   :  { %v5543_v62 = vadd.f32 %v5542_v22, %v4517_v58  ;;  %v5617_v27 = vadd.f32 %v5616_v23, %v4519_v24  ;;  %v2056_v7 = vpop.f32.mrb[0].mxu0  ;;  %v3369_v33 = vpop.f32.mrb[0].mxu1  ;;  %v8006_v22 = vld [vmem:[%s10829_s0 + $0x2e0] sm:$0xff]  }
 0x2de   :  { %v5507_v28 = vrot.slane %v5506_v25, 4  ;;  %v5581_v34 = vrot.slane %v5580_v40, 4  ;;  %v2057_v36 = vadd.f32 %v2056_v7, %v8480_v59  ;;  %v2058_v26 = vpop.f32.mrb[1].mxu0  ;;  %v9668_v38 = vadd.f32 %v3369_v33, %v8410_v43  ;;  %v3371_v41 = vpop.f32.mrb[1].mxu1 }
 0x2df   :  { %v5544_v13 = vrot.slane %v5543_v62, 4  ;;  %v5618_v42 = vrot.slane %v5617_v27, 4  ;;  %v2059_v5 = vadd.f32 %v2058_v26, %v8482_v60  ;;  %v2060_v39 = vpop.f32.mrb[2].mxu0  ;;  %v9672_v14 = vadd.f32 %v3371_v41, %v8486_v61  ;;  %v3373_v53 = vpop.f32.mrb[2].mxu1 }
 0x2e0   :  { %v5508_v47 = vadd.f32 %v5507_v28, %v5506_v25  ;;  %v5582_v44 = vadd.f32 %v5581_v34, %v5580_v40  ;;  %v4520_v49 = vmax.f32 %v2057_v36, 0.0  ;;  %v2061_v48 = vadd.f32 %v2060_v39, %v8480_v59  ;;  %v2062_v46 = vpop.f32.mrb[3].mxu0  ;;  %v3375_v50 = vpop.f32.mrb[3].mxu1 }
 0x2e1   :  { %v5545_v30 = vadd.f32 %v5544_v13, %v5543_v62  ;;  %v5619_v51 = vadd.f32 %v5618_v42, %v5617_v27  ;;  %v4521_v31 = vmax.f32 %v2059_v5, 0.0  ;;  %v2063_v54 = vadd.f32 %v2062_v46, %v8482_v60 }
 0x2e2   :  { %v5509_v55 = vrot.slane %v5508_v47, 2  ;;  %v5583_v63 = vrot.slane %v5582_v44, 2  ;;  %v4524_v1 = vmax.f32 %v2061_v48, 0.0  ;;  %7546 = vmatmul.mubr.msk.bf16.gmra.mrb[108].mxu0 %vm981_vm2, %v8005_v37  ;;  %7674 = vmatmul.mubr.msk.bf16.gmra.mrb[108].mxu1 %vm981_vm2, %v8005_v37  ;;  %v4522_v32 = vmax.f32 %v9668_v38, 0.0 }
 0x2e3   :  { %v5546_v2 = vrot.slane %v5545_v30, 2  ;;  %v5620_v35 = vrot.slane %v5619_v51, 2  ;;  %v4525_v0 = vmax.f32 %v2063_v54, 0.0  ;;  %2334 = vmatprep.mubr.bf16.mxu0 %v8211_v6  ;;  %3647 = vmatprep.mubr.bf16.mxu1 %v8211_v6  ;;  %v4523_v3 = vmax.f32 %v9672_v14, 0.0 }
 0x2e4   :  { %v5510_v4 = vadd.f32 %v5509_v55, %v5508_v47  ;;  %v5584_v9 = vadd.f32 %v5583_v63, %v5582_v44  ;;  %v5624_v10 = vadd.f32 %v4524_v1, %v4520_v49  ;;  %v3374_v8 = vadd.f32 %v3373_v53, %v8410_v43 }
 0x2e5   :  { %v5547_v11 = vadd.f32 %v5546_v2, %v5545_v30  ;;  %v5621_v12 = vadd.f32 %v5620_v35, %v5619_v51  ;;  %v2066_v56 = vpop.f32.mrb[4].mxu0  ;;  %v5661_v15 = vadd.f32 %v4525_v0, %v4521_v31  ;;  %v3376_v16 = vadd.f32 %v3375_v50, %v8486_v61  ;;  %v3379_v17 = vpop.f32.mrb[4].mxu1  ;;  %v8007_v0 = vld [vmem:[%s10829_s0 + $0x2e8] sm:$0xff]  }
 0x2e6   :  { %v5511_v18 = vrot.slane %v5510_v4, 1  ;;  %v5585_v19 = vrot.slane %v5584_v9, 1  ;;  %v2067_v20 = vadd.f32 %v2066_v56, %v8480_v59  ;;  %v2068_v21 = vpop.f32.mrb[5].mxu0  ;;  %v4526_v23 = vmax.f32 %v3374_v8, 0.0  ;;  %v3381_v58 = vpop.f32.mrb[5].mxu1 }
 0x2e7   :  { %v5548_v24 = vrot.slane %v5547_v11, 1  ;;  %v5622_v25 = vrot.slane %v5621_v12, 1  ;;  %v2069_v40 = vadd.f32 %v2068_v21, %v8482_v60  ;;  %v2070_v62 = vpop.f32.mrb[6].mxu0  ;;  %v4527_v27 = vmax.f32 %v3376_v16, 0.0  ;;  %v3383_v7 = vpop.f32.mrb[6].mxu1 }
 0x2e8   :  { %v5512_v33 = vadd.f32 %v5511_v18, %v5510_v4  ;;  %v5586_v28 = vadd.f32 %v5585_v19, %v5584_v9  ;;  %v4528_v34 = vmax.f32 %v2067_v20, 0.0  ;;  %v2071_v36 = vadd.f32 %v2070_v62, %v8480_v59  ;;  %v2072_v26 = vpop.f32.mrb[7].mxu0  ;;  %v3385_v37 = vpop.f32.mrb[7].mxu1 }
 0x2e9   :  { %v5549_v38 = vadd.f32 %v5548_v24, %v5547_v11  ;;  %v9690_v41 = vadd.f32 %v5622_v25, %v5621_v12  ;;  %v4529_v13 = vmax.f32 %v2069_v40, 0.0  ;;  %v2073_v42 = vadd.f32 %v2072_v26, %v8482_v60 }
 0x2ea   :  { %v6228_v5 = vpack.c.bf16 %v5512_v33, %v5512_v33  ;;  %v6230_v39 = vpack.c.bf16 %v5586_v28, %v5586_v28  ;;  %v5625_v14 = vadd.f32 %v5624_v10, %v4528_v34  ;;  %v4532_v53 = vmax.f32 %v2071_v36, 0.0  ;;  %7547 = vmatmul.mubr.msk.bf16.gmra.mrb[112].mxu0 %vm981_vm2, %v8006_v22  ;;  %7675 = vmatmul.mubr.msk.bf16.gmra.mrb[112].mxu1 %vm981_vm2, %v8006_v22 }
 0x2eb   :  { %v6229_v47 = vpack.c.bf16 %v5549_v38, %v5549_v38  ;;  %v5662_v44 = vadd.f32 %v5661_v15, %v4529_v13  ;;  %v4533_v49 = vmax.f32 %v2073_v42, 0.0  ;;  %2344 = vmatprep.mubr.bf16.mxu0 %v8211_v6  ;;  %3657 = vmatprep.mubr.bf16.mxu1 %v8211_v6  ;;  %v6231_v46 = vpack.c.bf16 %v9690_v41, %v9690_v41  ;;  %v8014_v42 = vld [vmem:[%s10829_s0 + $0x2f0] sm:$0xff]  }
 0x2ec   :  { %v6420_v48 = vunpack.c.l.b16 %v6228_v5  ;;  %v5626_v50 = vadd.f32 %v5625_v14, %v4532_v53  ;;  %v3380_v30 = vadd.f32 %v3379_v17, %v8410_v43  ;;  %v9700_v51 = vunpack.c.l.b16 %v6230_v39 }
 0x2ed   :  { %v9702_v31 = vunpack.c.l.b16 %v6229_v47  ;;  %v5663_v54 = vadd.f32 %v5662_v44, %v4533_v49  ;;  %v2076_v55 = vpop.f32.mrb[8].mxu0  ;;  %v5698_v63 = vadd.f32 %v4526_v23, %v4522_v32  ;;  %v3389_v1 = vpop.f32.mrb[8].mxu1  ;;  %v3382_v9 = vadd.f32 %v3381_v58, %v8486_v61  ;;  %v8036_v47 = vld [vmem:[%s10832_s3 + $0x140] ss:$16 sps:$4 sm:$0xff]  }
 0x2ee   :  { %v2077_v2 = vadd.f32 %v2076_v55, %v8480_v59  ;;  %v2078_v35 = vpop.f32.mrb[9].mxu0  ;;  %v4530_v4 = vmax.f32 %v3380_v30, 0.0  ;;  %v5735_v10 = vadd.f32 %v4527_v27, %v4523_v3  ;;  %v3391_v8 = vpop.f32.mrb[9].mxu1  ;;  %v3384_v56 = vadd.f32 %v3383_v7, %v8410_v43 }
 0x2ef   :  { %v2079_v11 = vadd.f32 %v2078_v35, %v8482_v60  ;;  %v2080_v12 = vpop.f32.mrb[10].mxu0  ;;  %v3386_v32 = vadd.f32 %v3385_v37, %v8486_v61  ;;  %v3390_v15 = vadd.f32 %v3389_v1, %v8410_v43  ;;  %v3393_v16 = vpop.f32.mrb[10].mxu1  ;;  %v4531_v21 = vmax.f32 %v3382_v9, 0.0 }
 0x2f0   :  { %v4536_v17 = vmax.f32 %v2077_v2, 0.0  ;;  %v2081_v18 = vadd.f32 %v2080_v12, %v8480_v59  ;;  %v2082_v19 = vpop.f32.mrb[11].mxu0  ;;  %v5699_v20 = vadd.f32 %v5698_v63, %v4530_v4  ;;  %v3395_v22 = vpop.f32.mrb[11].mxu1  ;;  %v4534_v58 = vmax.f32 %v3384_v56, 0.0  ;;  %v8038_v63 = vld [vmem:[%s10832_s3 + $0x144] ss:$16 sps:$4 sm:$0xff]  }
 0x2f1   :  { %v4537_v23 = vmax.f32 %v2079_v11, 0.0  ;;  %v2083_v3 = vadd.f32 %v2082_v19, %v8482_v60  ;;  %v4535_v24 = vmax.f32 %v3386_v32, 0.0  ;;  %v5736_v62 = vadd.f32 %v5735_v10, %v4531_v21  ;;  %7143 = vmatprep.subr.bf16.mxu0 %v8038_v63  ;;  %v8041_v56 = vld [vmem:[%s10832_s3 + $0x14c] ss:$16 sps:$4 sm:$0xff]  }
 0x2f2   :  { %v5627_v25 = vadd.f32 %v5626_v50, %v4536_v17  ;;  %v4540_v40 = vmax.f32 %v2081_v18, 0.0  ;;  %7548 = vmatmul.mubr.msk.bf16.gmra.mrb[116].mxu0 %vm981_vm2, %v8007_v0  ;;  %7676 = vmatmul.mubr.msk.bf16.gmra.mrb[116].mxu1 %vm981_vm2, %v8007_v0  ;;  %v4538_v27 = vmax.f32 %v3390_v15, 0.0  ;;  %v5700_v28 = vadd.f32 %v5699_v20, %v4534_v58  ;;  %v8039_v17 = vld [vmem:[%s10832_s3 + $0x148] ss:$16 sps:$4 sm:$0xff]  }
 0x2f3   :  { %v5664_v7 = vadd.f32 %v5663_v54, %v4537_v23  ;;  %v4541_v33 = vmax.f32 %v2083_v3, 0.0  ;;  %2354 = vmatprep.mubr.bf16.mxu0 %v8211_v6  ;;  %3667 = vmatprep.mubr.bf16.mxu1 %v8211_v6  ;;  %v3392_v34 = vadd.f32 %v3391_v8, %v8486_v61  ;;  %v5737_v26 = vadd.f32 %v5736_v62, %v4535_v24 }
 0x2f4   :  { %v5628_v36 = vadd.f32 %v5627_v25, %v4540_v40  ;;  %v3394_v37 = vadd.f32 %v3393_v16, %v8410_v43  ;;  %v3396_v38 = vadd.f32 %v3395_v22, %v8486_v61  ;;  %v5701_v5 = vadd.f32 %v5700_v28, %v4538_v27  ;;  %7144 = vmatpush1.bf16.msra.mxu0 %v8036_v47 }
 0x2f5   :  { %v5665_v41 = vadd.f32 %v5664_v7, %v4541_v33  ;;  %v2086_v13 = vpop.f32.mrb[12].mxu0  ;;  %v4539_v39 = vmax.f32 %v3392_v34, 0.0  ;;  %v3399_v14 = vpop.f32.mrb[12].mxu1  ;;  %v9727_v53 = vsel %vm6444_vm5, %v6420_v48, %v9410_v52  ;;  %v6423_v1 = vunpack.c.l.b16 %v6231_v46  ;;  %7225 = vmatprep.subr.bf16.mxu1 %v8041_v56 }
 0x2f6   :  { %v2087_v44 = vadd.f32 %v2086_v13, %v8480_v59  ;;  %v2088_v49 = vpop.f32.mrb[13].mxu0  ;;  %v4542_v50 = vmax.f32 %v3394_v37, 0.0  ;;  %v4543_v30 = vmax.f32 %v3396_v38, 0.0  ;;  %v3400_v54 = vadd.f32 %v3399_v14, %v8410_v43  ;;  %v3401_v55 = vpop.f32.mrb[13].mxu1  ;;  %7226 = vmatpush1.bf16.msra.mxu1 %v8039_v17 }
 0x2f7   :  { %v2089_v52 = vadd.f32 %v2088_v49, %v8482_v60  ;;  %v2090_v48 = vpop.f32.mrb[14].mxu0  ;;  %v5738_v2 = vadd.f32 %v5737_v26, %v4539_v39  ;;  %v3402_v35 = vadd.f32 %v3401_v55, %v8486_v61  ;;  %v3403_v0 = vpop.f32.mrb[14].mxu1  ;;  %v9756_v40 = vsel %vm6444_vm5, %v9700_v51, %v9414_v45  ;;  %v8015_v45 = vld [vmem:[%s10829_s0 + $0x2f8] sm:$0xff]  }
 0x2f8   :  { %v4544_v4 = vmax.f32 %v2087_v44, 0.0  ;;  %v2091_v9 = vadd.f32 %v2090_v48, %v8480_v59  ;;  %v2092_v10 = vpop.f32.mrb[15].mxu0  ;;  %v5702_v8 = vadd.f32 %v5701_v5, %v4542_v50  ;;  %v4546_v11 = vmax.f32 %v3400_v54, 0.0  ;;  %v3405_v12 = vpop.f32.mrb[15].mxu1 }
 0x2f9   :  { %v4545_v46 = vmax.f32 %v2089_v52, 0.0  ;;  %v2093_v32 = vadd.f32 %v2092_v10, %v8482_v60  ;;  %v5739_v15 = vadd.f32 %v5738_v2, %v4543_v30  ;;  %v4547_v16 = vmax.f32 %v3402_v35, 0.0 }
 0x2fa   :  { %v5629_v18 = vadd.f32 %v5628_v36, %v4544_v4  ;;  %v4548_v19 = vmax.f32 %v2091_v9, 0.0  ;;  %7549 = vmatmul.mubr.msk.bf16.gmra.mrb[120].mxu0 %vm981_vm2, %v8014_v42  ;;  %7677 = vmatmul.mubr.msk.bf16.gmra.mrb[120].mxu1 %vm981_vm2, %v8014_v42  ;;  %v5703_v20 = vadd.f32 %v5702_v8, %v4546_v11  ;;  %v3404_v21 = vadd.f32 %v3403_v0, %v8410_v43 }
 0x2fb   :  { %v5666_v22 = vadd.f32 %v5665_v41, %v4545_v46  ;;  %v4549_v23 = vmax.f32 %v2093_v32, 0.0  ;;  %2364 = vmatprep.mubr.bf16.mxu0 %v8211_v6  ;;  %3677 = vmatprep.mubr.bf16.mxu1 %v8211_v6  ;;  %v5740_v3 = vadd.f32 %v5739_v15, %v4547_v16  ;;  %v3406_v58 = vadd.f32 %v3405_v12, %v8486_v61  ;;  %v8016_v32 = vld [vmem:[%s10829_s0 + $0x300] sm:$0xff]  }
 0x2fc   :  { %v5630_v24 = vadd.f32 %v5629_v18, %v4548_v19  ;;  %v4550_v25 = vmax.f32 %v3404_v21, 0.0  ;;  %v9761_v62 = vsel %vm6444_vm5, %v9702_v31, %v9443_v29  ;;  %v9765_v34 = vsel %vm6444_vm5, %v6423_v1, %v9469_v57 }
 0x2fd   :  { %v5667_v27 = vadd.f32 %v5666_v22, %v4549_v23  ;;  %v2096_v7 = vpop.f32.mrb[16].mxu0  ;;  %v4551_v33 = vmax.f32 %v3406_v58, 0.0  ;;  %v3409_v28 = vpop.f32.mrb[16].mxu1 }
 0x2fe   :  { %v2097_v36 = vadd.f32 %v2096_v7, %v8480_v59  ;;  %v2098_v26 = vpop.f32.mrb[17].mxu0  ;;  %v5704_v51 = vadd.f32 %v5703_v20, %v4550_v25  ;;  %v3410_v29 = vadd.f32 %v3409_v28, %v8410_v43  ;;  %v3411_v31 = vpop.f32.mrb[17].mxu1 }
 0x2ff   :  { %v2099_v37 = vadd.f32 %v2098_v26, %v8482_v60  ;;  %v2100_v38 = vpop.f32.mrb[18].mxu0  ;;  %v5741_v41 = vadd.f32 %v5740_v3, %v4551_v33  ;;  %v3412_v13 = vadd.f32 %v3411_v31, %v8486_v61  ;;  %v3413_v42 = vpop.f32.mrb[18].mxu1 }
 0x300   :  { %v4552_v57 = vmax.f32 %v2097_v36, 0.0  ;;  %v2101_v5 = vadd.f32 %v2100_v38, %v8480_v59  ;;  %v2102_v39 = vpop.f32.mrb[19].mxu0  ;;  %v4554_v14 = vmax.f32 %v3410_v29, 0.0  ;;  %v3414_v47 = vadd.f32 %v3413_v42, %v8410_v43  ;;  %v3415_v44 = vpop.f32.mrb[19].mxu1 }
 0x301   :  { %v4553_v49 = vmax.f32 %v2099_v37, 0.0  ;;  %v2103_v50 = vadd.f32 %v2102_v39, %v8482_v60  ;;  %v4555_v30 = vmax.f32 %v3412_v13, 0.0  ;;  %v3416_v54 = vadd.f32 %v3415_v44, %v8486_v61 }
 0x302   :  { %v5631_v55 = vadd.f32 %v5630_v24, %v4552_v57  ;;  %v4556_v63 = vmax.f32 %v2101_v5, 0.0  ;;  %7550 = vmatmul.mubr.msk.bf16.gmra.mrb[124].mxu0 %vm981_vm2, %v8015_v45  ;;  %7678 = vmatmul.mubr.msk.bf16.gmra.mrb[124].mxu1 %vm981_vm2, %v8015_v45  ;;  %v5705_v1 = vadd.f32 %v5704_v51, %v4554_v14  ;;  %v4558_v52 = vmax.f32 %v3414_v47, 0.0  ;;  %v8017_v47 = vld [vmem:[%s10829_s0 + $0x308] sm:$0xff]  }
 0x303   :  { %v5668_v48 = vadd.f32 %v5667_v27, %v4553_v49  ;;  %v4557_v2 = vmax.f32 %v2103_v50, 0.0  ;;  %2374 = vmatprep.mubr.bf16.mxu0 %v8211_v6  ;;  %3687 = vmatprep.mubr.bf16.mxu1 %v8211_v6  ;;  %v5742_v35 = vadd.f32 %v5741_v41, %v4555_v30  ;;  %v4559_v0 = vmax.f32 %v3416_v54, 0.0 }
 0x304   :  { %v5632_v4 = vadd.f32 %v5631_v55, %v4556_v63  ;;  %v5706_v9 = vadd.f32 %v5705_v1, %v4558_v52 }
 0x305   :  { %v5669_v10 = vadd.f32 %v5668_v48, %v4557_v2  ;;  %v2106_v8 = vpop.f32.mrb[20].mxu0  ;;  %v5743_v11 = vadd.f32 %v5742_v35, %v4559_v0  ;;  %v3419_v12 = vpop.f32.mrb[20].mxu1 }
 0x306   :  { %v2107_v56 = vadd.f32 %v2106_v8, %v8480_v59  ;;  %v2108_v46 = vpop.f32.mrb[21].mxu0  ;;  %v3420_v15 = vadd.f32 %v3419_v12, %v8410_v43  ;;  %v3421_v16 = vpop.f32.mrb[21].mxu1 }
 0x307   :  { %v2109_v17 = vadd.f32 %v2108_v46, %v8482_v60  ;;  %v2110_v18 = vpop.f32.mrb[22].mxu0  ;;  %v3422_v19 = vadd.f32 %v3421_v16, %v8486_v61  ;;  %v3423_v20 = vpop.f32.mrb[22].mxu1 }
 0x308   :  { %v4560_v21 = vmax.f32 %v2107_v56, 0.0  ;;  %v2111_v22 = vadd.f32 %v2110_v18, %v8480_v59  ;;  %v2112_v23 = vpop.f32.mrb[23].mxu0  ;;  %v4562_v3 = vmax.f32 %v3420_v15, 0.0  ;;  %v3424_v58 = vadd.f32 %v3423_v20, %v8410_v43  ;;  %v3425_v24 = vpop.f32.mrb[23].mxu1 }
 0x309   :  { %v4561_v25 = vmax.f32 %v2109_v17, 0.0  ;;  %v2113_v27 = vadd.f32 %v2112_v23, %v8482_v60  ;;  %v4563_v7 = vmax.f32 %v3422_v19, 0.0  ;;  %v3426_v33 = vadd.f32 %v3425_v24, %v8486_v61 }
 0x30a   :  { %v5633_v28 = vadd.f32 %v5632_v4, %v4560_v21  ;;  %v4564_v36 = vmax.f32 %v2111_v22, 0.0  ;;  %7551 = vmatmul.mubr.msk.bf16.gmra.mrb[128].mxu0 %vm981_vm2, %v8016_v32  ;;  %7679 = vmatmul.mubr.msk.bf16.gmra.mrb[128].mxu1 %vm981_vm2, %v8016_v32  ;;  %v5707_v26 = vadd.f32 %v5706_v9, %v4562_v3  ;;  %v4566_v45 = vmax.f32 %v3424_v58, 0.0  ;;  %v8018_v58 = vld [vmem:[%s10829_s0 + $0x310] sm:$0xff]  }
 0x30b   :  { %v5670_v51 = vadd.f32 %v5669_v10, %v4561_v25  ;;  %v4565_v29 = vmax.f32 %v2113_v27, 0.0  ;;  %2384 = vmatprep.mubr.bf16.mxu0 %v8211_v6  ;;  %3697 = vmatprep.mubr.bf16.mxu1 %v8211_v6  ;;  %v5744_v31 = vadd.f32 %v5743_v11, %v4563_v7  ;;  %v4567_v37 = vmax.f32 %v3426_v33, 0.0 }
 0x30c   :  { %v5634_v38 = vadd.f32 %v5633_v28, %v4564_v36  ;;  %v5708_v41 = vadd.f32 %v5707_v26, %v4566_v45 }
 0x30d   :  { %v5671_v13 = vadd.f32 %v5670_v51, %v4565_v29  ;;  %v2116_v42 = vpop.f32.mrb[24].mxu0  ;;  %v5745_v57 = vadd.f32 %v5744_v31, %v4567_v37  ;;  %v3429_v5 = vpop.f32.mrb[24].mxu1 }
 0x30e   :  { %v2117_v39 = vadd.f32 %v2116_v42, %v8480_v59  ;;  %v2118_v14 = vpop.f32.mrb[25].mxu0  ;;  %v3430_v44 = vadd.f32 %v3429_v5, %v8410_v43  ;;  %v3431_v49 = vpop.f32.mrb[25].mxu1 }
 0x30f   :  { %v2119_v50 = vadd.f32 %v2118_v14, %v8482_v60  ;;  %v2120_v30 = vpop.f32.mrb[26].mxu0  ;;  %v3432_v54 = vadd.f32 %v3431_v49, %v8486_v61  ;;  %v3433_v55 = vpop.f32.mrb[26].mxu1 }
 0x310   :  { %v4568_v63 = vmax.f32 %v2117_v39, 0.0  ;;  %v2121_v1 = vadd.f32 %v2120_v30, %v8480_v59  ;;  %v2122_v52 = vpop.f32.mrb[27].mxu0  ;;  %v4570_v48 = vmax.f32 %v3430_v44, 0.0  ;;  %v3434_v2 = vadd.f32 %v3433_v55, %v8410_v43  ;;  %v3435_v35 = vpop.f32.mrb[27].mxu1 }
 0x311   :  { %v4569_v0 = vmax.f32 %v2119_v50, 0.0  ;;  %v2123_v4 = vadd.f32 %v2122_v52, %v8482_v60  ;;  %v4571_v9 = vmax.f32 %v3432_v54, 0.0  ;;  %v3436_v10 = vadd.f32 %v3435_v35, %v8486_v61 }
 0x312   :  { %v5635_v8 = vadd.f32 %v5634_v38, %v4568_v63  ;;  %v4572_v11 = vmax.f32 %v2121_v1, 0.0  ;;  %7552 = vmatmul.mubr.msk.bf16.gmra.mrb[132].mxu0 %vm981_vm2, %v8017_v47  ;;  %7680 = vmatmul.mubr.msk.bf16.gmra.mrb[132].mxu1 %vm981_vm2, %v8017_v47  ;;  %v5709_v12 = vadd.f32 %v5708_v41, %v4570_v48  ;;  %v4574_v56 = vmax.f32 %v3434_v2, 0.0  ;;  %v8019_v2 = vld [vmem:[%s10829_s0 + $0x318] sm:$0xff]  }
 0x313   :  { %v5672_v46 = vadd.f32 %v5671_v13, %v4569_v0  ;;  %v4573_v32 = vmax.f32 %v2123_v4, 0.0  ;;  %2394 = vmatprep.mubr.bf16.mxu0 %v8211_v6  ;;  %3707 = vmatprep.mubr.bf16.mxu1 %v8211_v6  ;;  %v5746_v15 = vadd.f32 %v5745_v57, %v4571_v9  ;;  %v4575_v16 = vmax.f32 %v3436_v10, 0.0 }
 0x314   :  { %v5636_v17 = vadd.f32 %v5635_v8, %v4572_v11  ;;  %v5710_v18 = vadd.f32 %v5709_v12, %v4574_v56 }
 0x315   :  { %v5673_v19 = vadd.f32 %v5672_v46, %v4573_v32  ;;  %v2126_v20 = vpop.f32.mrb[28].mxu0  ;;  %v5747_v21 = vadd.f32 %v5746_v15, %v4575_v16  ;;  %v3439_v22 = vpop.f32.mrb[28].mxu1 }
 0x316   :  { %v2127_v23 = vadd.f32 %v2126_v20, %v8480_v59  ;;  %v2128_v3 = vpop.f32.mrb[29].mxu0  ;;  %v3440_v24 = vadd.f32 %v3439_v22, %v8410_v43  ;;  %v3441_v25 = vpop.f32.mrb[29].mxu1 }
 0x317   :  { %v2129_v27 = vadd.f32 %v2128_v3, %v8482_v60  ;;  %v2130_v7 = vpop.f32.mrb[30].mxu0  ;;  %v3442_v33 = vadd.f32 %v3441_v25, %v8486_v61  ;;  %v3443_v28 = vpop.f32.mrb[30].mxu1 }
 0x318   :  { %v4576_v36 = vmax.f32 %v2127_v23, 0.0  ;;  %v2131_v26 = vadd.f32 %v2130_v7, %v8480_v59  ;;  %v2132_v45 = vpop.f32.mrb[31].mxu0  ;;  %v4578_v51 = vmax.f32 %v3440_v24, 0.0  ;;  %v3444_v29 = vadd.f32 %v3443_v28, %v8410_v43  ;;  %v3445_v31 = vpop.f32.mrb[31].mxu1 }
 0x319   :  { %v4577_v37 = vmax.f32 %v2129_v27, 0.0  ;;  %v2133_v38 = vadd.f32 %v2132_v45, %v8482_v60  ;;  %v4579_v41 = vmax.f32 %v3442_v33, 0.0  ;;  %v3446_v13 = vadd.f32 %v3445_v31, %v8486_v61 }
 0x31a   :  { %v5637_v42 = vadd.f32 %v5636_v17, %v4576_v36  ;;  %v4580_v57 = vmax.f32 %v2131_v26, 0.0  ;;  %7553 = vmatmul.mubr.msk.bf16.gmra.mrb[136].mxu0 %vm981_vm2, %v8018_v58  ;;  %7681 = vmatmul.mubr.msk.bf16.gmra.mrb[136].mxu1 %vm981_vm2, %v8018_v58  ;;  %v5711_v5 = vadd.f32 %v5710_v18, %v4578_v51  ;;  %v4582_v39 = vmax.f32 %v3444_v29, 0.0  ;;  %v8020_v29 = vld [vmem:[%s10829_s0 + $0x320] sm:$0xff]  }
 0x31b   :  { %v5674_v14 = vadd.f32 %v5673_v19, %v4577_v37  ;;  %v4581_v47 = vmax.f32 %v2133_v38, 0.0  ;;  %2404 = vmatprep.mubr.bf16.mxu0 %v8211_v6  ;;  %3717 = vmatprep.mubr.bf16.mxu1 %v8211_v6  ;;  %v5748_v44 = vadd.f32 %v5747_v21, %v4579_v41  ;;  %v4583_v49 = vmax.f32 %v3446_v13, 0.0 }
 0x31c   :  { %v5638_v50 = vadd.f32 %v5637_v42, %v4580_v57  ;;  %v5712_v30 = vadd.f32 %v5711_v5, %v4582_v39 }
 0x31d   :  { %v5675_v54 = vadd.f32 %v5674_v14, %v4581_v47  ;;  %v2136_v55 = vpop.f32.mrb[32].mxu0  ;;  %v5749_v63 = vadd.f32 %v5748_v44, %v4583_v49  ;;  %v3449_v1 = vpop.f32.mrb[32].mxu1 }
 0x31e   :  { %v2137_v52 = vadd.f32 %v2136_v55, %v8480_v59  ;;  %v2138_v48 = vpop.f32.mrb[33].mxu0  ;;  %v3450_v35 = vadd.f32 %v3449_v1, %v8410_v43  ;;  %v3451_v0 = vpop.f32.mrb[33].mxu1 }
 0x31f   :  { %v2139_v4 = vadd.f32 %v2138_v48, %v8482_v60  ;;  %v2140_v9 = vpop.f32.mrb[34].mxu0  ;;  %v3452_v10 = vadd.f32 %v3451_v0, %v8486_v61  ;;  %v3453_v8 = vpop.f32.mrb[34].mxu1 }
 0x320   :  { %v4584_v11 = vmax.f32 %v2137_v52, 0.0  ;;  %v2141_v12 = vadd.f32 %v2140_v9, %v8480_v59  ;;  %v2142_v56 = vpop.f32.mrb[35].mxu0  ;;  %v4586_v46 = vmax.f32 %v3450_v35, 0.0  ;;  %v3454_v32 = vadd.f32 %v3453_v8, %v8410_v43  ;;  %v3455_v15 = vpop.f32.mrb[35].mxu1 }
 0x321   :  { %v4585_v16 = vmax.f32 %v2139_v4, 0.0  ;;  %v2143_v17 = vadd.f32 %v2142_v56, %v8482_v60  ;;  %v4587_v18 = vmax.f32 %v3452_v10, 0.0  ;;  %v3456_v19 = vadd.f32 %v3455_v15, %v8486_v61 }
 0x322   :  { %v5639_v20 = vadd.f32 %v5638_v50, %v4584_v11  ;;  %v4588_v21 = vmax.f32 %v2141_v12, 0.0  ;;  %7554 = vmatmul.mubr.msk.bf16.gmra.mrb[140].mxu0 %vm981_vm2, %v8019_v2  ;;  %7682 = vmatmul.mubr.msk.bf16.gmra.mrb[140].mxu1 %vm981_vm2, %v8019_v2  ;;  %v5713_v22 = vadd.f32 %v5712_v30, %v4586_v46  ;;  %v4590_v23 = vmax.f32 %v3454_v32, 0.0  ;;  %v8021_v32 = vld [vmem:[%s10829_s0 + $0x328] sm:$0xff]  }
 0x323   :  { %v5676_v3 = vadd.f32 %v5675_v54, %v4585_v16  ;;  %v4589_v58 = vmax.f32 %v2143_v17, 0.0  ;;  %2414 = vmatprep.mubr.bf16.mxu0 %v8211_v6  ;;  %3727 = vmatprep.mubr.bf16.mxu1 %v8211_v6  ;;  %v5750_v24 = vadd.f32 %v5749_v63, %v4587_v18  ;;  %v4591_v25 = vmax.f32 %v3456_v19, 0.0 }
 0x324   :  { %v5640_v27 = vadd.f32 %v5639_v20, %v4588_v21  ;;  %v5714_v7 = vadd.f32 %v5713_v22, %v4590_v23 }
 0x325   :  { %v5677_v33 = vadd.f32 %v5676_v3, %v4589_v58  ;;  %v2146_v28 = vpop.f32.mrb[36].mxu0  ;;  %v5751_v36 = vadd.f32 %v5750_v24, %v4591_v25  ;;  %v3459_v26 = vpop.f32.mrb[36].mxu1 }
 0x326   :  { %v2147_v45 = vadd.f32 %v2146_v28, %v8480_v59  ;;  %v2148_v51 = vpop.f32.mrb[37].mxu0  ;;  %v3460_v31 = vadd.f32 %v3459_v26, %v8410_v43  ;;  %v3461_v37 = vpop.f32.mrb[37].mxu1 }
 0x327   :  { %v2149_v38 = vadd.f32 %v2148_v51, %v8482_v60  ;;  %v2150_v41 = vpop.f32.mrb[38].mxu0  ;;  %v3462_v13 = vadd.f32 %v3461_v37, %v8486_v61  ;;  %v3463_v42 = vpop.f32.mrb[38].mxu1 }
 0x328   :  { %v4592_v57 = vmax.f32 %v2147_v45, 0.0  ;;  %v2151_v5 = vadd.f32 %v2150_v41, %v8480_v59  ;;  %v2152_v39 = vpop.f32.mrb[39].mxu0  ;;  %v4594_v14 = vmax.f32 %v3460_v31, 0.0  ;;  %v3464_v47 = vadd.f32 %v3463_v42, %v8410_v43  ;;  %v3465_v44 = vpop.f32.mrb[39].mxu1 }
 0x329   :  { %v4593_v49 = vmax.f32 %v2149_v38, 0.0  ;;  %v2153_v50 = vadd.f32 %v2152_v39, %v8482_v60  ;;  %v4595_v30 = vmax.f32 %v3462_v13, 0.0  ;;  %v3466_v54 = vadd.f32 %v3465_v44, %v8486_v61  ;;  %v8050_v39 = vld [vmem:[%s10832_s3 + $0x160] ss:$16 sps:$4 sm:$0xff]  }
 0x32a   :  { %v5641_v55 = vadd.f32 %v5640_v27, %v4592_v57  ;;  %v4596_v63 = vmax.f32 %v2151_v5, 0.0  ;;  %7555 = vmatmul.mubr.msk.bf16.gmra.mrb[144].mxu0 %vm981_vm2, %v8020_v29  ;;  %7683 = vmatmul.mubr.msk.bf16.gmra.mrb[144].mxu1 %vm981_vm2, %v8020_v29  ;;  %v5715_v1 = vadd.f32 %v5714_v7, %v4594_v14  ;;  %v4598_v52 = vmax.f32 %v3464_v47, 0.0  ;;  %v8028_v44 = vld [vmem:[%s10829_s0 + $0x330] sm:$0xff]  }
 0x32b   :  { %v5678_v48 = vadd.f32 %v5677_v33, %v4593_v49  ;;  %v4597_v2 = vmax.f32 %v2153_v50, 0.0  ;;  %2424 = vmatprep.mubr.bf16.mxu0 %v8211_v6  ;;  %3737 = vmatprep.mubr.bf16.mxu1 %v8211_v6  ;;  %v5752_v35 = vadd.f32 %v5751_v36, %v4595_v30  ;;  %v4599_v0 = vmax.f32 %v3466_v54, 0.0  ;;  %v8052_v30 = vld [vmem:[%s10832_s3 + $0x164] ss:$16 sps:$4 sm:$0xff]  }
 0x32c   :  { %v5642_v4 = vadd.f32 %v5641_v55, %v4596_v63  ;;  %v5716_v9 = vadd.f32 %v5715_v1, %v4598_v52  ;;  %v8055_v52 = vld [vmem:[%s10832_s3 + $0x16c] ss:$16 sps:$4 sm:$0xff]   ;;  %7145 = vmatprep.subr.bf16.mxu0 %v8052_v30 }
 0x32d   :  { %v5679_v10 = vadd.f32 %v5678_v48, %v4597_v2  ;;  %v2156_v8 = vpop.f32.mrb[40].mxu0  ;;  %v5753_v11 = vadd.f32 %v5752_v35, %v4599_v0  ;;  %v3469_v12 = vpop.f32.mrb[40].mxu1  ;;  %7227 = vmatprep.subr.bf16.mxu1 %v8055_v52  ;;  %7146 = vmatpush1.bf16.msra.mxu0 %v8050_v39 }
 0x32e   :  { %v2157_v56 = vadd.f32 %v2156_v8, %v8480_v59  ;;  %v2158_v46 = vpop.f32.mrb[41].mxu0  ;;  %v3470_v15 = vadd.f32 %v3469_v12, %v8410_v43  ;;  %v3471_v16 = vpop.f32.mrb[41].mxu1 }
 0x32f   :  { %v2159_v17 = vadd.f32 %v2158_v46, %v8482_v60  ;;  %v2160_v18 = vpop.f32.mrb[42].mxu0  ;;  %v3472_v19 = vadd.f32 %v3471_v16, %v8486_v61  ;;  %v3473_v20 = vpop.f32.mrb[42].mxu1 }
 0x330   :  { %v4600_v21 = vmax.f32 %v2157_v56, 0.0  ;;  %v2161_v22 = vadd.f32 %v2160_v18, %v8480_v59  ;;  %v2162_v23 = vpop.f32.mrb[43].mxu0  ;;  %v4602_v3 = vmax.f32 %v3470_v15, 0.0  ;;  %v3474_v58 = vadd.f32 %v3473_v20, %v8410_v43  ;;  %v3475_v24 = vpop.f32.mrb[43].mxu1 }
 0x331   :  { %v4601_v25 = vmax.f32 %v2159_v17, 0.0  ;;  %v2163_v27 = vadd.f32 %v2162_v23, %v8482_v60  ;;  %v4603_v7 = vmax.f32 %v3472_v19, 0.0  ;;  %v3476_v33 = vadd.f32 %v3475_v24, %v8486_v61 }
 0x332   :  { %v5643_v28 = vadd.f32 %v5642_v4, %v4600_v21  ;;  %v4604_v36 = vmax.f32 %v2161_v22, 0.0  ;;  %7556 = vmatmul.mubr.msk.bf16.gmra.mrb[148].mxu0 %vm981_vm2, %v8021_v32  ;;  %7684 = vmatmul.mubr.msk.bf16.gmra.mrb[148].mxu1 %vm981_vm2, %v8021_v32  ;;  %v5717_v26 = vadd.f32 %v5716_v9, %v4602_v3  ;;  %v4606_v45 = vmax.f32 %v3474_v58, 0.0 }
 0x333   :  { %v5680_v51 = vadd.f32 %v5679_v10, %v4601_v25  ;;  %v4605_v29 = vmax.f32 %v2163_v27, 0.0  ;;  %2434 = vmatprep.mubr.bf16.mxu0 %v8211_v6  ;;  %3747 = vmatprep.mubr.bf16.mxu1 %v8211_v6  ;;  %v5754_v31 = vadd.f32 %v5753_v11, %v4603_v7  ;;  %v4607_v37 = vmax.f32 %v3476_v33, 0.0  ;;  %v8053_v10 = vld [vmem:[%s10832_s3 + $0x168] ss:$16 sps:$4 sm:$0xff]  }
 0x334   :  { %v5644_v38 = vadd.f32 %v5643_v28, %v4604_v36  ;;  %v5718_v41 = vadd.f32 %v5717_v26, %v4606_v45  ;;  %7228 = vmatpush1.bf16.msra.mxu1 %v8053_v10  ;;  %v8029_v7 = vld [vmem:[%s10829_s0 + $0x338] sm:$0xff]  }
 0x335   :  { %v5681_v13 = vadd.f32 %v5680_v51, %v4605_v29  ;;  %v2166_v42 = vpop.f32.mrb[44].mxu0  ;;  %v5755_v57 = vadd.f32 %v5754_v31, %v4607_v37  ;;  %v3479_v5 = vpop.f32.mrb[44].mxu1 }
 0x336   :  { %v2167_v14 = vadd.f32 %v2166_v42, %v8480_v59  ;;  %v2168_v47 = vpop.f32.mrb[45].mxu0  ;;  %v3480_v49 = vadd.f32 %v3479_v5, %v8410_v43  ;;  %v3481_v50 = vpop.f32.mrb[45].mxu1 }
 0x337   :  { %v2169_v54 = vadd.f32 %v2168_v47, %v8482_v60  ;;  %v2170_v55 = vpop.f32.mrb[46].mxu0  ;;  %v3482_v63 = vadd.f32 %v3481_v50, %v8486_v61  ;;  %v3483_v1 = vpop.f32.mrb[46].mxu1 }
 0x338   :  { %v4608_v48 = vmax.f32 %v2167_v14, 0.0  ;;  %v2171_v2 = vadd.f32 %v2170_v55, %v8480_v59  ;;  %v2172_v35 = vpop.f32.mrb[47].mxu0  ;;  %v4610_v0 = vmax.f32 %v3480_v49, 0.0  ;;  %v3484_v4 = vadd.f32 %v3483_v1, %v8410_v43  ;;  %v3485_v9 = vpop.f32.mrb[47].mxu1 }
 0x339   :  { %v4609_v8 = vmax.f32 %v2169_v54, 0.0  ;;  %v2173_v11 = vadd.f32 %v2172_v35, %v8482_v60  ;;  %v4611_v12 = vmax.f32 %v3482_v63, 0.0  ;;  %v3486_v56 = vadd.f32 %v3485_v9, %v8486_v61  ;;  %v8030_v9 = vld [vmem:[%s10829_s0 + $0x340] sm:$0xff]  }
 0x33a   :  { %v5645_v46 = vadd.f32 %v5644_v38, %v4608_v48  ;;  %v4612_v32 = vmax.f32 %v2171_v2, 0.0  ;;  %7557 = vmatmul.mubr.msk.bf16.gmra.mrb[152].mxu0 %vm981_vm2, %v8028_v44  ;;  %7685 = vmatmul.mubr.msk.bf16.gmra.mrb[152].mxu1 %vm981_vm2, %v8028_v44  ;;  %v5719_v15 = vadd.f32 %v5718_v41, %v4610_v0  ;;  %v4614_v16 = vmax.f32 %v3484_v4, 0.0 }
 0x33b   :  { %v5682_v17 = vadd.f32 %v5681_v13, %v4609_v8  ;;  %v4613_v18 = vmax.f32 %v2173_v11, 0.0  ;;  %2444 = vmatprep.mubr.bf16.mxu0 %v8211_v6  ;;  %3757 = vmatprep.mubr.bf16.mxu1 %v8211_v6  ;;  %v5756_v19 = vadd.f32 %v5755_v57, %v4611_v12  ;;  %v4615_v20 = vmax.f32 %v3486_v56, 0.0 }
 0x33c   :  { %v5646_v21 = vadd.f32 %v5645_v46, %v4612_v32  ;;  %v5720_v22 = vadd.f32 %v5719_v15, %v4614_v16 }
 0x33d   :  { %v5683_v23 = vadd.f32 %v5682_v17, %v4613_v18  ;;  %v2176_v3 = vpop.f32.mrb[48].mxu0  ;;  %v5757_v58 = vadd.f32 %v5756_v19, %v4615_v20  ;;  %v3489_v24 = vpop.f32.mrb[48].mxu1 }
 0x33e   :  { %v2177_v25 = vadd.f32 %v2176_v3, %v8480_v59  ;;  %v2178_v27 = vpop.f32.mrb[49].mxu0  ;;  %v3490_v33 = vadd.f32 %v3489_v24, %v8410_v43  ;;  %v3491_v28 = vpop.f32.mrb[49].mxu1 }
 0x33f   :  { %v2179_v36 = vadd.f32 %v2178_v27, %v8482_v60  ;;  %v2180_v26 = vpop.f32.mrb[50].mxu0  ;;  %v3492_v45 = vadd.f32 %v3491_v28, %v8486_v61  ;;  %v3493_v51 = vpop.f32.mrb[50].mxu1 }
 0x340   :  { %v4616_v29 = vmax.f32 %v2177_v25, 0.0  ;;  %v2181_v31 = vadd.f32 %v2180_v26, %v8480_v59  ;;  %v2182_v37 = vpop.f32.mrb[51].mxu0  ;;  %v4618_v38 = vmax.f32 %v3490_v33, 0.0  ;;  %v3494_v41 = vadd.f32 %v3493_v51, %v8410_v43  ;;  %v3495_v13 = vpop.f32.mrb[51].mxu1 }
 0x341   :  { %v4617_v42 = vmax.f32 %v2179_v36, 0.0  ;;  %v2183_v57 = vadd.f32 %v2182_v37, %v8482_v60  ;;  %v4619_v5 = vmax.f32 %v3492_v45, 0.0  ;;  %v3496_v39 = vadd.f32 %v3495_v13, %v8486_v61  ;;  %v8031_v13 = vld [vmem:[%s10829_s0 + $0x348] sm:$0xff]  }
 0x342   :  { %v5647_v14 = vadd.f32 %v5646_v21, %v4616_v29  ;;  %v4620_v47 = vmax.f32 %v2181_v31, 0.0  ;;  %7558 = vmatmul.mubr.msk.bf16.gmra.mrb[156].mxu0 %vm981_vm2, %v8029_v7  ;;  %7686 = vmatmul.mubr.msk.bf16.gmra.mrb[156].mxu1 %vm981_vm2, %v8029_v7  ;;  %v5721_v44 = vadd.f32 %v5720_v22, %v4618_v38  ;;  %v4622_v49 = vmax.f32 %v3494_v41, 0.0 }
 0x343   :  { %v5684_v50 = vadd.f32 %v5683_v23, %v4617_v42  ;;  %v4621_v30 = vmax.f32 %v2183_v57, 0.0  ;;  %2454 = vmatprep.mubr.bf16.mxu0 %v8211_v6  ;;  %3767 = vmatprep.mubr.bf16.mxu1 %v8211_v6  ;;  %v5758_v54 = vadd.f32 %v5757_v58, %v4619_v5  ;;  %v4623_v55 = vmax.f32 %v3496_v39, 0.0 }
 0x344   :  { %v5648_v63 = vadd.f32 %v5647_v14, %v4620_v47  ;;  %v5722_v1 = vadd.f32 %v5721_v44, %v4622_v49 }
 0x345   :  { %v5685_v52 = vadd.f32 %v5684_v50, %v4621_v30  ;;  %v2186_v48 = vpop.f32.mrb[52].mxu0  ;;  %v5759_v2 = vadd.f32 %v5758_v54, %v4623_v55  ;;  %v3499_v35 = vpop.f32.mrb[52].mxu1 }
 0x346   :  { %v2187_v0 = vadd.f32 %v2186_v48, %v8480_v59  ;;  %v2188_v4 = vpop.f32.mrb[53].mxu0  ;;  %v3500_v10 = vadd.f32 %v3499_v35, %v8410_v43  ;;  %v3501_v8 = vpop.f32.mrb[53].mxu1 }
 0x347   :  { %v2189_v11 = vadd.f32 %v2188_v4, %v8482_v60  ;;  %v2190_v12 = vpop.f32.mrb[54].mxu0  ;;  %v3502_v56 = vadd.f32 %v3501_v8, %v8486_v61  ;;  %v3503_v46 = vpop.f32.mrb[54].mxu1 }
 0x348   :  { %v4624_v32 = vmax.f32 %v2187_v0, 0.0  ;;  %v2191_v15 = vadd.f32 %v2190_v12, %v8480_v59  ;;  %v2192_v16 = vpop.f32.mrb[55].mxu0  ;;  %v4626_v17 = vmax.f32 %v3500_v10, 0.0  ;;  %v3504_v18 = vadd.f32 %v3503_v46, %v8410_v43  ;;  %v3505_v19 = vpop.f32.mrb[55].mxu1 }
 0x349   :  { %v4625_v20 = vmax.f32 %v2189_v11, 0.0  ;;  %v2193_v21 = vadd.f32 %v2192_v16, %v8482_v60  ;;  %v4627_v22 = vmax.f32 %v3502_v56, 0.0  ;;  %v3506_v23 = vadd.f32 %v3505_v19, %v8486_v61 }
 0x34a   :  { %v5649_v3 = vadd.f32 %v5648_v63, %v4624_v32  ;;  %v4628_v58 = vmax.f32 %v2191_v15, 0.0  ;;  %7559 = vmatmul.mubr.msk.bf16.gmra.mrb[160].mxu0 %vm981_vm2, %v8030_v9  ;;  %7687 = vmatmul.mubr.msk.bf16.gmra.mrb[160].mxu1 %vm981_vm2, %v8030_v9  ;;  %v5723_v24 = vadd.f32 %v5722_v1, %v4626_v17  ;;  %v4630_v25 = vmax.f32 %v3504_v18, 0.0 }
 0x34b   :  { %v5686_v27 = vadd.f32 %v5685_v52, %v4625_v20  ;;  %v4629_v7 = vmax.f32 %v2193_v21, 0.0  ;;  %v5760_v33 = vadd.f32 %v5759_v2, %v4627_v22  ;;  %v4631_v28 = vmax.f32 %v3506_v23, 0.0  ;;  %2464 = vmatprep.mubr.bf16.mxu0 %v8211_v6  ;;  %3777 = vmatprep.mubr.bf16.mxu1 %v8211_v6  ;;  %v8032_v20 = vld [vmem:[%s10829_s0 + $0x350] sm:$0xff]  }
 0x34c   :  { %v5650_v36 = vadd.f32 %v5649_v3, %v4628_v58  ;;  %v5724_v26 = vadd.f32 %v5723_v24, %v4630_v25 }
 0x34d   :  { %v5687_v45 = vadd.f32 %v5686_v27, %v4629_v7  ;;  %v2196_v51 = vpop.f32.mrb[56].mxu0  ;;  %v5761_v29 = vadd.f32 %v5760_v33, %v4631_v28  ;;  %v3509_v31 = vpop.f32.mrb[56].mxu1 }
 0x34e   :  { %v2197_v37 = vadd.f32 %v2196_v51, %v8480_v59  ;;  %v2198_v38 = vpop.f32.mrb[57].mxu0  ;;  %v3510_v41 = vadd.f32 %v3509_v31, %v8410_v43  ;;  %v3511_v42 = vpop.f32.mrb[57].mxu1 }
 0x34f   :  { %v2199_v57 = vadd.f32 %v2198_v38, %v8482_v60  ;;  %v2200_v5 = vpop.f32.mrb[58].mxu0  ;;  %v3512_v39 = vadd.f32 %v3511_v42, %v8486_v61  ;;  %v3513_v14 = vpop.f32.mrb[58].mxu1 }
 0x350   :  { %v4632_v47 = vmax.f32 %v2197_v37, 0.0  ;;  %v2201_v44 = vadd.f32 %v2200_v5, %v8480_v59  ;;  %v2202_v49 = vpop.f32.mrb[59].mxu0  ;;  %v4634_v50 = vmax.f32 %v3510_v41, 0.0  ;;  %v3514_v30 = vadd.f32 %v3513_v14, %v8410_v43  ;;  %v3515_v54 = vpop.f32.mrb[59].mxu1 }
 0x351   :  { %v4633_v55 = vmax.f32 %v2199_v57, 0.0  ;;  %v2203_v63 = vadd.f32 %v2202_v49, %v8482_v60  ;;  %v4635_v1 = vmax.f32 %v3512_v39, 0.0  ;;  %v3516_v52 = vadd.f32 %v3515_v54, %v8486_v61 }
 0x352   :  { %v5651_v48 = vadd.f32 %v5650_v36, %v4632_v47  ;;  %v4636_v2 = vmax.f32 %v2201_v44, 0.0  ;;  %v5725_v35 = vadd.f32 %v5724_v26, %v4634_v50  ;;  %7560 = vmatmul.mubr.msk.bf16.gmra.mrb[164].mxu0 %vm981_vm2, %v8031_v13  ;;  %7688 = vmatmul.mubr.msk.bf16.gmra.mrb[164].mxu1 %vm981_vm2, %v8031_v13  ;;  %v4638_v0 = vmax.f32 %v3514_v30, 0.0 }
 0x353   :  { %v5688_v4 = vadd.f32 %v5687_v45, %v4633_v55  ;;  %v4637_v9 = vmax.f32 %v2203_v63, 0.0  ;;  %v5762_v10 = vadd.f32 %v5761_v29, %v4635_v1  ;;  %v4639_v8 = vmax.f32 %v3516_v52, 0.0  ;;  %2474 = vmatprep.mubr.bf16.mxu0 %v8211_v6  ;;  %3787 = vmatprep.mubr.bf16.mxu1 %v8211_v6  ;;  %v8033_v55 = vld [vmem:[%s10829_s0 + $0x358] sm:$0xff]  }
 0x354   :  { %v5652_v11 = vadd.f32 %v5651_v48, %v4636_v2  ;;  %v5726_v12 = vadd.f32 %v5725_v35, %v4638_v0 }
 0x355   :  { %v5689_v56 = vadd.f32 %v5688_v4, %v4637_v9  ;;  %v5763_v46 = vadd.f32 %v5762_v10, %v4639_v8  ;;  %v2206_v32 = vpop.f32.mrb[60].mxu0  ;;  %v3519_v15 = vpop.f32.mrb[60].mxu1 }
 0x356   :  { %v2207_v16 = vadd.f32 %v2206_v32, %v8480_v59  ;;  %v3520_v17 = vadd.f32 %v3519_v15, %v8410_v43  ;;  %v2208_v18 = vpop.f32.mrb[61].mxu0  ;;  %v3521_v19 = vpop.f32.mrb[61].mxu1 }
 0x357   :  { %v2209_v21 = vadd.f32 %v2208_v18, %v8482_v60  ;;  %v3522_v22 = vadd.f32 %v3521_v19, %v8486_v61  ;;  %v2210_v23 = vpop.f32.mrb[62].mxu0  ;;  %v3523_v3 = vpop.f32.mrb[62].mxu1 }
 0x358   :  { %v4640_v58 = vmax.f32 %v2207_v16, 0.0  ;;  %v4642_v24 = vmax.f32 %v3520_v17, 0.0  ;;  %v2211_v25 = vadd.f32 %v2210_v23, %v8480_v59  ;;  %v3524_v27 = vadd.f32 %v3523_v3, %v8410_v43  ;;  %v2212_v7 = vpop.f32.mrb[63].mxu0  ;;  %v3525_v33 = vpop.f32.mrb[63].mxu1 }
 0x359   :  { %v4641_v28 = vmax.f32 %v2209_v21, 0.0  ;;  %v4643_v36 = vmax.f32 %v3522_v22, 0.0  ;;  %v2213_v26 = vadd.f32 %v2212_v7, %v8482_v60  ;;  %v3526_v45 = vadd.f32 %v3525_v33, %v8486_v61 }
 0x35a   :  { %v5653_v51 = vadd.f32 %v5652_v11, %v4640_v58  ;;  %v5727_v29 = vadd.f32 %v5726_v12, %v4642_v24  ;;  %v4644_v31 = vmax.f32 %v2211_v25, 0.0  ;;  %v4646_v37 = vmax.f32 %v3524_v27, 0.0  ;;  %7561 = vmatmul.mubr.msk.bf16.gmra.mrb[168].mxu0 %vm981_vm2, %v8032_v20  ;;  %7689 = vmatmul.mubr.msk.bf16.gmra.mrb[168].mxu1 %vm981_vm2, %v8032_v20 }
 0x35b   :  { %v5690_v38 = vadd.f32 %v5689_v56, %v4641_v28  ;;  %v5764_v41 = vadd.f32 %v5763_v46, %v4643_v36  ;;  %v4645_v13 = vmax.f32 %v2213_v26, 0.0  ;;  %v4647_v42 = vmax.f32 %v3526_v45, 0.0  ;;  %2484 = vmatprep.mubr.bf16.mxu0 %v8211_v6  ;;  %3797 = vmatprep.mubr.bf16.mxu1 %v8211_v6 }
 0x35c   :  { %v5654_v57 = vadd.f32 %v5653_v51, %v4644_v31  ;;  %v5728_v5 = vadd.f32 %v5727_v29, %v4646_v37 }
 0x35d   :  { %v5691_v39 = vadd.f32 %v5690_v38, %v4645_v13  ;;  %v5765_v14 = vadd.f32 %v5764_v41, %v4647_v42  ;;  %v2216_v47 = vpop.f32.mrb[64].mxu0  ;;  %v3529_v44 = vpop.f32.mrb[64].mxu1  ;;  %v8034_v38 = vld [vmem:[%s10829_s0 + $0x360] sm:$0xff]  }
 0x35e   :  { %v5655_v49 = vrot.slane %v5654_v57, 4  ;;  %v5729_v50 = vrot.slane %v5728_v5, 4  ;;  %v2217_v30 = vadd.f32 %v2216_v47, %v8480_v59  ;;  %v2218_v54 = vpop.f32.mrb[65].mxu0  ;;  %v9964_v63 = vadd.f32 %v3529_v44, %v8410_v43  ;;  %v3531_v1 = vpop.f32.mrb[65].mxu1 }
 0x35f   :  { %v5692_v52 = vrot.slane %v5691_v39, 4  ;;  %v5766_v48 = vrot.slane %v5765_v14, 4  ;;  %v2219_v2 = vadd.f32 %v2218_v54, %v8482_v60  ;;  %v2220_v35 = vpop.f32.mrb[66].mxu0  ;;  %v9968_v0 = vadd.f32 %v3531_v1, %v8486_v61  ;;  %v3533_v4 = vpop.f32.mrb[66].mxu1 }
 0x360   :  { %v5656_v9 = vadd.f32 %v5655_v49, %v5654_v57  ;;  %v5730_v10 = vadd.f32 %v5729_v50, %v5728_v5  ;;  %v4648_v8 = vmax.f32 %v2217_v30, 0.0  ;;  %v2221_v11 = vadd.f32 %v2220_v35, %v8480_v59  ;;  %v2222_v12 = vpop.f32.mrb[67].mxu0  ;;  %v3535_v56 = vpop.f32.mrb[67].mxu1 }
 0x361   :  { %v5693_v46 = vadd.f32 %v5692_v52, %v5691_v39  ;;  %v5767_v32 = vadd.f32 %v5766_v48, %v5765_v14  ;;  %v4649_v15 = vmax.f32 %v2219_v2, 0.0  ;;  %v2223_v16 = vadd.f32 %v2222_v12, %v8482_v60 }
 0x362   :  { %v5657_v17 = vrot.slane %v5656_v9, 2  ;;  %v5731_v18 = vrot.slane %v5730_v10, 2  ;;  %v4652_v19 = vmax.f32 %v2221_v11, 0.0  ;;  %7562 = vmatmul.mubr.msk.bf16.gmra.mrb[172].mxu0 %vm981_vm2, %v8033_v55  ;;  %7690 = vmatmul.mubr.msk.bf16.gmra.mrb[172].mxu1 %vm981_vm2, %v8033_v55  ;;  %v4650_v20 = vmax.f32 %v9964_v63, 0.0 }
 0x363   :  { %v5694_v21 = vrot.slane %v5693_v46, 2  ;;  %v5768_v22 = vrot.slane %v5767_v32, 2  ;;  %v4653_v23 = vmax.f32 %v2223_v16, 0.0  ;;  %2494 = vmatprep.mubr.bf16.mxu0 %v8211_v6  ;;  %3807 = vmatprep.mubr.bf16.mxu1 %v8211_v6  ;;  %v4651_v3 = vmax.f32 %v9968_v0, 0.0 }
 0x364   :  { %v5658_v58 = vadd.f32 %v5657_v17, %v5656_v9  ;;  %v5732_v24 = vadd.f32 %v5731_v18, %v5730_v10  ;;  %v5772_v25 = vadd.f32 %v4652_v19, %v4648_v8  ;;  %v3534_v27 = vadd.f32 %v3533_v4, %v8410_v43 }
 0x365   :  { %v5695_v7 = vadd.f32 %v5694_v21, %v5693_v46  ;;  %v5769_v33 = vadd.f32 %v5768_v22, %v5767_v32  ;;  %v5809_v28 = vadd.f32 %v4653_v23, %v4649_v15  ;;  %v2226_v36 = vpop.f32.mrb[68].mxu0  ;;  %v3536_v26 = vadd.f32 %v3535_v56, %v8486_v61  ;;  %v3539_v45 = vpop.f32.mrb[68].mxu1 }
 0x366   :  { %v5659_v51 = vrot.slane %v5658_v58, 1  ;;  %v5733_v29 = vrot.slane %v5732_v24, 1  ;;  %v2227_v31 = vadd.f32 %v2226_v36, %v8480_v59  ;;  %v2228_v37 = vpop.f32.mrb[69].mxu0  ;;  %v4654_v41 = vmax.f32 %v3534_v27, 0.0  ;;  %v3541_v13 = vpop.f32.mrb[69].mxu1 }
 0x367   :  { %v5696_v42 = vrot.slane %v5695_v7, 1  ;;  %v5770_v57 = vrot.slane %v5769_v33, 1  ;;  %v2229_v5 = vadd.f32 %v2228_v37, %v8482_v60  ;;  %v2230_v39 = vpop.f32.mrb[70].mxu0  ;;  %v4655_v14 = vmax.f32 %v3536_v26, 0.0  ;;  %v3543_v47 = vpop.f32.mrb[70].mxu1 }
 0x368   :  { %v5660_v44 = vadd.f32 %v5659_v51, %v5658_v58  ;;  %v5734_v49 = vadd.f32 %v5733_v29, %v5732_v24  ;;  %v4656_v50 = vmax.f32 %v2227_v31, 0.0  ;;  %v2231_v30 = vadd.f32 %v2230_v39, %v8480_v59  ;;  %v2232_v54 = vpop.f32.mrb[71].mxu0  ;;  %v3545_v55 = vpop.f32.mrb[71].mxu1 }
 0x369   :  { %v5697_v63 = vadd.f32 %v5696_v42, %v5695_v7  ;;  %v5771_v1 = vadd.f32 %v5770_v57, %v5769_v33  ;;  %v4657_v52 = vmax.f32 %v2229_v5, 0.0  ;;  %v2233_v48 = vadd.f32 %v2232_v54, %v8482_v60 }
 0x36a   :  { %v6232_v2 = vpack.c.bf16 %v5660_v44, %v5660_v44  ;;  %v6234_v35 = vpack.c.bf16 %v5734_v49, %v5734_v49  ;;  %v5773_v0 = vadd.f32 %v5772_v25, %v4656_v50  ;;  %v4660_v4 = vmax.f32 %v2231_v30, 0.0  ;;  %7563 = vmatmul.mubr.msk.bf16.gmra.mrb[176].mxu0 %vm981_vm2, %v8034_v38  ;;  %7691 = vmatmul.mubr.msk.bf16.gmra.mrb[176].mxu1 %vm981_vm2, %v8034_v38 }
 0x36b   :  { %v6233_v9 = vpack.c.bf16 %v5697_v63, %v5697_v63  ;;  %v6235_v10 = vpack.c.bf16 %v5771_v1, %v5771_v1  ;;  %v5810_v8 = vadd.f32 %v5809_v28, %v4657_v52  ;;  %v4661_v11 = vmax.f32 %v2233_v48, 0.0  ;;  %2504 = vmatprep.mubr.bf16.mxu0 %v8211_v6  ;;  %3817 = vmatprep.mubr.bf16.mxu1 %v8211_v6  ;;  %v8042_v52 = vld [vmem:[%s10829_s0 + $0x370] sm:$0xff]  }
 0x36c   :  { %v6424_v12 = vunpack.c.l.b16 %v6232_v2  ;;  %v6426_v56 = vunpack.c.l.b16 %v6234_v35  ;;  %v5774_v46 = vadd.f32 %v5773_v0, %v4660_v4  ;;  %v5846_v32 = vadd.f32 %v4654_v41, %v4650_v20  ;;  %v8035_v20 = vld [vmem:[%s10829_s0 + $0x368] sm:$0xff]   ;;  %v8064_v0 = vld [vmem:[%s10832_s3 + $0x180] ss:$16 sps:$4 sm:$0xff]  }
 0x36d   :  { %v6425_v15 = vunpack.c.l.b16 %v6233_v9  ;;  %v9991_v16 = vunpack.c.l.b16 %v6235_v10  ;;  %v5811_v17 = vadd.f32 %v5810_v8, %v4661_v11  ;;  %v2236_v18 = vpop.f32.mrb[72].mxu0  ;;  %v5883_v19 = vadd.f32 %v4655_v14, %v4651_v3  ;;  %v3549_v21 = vpop.f32.mrb[72].mxu1 }
 0x36e   :  { %v9995_v22 = vsel %vm6446_vm6, %v6424_v12, %v9727_v53  ;;  %v9999_v23 = vsel %vm6446_vm6, %v6426_v56, %v9756_v40  ;;  %v2237_v58 = vadd.f32 %v2236_v18, %v8480_v59  ;;  %v2238_v24 = vpop.f32.mrb[73].mxu0  ;;  %v3540_v25 = vadd.f32 %v3539_v45, %v8410_v43  ;;  %v3551_v27 = vpop.f32.mrb[73].mxu1 }
 0x36f   :  { %v2239_v3 = vadd.f32 %v2238_v24, %v8482_v60  ;;  %v2240_v7 = vpop.f32.mrb[74].mxu0  ;;  %v3542_v53 = vadd.f32 %v3541_v13, %v8486_v61  ;;  %v3544_v33 = vadd.f32 %v3543_v47, %v8410_v43  ;;  %v3546_v40 = vadd.f32 %v3545_v55, %v8486_v61  ;;  %v3553_v28 = vpop.f32.mrb[74].mxu1 }
 0x370   :  { %v4664_v36 = vmax.f32 %v2237_v58, 0.0  ;;  %v2241_v26 = vadd.f32 %v2240_v7, %v8480_v59  ;;  %v2242_v51 = vpop.f32.mrb[75].mxu0  ;;  %v4658_v29 = vmax.f32 %v3540_v25, 0.0  ;;  %v3550_v31 = vadd.f32 %v3549_v21, %v8410_v43  ;;  %v3555_v37 = vpop.f32.mrb[75].mxu1 }
 0x371   :  { %v4665_v45 = vmax.f32 %v2239_v3, 0.0  ;;  %v2243_v38 = vadd.f32 %v2242_v51, %v8482_v60  ;;  %v4659_v41 = vmax.f32 %v3542_v53, 0.0  ;;  %v4662_v42 = vmax.f32 %v3544_v33, 0.0  ;;  %v8069_v3 = vld [vmem:[%s10832_s3 + $0x18c] ss:$16 sps:$4 sm:$0xff]  }
 0x372   :  { %v5775_v57 = vadd.f32 %v5774_v46, %v4664_v36  ;;  %v4668_v13 = vmax.f32 %v2241_v26, 0.0  ;;  %7564 = vmatmul.mubr.msk.bf16.gmra.mrb[180].mxu0 %vm981_vm2, %v8035_v20  ;;  %7692 = vmatmul.mubr.msk.bf16.gmra.mrb[180].mxu1 %vm981_vm2, %v8035_v20  ;;  %v5847_v5 = vadd.f32 %v5846_v32, %v4658_v29  ;;  %v4663_v39 = vmax.f32 %v3546_v40, 0.0  ;;  %v8066_v46 = vld [vmem:[%s10832_s3 + $0x184] ss:$16 sps:$4 sm:$0xff]  }
 0x373   :  { %v5812_v14 = vadd.f32 %v5811_v17, %v4665_v45  ;;  %v4669_v47 = vmax.f32 %v2243_v38, 0.0  ;;  %2514 = vmatprep.mubr.bf16.mxu0 %v8211_v6  ;;  %3827 = vmatprep.mubr.bf16.mxu1 %v8211_v6  ;;  %v5884_v44 = vadd.f32 %v5883_v19, %v4659_v41  ;;  %v4666_v49 = vmax.f32 %v3550_v31, 0.0 }
 0x374   :  { %v5776_v50 = vadd.f32 %v5775_v57, %v4668_v13  ;;  %v5848_v30 = vadd.f32 %v5847_v5, %v4662_v42  ;;  %v3552_v54 = vadd.f32 %v3551_v27, %v8486_v61  ;;  %v3554_v55 = vadd.f32 %v3553_v28, %v8410_v43  ;;  %7147 = vmatprep.subr.bf16.mxu0 %v8066_v46  ;;  %v8067_v28 = vld [vmem:[%s10832_s3 + $0x188] ss:$16 sps:$4 sm:$0xff]  }
 0x375   :  { %v5813_v63 = vadd.f32 %v5812_v14, %v4669_v47  ;;  %v2246_v1 = vpop.f32.mrb[76].mxu0  ;;  %v5885_v48 = vadd.f32 %v5884_v44, %v4663_v39  ;;  %v3556_v2 = vadd.f32 %v3555_v37, %v8486_v61  ;;  %v3559_v35 = vpop.f32.mrb[76].mxu1  ;;  %v10028_v4 = vsel %vm6446_vm6, %v6425_v15, %v9761_v62  ;;  %7148 = vmatpush1.bf16.msra.mxu0 %v8064_v0 }
 0x376   :  { %v2247_v9 = vadd.f32 %v2246_v1, %v8480_v59  ;;  %v2248_v10 = vpop.f32.mrb[77].mxu0  ;;  %v5849_v8 = vadd.f32 %v5848_v30, %v4666_v49  ;;  %v4667_v11 = vmax.f32 %v3552_v54, 0.0  ;;  %v4670_v12 = vmax.f32 %v3554_v55, 0.0  ;;  %v3561_v56 = vpop.f32.mrb[77].mxu1  ;;  %7229 = vmatprep.subr.bf16.mxu1 %v8069_v3 }
 0x377   :  { %v2249_v32 = vadd.f32 %v2248_v10, %v8482_v60  ;;  %v2250_v17 = vpop.f32.mrb[78].mxu0  ;;  %v4671_v18 = vmax.f32 %v3556_v2, 0.0  ;;  %v3560_v19 = vadd.f32 %v3559_v35, %v8410_v43  ;;  %v3562_v62 = vadd.f32 %v3561_v56, %v8486_v61  ;;  %v3563_v15 = vpop.f32.mrb[78].mxu1  ;;  %7230 = vmatpush1.bf16.msra.mxu1 %v8067_v28 }
 0x378   :  { %v4672_v21 = vmax.f32 %v2247_v9, 0.0  ;;  %v2251_v58 = vadd.f32 %v2250_v17, %v8480_v59  ;;  %v2252_v24 = vpop.f32.mrb[79].mxu0  ;;  %v5886_v20 = vadd.f32 %v5885_v48, %v4667_v11  ;;  %v5850_v25 = vadd.f32 %v5849_v8, %v4670_v12  ;;  %v3565_v27 = vpop.f32.mrb[79].mxu1 }
 0x379   :  { %v4673_v7 = vmax.f32 %v2249_v32, 0.0  ;;  %v2253_v53 = vadd.f32 %v2252_v24, %v8482_v60  ;;  %v4674_v33 = vmax.f32 %v3560_v19, 0.0  ;;  %v4675_v40 = vmax.f32 %v3562_v62, 0.0 }
 0x37a   :  { %v5777_v36 = vadd.f32 %v5776_v50, %v4672_v21  ;;  %v4676_v26 = vmax.f32 %v2251_v58, 0.0  ;;  %7565 = vmatmul.mubr.msk.bf16.gmra.mrb[184].mxu0 %vm981_vm2, %v8042_v52  ;;  %7693 = vmatmul.mubr.msk.bf16.gmra.mrb[184].mxu1 %vm981_vm2, %v8042_v52  ;;  %v5887_v51 = vadd.f32 %v5886_v20, %v4671_v18  ;;  %v3564_v29 = vadd.f32 %v3563_v15, %v8410_v43  ;;  %v8043_v50 = vld [vmem:[%s10829_s0 + $0x378] sm:$0xff]  }
 0x37b   :  { %v5814_v31 = vadd.f32 %v5813_v63, %v4673_v7  ;;  %v4677_v37 = vmax.f32 %v2253_v53, 0.0  ;;  %2524 = vmatprep.mubr.bf16.mxu0 %v8211_v6  ;;  %3837 = vmatprep.mubr.bf16.mxu1 %v8211_v6  ;;  %v5851_v45 = vadd.f32 %v5850_v25, %v4674_v33  ;;  %v3566_v38 = vadd.f32 %v3565_v27, %v8486_v61  ;;  %v8044_v33 = vld [vmem:[%s10829_s0 + $0x380] sm:$0xff]  }
 0x37c   :  { %v5778_v41 = vadd.f32 %v5777_v36, %v4676_v26  ;;  %v5888_v42 = vadd.f32 %v5887_v51, %v4675_v40  ;;  %v4678_v57 = vmax.f32 %v3564_v29, 0.0  ;;  %v10054_v47 = vsel %vm6446_vm6, %v9991_v16, %v9765_v34 }
 0x37d   :  { %v5815_v13 = vadd.f32 %v5814_v31, %v4677_v37  ;;  %v2256_v5 = vpop.f32.mrb[80].mxu0  ;;  %v4679_v39 = vmax.f32 %v3566_v38, 0.0  ;;  %v3569_v14 = vpop.f32.mrb[80].mxu1 }
 0x37e   :  { %v2257_v44 = vadd.f32 %v2256_v5, %v8480_v59  ;;  %v2258_v49 = vpop.f32.mrb[81].mxu0  ;;  %v5852_v30 = vadd.f32 %v5851_v45, %v4678_v57  ;;  %v3570_v54 = vadd.f32 %v3569_v14, %v8410_v43  ;;  %v3571_v55 = vpop.f32.mrb[81].mxu1 }
 0x37f   :  { %v2259_v63 = vadd.f32 %v2258_v49, %v8482_v60  ;;  %v2260_v1 = vpop.f32.mrb[82].mxu0  ;;  %v5889_v52 = vadd.f32 %v5888_v42, %v4679_v39  ;;  %v3572_v48 = vadd.f32 %v3571_v55, %v8486_v61  ;;  %v3573_v2 = vpop.f32.mrb[82].mxu1 }
 0x380   :  { %v4680_v34 = vmax.f32 %v2257_v44, 0.0  ;;  %v2261_v16 = vadd.f32 %v2260_v1, %v8480_v59  ;;  %v2262_v35 = vpop.f32.mrb[83].mxu0  ;;  %v4682_v0 = vmax.f32 %v3570_v54, 0.0  ;;  %v3574_v9 = vadd.f32 %v3573_v2, %v8410_v43  ;;  %v3575_v10 = vpop.f32.mrb[83].mxu1 }
 0x381   :  { %v4681_v8 = vmax.f32 %v2259_v63, 0.0  ;;  %v2263_v11 = vadd.f32 %v2262_v35, %v8482_v60  ;;  %v4683_v12 = vmax.f32 %v3572_v48, 0.0  ;;  %v3576_v56 = vadd.f32 %v3575_v10, %v8486_v61 }
 0x382   :  { %v5779_v46 = vadd.f32 %v5778_v41, %v4680_v34  ;;  %v4684_v32 = vmax.f32 %v2261_v16, 0.0  ;;  %7566 = vmatmul.mubr.msk.bf16.gmra.mrb[188].mxu0 %vm981_vm2, %v8043_v50  ;;  %7694 = vmatmul.mubr.msk.bf16.gmra.mrb[188].mxu1 %vm981_vm2, %v8043_v50  ;;  %v5853_v17 = vadd.f32 %v5852_v30, %v4682_v0  ;;  %v4686_v18 = vmax.f32 %v3574_v9, 0.0  ;;  %v8045_v9 = vld [vmem:[%s10829_s0 + $0x388] sm:$0xff]  }
 0x383   :  { %v5816_v19 = vadd.f32 %v5815_v13, %v4681_v8  ;;  %v4685_v62 = vmax.f32 %v2263_v11, 0.0  ;;  %2534 = vmatprep.mubr.bf16.mxu0 %v8211_v6  ;;  %3847 = vmatprep.mubr.bf16.mxu1 %v8211_v6  ;;  %v5890_v15 = vadd.f32 %v5889_v52, %v4683_v12  ;;  %v4687_v21 = vmax.f32 %v3576_v56, 0.0 }
 0x384   :  { %v5780_v58 = vadd.f32 %v5779_v46, %v4684_v32  ;;  %v5854_v24 = vadd.f32 %v5853_v17, %v4686_v18 }
 0x385   :  { %v5817_v20 = vadd.f32 %v5816_v19, %v4685_v62  ;;  %v2266_v25 = vpop.f32.mrb[84].mxu0  ;;  %v5891_v27 = vadd.f32 %v5890_v15, %v4687_v21  ;;  %v3579_v3 = vpop.f32.mrb[84].mxu1 }
 0x386   :  { %v2267_v7 = vadd.f32 %v2266_v25, %v8480_v59  ;;  %v2268_v53 = vpop.f32.mrb[85].mxu0  ;;  %v3580_v40 = vadd.f32 %v3579_v3, %v8410_v43  ;;  %v3581_v28 = vpop.f32.mrb[85].mxu1 }
 0x387   :  { %v2269_v36 = vadd.f32 %v2268_v53, %v8482_v60  ;;  %v2270_v26 = vpop.f32.mrb[86].mxu0  ;;  %v3582_v51 = vadd.f32 %v3581_v28, %v8486_v61  ;;  %v3583_v29 = vpop.f32.mrb[86].mxu1 }
 0x388   :  { %v4688_v31 = vmax.f32 %v2267_v7, 0.0  ;;  %v2271_v37 = vadd.f32 %v2270_v26, %v8480_v59  ;;  %v2272_v45 = vpop.f32.mrb[87].mxu0  ;;  %v4690_v38 = vmax.f32 %v3580_v40, 0.0  ;;  %v3584_v41 = vadd.f32 %v3583_v29, %v8410_v43  ;;  %v3585_v42 = vpop.f32.mrb[87].mxu1 }
 0x389   :  { %v4689_v57 = vmax.f32 %v2269_v36, 0.0  ;;  %v2273_v13 = vadd.f32 %v2272_v45, %v8482_v60  ;;  %v4691_v5 = vmax.f32 %v3582_v51, 0.0  ;;  %v3586_v39 = vadd.f32 %v3585_v42, %v8486_v61 }
 0x38a   :  { %v5781_v14 = vadd.f32 %v5780_v58, %v4688_v31  ;;  %v4692_v44 = vmax.f32 %v2271_v37, 0.0  ;;  %7567 = vmatmul.mubr.msk.bf16.gmra.mrb[192].mxu0 %vm981_vm2, %v8044_v33  ;;  %7695 = vmatmul.mubr.msk.bf16.gmra.mrb[192].mxu1 %vm981_vm2, %v8044_v33  ;;  %v5855_v49 = vadd.f32 %v5854_v24, %v4690_v38  ;;  %v4694_v50 = vmax.f32 %v3584_v41, 0.0  ;;  %v8046_v41 = vld [vmem:[%s10829_s0 + $0x390] sm:$0xff]  }
 0x38b   :  { %v5818_v30 = vadd.f32 %v5817_v20, %v4689_v57  ;;  %v4693_v54 = vmax.f32 %v2273_v13, 0.0  ;;  %2544 = vmatprep.mubr.bf16.mxu0 %v8211_v6  ;;  %3857 = vmatprep.mubr.bf16.mxu1 %v8211_v6  ;;  %v5892_v55 = vadd.f32 %v5891_v27, %v4691_v5  ;;  %v4695_v63 = vmax.f32 %v3586_v39, 0.0 }
 0x38c   :  { %v5782_v1 = vadd.f32 %v5781_v14, %v4692_v44  ;;  %v5856_v52 = vadd.f32 %v5855_v49, %v4694_v50 }
 0x38d   :  { %v5819_v48 = vadd.f32 %v5818_v30, %v4693_v54  ;;  %v2276_v2 = vpop.f32.mrb[88].mxu0  ;;  %v5893_v34 = vadd.f32 %v5892_v55, %v4695_v63  ;;  %v3589_v16 = vpop.f32.mrb[88].mxu1 }
 0x38e   :  { %v2277_v35 = vadd.f32 %v2276_v2, %v8480_v59  ;;  %v2278_v0 = vpop.f32.mrb[89].mxu0  ;;  %v3590_v10 = vadd.f32 %v3589_v16, %v8410_v43  ;;  %v3591_v8 = vpop.f32.mrb[89].mxu1 }
 0x38f   :  { %v2279_v11 = vadd.f32 %v2278_v0, %v8482_v60  ;;  %v2280_v12 = vpop.f32.mrb[90].mxu0  ;;  %v3592_v56 = vadd.f32 %v3591_v8, %v8486_v61  ;;  %v3593_v46 = vpop.f32.mrb[90].mxu1 }
 0x390   :  { %v4696_v32 = vmax.f32 %v2277_v35, 0.0  ;;  %v2281_v17 = vadd.f32 %v2280_v12, %v8480_v59  ;;  %v2282_v18 = vpop.f32.mrb[91].mxu0  ;;  %v4698_v19 = vmax.f32 %v3590_v10, 0.0  ;;  %v3594_v62 = vadd.f32 %v3593_v46, %v8410_v43  ;;  %v3595_v15 = vpop.f32.mrb[91].mxu1 }
 0x391   :  { %v4697_v21 = vmax.f32 %v2279_v11, 0.0  ;;  %v2283_v58 = vadd.f32 %v2282_v18, %v8482_v60  ;;  %v4699_v24 = vmax.f32 %v3592_v56, 0.0  ;;  %v3596_v20 = vadd.f32 %v3595_v15, %v8486_v61 }
 0x392   :  { %v5783_v25 = vadd.f32 %v5782_v1, %v4696_v32  ;;  %v4700_v27 = vmax.f32 %v2281_v17, 0.0  ;;  %7568 = vmatmul.mubr.msk.bf16.gmra.mrb[196].mxu0 %vm981_vm2, %v8045_v9  ;;  %7696 = vmatmul.mubr.msk.bf16.gmra.mrb[196].mxu1 %vm981_vm2, %v8045_v9  ;;  %v5857_v3 = vadd.f32 %v5856_v52, %v4698_v19  ;;  %v4702_v7 = vmax.f32 %v3594_v62, 0.0  ;;  %v8047_v62 = vld [vmem:[%s10829_s0 + $0x398] sm:$0xff]  }
 0x393   :  { %v5820_v53 = vadd.f32 %v5819_v48, %v4697_v21  ;;  %v4701_v33 = vmax.f32 %v2283_v58, 0.0  ;;  %2554 = vmatprep.mubr.bf16.mxu0 %v8211_v6  ;;  %3867 = vmatprep.mubr.bf16.mxu1 %v8211_v6  ;;  %v5894_v40 = vadd.f32 %v5893_v34, %v4699_v24  ;;  %v4703_v28 = vmax.f32 %v3596_v20, 0.0 }
 0x394   :  { %v5784_v36 = vadd.f32 %v5783_v25, %v4700_v27  ;;  %v5858_v26 = vadd.f32 %v5857_v3, %v4702_v7 }
 0x395   :  { %v5821_v51 = vadd.f32 %v5820_v53, %v4701_v33  ;;  %v2286_v29 = vpop.f32.mrb[92].mxu0  ;;  %v5895_v31 = vadd.f32 %v5894_v40, %v4703_v28  ;;  %v3599_v37 = vpop.f32.mrb[92].mxu1 }
 0x396   :  { %v2287_v45 = vadd.f32 %v2286_v29, %v8480_v59  ;;  %v2288_v38 = vpop.f32.mrb[93].mxu0  ;;  %v3600_v42 = vadd.f32 %v3599_v37, %v8410_v43  ;;  %v3601_v57 = vpop.f32.mrb[93].mxu1 }
 0x397   :  { %v2289_v13 = vadd.f32 %v2288_v38, %v8482_v60  ;;  %v2290_v5 = vpop.f32.mrb[94].mxu0  ;;  %v3602_v39 = vadd.f32 %v3601_v57, %v8486_v61  ;;  %v3603_v14 = vpop.f32.mrb[94].mxu1 }
 0x398   :  { %v4704_v44 = vmax.f32 %v2287_v45, 0.0  ;;  %v2291_v49 = vadd.f32 %v2290_v5, %v8480_v59  ;;  %v2292_v50 = vpop.f32.mrb[95].mxu0  ;;  %v4706_v30 = vmax.f32 %v3600_v42, 0.0  ;;  %v3604_v54 = vadd.f32 %v3603_v14, %v8410_v43  ;;  %v3605_v55 = vpop.f32.mrb[95].mxu1 }
 0x399   :  { %v4705_v63 = vmax.f32 %v2289_v13, 0.0  ;;  %v2293_v1 = vadd.f32 %v2292_v50, %v8482_v60  ;;  %v4707_v52 = vmax.f32 %v3602_v39, 0.0  ;;  %v3606_v48 = vadd.f32 %v3605_v55, %v8486_v61 }
 0x39a   :  { %v5785_v2 = vadd.f32 %v5784_v36, %v4704_v44  ;;  %v4708_v34 = vmax.f32 %v2291_v49, 0.0  ;;  %7569 = vmatmul.mubr.msk.bf16.gmra.mrb[200].mxu0 %vm981_vm2, %v8046_v41  ;;  %7697 = vmatmul.mubr.msk.bf16.gmra.mrb[200].mxu1 %vm981_vm2, %v8046_v41  ;;  %v5859_v16 = vadd.f32 %v5858_v26, %v4706_v30  ;;  %v4710_v35 = vmax.f32 %v3604_v54, 0.0  ;;  %v8048_v54 = vld [vmem:[%s10829_s0 + $0x3a0] sm:$0xff]  }
 0x39b   :  { %v5822_v0 = vadd.f32 %v5821_v51, %v4705_v63  ;;  %v4709_v9 = vmax.f32 %v2293_v1, 0.0  ;;  %2564 = vmatprep.mubr.bf16.mxu0 %v8211_v6  ;;  %3877 = vmatprep.mubr.bf16.mxu1 %v8211_v6  ;;  %v5896_v10 = vadd.f32 %v5895_v31, %v4707_v52  ;;  %v4711_v8 = vmax.f32 %v3606_v48, 0.0 }
 0x39c   :  { %v5786_v11 = vadd.f32 %v5785_v2, %v4708_v34  ;;  %v5860_v12 = vadd.f32 %v5859_v16, %v4710_v35 }
 0x39d   :  { %v5823_v56 = vadd.f32 %v5822_v0, %v4709_v9  ;;  %v2296_v46 = vpop.f32.mrb[96].mxu0  ;;  %v5897_v32 = vadd.f32 %v5896_v10, %v4711_v8  ;;  %v3609_v17 = vpop.f32.mrb[96].mxu1 }
 0x39e   :  { %v2297_v18 = vadd.f32 %v2296_v46, %v8480_v59  ;;  %v2298_v19 = vpop.f32.mrb[97].mxu0  ;;  %v3610_v15 = vadd.f32 %v3609_v17, %v8410_v43  ;;  %v3611_v21 = vpop.f32.mrb[97].mxu1 }
 0x39f   :  { %v2299_v58 = vadd.f32 %v2298_v19, %v8482_v60  ;;  %v2300_v24 = vpop.f32.mrb[98].mxu0  ;;  %v3612_v20 = vadd.f32 %v3611_v21, %v8486_v61  ;;  %v3613_v25 = vpop.f32.mrb[98].mxu1 }
 0x3a0   :  { %v4712_v27 = vmax.f32 %v2297_v18, 0.0  ;;  %v2301_v3 = vadd.f32 %v2300_v24, %v8480_v59  ;;  %v2302_v7 = vpop.f32.mrb[99].mxu0  ;;  %v4714_v53 = vmax.f32 %v3610_v15, 0.0  ;;  %v3614_v33 = vadd.f32 %v3613_v25, %v8410_v43  ;;  %v3615_v40 = vpop.f32.mrb[99].mxu1 }
 0x3a1   :  { %v4713_v28 = vmax.f32 %v2299_v58, 0.0  ;;  %v2303_v36 = vadd.f32 %v2302_v7, %v8482_v60  ;;  %v4715_v26 = vmax.f32 %v3612_v20, 0.0  ;;  %v3616_v51 = vadd.f32 %v3615_v40, %v8486_v61 }
 0x3a2   :  { %v5787_v29 = vadd.f32 %v5786_v11, %v4712_v27  ;;  %v4716_v31 = vmax.f32 %v2301_v3, 0.0  ;;  %7570 = vmatmul.mubr.msk.bf16.gmra.mrb[204].mxu0 %vm981_vm2, %v8047_v62  ;;  %7698 = vmatmul.mubr.msk.bf16.gmra.mrb[204].mxu1 %vm981_vm2, %v8047_v62  ;;  %v5861_v37 = vadd.f32 %v5860_v12, %v4714_v53  ;;  %v4718_v45 = vmax.f32 %v3614_v33, 0.0  ;;  %v8049_v33 = vld [vmem:[%s10829_s0 + $0x3a8] sm:$0xff]  }
 0x3a3   :  { %v5824_v38 = vadd.f32 %v5823_v56, %v4713_v28  ;;  %v4717_v41 = vmax.f32 %v2303_v36, 0.0  ;;  %2574 = vmatprep.mubr.bf16.mxu0 %v8211_v6  ;;  %3887 = vmatprep.mubr.bf16.mxu1 %v8211_v6  ;;  %v5898_v42 = vadd.f32 %v5897_v32, %v4715_v26  ;;  %v4719_v57 = vmax.f32 %v3616_v51, 0.0 }
 0x3a4   :  { %v5788_v13 = vadd.f32 %v5787_v29, %v4716_v31  ;;  %v5862_v5 = vadd.f32 %v5861_v37, %v4718_v45 }
 0x3a5   :  { %v5825_v39 = vadd.f32 %v5824_v38, %v4717_v41  ;;  %v2306_v14 = vpop.f32.mrb[100].mxu0  ;;  %v5899_v44 = vadd.f32 %v5898_v42, %v4719_v57  ;;  %v3619_v49 = vpop.f32.mrb[100].mxu1 }
 0x3a6   :  { %v2307_v50 = vadd.f32 %v2306_v14, %v8480_v59  ;;  %v2308_v30 = vpop.f32.mrb[101].mxu0  ;;  %v3620_v55 = vadd.f32 %v3619_v49, %v8410_v43  ;;  %v3621_v63 = vpop.f32.mrb[101].mxu1 }
 0x3a7   :  { %v2309_v1 = vadd.f32 %v2308_v30, %v8482_v60  ;;  %v2310_v52 = vpop.f32.mrb[102].mxu0  ;;  %v3622_v48 = vadd.f32 %v3621_v63, %v8486_v61  ;;  %v3623_v2 = vpop.f32.mrb[102].mxu1 }
 0x3a8   :  { %v4720_v34 = vmax.f32 %v2307_v50, 0.0  ;;  %v2311_v16 = vadd.f32 %v2310_v52, %v8480_v59  ;;  %v2312_v35 = vpop.f32.mrb[103].mxu0  ;;  %v4722_v0 = vmax.f32 %v3620_v55, 0.0  ;;  %v3624_v9 = vadd.f32 %v3623_v2, %v8410_v43  ;;  %v3625_v10 = vpop.f32.mrb[103].mxu1  ;;  %v8056_v52 = vld [vmem:[%s10829_s0 + $0x3b0] sm:$0xff]  }
 0x3a9   :  { %v4721_v8 = vmax.f32 %v2309_v1, 0.0  ;;  %v2313_v11 = vadd.f32 %v2312_v35, %v8482_v60  ;;  %v4723_v12 = vmax.f32 %v3622_v48, 0.0  ;;  %v3626_v56 = vadd.f32 %v3625_v10, %v8486_v61 }
 0x3aa   :  { %v5789_v46 = vadd.f32 %v5788_v13, %v4720_v34  ;;  %v4724_v32 = vmax.f32 %v2311_v16, 0.0  ;;  %7571 = vmatmul.mubr.msk.bf16.gmra.mrb[208].mxu0 %vm981_vm2, %v8048_v54  ;;  %7699 = vmatmul.mubr.msk.bf16.gmra.mrb[208].mxu1 %vm981_vm2, %v8048_v54  ;;  %v5863_v17 = vadd.f32 %v5862_v5, %v4722_v0  ;;  %v4726_v18 = vmax.f32 %v3624_v9, 0.0  ;;  %v8072_v0 = vld [vmem:[%s10832_s3 + $0x1a0] ss:$16 sps:$4 sm:$0xff]   ;;  %v8074_v9 = vld [vmem:[%s10832_s3 + $0x1a4] ss:$16 sps:$4 sm:$0xff]  }
 0x3ab   :  { %v5826_v19 = vadd.f32 %v5825_v39, %v4721_v8  ;;  %v4725_v62 = vmax.f32 %v2313_v11, 0.0  ;;  %2584 = vmatprep.mubr.bf16.mxu0 %v8211_v6  ;;  %3897 = vmatprep.mubr.bf16.mxu1 %v8211_v6  ;;  %v5900_v15 = vadd.f32 %v5899_v44, %v4723_v12  ;;  %v4727_v21 = vmax.f32 %v3626_v56, 0.0  ;;  %v8075_v56 = vld [vmem:[%s10832_s3 + $0x1a8] ss:$16 sps:$4 sm:$0xff]  }
 0x3ac   :  { %v5790_v58 = vadd.f32 %v5789_v46, %v4724_v32  ;;  %v5864_v24 = vadd.f32 %v5863_v17, %v4726_v18  ;;  %v8077_v46 = vld [vmem:[%s10832_s3 + $0x1ac] ss:$16 sps:$4 sm:$0xff]   ;;  %7149 = vmatprep.subr.bf16.mxu0 %v8074_v9 }
 0x3ad   :  { %v5827_v20 = vadd.f32 %v5826_v19, %v4725_v62  ;;  %v2316_v25 = vpop.f32.mrb[104].mxu0  ;;  %v5901_v27 = vadd.f32 %v5900_v15, %v4727_v21  ;;  %v3629_v3 = vpop.f32.mrb[104].mxu1  ;;  %7231 = vmatprep.subr.bf16.mxu1 %v8077_v46  ;;  %7150 = vmatpush1.bf16.msra.mxu0 %v8072_v0 }
 0x3ae   :  { %v2317_v7 = vadd.f32 %v2316_v25, %v8480_v59  ;;  %v2318_v53 = vpop.f32.mrb[105].mxu0  ;;  %v3630_v40 = vadd.f32 %v3629_v3, %v8410_v43  ;;  %v3631_v28 = vpop.f32.mrb[105].mxu1  ;;  %7232 = vmatpush1.bf16.msra.mxu1 %v8075_v56 }
 0x3af   :  { %v2319_v36 = vadd.f32 %v2318_v53, %v8482_v60  ;;  %v2320_v26 = vpop.f32.mrb[106].mxu0  ;;  %v3632_v51 = vadd.f32 %v3631_v28, %v8486_v61  ;;  %v3633_v29 = vpop.f32.mrb[106].mxu1 }
 0x3b0   :  { %v4728_v31 = vmax.f32 %v2317_v7, 0.0  ;;  %v2321_v37 = vadd.f32 %v2320_v26, %v8480_v59  ;;  %v2322_v45 = vpop.f32.mrb[107].mxu0  ;;  %v4730_v38 = vmax.f32 %v3630_v40, 0.0  ;;  %v3634_v41 = vadd.f32 %v3633_v29, %v8410_v43  ;;  %v3635_v42 = vpop.f32.mrb[107].mxu1 }
 0x3b1   :  { %v4729_v57 = vmax.f32 %v2319_v36, 0.0  ;;  %v2323_v13 = vadd.f32 %v2322_v45, %v8482_v60  ;;  %v4731_v5 = vmax.f32 %v3632_v51, 0.0  ;;  %v3636_v39 = vadd.f32 %v3635_v42, %v8486_v61 }
 0x3b2   :  { %v5791_v14 = vadd.f32 %v5790_v58, %v4728_v31  ;;  %v4732_v44 = vmax.f32 %v2321_v37, 0.0  ;;  %7572 = vmatmul.mubr.msk.bf16.gmra.mrb[212].mxu0 %vm981_vm2, %v8049_v33  ;;  %7700 = vmatmul.mubr.msk.bf16.gmra.mrb[212].mxu1 %vm981_vm2, %v8049_v33  ;;  %v5865_v49 = vadd.f32 %v5864_v24, %v4730_v38  ;;  %v4734_v50 = vmax.f32 %v3634_v41, 0.0 }
 0x3b3   :  { %v5828_v30 = vadd.f32 %v5827_v20, %v4729_v57  ;;  %v4733_v54 = vmax.f32 %v2323_v13, 0.0  ;;  %2594 = vmatprep.mubr.bf16.mxu0 %v8211_v6  ;;  %3907 = vmatprep.mubr.bf16.mxu1 %v8211_v6  ;;  %v5902_v55 = vadd.f32 %v5901_v27, %v4731_v5  ;;  %v4735_v63 = vmax.f32 %v3636_v39, 0.0  ;;  %v8057_v5 = vld [vmem:[%s10829_s0 + $0x3b8] sm:$0xff]  }
 0x3b4   :  { %v5792_v1 = vadd.f32 %v5791_v14, %v4732_v44  ;;  %v5866_v48 = vadd.f32 %v5865_v49, %v4734_v50 }
 0x3b5   :  { %v5829_v2 = vadd.f32 %v5828_v30, %v4733_v54  ;;  %v2326_v34 = vpop.f32.mrb[108].mxu0  ;;  %v5903_v16 = vadd.f32 %v5902_v55, %v4735_v63  ;;  %v3639_v35 = vpop.f32.mrb[108].mxu1 }
 0x3b6   :  { %v2327_v10 = vadd.f32 %v2326_v34, %v8480_v59  ;;  %v2328_v8 = vpop.f32.mrb[109].mxu0  ;;  %v3640_v11 = vadd.f32 %v3639_v35, %v8410_v43  ;;  %v3641_v12 = vpop.f32.mrb[109].mxu1 }
 0x3b7   :  { %v2329_v32 = vadd.f32 %v2328_v8, %v8482_v60  ;;  %v2330_v17 = vpop.f32.mrb[110].mxu0  ;;  %v3642_v18 = vadd.f32 %v3641_v12, %v8486_v61  ;;  %v3643_v19 = vpop.f32.mrb[110].mxu1 }
 0x3b8   :  { %v4736_v62 = vmax.f32 %v2327_v10, 0.0  ;;  %v2331_v15 = vadd.f32 %v2330_v17, %v8480_v59  ;;  %v2332_v21 = vpop.f32.mrb[111].mxu0  ;;  %v4738_v58 = vmax.f32 %v3640_v11, 0.0  ;;  %v3644_v24 = vadd.f32 %v3643_v19, %v8410_v43  ;;  %v3645_v20 = vpop.f32.mrb[111].mxu1 }
 0x3b9   :  { %v4737_v25 = vmax.f32 %v2329_v32, 0.0  ;;  %v2333_v27 = vadd.f32 %v2332_v21, %v8482_v60  ;;  %v4739_v3 = vmax.f32 %v3642_v18, 0.0  ;;  %v3646_v7 = vadd.f32 %v3645_v20, %v8486_v61 }
 0x3ba   :  { %v5793_v53 = vadd.f32 %v5792_v1, %v4736_v62  ;;  %v4740_v33 = vmax.f32 %v2331_v15, 0.0  ;;  %7573 = vmatmul.mubr.msk.bf16.gmra.mrb[216].mxu0 %vm981_vm2, %v8056_v52  ;;  %7701 = vmatmul.mubr.msk.bf16.gmra.mrb[216].mxu1 %vm981_vm2, %v8056_v52  ;;  %v5867_v40 = vadd.f32 %v5866_v48, %v4738_v58  ;;  %v4742_v28 = vmax.f32 %v3644_v24, 0.0  ;;  %v8058_v24 = vld [vmem:[%s10829_s0 + $0x3c0] sm:$0xff]  }
 0x3bb   :  { %v5830_v36 = vadd.f32 %v5829_v2, %v4737_v25  ;;  %v4741_v26 = vmax.f32 %v2333_v27, 0.0  ;;  %2604 = vmatprep.mubr.bf16.mxu0 %v8211_v6  ;;  %3917 = vmatprep.mubr.bf16.mxu1 %v8211_v6  ;;  %v5904_v51 = vadd.f32 %v5903_v16, %v4739_v3  ;;  %v4743_v29 = vmax.f32 %v3646_v7, 0.0 }
 0x3bc   :  { %v5794_v31 = vadd.f32 %v5793_v53, %v4740_v33  ;;  %v5868_v37 = vadd.f32 %v5867_v40, %v4742_v28 }
 0x3bd   :  { %v5831_v45 = vadd.f32 %v5830_v36, %v4741_v26  ;;  %v2336_v38 = vpop.f32.mrb[112].mxu0  ;;  %v5905_v41 = vadd.f32 %v5904_v51, %v4743_v29  ;;  %v3649_v42 = vpop.f32.mrb[112].mxu1 }
 0x3be   :  { %v2337_v57 = vadd.f32 %v2336_v38, %v8480_v59  ;;  %v2338_v13 = vpop.f32.mrb[113].mxu0  ;;  %v3650_v39 = vadd.f32 %v3649_v42, %v8410_v43  ;;  %v3651_v14 = vpop.f32.mrb[113].mxu1 }
 0x3bf   :  { %v2339_v44 = vadd.f32 %v2338_v13, %v8482_v60  ;;  %v2340_v49 = vpop.f32.mrb[114].mxu0  ;;  %v3652_v50 = vadd.f32 %v3651_v14, %v8486_v61  ;;  %v3653_v30 = vpop.f32.mrb[114].mxu1 }
 0x3c0   :  { %v4744_v54 = vmax.f32 %v2337_v57, 0.0  ;;  %v2341_v55 = vadd.f32 %v2340_v49, %v8480_v59  ;;  %v2342_v63 = vpop.f32.mrb[115].mxu0  ;;  %v4746_v1 = vmax.f32 %v3650_v39, 0.0  ;;  %v3654_v52 = vadd.f32 %v3653_v30, %v8410_v43  ;;  %v3655_v48 = vpop.f32.mrb[115].mxu1 }
 0x3c1   :  { %v4745_v2 = vmax.f32 %v2339_v44, 0.0  ;;  %v2343_v34 = vadd.f32 %v2342_v63, %v8482_v60  ;;  %v4747_v16 = vmax.f32 %v3652_v50, 0.0  ;;  %v3656_v35 = vadd.f32 %v3655_v48, %v8486_v61  ;;  %v8059_v48 = vld [vmem:[%s10829_s0 + $0x3c8] sm:$0xff]  }
 0x3c2   :  { %v5795_v0 = vadd.f32 %v5794_v31, %v4744_v54  ;;  %v4748_v9 = vmax.f32 %v2341_v55, 0.0  ;;  %7574 = vmatmul.mubr.msk.bf16.gmra.mrb[220].mxu0 %vm981_vm2, %v8057_v5  ;;  %7702 = vmatmul.mubr.msk.bf16.gmra.mrb[220].mxu1 %vm981_vm2, %v8057_v5  ;;  %v5869_v10 = vadd.f32 %v5868_v37, %v4746_v1  ;;  %v4750_v8 = vmax.f32 %v3654_v52, 0.0 }
 0x3c3   :  { %v5832_v11 = vadd.f32 %v5831_v45, %v4745_v2  ;;  %v4749_v12 = vmax.f32 %v2343_v34, 0.0  ;;  %2614 = vmatprep.mubr.bf16.mxu0 %v8211_v6  ;;  %3927 = vmatprep.mubr.bf16.mxu1 %v8211_v6  ;;  %v5906_v56 = vadd.f32 %v5905_v41, %v4747_v16  ;;  %v4751_v46 = vmax.f32 %v3656_v35, 0.0 }
 0x3c4   :  { %v5796_v32 = vadd.f32 %v5795_v0, %v4748_v9  ;;  %v5870_v17 = vadd.f32 %v5869_v10, %v4750_v8 }
 0x3c5   :  { %v5833_v18 = vadd.f32 %v5832_v11, %v4749_v12  ;;  %v2346_v19 = vpop.f32.mrb[116].mxu0  ;;  %v5907_v62 = vadd.f32 %v5906_v56, %v4751_v46  ;;  %v3659_v15 = vpop.f32.mrb[116].mxu1 }
 0x3c6   :  { %v2347_v21 = vadd.f32 %v2346_v19, %v8480_v59  ;;  %v2348_v58 = vpop.f32.mrb[117].mxu0  ;;  %v3660_v20 = vadd.f32 %v3659_v15, %v8410_v43  ;;  %v3661_v25 = vpop.f32.mrb[117].mxu1 }
 0x3c7   :  { %v2349_v27 = vadd.f32 %v2348_v58, %v8482_v60  ;;  %v2350_v3 = vpop.f32.mrb[118].mxu0  ;;  %v3662_v7 = vadd.f32 %v3661_v25, %v8486_v61  ;;  %v3663_v53 = vpop.f32.mrb[118].mxu1 }
 0x3c8   :  { %v4752_v33 = vmax.f32 %v2347_v21, 0.0  ;;  %v2351_v40 = vadd.f32 %v2350_v3, %v8480_v59  ;;  %v2352_v28 = vpop.f32.mrb[119].mxu0  ;;  %v4754_v36 = vmax.f32 %v3660_v20, 0.0  ;;  %v3664_v26 = vadd.f32 %v3663_v53, %v8410_v43  ;;  %v3665_v51 = vpop.f32.mrb[119].mxu1 }
 0x3c9   :  { %v4753_v29 = vmax.f32 %v2349_v27, 0.0  ;;  %v2353_v31 = vadd.f32 %v2352_v28, %v8482_v60  ;;  %v4755_v37 = vmax.f32 %v3662_v7, 0.0  ;;  %v3666_v45 = vadd.f32 %v3665_v51, %v8486_v61 }
 0x3ca   :  { %v5797_v38 = vadd.f32 %v5796_v32, %v4752_v33  ;;  %v4756_v41 = vmax.f32 %v2351_v40, 0.0  ;;  %7575 = vmatmul.mubr.msk.bf16.gmra.mrb[224].mxu0 %vm981_vm2, %v8058_v24  ;;  %7703 = vmatmul.mubr.msk.bf16.gmra.mrb[224].mxu1 %vm981_vm2, %v8058_v24  ;;  %v5871_v42 = vadd.f32 %v5870_v17, %v4754_v36  ;;  %v4758_v57 = vmax.f32 %v3664_v26, 0.0 }
 0x3cb   :  { %v5834_v13 = vadd.f32 %v5833_v18, %v4753_v29  ;;  %v4757_v5 = vmax.f32 %v2353_v31, 0.0  ;;  %v5908_v39 = vadd.f32 %v5907_v62, %v4755_v37  ;;  %v4759_v14 = vmax.f32 %v3666_v45, 0.0  ;;  %2624 = vmatprep.mubr.bf16.mxu0 %v8211_v6  ;;  %3937 = vmatprep.mubr.bf16.mxu1 %v8211_v6  ;;  %v8060_v29 = vld [vmem:[%s10829_s0 + $0x3d0] sm:$0xff]  }
 0x3cc   :  { %v5798_v44 = vadd.f32 %v5797_v38, %v4756_v41  ;;  %v5872_v49 = vadd.f32 %v5871_v42, %v4758_v57 }
 0x3cd   :  { %v5835_v50 = vadd.f32 %v5834_v13, %v4757_v5  ;;  %v2356_v30 = vpop.f32.mrb[120].mxu0  ;;  %v5909_v54 = vadd.f32 %v5908_v39, %v4759_v14  ;;  %v3669_v55 = vpop.f32.mrb[120].mxu1 }
 0x3ce   :  { %v2357_v63 = vadd.f32 %v2356_v30, %v8480_v59  ;;  %v2358_v1 = vpop.f32.mrb[121].mxu0  ;;  %v3670_v52 = vadd.f32 %v3669_v55, %v8410_v43  ;;  %v3671_v2 = vpop.f32.mrb[121].mxu1 }
 0x3cf   :  { %v2359_v34 = vadd.f32 %v2358_v1, %v8482_v60  ;;  %v2360_v16 = vpop.f32.mrb[122].mxu0  ;;  %v3672_v35 = vadd.f32 %v3671_v2, %v8486_v61  ;;  %v3673_v0 = vpop.f32.mrb[122].mxu1 }
 0x3d0   :  { %v4760_v9 = vmax.f32 %v2357_v63, 0.0  ;;  %v2361_v10 = vadd.f32 %v2360_v16, %v8480_v59  ;;  %v2362_v8 = vpop.f32.mrb[123].mxu0  ;;  %v4762_v11 = vmax.f32 %v3670_v52, 0.0  ;;  %v3674_v12 = vadd.f32 %v3673_v0, %v8410_v43  ;;  %v3675_v56 = vpop.f32.mrb[123].mxu1 }
 0x3d1   :  { %v4761_v46 = vmax.f32 %v2359_v34, 0.0  ;;  %v2363_v32 = vadd.f32 %v2362_v8, %v8482_v60  ;;  %v4763_v17 = vmax.f32 %v3672_v35, 0.0  ;;  %v3676_v18 = vadd.f32 %v3675_v56, %v8486_v61 }
 0x3d2   :  { %v5799_v19 = vadd.f32 %v5798_v44, %v4760_v9  ;;  %v4764_v62 = vmax.f32 %v2361_v10, 0.0  ;;  %v5873_v15 = vadd.f32 %v5872_v49, %v4762_v11  ;;  %7576 = vmatmul.mubr.msk.bf16.gmra.mrb[228].mxu0 %vm981_vm2, %v8059_v48  ;;  %7704 = vmatmul.mubr.msk.bf16.gmra.mrb[228].mxu1 %vm981_vm2, %v8059_v48  ;;  %v4766_v21 = vmax.f32 %v3674_v12, 0.0 }
 0x3d3   :  { %v5836_v58 = vadd.f32 %v5835_v50, %v4761_v46  ;;  %v4765_v24 = vmax.f32 %v2363_v32, 0.0  ;;  %v5910_v20 = vadd.f32 %v5909_v54, %v4763_v17  ;;  %v4767_v25 = vmax.f32 %v3676_v18, 0.0  ;;  %2634 = vmatprep.mubr.bf16.mxu0 %v8211_v6  ;;  %3947 = vmatprep.mubr.bf16.mxu1 %v8211_v6  ;;  %v8061_v46 = vld [vmem:[%s10829_s0 + $0x3d8] sm:$0xff]  }
 0x3d4   :  { %v5800_v27 = vadd.f32 %v5799_v19, %v4764_v62  ;;  %v5874_v3 = vadd.f32 %v5873_v15, %v4766_v21 }
 0x3d5   :  { %v5837_v7 = vadd.f32 %v5836_v58, %v4765_v24  ;;  %v5911_v53 = vadd.f32 %v5910_v20, %v4767_v25  ;;  %v2366_v33 = vpop.f32.mrb[124].mxu0  ;;  %v3679_v40 = vpop.f32.mrb[124].mxu1 }
 0x3d6   :  { %v2367_v28 = vadd.f32 %v2366_v33, %v8480_v59  ;;  %v3680_v36 = vadd.f32 %v3679_v40, %v8410_v43  ;;  %v2368_v26 = vpop.f32.mrb[125].mxu0  ;;  %v3681_v51 = vpop.f32.mrb[125].mxu1 }
 0x3d7   :  { %v2369_v31 = vadd.f32 %v2368_v26, %v8482_v60  ;;  %v3682_v37 = vadd.f32 %v3681_v51, %v8486_v61  ;;  %v2370_v45 = vpop.f32.mrb[126].mxu0  ;;  %v3683_v38 = vpop.f32.mrb[126].mxu1 }
 0x3d8   :  { %v4768_v41 = vmax.f32 %v2367_v28, 0.0  ;;  %v4770_v42 = vmax.f32 %v3680_v36, 0.0  ;;  %v2371_v57 = vadd.f32 %v2370_v45, %v8480_v59  ;;  %v3684_v13 = vadd.f32 %v3683_v38, %v8410_v43  ;;  %v2372_v5 = vpop.f32.mrb[127].mxu0  ;;  %v3685_v39 = vpop.f32.mrb[127].mxu1 }
 0x3d9   :  { %v4769_v14 = vmax.f32 %v2369_v31, 0.0  ;;  %v4771_v44 = vmax.f32 %v3682_v37, 0.0  ;;  %v2373_v49 = vadd.f32 %v2372_v5, %v8482_v60  ;;  %v3686_v50 = vadd.f32 %v3685_v39, %v8486_v61 }
 0x3da   :  { %v5801_v30 = vadd.f32 %v5800_v27, %v4768_v41  ;;  %v5875_v54 = vadd.f32 %v5874_v3, %v4770_v42  ;;  %v4772_v55 = vmax.f32 %v2371_v57, 0.0  ;;  %v4774_v63 = vmax.f32 %v3684_v13, 0.0  ;;  %7577 = vmatmul.mubr.msk.bf16.gmra.mrb[232].mxu0 %vm981_vm2, %v8060_v29  ;;  %7705 = vmatmul.mubr.msk.bf16.gmra.mrb[232].mxu1 %vm981_vm2, %v8060_v29 }
 0x3db   :  { %v5838_v1 = vadd.f32 %v5837_v7, %v4769_v14  ;;  %v5912_v52 = vadd.f32 %v5911_v53, %v4771_v44  ;;  %v4773_v48 = vmax.f32 %v2373_v49, 0.0  ;;  %v4775_v2 = vmax.f32 %v3686_v50, 0.0  ;;  %2644 = vmatprep.mubr.bf16.mxu0 %v8211_v6  ;;  %3957 = vmatprep.mubr.bf16.mxu1 %v8211_v6 }
 0x3dc   :  { %v5802_v34 = vadd.f32 %v5801_v30, %v4772_v55  ;;  %v5876_v16 = vadd.f32 %v5875_v54, %v4774_v63 }
 0x3dd   :  { %v5839_v35 = vadd.f32 %v5838_v1, %v4773_v48  ;;  %v5913_v0 = vadd.f32 %v5912_v52, %v4775_v2  ;;  %v2376_v9 = vpop.f32.mrb[128].mxu0  ;;  %v3689_v10 = vpop.f32.mrb[128].mxu1  ;;  %v8062_v1 = vld [vmem:[%s10829_s0 + $0x3e0] sm:$0xff]  }
 0x3de   :  { %v5803_v8 = vrot.slane %v5802_v34, 4  ;;  %v5877_v11 = vrot.slane %v5876_v16, 4  ;;  %v2377_v12 = vadd.f32 %v2376_v9, %v8480_v59  ;;  %v2378_v56 = vpop.f32.mrb[129].mxu0  ;;  %v10253_v32 = vadd.f32 %v3689_v10, %v8410_v43  ;;  %v3691_v17 = vpop.f32.mrb[129].mxu1 }
 0x3df   :  { %v5840_v18 = vrot.slane %v5839_v35, 4  ;;  %v5914_v19 = vrot.slane %v5913_v0, 4  ;;  %v2379_v62 = vadd.f32 %v2378_v56, %v8482_v60  ;;  %v2380_v15 = vpop.f32.mrb[130].mxu0  ;;  %v10257_v21 = vadd.f32 %v3691_v17, %v8486_v61  ;;  %v3693_v58 = vpop.f32.mrb[130].mxu1 }
 0x3e0   :  { %v5804_v24 = vadd.f32 %v5803_v8, %v5802_v34  ;;  %v5878_v20 = vadd.f32 %v5877_v11, %v5876_v16  ;;  %v4776_v25 = vmax.f32 %v2377_v12, 0.0  ;;  %v2381_v27 = vadd.f32 %v2380_v15, %v8480_v59  ;;  %v2382_v3 = vpop.f32.mrb[131].mxu0  ;;  %v3695_v7 = vpop.f32.mrb[131].mxu1 }
 0x3e1   :  { %v5841_v53 = vadd.f32 %v5840_v18, %v5839_v35  ;;  %v5915_v33 = vadd.f32 %v5914_v19, %v5913_v0  ;;  %v4777_v40 = vmax.f32 %v2379_v62, 0.0  ;;  %v2383_v28 = vadd.f32 %v2382_v3, %v8482_v60 }
 0x3e2   :  { %v5805_v36 = vrot.slane %v5804_v24, 2  ;;  %v5879_v26 = vrot.slane %v5878_v20, 2  ;;  %v4780_v51 = vmax.f32 %v2381_v27, 0.0  ;;  %7578 = vmatmul.mubr.msk.bf16.gmra.mrb[236].mxu0 %vm981_vm2, %v8061_v46  ;;  %7706 = vmatmul.mubr.msk.bf16.gmra.mrb[236].mxu1 %vm981_vm2, %v8061_v46  ;;  %v4778_v29 = vmax.f32 %v10253_v32, 0.0 }
 0x3e3   :  { %v5842_v31 = vrot.slane %v5841_v53, 2  ;;  %v5916_v37 = vrot.slane %v5915_v33, 2  ;;  %v4781_v45 = vmax.f32 %v2383_v28, 0.0  ;;  %2654 = vmatprep.mubr.bf16.mxu0 %v8211_v6  ;;  %3967 = vmatprep.mubr.bf16.mxu1 %v8211_v6  ;;  %v4779_v38 = vmax.f32 %v10257_v21, 0.0 }
 0x3e4   :  { %v5806_v41 = vadd.f32 %v5805_v36, %v5804_v24  ;;  %v5880_v42 = vadd.f32 %v5879_v26, %v5878_v20  ;;  %v5920_v57 = vadd.f32 %v4780_v51, %v4776_v25  ;;  %v3694_v13 = vadd.f32 %v3693_v58, %v8410_v43 }
 0x3e5   :  { %v5843_v5 = vadd.f32 %v5842_v31, %v5841_v53  ;;  %v5917_v39 = vadd.f32 %v5916_v37, %v5915_v33  ;;  %v5957_v14 = vadd.f32 %v4781_v45, %v4777_v40  ;;  %v2386_v44 = vpop.f32.mrb[132].mxu0  ;;  %v3696_v49 = vadd.f32 %v3695_v7, %v8486_v61  ;;  %v3699_v50 = vpop.f32.mrb[132].mxu1 }
 0x3e6   :  { %v5807_v30 = vrot.slane %v5806_v41, 1  ;;  %v5881_v54 = vrot.slane %v5880_v42, 1  ;;  %v2387_v55 = vadd.f32 %v2386_v44, %v8480_v59  ;;  %v2388_v63 = vpop.f32.mrb[133].mxu0  ;;  %v4782_v52 = vmax.f32 %v3694_v13, 0.0  ;;  %v3701_v48 = vpop.f32.mrb[133].mxu1 }
 0x3e7   :  { %v5844_v2 = vrot.slane %v5843_v5, 1  ;;  %v5918_v34 = vrot.slane %v5917_v39, 1  ;;  %v2389_v16 = vadd.f32 %v2388_v63, %v8482_v60  ;;  %v2390_v35 = vpop.f32.mrb[134].mxu0  ;;  %v4783_v0 = vmax.f32 %v3696_v49, 0.0  ;;  %v3703_v9 = vpop.f32.mrb[134].mxu1 }
 0x3e8   :  { %v5808_v10 = vadd.f32 %v5807_v30, %v5806_v41  ;;  %v5882_v8 = vadd.f32 %v5881_v54, %v5880_v42  ;;  %v4784_v11 = vmax.f32 %v2387_v55, 0.0  ;;  %v2391_v12 = vadd.f32 %v2390_v35, %v8480_v59  ;;  %v2392_v56 = vpop.f32.mrb[135].mxu0  ;;  %v3705_v46 = vpop.f32.mrb[135].mxu1  ;;  %v8063_v41 = vld [vmem:[%s10829_s0 + $0x3e8] sm:$0xff]  }
 0x3e9   :  { %v5845_v32 = vadd.f32 %v5844_v2, %v5843_v5  ;;  %v5919_v17 = vadd.f32 %v5918_v34, %v5917_v39  ;;  %v4785_v18 = vmax.f32 %v2389_v16, 0.0  ;;  %v2393_v19 = vadd.f32 %v2392_v56, %v8482_v60 }
 0x3ea   :  { %v6236_v62 = vpack.c.bf16 %v5808_v10, %v5808_v10  ;;  %v6238_v15 = vpack.c.bf16 %v5882_v8, %v5882_v8  ;;  %v5921_v21 = vadd.f32 %v5920_v57, %v4784_v11  ;;  %v4788_v58 = vmax.f32 %v2391_v12, 0.0  ;;  %7579 = vmatmul.mubr.msk.bf16.gmra.mrb[240].mxu0 %vm981_vm2, %v8062_v1  ;;  %7707 = vmatmul.mubr.msk.bf16.gmra.mrb[240].mxu1 %vm981_vm2, %v8062_v1 }
 0x3eb   :  { %v6237_v24 = vpack.c.bf16 %v5845_v32, %v5845_v32  ;;  %v6239_v20 = vpack.c.bf16 %v5919_v17, %v5919_v17  ;;  %v5958_v25 = vadd.f32 %v5957_v14, %v4785_v18  ;;  %v4789_v27 = vmax.f32 %v2393_v19, 0.0  ;;  %2664 = vmatprep.mubr.bf16.mxu0 %v8211_v6  ;;  %3977 = vmatprep.mubr.bf16.mxu1 %v8211_v6 }
 0x3ec   :  { %v6428_v3 = vunpack.c.l.b16 %v6236_v62  ;;  %v10280_v7 = vunpack.c.l.b16 %v6238_v15  ;;  %v5922_v53 = vadd.f32 %v5921_v21, %v4788_v58  ;;  %v5994_v33 = vadd.f32 %v4782_v52, %v4778_v29  ;;  %v8078_v21 = vld [vmem:[%s10832_s3 + $0x1c0] ss:$16 sps:$4 sm:$0xff]   ;;  %v8080_v58 = vld [vmem:[%s10832_s3 + $0x1c4] ss:$16 sps:$4 sm:$0xff]  }
 0x3ed   :  { %v6429_v40 = vunpack.c.l.b16 %v6237_v24  ;;  %v10282_v28 = vunpack.c.l.b16 %v6239_v20  ;;  %v5959_v36 = vadd.f32 %v5958_v25, %v4789_v27  ;;  %v2396_v26 = vpop.f32.mrb[136].mxu0  ;;  %v6031_v51 = vadd.f32 %v4783_v0, %v4779_v38  ;;  %v3709_v31 = vpop.f32.mrb[136].mxu1  ;;  %7151 = vmatprep.subr.bf16.mxu0 %v8080_v58 }
 0x3ee   :  { %v2397_v37 = vadd.f32 %v2396_v26, %v8480_v59  ;;  %v2398_v45 = vpop.f32.mrb[137].mxu0  ;;  %v3700_v42 = vadd.f32 %v3699_v50, %v8410_v43  ;;  %v3702_v57 = vadd.f32 %v3701_v48, %v8486_v61  ;;  %v3704_v29 = vadd.f32 %v3703_v9, %v8410_v43  ;;  %v3711_v13 = vpop.f32.mrb[137].mxu1  ;;  %7152 = vmatpush1.bf16.msra.mxu0 %v8078_v21 }
 0x3ef   :  { %v2399_v5 = vadd.f32 %v2398_v45, %v8482_v60  ;;  %v2400_v39 = vpop.f32.mrb[138].mxu0  ;;  %v3706_v38 = vadd.f32 %v3705_v46, %v8486_v61  ;;  %v3710_v14 = vadd.f32 %v3709_v31, %v8410_v43  ;;  %v3712_v44 = vadd.f32 %v3711_v13, %v8486_v61  ;;  %v3713_v49 = vpop.f32.mrb[138].mxu1  ;;  %v8083_v45 = vld [vmem:[%s10832_s3 + $0x1cc] ss:$16 sps:$4 sm:$0xff]  }
 0x3f0   :  { %v4792_v30 = vmax.f32 %v2397_v37, 0.0  ;;  %v2401_v54 = vadd.f32 %v2400_v39, %v8480_v59  ;;  %v2402_v55 = vpop.f32.mrb[139].mxu0  ;;  %v4786_v50 = vmax.f32 %v3700_v42, 0.0  ;;  %v4787_v63 = vmax.f32 %v3702_v57, 0.0  ;;  %v3715_v1 = vpop.f32.mrb[139].mxu1  ;;  %7233 = vmatprep.subr.bf16.mxu1 %v8083_v45 }
 0x3f1   :  { %v4793_v52 = vmax.f32 %v2399_v5, 0.0  ;;  %v2403_v48 = vadd.f32 %v2402_v55, %v8482_v60  ;;  %v4790_v2 = vmax.f32 %v3704_v29, 0.0  ;;  %v4791_v34 = vmax.f32 %v3706_v38, 0.0  ;;  %v8081_v39 = vld [vmem:[%s10832_s3 + $0x1c8] ss:$16 sps:$4 sm:$0xff]  }
 0x3f2   :  { %v5923_v16 = vadd.f32 %v5922_v53, %v4792_v30  ;;  %v4796_v35 = vmax.f32 %v2401_v54, 0.0  ;;  %7580 = vmatmul.mubr.msk.bf16.gmra.mrb[244].mxu0 %vm981_vm2, %v8063_v41  ;;  %7708 = vmatmul.mubr.msk.bf16.gmra.mrb[244].mxu1 %vm981_vm2, %v8063_v41  ;;  %v5995_v0 = vadd.f32 %v5994_v33, %v4786_v50  ;;  %v6032_v9 = vadd.f32 %v6031_v51, %v4787_v63  ;;  %v8070_v53 = vld [vmem:[%s10829_s0 + $0x3f0] sm:$0xff]  }
 0x3f3   :  { %v5960_v10 = vadd.f32 %v5959_v36, %v4793_v52  ;;  %v4797_v8 = vmax.f32 %v2403_v48, 0.0  ;;  %2674 = vmatprep.mubr.bf16.mxu0 %v8211_v6  ;;  %3987 = vmatprep.mubr.bf16.mxu1 %v8211_v6  ;;  %v4794_v11 = vmax.f32 %v3710_v14, 0.0  ;;  %v4795_v12 = vmax.f32 %v3712_v44, 0.0 }
 0x3f4   :  { %v5924_v56 = vadd.f32 %v5923_v16, %v4796_v35  ;;  %v5996_v46 = vadd.f32 %v5995_v0, %v4790_v2  ;;  %v6033_v32 = vadd.f32 %v6032_v9, %v4791_v34  ;;  %v3714_v17 = vadd.f32 %v3713_v49, %v8410_v43  ;;  %7234 = vmatpush1.bf16.msra.mxu1 %v8081_v39 }
 0x3f5   :  { %v5961_v18 = vadd.f32 %v5960_v10, %v4797_v8  ;;  %v2406_v19 = vpop.f32.mrb[140].mxu0  ;;  %v3716_v62 = vadd.f32 %v3715_v1, %v8486_v61  ;;  %v3719_v15 = vpop.f32.mrb[140].mxu1  ;;  %v10311_v24 = vsel %vm6448_vm7, %v6428_v3, %v9995_v22  ;;  %v10315_v20 = vsel %vm6448_vm7, %v6429_v40, %v10028_v4 }
 0x3f6   :  { %v2407_v25 = vadd.f32 %v2406_v19, %v8480_v59  ;;  %v2408_v27 = vpop.f32.mrb[141].mxu0  ;;  %v5997_v33 = vadd.f32 %v5996_v46, %v4794_v11  ;;  %v6034_v36 = vadd.f32 %v6033_v32, %v4795_v12  ;;  %v4798_v26 = vmax.f32 %v3714_v17, 0.0  ;;  %v3721_v51 = vpop.f32.mrb[141].mxu1 }
 0x3f7   :  { %v2409_v31 = vadd.f32 %v2408_v27, %v8482_v60  ;;  %v2410_v37 = vpop.f32.mrb[142].mxu0  ;;  %v4799_v22 = vmax.f32 %v3716_v62, 0.0  ;;  %v3720_v3 = vadd.f32 %v3719_v15, %v8410_v43  ;;  %v3722_v4 = vadd.f32 %v3721_v51, %v8486_v61  ;;  %v3723_v40 = vpop.f32.mrb[142].mxu1 }
 0x3f8   :  { %v4800_v41 = vmax.f32 %v2407_v25, 0.0  ;;  %v2411_v42 = vadd.f32 %v2410_v37, %v8480_v59  ;;  %v2412_v57 = vpop.f32.mrb[143].mxu0  ;;  %v5998_v29 = vadd.f32 %v5997_v33, %v4798_v26  ;;  %v3724_v13 = vadd.f32 %v3723_v40, %v8410_v43  ;;  %v3725_v5 = vpop.f32.mrb[143].mxu1 }
 0x3f9   :  { %v4801_v38 = vmax.f32 %v2409_v31, 0.0  ;;  %v2413_v14 = vadd.f32 %v2412_v57, %v8482_v60  ;;  %v6035_v44 = vadd.f32 %v6034_v36, %v4799_v22  ;;  %v4802_v49 = vmax.f32 %v3720_v3, 0.0 }
 0x3fa   :  { %v5925_v30 = vadd.f32 %v5924_v56, %v4800_v41  ;;  %v4804_v54 = vmax.f32 %v2411_v42, 0.0  ;;  %7581 = vmatmul.mubr.msk.bf16.gmra.mrb[248].mxu0 %vm981_vm2, %v8070_v53  ;;  %7709 = vmatmul.mubr.msk.bf16.gmra.mrb[248].mxu1 %vm981_vm2, %v8070_v53  ;;  %v4803_v55 = vmax.f32 %v3722_v4, 0.0  ;;  %v4806_v50 = vmax.f32 %v3724_v13, 0.0  ;;  %v8071_v56 = vld [vmem:[%s10829_s0 + $0x3f8] sm:$0xff]  }
 0x3fb   :  { %v5962_v63 = vadd.f32 %v5961_v18, %v4801_v38  ;;  %v4805_v1 = vmax.f32 %v2413_v14, 0.0  ;;  %2684 = vmatprep.mubr.bf16.mxu0 %v8211_v6  ;;  %3997 = vmatprep.mubr.bf16.mxu1 %v8211_v6  ;;  %v5999_v52 = vadd.f32 %v5998_v29, %v4802_v49  ;;  %v3726_v48 = vadd.f32 %v3725_v5, %v8486_v61 }
 0x3fc   :  { %v5926_v2 = vadd.f32 %v5925_v30, %v4804_v54  ;;  %v6036_v34 = vadd.f32 %v6035_v44, %v4803_v55  ;;  %v10341_v16 = vsel %vm6448_vm7, %v10280_v7, %v9999_v23  ;;  %v10346_v6 = vsel %vm6448_vm7, %v10282_v28, %v10054_v47 }
 0x3fd   :  { %v5963_v35 = vadd.f32 %v5962_v63, %v4805_v1  ;;  %v2416_v0 = vpop.f32.mrb[144].mxu0  ;;  %v6000_v9 = vadd.f32 %v5999_v52, %v4806_v50  ;;  %v4807_v10 = vmax.f32 %v3726_v48, 0.0  ;;  %v3729_v8 = vpop.f32.mrb[144].mxu1 }
 0x3fe   :  { %v2417_v11 = vadd.f32 %v2416_v0, %v8480_v59  ;;  %v2418_v12 = vpop.f32.mrb[145].mxu0  ;;  %v3730_v23 = vadd.f32 %v3729_v8, %v8410_v43  ;;  %v3731_v7 = vpop.f32.mrb[145].mxu1 }
 0x3ff   :  { %v2419_v46 = vadd.f32 %v2418_v12, %v8482_v60  ;;  %v2420_v32 = vpop.f32.mrb[146].mxu0  ;;  %v6037_v17 = vadd.f32 %v6036_v34, %v4807_v10  ;;  %v3732_v18 = vadd.f32 %v3731_v7, %v8486_v61  ;;  %v3733_v19 = vpop.f32.mrb[146].mxu1 }
 0x400   :  { %v4808_v62 = vmax.f32 %v2417_v11, 0.0  ;;  %v2421_v47 = vadd.f32 %v2420_v32, %v8480_v59  ;;  %v2422_v28 = vpop.f32.mrb[147].mxu0  ;;  %v4810_v15 = vmax.f32 %v3730_v23, 0.0  ;;  %v3734_v21 = vadd.f32 %v3733_v19, %v8410_v43  ;;  %v3735_v58 = vpop.f32.mrb[147].mxu1 }
 0x401   :  { %v4809_v25 = vmax.f32 %v2419_v46, 0.0  ;;  %v2423_v27 = vadd.f32 %v2422_v28, %v8482_v60  ;;  %v4811_v53 = vmax.f32 %v3732_v18, 0.0  ;;  %v3736_v33 = vadd.f32 %v3735_v58, %v8486_v61 }
 0x402   :  { %v5927_v36 = vadd.f32 %v5926_v2, %v4808_v62  ;;  %v4812_v26 = vmax.f32 %v2421_v47, 0.0  ;;  %7582 = vmatmul.mubr.msk.bf16.gmra.mrb[252].mxu0 %vm981_vm2, %v8071_v56  ;;  %7710 = vmatmul.mubr.msk.bf16.gmra.mrb[252].mxu1 %vm981_vm2, %v8071_v56  ;;  %v6001_v51 = vadd.f32 %v6000_v9, %v4810_v15  ;;  %v4814_v31 = vmax.f32 %v3734_v21, 0.0 }
 0x403   :  { %v5964_v37 = vadd.f32 %v5963_v35, %v4809_v25  ;;  %v4813_v22 = vmax.f32 %v2423_v27, 0.0  ;;  %v6038_v3 = vadd.f32 %v6037_v17, %v4811_v53  ;;  %v4815_v4 = vmax.f32 %v3736_v33, 0.0 }
 0x404   :  { %v5928_v40 = vadd.f32 %v5927_v36, %v4812_v26  ;;  %v6002_v45 = vadd.f32 %v6001_v51, %v4814_v31 }
 0x405   :  { %v5965_v41 = vadd.f32 %v5964_v37, %v4813_v22  ;;  %v2426_v42 = vpop.f32.mrb[148].mxu0  ;;  %v6039_v57 = vadd.f32 %v6038_v3, %v4815_v4  ;;  %v3739_v29 = vpop.f32.mrb[148].mxu1 }
 0x406   :  { %v2427_v13 = vadd.f32 %v2426_v42, %v8480_v59  ;;  %v2428_v5 = vpop.f32.mrb[149].mxu0  ;;  %v3740_v39 = vadd.f32 %v3739_v29, %v8410_v43  ;;  %v3741_v38 = vpop.f32.mrb[149].mxu1 }
 0x407   :  { %v2429_v14 = vadd.f32 %v2428_v5, %v8482_v60  ;;  %v2430_v44 = vpop.f32.mrb[150].mxu0  ;;  %v3742_v49 = vadd.f32 %v3741_v38, %v8486_v61  ;;  %v3743_v30 = vpop.f32.mrb[150].mxu1 }
 0x408   :  { %v4816_v54 = vmax.f32 %v2427_v13, 0.0  ;;  %v2431_v55 = vadd.f32 %v2430_v44, %v8480_v59  ;;  %v2432_v50 = vpop.f32.mrb[151].mxu0  ;;  %v4818_v63 = vmax.f32 %v3740_v39, 0.0  ;;  %v3744_v1 = vadd.f32 %v3743_v30, %v8410_v43  ;;  %v3745_v52 = vpop.f32.mrb[151].mxu1 }
 0x409   :  { %v4817_v48 = vmax.f32 %v2429_v14, 0.0  ;;  %v2433_v2 = vadd.f32 %v2432_v50, %v8482_v60  ;;  %v4819_v34 = vmax.f32 %v3742_v49, 0.0  ;;  %v3746_v35 = vadd.f32 %v3745_v52, %v8486_v61 }
 0x40a   :  { %v5929_v0 = vadd.f32 %v5928_v40, %v4816_v54  ;;  %v4820_v9 = vmax.f32 %v2431_v55, 0.0  ;;  %v6003_v10 = vadd.f32 %v6002_v45, %v4818_v63  ;;  %v4822_v8 = vmax.f32 %v3744_v1, 0.0 }
 0x40b   :  { %v5966_v11 = vadd.f32 %v5965_v41, %v4817_v48  ;;  %v4821_v12 = vmax.f32 %v2433_v2, 0.0  ;;  %v6040_v56 = vadd.f32 %v6039_v57, %v4819_v34  ;;  %v4823_v23 = vmax.f32 %v3746_v35, 0.0 }
 0x40c   :  { %v5930_v7 = vadd.f32 %v5929_v0, %v4820_v9  ;;  %v6004_v46 = vadd.f32 %v6003_v10, %v4822_v8 }
 0x40d   :  { %v5967_v32 = vadd.f32 %v5966_v11, %v4821_v12  ;;  %v2436_v17 = vpop.f32.mrb[152].mxu0  ;;  %v6041_v18 = vadd.f32 %v6040_v56, %v4823_v23  ;;  %v3749_v19 = vpop.f32.mrb[152].mxu1 }
 0x40e   :  { %v2437_v62 = vadd.f32 %v2436_v17, %v8480_v59  ;;  %v2438_v47 = vpop.f32.mrb[153].mxu0  ;;  %v3750_v28 = vadd.f32 %v3749_v19, %v8410_v43  ;;  %v3751_v15 = vpop.f32.mrb[153].mxu1 }
 0x40f   :  { %v2439_v21 = vadd.f32 %v2438_v47, %v8482_v60  ;;  %v2440_v58 = vpop.f32.mrb[154].mxu0  ;;  %v3752_v25 = vadd.f32 %v3751_v15, %v8486_v61  ;;  %v3753_v27 = vpop.f32.mrb[154].mxu1 }
 0x410   :  { %v4824_v53 = vmax.f32 %v2437_v62, 0.0  ;;  %v2441_v33 = vadd.f32 %v2440_v58, %v8480_v59  ;;  %v2442_v36 = vpop.f32.mrb[155].mxu0  ;;  %v4826_v26 = vmax.f32 %v3750_v28, 0.0  ;;  %v3754_v51 = vadd.f32 %v3753_v27, %v8410_v43  ;;  %v3755_v31 = vpop.f32.mrb[155].mxu1 }
 0x411   :  { %v4825_v37 = vmax.f32 %v2439_v21, 0.0  ;;  %v2443_v22 = vadd.f32 %v2442_v36, %v8482_v60  ;;  %v4827_v3 = vmax.f32 %v3752_v25, 0.0  ;;  %v3756_v4 = vadd.f32 %v3755_v31, %v8486_v61 }
 0x412   :  { %v5931_v40 = vadd.f32 %v5930_v7, %v4824_v53  ;;  %v4828_v45 = vmax.f32 %v2441_v33, 0.0  ;;  %v6005_v41 = vadd.f32 %v6004_v46, %v4826_v26  ;;  %v4830_v42 = vmax.f32 %v3754_v51, 0.0 }
 0x413   :  { %v5968_v57 = vadd.f32 %v5967_v32, %v4825_v37  ;;  %v4829_v29 = vmax.f32 %v2443_v22, 0.0  ;;  %v6042_v13 = vadd.f32 %v6041_v18, %v4827_v3  ;;  %v4831_v5 = vmax.f32 %v3756_v4, 0.0 }
 0x414   :  { %v5932_v39 = vadd.f32 %v5931_v40, %v4828_v45  ;;  %v6006_v38 = vadd.f32 %v6005_v41, %v4830_v42 }
 0x415   :  { %v5969_v14 = vadd.f32 %v5968_v57, %v4829_v29  ;;  %v2446_v44 = vpop.f32.mrb[156].mxu0  ;;  %v6043_v49 = vadd.f32 %v6042_v13, %v4831_v5  ;;  %v3759_v30 = vpop.f32.mrb[156].mxu1 }
 0x416   :  { %v2447_v54 = vadd.f32 %v2446_v44, %v8480_v59  ;;  %v2448_v55 = vpop.f32.mrb[157].mxu0  ;;  %v3760_v50 = vadd.f32 %v3759_v30, %v8410_v43  ;;  %v3761_v63 = vpop.f32.mrb[157].mxu1 }
 0x417   :  { %v2449_v1 = vadd.f32 %v2448_v55, %v8482_v60  ;;  %v2450_v52 = vpop.f32.mrb[158].mxu0  ;;  %v3762_v48 = vadd.f32 %v3761_v63, %v8486_v61  ;;  %v3763_v2 = vpop.f32.mrb[158].mxu1 }
 0x418   :  { %v4832_v34 = vmax.f32 %v2447_v54, 0.0  ;;  %v2451_v35 = vadd.f32 %v2450_v52, %v8480_v59  ;;  %v2452_v0 = vpop.f32.mrb[159].mxu0  ;;  %v4834_v9 = vmax.f32 %v3760_v50, 0.0  ;;  %v3764_v10 = vadd.f32 %v3763_v2, %v8410_v43  ;;  %v3765_v8 = vpop.f32.mrb[159].mxu1 }
 0x419   :  { %v4833_v11 = vmax.f32 %v2449_v1, 0.0  ;;  %v2453_v12 = vadd.f32 %v2452_v0, %v8482_v60  ;;  %v4835_v56 = vmax.f32 %v3762_v48, 0.0  ;;  %v3766_v23 = vadd.f32 %v3765_v8, %v8486_v61 }
 0x41a   :  { %v5933_v7 = vadd.f32 %v5932_v39, %v4832_v34  ;;  %v4836_v46 = vmax.f32 %v2451_v35, 0.0  ;;  %v6007_v32 = vadd.f32 %v6006_v38, %v4834_v9  ;;  %v4838_v17 = vmax.f32 %v3764_v10, 0.0 }
 0x41b   :  { %v5970_v18 = vadd.f32 %v5969_v14, %v4833_v11  ;;  %v4837_v19 = vmax.f32 %v2453_v12, 0.0  ;;  %v6044_v62 = vadd.f32 %v6043_v49, %v4835_v56  ;;  %v4839_v47 = vmax.f32 %v3766_v23, 0.0 }
 0x41c   :  { %v5934_v28 = vadd.f32 %v5933_v7, %v4836_v46  ;;  %v6008_v15 = vadd.f32 %v6007_v32, %v4838_v17 }
 0x41d   :  { %v5971_v21 = vadd.f32 %v5970_v18, %v4837_v19  ;;  %v2456_v58 = vpop.f32.mrb[160].mxu0  ;;  %v6045_v25 = vadd.f32 %v6044_v62, %v4839_v47  ;;  %v3769_v27 = vpop.f32.mrb[160].mxu1 }
 0x41e   :  { %v2457_v53 = vadd.f32 %v2456_v58, %v8480_v59  ;;  %v2458_v33 = vpop.f32.mrb[161].mxu0  ;;  %v3770_v36 = vadd.f32 %v3769_v27, %v8410_v43  ;;  %v3771_v26 = vpop.f32.mrb[161].mxu1 }
 0x41f   :  { %v2459_v51 = vadd.f32 %v2458_v33, %v8482_v60  ;;  %v2460_v31 = vpop.f32.mrb[162].mxu0  ;;  %v3772_v37 = vadd.f32 %v3771_v26, %v8486_v61  ;;  %v3773_v22 = vpop.f32.mrb[162].mxu1 }
 0x420   :  { %v4840_v3 = vmax.f32 %v2457_v53, 0.0  ;;  %v2461_v4 = vadd.f32 %v2460_v31, %v8480_v59  ;;  %v2462_v40 = vpop.f32.mrb[163].mxu0  ;;  %v4842_v45 = vmax.f32 %v3770_v36, 0.0  ;;  %v3774_v41 = vadd.f32 %v3773_v22, %v8410_v43  ;;  %v3775_v42 = vpop.f32.mrb[163].mxu1 }
 0x421   :  { %v4841_v57 = vmax.f32 %v2459_v51, 0.0  ;;  %v2463_v29 = vadd.f32 %v2462_v40, %v8482_v60  ;;  %v4843_v13 = vmax.f32 %v3772_v37, 0.0  ;;  %v3776_v5 = vadd.f32 %v3775_v42, %v8486_v61 }
 0x422   :  { %v5935_v39 = vadd.f32 %v5934_v28, %v4840_v3  ;;  %v4844_v38 = vmax.f32 %v2461_v4, 0.0  ;;  %v6009_v14 = vadd.f32 %v6008_v15, %v4842_v45  ;;  %v4846_v44 = vmax.f32 %v3774_v41, 0.0 }
 0x423   :  { %v5972_v49 = vadd.f32 %v5971_v21, %v4841_v57  ;;  %v4845_v30 = vmax.f32 %v2463_v29, 0.0  ;;  %v6046_v54 = vadd.f32 %v6045_v25, %v4843_v13  ;;  %v4847_v55 = vmax.f32 %v3776_v5, 0.0 }
 0x424   :  { %v5936_v50 = vadd.f32 %v5935_v39, %v4844_v38  ;;  %v6010_v63 = vadd.f32 %v6009_v14, %v4846_v44 }
 0x425   :  { %v5973_v1 = vadd.f32 %v5972_v49, %v4845_v30  ;;  %v2466_v52 = vpop.f32.mrb[164].mxu0  ;;  %v6047_v48 = vadd.f32 %v6046_v54, %v4847_v55  ;;  %v3779_v2 = vpop.f32.mrb[164].mxu1 }
 0x426   :  { %v2467_v34 = vadd.f32 %v2466_v52, %v8480_v59  ;;  %v2468_v35 = vpop.f32.mrb[165].mxu0  ;;  %v3780_v0 = vadd.f32 %v3779_v2, %v8410_v43  ;;  %v3781_v9 = vpop.f32.mrb[165].mxu1 }
 0x427   :  { %v2469_v10 = vadd.f32 %v2468_v35, %v8482_v60  ;;  %v2470_v8 = vpop.f32.mrb[166].mxu0  ;;  %v3782_v11 = vadd.f32 %v3781_v9, %v8486_v61  ;;  %v3783_v12 = vpop.f32.mrb[166].mxu1 }
 0x428   :  { %v4848_v56 = vmax.f32 %v2467_v34, 0.0  ;;  %v2471_v23 = vadd.f32 %v2470_v8, %v8480_v59  ;;  %v2472_v7 = vpop.f32.mrb[167].mxu0  ;;  %v4850_v46 = vmax.f32 %v3780_v0, 0.0  ;;  %v3784_v32 = vadd.f32 %v3783_v12, %v8410_v43  ;;  %v3785_v17 = vpop.f32.mrb[167].mxu1 }
 0x429   :  { %v4849_v18 = vmax.f32 %v2469_v10, 0.0  ;;  %v2473_v19 = vadd.f32 %v2472_v7, %v8482_v60  ;;  %v4851_v62 = vmax.f32 %v3782_v11, 0.0  ;;  %v3786_v47 = vadd.f32 %v3785_v17, %v8486_v61 }
 0x42a   :  { %v5937_v28 = vadd.f32 %v5936_v50, %v4848_v56  ;;  %v4852_v15 = vmax.f32 %v2471_v23, 0.0  ;;  %v6011_v21 = vadd.f32 %v6010_v63, %v4850_v46  ;;  %v4854_v58 = vmax.f32 %v3784_v32, 0.0  ;;  %v8084_v56 = vld [vmem:[%s10832_s3 + $0x1e0] ss:$16 sps:$4 sm:$0xff]   ;;  %v8086_v23 = vld [vmem:[%s10832_s3 + $0x1e4] ss:$16 sps:$4 sm:$0xff]  }
 0x42b   :  { %v5974_v25 = vadd.f32 %v5973_v1, %v4849_v18  ;;  %v4853_v27 = vmax.f32 %v2473_v19, 0.0  ;;  %v6048_v53 = vadd.f32 %v6047_v48, %v4851_v62  ;;  %v4855_v33 = vmax.f32 %v3786_v47, 0.0  ;;  %v8087_v18 = vld [vmem:[%s10832_s3 + $0x1e8] ss:$16 sps:$4 sm:$0xff]   ;;  %v8089_v19 = vld [vmem:[%s10832_s3 + $0x1ec] ss:$16 sps:$4 sm:$0xff]   ;;  %7153 = vmatprep.subr.bf16.mxu0 %v8086_v23 }
 0x42c   :  { %v5938_v36 = vadd.f32 %v5937_v28, %v4852_v15  ;;  %v6012_v26 = vadd.f32 %v6011_v21, %v4854_v58  ;;  %7235 = vmatprep.subr.bf16.mxu1 %v8089_v19  ;;  %7154 = vmatpush1.bf16.msra.mxu0 %v8084_v56 }
 0x42d   :  { %v5975_v51 = vadd.f32 %v5974_v25, %v4853_v27  ;;  %v2476_v31 = vpop.f32.mrb[168].mxu0  ;;  %v6049_v37 = vadd.f32 %v6048_v53, %v4855_v33  ;;  %v3789_v22 = vpop.f32.mrb[168].mxu1  ;;  %7236 = vmatpush1.bf16.msra.mxu1 %v8087_v18 }
 0x42e   :  { %v2477_v3 = vadd.f32 %v2476_v31, %v8480_v59  ;;  %v2478_v4 = vpop.f32.mrb[169].mxu0  ;;  %v3790_v40 = vadd.f32 %v3789_v22, %v8410_v43  ;;  %v3791_v45 = vpop.f32.mrb[169].mxu1 }
 0x42f   :  { %v2479_v41 = vadd.f32 %v2478_v4, %v8482_v60  ;;  %v2480_v42 = vpop.f32.mrb[170].mxu0  ;;  %v3792_v57 = vadd.f32 %v3791_v45, %v8486_v61  ;;  %v3793_v29 = vpop.f32.mrb[170].mxu1 }
 0x430   :  { %v4856_v13 = vmax.f32 %v2477_v3, 0.0  ;;  %v2481_v5 = vadd.f32 %v2480_v42, %v8480_v59  ;;  %v2482_v39 = vpop.f32.mrb[171].mxu0  ;;  %v4858_v38 = vmax.f32 %v3790_v40, 0.0  ;;  %v3794_v14 = vadd.f32 %v3793_v29, %v8410_v43  ;;  %v3795_v44 = vpop.f32.mrb[171].mxu1 }
 0x431   :  { %v4857_v49 = vmax.f32 %v2479_v41, 0.0  ;;  %v2483_v30 = vadd.f32 %v2482_v39, %v8482_v60  ;;  %v4859_v54 = vmax.f32 %v3792_v57, 0.0  ;;  %v3796_v55 = vadd.f32 %v3795_v44, %v8486_v61 }
 0x432   :  { %v5939_v50 = vadd.f32 %v5938_v36, %v4856_v13  ;;  %v4860_v63 = vmax.f32 %v2481_v5, 0.0  ;;  %v6013_v1 = vadd.f32 %v6012_v26, %v4858_v38  ;;  %v4862_v52 = vmax.f32 %v3794_v14, 0.0 }
 0x433   :  { %v5976_v48 = vadd.f32 %v5975_v51, %v4857_v49  ;;  %v4861_v2 = vmax.f32 %v2483_v30, 0.0  ;;  %v6050_v34 = vadd.f32 %v6049_v37, %v4859_v54  ;;  %v4863_v35 = vmax.f32 %v3796_v55, 0.0 }
 0x434   :  { %v5940_v0 = vadd.f32 %v5939_v50, %v4860_v63  ;;  %v6014_v9 = vadd.f32 %v6013_v1, %v4862_v52 }
 0x435   :  { %v5977_v10 = vadd.f32 %v5976_v48, %v4861_v2  ;;  %v2486_v8 = vpop.f32.mrb[172].mxu0  ;;  %v6051_v11 = vadd.f32 %v6050_v34, %v4863_v35  ;;  %v3799_v12 = vpop.f32.mrb[172].mxu1 }
 0x436   :  { %v2487_v7 = vadd.f32 %v2486_v8, %v8480_v59  ;;  %v2488_v46 = vpop.f32.mrb[173].mxu0  ;;  %v3800_v32 = vadd.f32 %v3799_v12, %v8410_v43  ;;  %v3801_v17 = vpop.f32.mrb[173].mxu1 }
 0x437   :  { %v2489_v62 = vadd.f32 %v2488_v46, %v8482_v60  ;;  %v2490_v47 = vpop.f32.mrb[174].mxu0  ;;  %v3802_v28 = vadd.f32 %v3801_v17, %v8486_v61  ;;  %v3803_v15 = vpop.f32.mrb[174].mxu1 }
 0x438   :  { %v4864_v21 = vmax.f32 %v2487_v7, 0.0  ;;  %v2491_v58 = vadd.f32 %v2490_v47, %v8480_v59  ;;  %v2492_v25 = vpop.f32.mrb[175].mxu0  ;;  %v4866_v27 = vmax.f32 %v3800_v32, 0.0  ;;  %v3804_v53 = vadd.f32 %v3803_v15, %v8410_v43  ;;  %v3805_v33 = vpop.f32.mrb[175].mxu1 }
 0x439   :  { %v4865_v36 = vmax.f32 %v2489_v62, 0.0  ;;  %v2493_v26 = vadd.f32 %v2492_v25, %v8482_v60  ;;  %v4867_v51 = vmax.f32 %v3802_v28, 0.0  ;;  %v3806_v31 = vadd.f32 %v3805_v33, %v8486_v61 }
 0x43a   :  { %v5941_v37 = vadd.f32 %v5940_v0, %v4864_v21  ;;  %v4868_v22 = vmax.f32 %v2491_v58, 0.0  ;;  %v6015_v3 = vadd.f32 %v6014_v9, %v4866_v27  ;;  %v4870_v4 = vmax.f32 %v3804_v53, 0.0 }
 0x43b   :  { %v5978_v40 = vadd.f32 %v5977_v10, %v4865_v36  ;;  %v4869_v45 = vmax.f32 %v2493_v26, 0.0  ;;  %v6052_v41 = vadd.f32 %v6051_v11, %v4867_v51  ;;  %v4871_v42 = vmax.f32 %v3806_v31, 0.0 }
 0x43c   :  { %v5942_v57 = vadd.f32 %v5941_v37, %v4868_v22  ;;  %v6016_v29 = vadd.f32 %v6015_v3, %v4870_v4 }
 0x43d   :  { %v5979_v13 = vadd.f32 %v5978_v40, %v4869_v45  ;;  %v2496_v5 = vpop.f32.mrb[176].mxu0  ;;  %v6053_v39 = vadd.f32 %v6052_v41, %v4871_v42  ;;  %v3809_v38 = vpop.f32.mrb[176].mxu1 }
 0x43e   :  { %v2497_v14 = vadd.f32 %v2496_v5, %v8480_v59  ;;  %v2498_v44 = vpop.f32.mrb[177].mxu0  ;;  %v3810_v49 = vadd.f32 %v3809_v38, %v8410_v43  ;;  %v3811_v30 = vpop.f32.mrb[177].mxu1 }
 0x43f   :  { %v2499_v54 = vadd.f32 %v2498_v44, %v8482_v60  ;;  %v2500_v55 = vpop.f32.mrb[178].mxu0  ;;  %v3812_v50 = vadd.f32 %v3811_v30, %v8486_v61  ;;  %v3813_v63 = vpop.f32.mrb[178].mxu1 }
 0x440   :  { %v4872_v1 = vmax.f32 %v2497_v14, 0.0  ;;  %v2501_v52 = vadd.f32 %v2500_v55, %v8480_v59  ;;  %v2502_v48 = vpop.f32.mrb[179].mxu0  ;;  %v4874_v2 = vmax.f32 %v3810_v49, 0.0  ;;  %v3814_v34 = vadd.f32 %v3813_v63, %v8410_v43  ;;  %v3815_v35 = vpop.f32.mrb[179].mxu1 }
 0x441   :  { %v4873_v0 = vmax.f32 %v2499_v54, 0.0  ;;  %v2503_v9 = vadd.f32 %v2502_v48, %v8482_v60  ;;  %v4875_v10 = vmax.f32 %v3812_v50, 0.0  ;;  %v3816_v8 = vadd.f32 %v3815_v35, %v8486_v61 }
 0x442   :  { %v5943_v11 = vadd.f32 %v5942_v57, %v4872_v1  ;;  %v4876_v12 = vmax.f32 %v2501_v52, 0.0  ;;  %v6017_v56 = vadd.f32 %v6016_v29, %v4874_v2  ;;  %v4878_v23 = vmax.f32 %v3814_v34, 0.0 }
 0x443   :  { %v5980_v7 = vadd.f32 %v5979_v13, %v4873_v0  ;;  %v4877_v46 = vmax.f32 %v2503_v9, 0.0  ;;  %v6054_v32 = vadd.f32 %v6053_v39, %v4875_v10  ;;  %v4879_v17 = vmax.f32 %v3816_v8, 0.0 }
 0x444   :  { %v5944_v18 = vadd.f32 %v5943_v11, %v4876_v12  ;;  %v6018_v19 = vadd.f32 %v6017_v56, %v4878_v23 }
 0x445   :  { %v5981_v62 = vadd.f32 %v5980_v7, %v4877_v46  ;;  %v2506_v47 = vpop.f32.mrb[180].mxu0  ;;  %v6055_v28 = vadd.f32 %v6054_v32, %v4879_v17  ;;  %v3819_v15 = vpop.f32.mrb[180].mxu1 }
 0x446   :  { %v2507_v21 = vadd.f32 %v2506_v47, %v8480_v59  ;;  %v2508_v58 = vpop.f32.mrb[181].mxu0  ;;  %v3820_v25 = vadd.f32 %v3819_v15, %v8410_v43  ;;  %v3821_v27 = vpop.f32.mrb[181].mxu1 }
 0x447   :  { %v2509_v53 = vadd.f32 %v2508_v58, %v8482_v60  ;;  %v2510_v33 = vpop.f32.mrb[182].mxu0  ;;  %v3822_v36 = vadd.f32 %v3821_v27, %v8486_v61  ;;  %v3823_v26 = vpop.f32.mrb[182].mxu1 }
 0x448   :  { %v4880_v51 = vmax.f32 %v2507_v21, 0.0  ;;  %v2511_v31 = vadd.f32 %v2510_v33, %v8480_v59  ;;  %v2512_v37 = vpop.f32.mrb[183].mxu0  ;;  %v4882_v22 = vmax.f32 %v3820_v25, 0.0  ;;  %v3824_v3 = vadd.f32 %v3823_v26, %v8410_v43  ;;  %v3825_v4 = vpop.f32.mrb[183].mxu1 }
 0x449   :  { %v4881_v40 = vmax.f32 %v2509_v53, 0.0  ;;  %v2513_v45 = vadd.f32 %v2512_v37, %v8482_v60  ;;  %v4883_v41 = vmax.f32 %v3822_v36, 0.0  ;;  %v3826_v42 = vadd.f32 %v3825_v4, %v8486_v61 }
 0x44a   :  { %v5945_v57 = vadd.f32 %v5944_v18, %v4880_v51  ;;  %v4884_v29 = vmax.f32 %v2511_v31, 0.0  ;;  %v6019_v13 = vadd.f32 %v6018_v19, %v4882_v22  ;;  %v4886_v5 = vmax.f32 %v3824_v3, 0.0 }
 0x44b   :  { %v5982_v39 = vadd.f32 %v5981_v62, %v4881_v40  ;;  %v4885_v38 = vmax.f32 %v2513_v45, 0.0  ;;  %v6056_v14 = vadd.f32 %v6055_v28, %v4883_v41  ;;  %v4887_v44 = vmax.f32 %v3826_v42, 0.0 }
 0x44c   :  { %v5946_v49 = vadd.f32 %v5945_v57, %v4884_v29  ;;  %v6020_v30 = vadd.f32 %v6019_v13, %v4886_v5 }
 0x44d   :  { %v5983_v54 = vadd.f32 %v5982_v39, %v4885_v38  ;;  %v2516_v55 = vpop.f32.mrb[184].mxu0  ;;  %v6057_v50 = vadd.f32 %v6056_v14, %v4887_v44  ;;  %v3829_v63 = vpop.f32.mrb[184].mxu1 }
 0x44e   :  { %v2517_v1 = vadd.f32 %v2516_v55, %v8480_v59  ;;  %v2518_v52 = vpop.f32.mrb[185].mxu0  ;;  %v3830_v48 = vadd.f32 %v3829_v63, %v8410_v43  ;;  %v3831_v2 = vpop.f32.mrb[185].mxu1 }
 0x44f   :  { %v2519_v34 = vadd.f32 %v2518_v52, %v8482_v60  ;;  %v2520_v35 = vpop.f32.mrb[186].mxu0  ;;  %v3832_v0 = vadd.f32 %v3831_v2, %v8486_v61  ;;  %v3833_v9 = vpop.f32.mrb[186].mxu1 }
 0x450   :  { %v4888_v10 = vmax.f32 %v2517_v1, 0.0  ;;  %v2521_v8 = vadd.f32 %v2520_v35, %v8480_v59  ;;  %v2522_v11 = vpop.f32.mrb[187].mxu0  ;;  %v4890_v12 = vmax.f32 %v3830_v48, 0.0  ;;  %v3834_v56 = vadd.f32 %v3833_v9, %v8410_v43  ;;  %v3835_v23 = vpop.f32.mrb[187].mxu1 }
 0x451   :  { %v4889_v7 = vmax.f32 %v2519_v34, 0.0  ;;  %v2523_v46 = vadd.f32 %v2522_v11, %v8482_v60  ;;  %v4891_v32 = vmax.f32 %v3832_v0, 0.0  ;;  %v3836_v17 = vadd.f32 %v3835_v23, %v8486_v61 }
 0x452   :  { %v5947_v18 = vadd.f32 %v5946_v49, %v4888_v10  ;;  %v4892_v19 = vmax.f32 %v2521_v8, 0.0  ;;  %v6021_v62 = vadd.f32 %v6020_v30, %v4890_v12  ;;  %v4894_v47 = vmax.f32 %v3834_v56, 0.0 }
 0x453   :  { %v5984_v28 = vadd.f32 %v5983_v54, %v4889_v7  ;;  %v4893_v15 = vmax.f32 %v2523_v46, 0.0  ;;  %v6058_v21 = vadd.f32 %v6057_v50, %v4891_v32  ;;  %v4895_v58 = vmax.f32 %v3836_v17, 0.0 }
 0x454   :  { %v5948_v25 = vadd.f32 %v5947_v18, %v4892_v19  ;;  %v6022_v27 = vadd.f32 %v6021_v62, %v4894_v47 }
 0x455   :  { %v5985_v53 = vadd.f32 %v5984_v28, %v4893_v15  ;;  %v6059_v33 = vadd.f32 %v6058_v21, %v4895_v58  ;;  %v2526_v36 = vpop.f32.mrb[188].mxu0  ;;  %v3839_v26 = vpop.f32.mrb[188].mxu1 }
 0x456   :  { %v2527_v51 = vadd.f32 %v2526_v36, %v8480_v59  ;;  %v3840_v31 = vadd.f32 %v3839_v26, %v8410_v43  ;;  %v2528_v37 = vpop.f32.mrb[189].mxu0  ;;  %v3841_v22 = vpop.f32.mrb[189].mxu1 }
 0x457   :  { %v2529_v3 = vadd.f32 %v2528_v37, %v8482_v60  ;;  %v3842_v4 = vadd.f32 %v3841_v22, %v8486_v61  ;;  %v2530_v40 = vpop.f32.mrb[190].mxu0  ;;  %v3843_v45 = vpop.f32.mrb[190].mxu1 }
 0x458   :  { %v4896_v41 = vmax.f32 %v2527_v51, 0.0  ;;  %v4898_v42 = vmax.f32 %v3840_v31, 0.0  ;;  %v2531_v57 = vadd.f32 %v2530_v40, %v8480_v59  ;;  %v3844_v29 = vadd.f32 %v3843_v45, %v8410_v43  ;;  %v2532_v13 = vpop.f32.mrb[191].mxu0  ;;  %v3845_v5 = vpop.f32.mrb[191].mxu1 }
 0x459   :  { %v4897_v39 = vmax.f32 %v2529_v3, 0.0  ;;  %v4899_v38 = vmax.f32 %v3842_v4, 0.0  ;;  %v2533_v14 = vadd.f32 %v2532_v13, %v8482_v60  ;;  %v3846_v44 = vadd.f32 %v3845_v5, %v8486_v61 }
 0x45a   :  { %v5949_v49 = vadd.f32 %v5948_v25, %v4896_v41  ;;  %v6023_v30 = vadd.f32 %v6022_v27, %v4898_v42  ;;  %v4900_v54 = vmax.f32 %v2531_v57, 0.0  ;;  %v4902_v55 = vmax.f32 %v3844_v29, 0.0 }
 0x45b   :  { %v5986_v50 = vadd.f32 %v5985_v53, %v4897_v39  ;;  %v6060_v63 = vadd.f32 %v6059_v33, %v4899_v38  ;;  %v4901_v1 = vmax.f32 %v2533_v14, 0.0  ;;  %v4903_v52 = vmax.f32 %v3846_v44, 0.0 }
 0x45c   :  { %v5950_v48 = vadd.f32 %v5949_v49, %v4900_v54  ;;  %v6024_v2 = vadd.f32 %v6023_v30, %v4902_v55 }
 0x45d   :  { %v5987_v34 = vadd.f32 %v5986_v50, %v4901_v1  ;;  %v6061_v35 = vadd.f32 %v6060_v63, %v4903_v52  ;;  %v2536_v0 = vpop.f32.mrb[192].mxu0  ;;  %v3849_v9 = vpop.f32.mrb[192].mxu1 }
 0x45e   :  { %v5951_v10 = vrot.slane %v5950_v48, 4  ;;  %v6025_v8 = vrot.slane %v6024_v2, 4  ;;  %v2537_v11 = vadd.f32 %v2536_v0, %v8480_v59  ;;  %v2538_v12 = vpop.f32.mrb[193].mxu0  ;;  %v10463_v56 = vadd.f32 %v3849_v9, %v8410_v43  ;;  %v3851_v23 = vpop.f32.mrb[193].mxu1 }
 0x45f   :  { %v5988_v7 = vrot.slane %v5987_v34, 4  ;;  %v6062_v46 = vrot.slane %v6061_v35, 4  ;;  %v2539_v32 = vadd.f32 %v2538_v12, %v8482_v60  ;;  %v2540_v17 = vpop.f32.mrb[194].mxu0  ;;  %v10467_v18 = vadd.f32 %v3851_v23, %v8486_v61  ;;  %v3853_v19 = vpop.f32.mrb[194].mxu1 }
 0x460   :  { %v5952_v62 = vadd.f32 %v5951_v10, %v5950_v48  ;;  %v6026_v47 = vadd.f32 %v6025_v8, %v6024_v2  ;;  %v4904_v28 = vmax.f32 %v2537_v11, 0.0  ;;  %v2541_v15 = vadd.f32 %v2540_v17, %v8480_v59  ;;  %v2542_v21 = vpop.f32.mrb[195].mxu0  ;;  %v3855_v58 = vpop.f32.mrb[195].mxu1 }
 0x461   :  { %v5989_v25 = vadd.f32 %v5988_v7, %v5987_v34  ;;  %v6063_v27 = vadd.f32 %v6062_v46, %v6061_v35  ;;  %v4905_v53 = vmax.f32 %v2539_v32, 0.0  ;;  %v2543_v33 = vadd.f32 %v2542_v21, %v8482_v60 }
 0x462   :  { %v5953_v36 = vrot.slane %v5952_v62, 2  ;;  %v6027_v26 = vrot.slane %v6026_v47, 2  ;;  %v4908_v51 = vmax.f32 %v2541_v15, 0.0  ;;  %v4906_v31 = vmax.f32 %v10463_v56, 0.0 }
 0x463   :  { %v5990_v37 = vrot.slane %v5989_v25, 2  ;;  %v6064_v22 = vrot.slane %v6063_v27, 2  ;;  %v4909_v3 = vmax.f32 %v2543_v33, 0.0  ;;  %v4907_v4 = vmax.f32 %v10467_v18, 0.0 }
 0x464   :  { %v5954_v40 = vadd.f32 %v5953_v36, %v5952_v62  ;;  %v6028_v45 = vadd.f32 %v6027_v26, %v6026_v47  ;;  %v6068_v41 = vadd.f32 %v4908_v51, %v4904_v28  ;;  %v3854_v42 = vadd.f32 %v3853_v19, %v8410_v43 }
 0x465   :  { %v5991_v57 = vadd.f32 %v5990_v37, %v5989_v25  ;;  %v6065_v29 = vadd.f32 %v6064_v22, %v6063_v27  ;;  %v6105_v13 = vadd.f32 %v4909_v3, %v4905_v53  ;;  %v2546_v5 = vpop.f32.mrb[196].mxu0  ;;  %v3856_v39 = vadd.f32 %v3855_v58, %v8486_v61  ;;  %v3859_v38 = vpop.f32.mrb[196].mxu1 }
 0x466   :  { %v5955_v14 = vrot.slane %v5954_v40, 1  ;;  %v6029_v44 = vrot.slane %v6028_v45, 1  ;;  %v2547_v49 = vadd.f32 %v2546_v5, %v8480_v59  ;;  %v2548_v30 = vpop.f32.mrb[197].mxu0  ;;  %v4910_v54 = vmax.f32 %v3854_v42, 0.0  ;;  %v3861_v55 = vpop.f32.mrb[197].mxu1 }
 0x467   :  { %v5992_v50 = vrot.slane %v5991_v57, 1  ;;  %v6066_v63 = vrot.slane %v6065_v29, 1  ;;  %v2549_v1 = vadd.f32 %v2548_v30, %v8482_v60  ;;  %v2550_v52 = vpop.f32.mrb[198].mxu0  ;;  %v4911_v48 = vmax.f32 %v3856_v39, 0.0  ;;  %v3863_v2 = vpop.f32.mrb[198].mxu1 }
 0x468   :  { %v5956_v34 = vadd.f32 %v5955_v14, %v5954_v40  ;;  %v6030_v35 = vadd.f32 %v6029_v44, %v6028_v45  ;;  %v4912_v0 = vmax.f32 %v2547_v49, 0.0  ;;  %v2551_v9 = vadd.f32 %v2550_v52, %v8480_v59  ;;  %v2552_v10 = vpop.f32.mrb[199].mxu0  ;;  %v3865_v8 = vpop.f32.mrb[199].mxu1  ;;  %v8092_v52 = vld [vmem:[%s10832_s3 + $0x204] ss:$16 sps:$4 sm:$0xff]  }
 0x469   :  { %v5993_v11 = vadd.f32 %v5992_v50, %v5991_v57  ;;  %v6067_v12 = vadd.f32 %v6066_v63, %v6065_v29  ;;  %v4913_v56 = vmax.f32 %v2549_v1, 0.0  ;;  %v2553_v23 = vadd.f32 %v2552_v10, %v8482_v60  ;;  %7164 = vmatprep.subr.bf16.mxu0 %v8092_v52 }
 0x46a   :  { %v6240_v7 = vpack.c.bf16 %v5956_v34, %v5956_v34  ;;  %v6242_v46 = vpack.c.bf16 %v6030_v35, %v6030_v35  ;;  %v6069_v32 = vadd.f32 %v6068_v41, %v4912_v0  ;;  %v4916_v17 = vmax.f32 %v2551_v9, 0.0 }
 0x46b   :  { %v6241_v18 = vpack.c.bf16 %v5993_v11, %v5993_v11  ;;  %v6106_v19 = vadd.f32 %v6105_v13, %v4913_v56  ;;  %v4917_v62 = vmax.f32 %v2553_v23, 0.0  ;;  %v6243_v28 = vpack.c.bf16 %v6067_v12, %v6067_v12  ;;  %v8095_v11 = vld [vmem:[%s10832_s3 + $0x20c] ss:$16 sps:$4 sm:$0xff]  }
 0x46c   :  { %v6432_v47 = vunpack.c.l.b16 %v6240_v7  ;;  %v6070_v15 = vadd.f32 %v6069_v32, %v4916_v17  ;;  %v6142_v21 = vadd.f32 %v4910_v54, %v4906_v31  ;;  %v10479_v58 = vunpack.c.l.b16 %v6242_v46  ;;  %7246 = vmatprep.subr.bf16.mxu1 %v8095_v11 }
 0x46d   :  { %v10481_v25 = vunpack.c.l.b16 %v6241_v18  ;;  %v6107_v27 = vadd.f32 %v6106_v19, %v4917_v62  ;;  %v2556_v53 = vpop.f32.mrb[200].mxu0  ;;  %v6179_v33 = vadd.f32 %v4911_v48, %v4907_v4  ;;  %v3869_v36 = vpop.f32.mrb[200].mxu1  ;;  %v3860_v37 = vadd.f32 %v3859_v38, %v8410_v43 }
 0x46e   :  { %v2557_v26 = vadd.f32 %v2556_v53, %v8480_v59  ;;  %v2558_v51 = vpop.f32.mrb[201].mxu0  ;;  %v3862_v22 = vadd.f32 %v3861_v55, %v8486_v61  ;;  %v3864_v3 = vadd.f32 %v3863_v2, %v8410_v43  ;;  %v3871_v40 = vpop.f32.mrb[201].mxu1  ;;  %v3866_v41 = vadd.f32 %v3865_v8, %v8486_v61 }
 0x46f   :  { %v2559_v31 = vadd.f32 %v2558_v51, %v8482_v60  ;;  %v2560_v45 = vpop.f32.mrb[202].mxu0  ;;  %v3870_v42 = vadd.f32 %v3869_v36, %v8410_v43  ;;  %v3872_v4 = vadd.f32 %v3871_v40, %v8486_v61  ;;  %v3873_v57 = vpop.f32.mrb[202].mxu1  ;;  %v4914_v39 = vmax.f32 %v3860_v37, 0.0 }
 0x470   :  { %v4920_v29 = vmax.f32 %v2557_v26, 0.0  ;;  %v2561_v13 = vadd.f32 %v2560_v45, %v8480_v59  ;;  %v2562_v5 = vpop.f32.mrb[203].mxu0  ;;  %v4915_v38 = vmax.f32 %v3862_v22, 0.0  ;;  %v3875_v14 = vpop.f32.mrb[203].mxu1  ;;  %v4918_v30 = vmax.f32 %v3864_v3, 0.0 }
 0x471   :  { %v4921_v44 = vmax.f32 %v2559_v31, 0.0  ;;  %v2563_v49 = vadd.f32 %v2562_v5, %v8482_v60  ;;  %v4919_v54 = vmax.f32 %v3866_v41, 0.0  ;;  %v6143_v63 = vadd.f32 %v6142_v21, %v4914_v39 }
 0x472   :  { %v6071_v55 = vadd.f32 %v6070_v15, %v4920_v29  ;;  %v4924_v50 = vmax.f32 %v2561_v13, 0.0  ;;  %v6180_v1 = vadd.f32 %v6179_v33, %v4915_v38  ;;  %v4922_v34 = vmax.f32 %v3870_v42, 0.0 }
 0x473   :  { %v6108_v48 = vadd.f32 %v6107_v27, %v4921_v44  ;;  %v4925_v2 = vmax.f32 %v2563_v49, 0.0  ;;  %v4923_v35 = vmax.f32 %v3872_v4, 0.0  ;;  %v6144_v9 = vadd.f32 %v6143_v63, %v4918_v30 }
 0x474   :  { %v6072_v0 = vadd.f32 %v6071_v55, %v4924_v50  ;;  %v6181_v10 = vadd.f32 %v6180_v1, %v4919_v54  ;;  %v3874_v8 = vadd.f32 %v3873_v57, %v8410_v43  ;;  %v6435_v12 = vunpack.c.l.b16 %v6243_v28 }
 0x475   :  { %v6109_v56 = vadd.f32 %v6108_v48, %v4925_v2  ;;  %v2566_v23 = vpop.f32.mrb[204].mxu0  ;;  %v3876_v7 = vadd.f32 %v3875_v14, %v8486_v61  ;;  %v3879_v46 = vpop.f32.mrb[204].mxu1  ;;  %v10503_v32 = vsel %vm6450_vm8, %v6432_v47, %v10311_v24  ;;  %v6145_v19 = vadd.f32 %v6144_v9, %v4922_v34 }
 0x476   :  { %v2567_v17 = vadd.f32 %v2566_v23, %v8480_v59  ;;  %v2568_v18 = vpop.f32.mrb[205].mxu0  ;;  %v6182_v62 = vadd.f32 %v6181_v10, %v4923_v35  ;;  %v4926_v15 = vmax.f32 %v3874_v8, 0.0  ;;  %v3881_v21 = vpop.f32.mrb[205].mxu1  ;;  %v3880_v33 = vadd.f32 %v3879_v46, %v8410_v43 }
 0x477   :  { %v2569_v27 = vadd.f32 %v2568_v18, %v8482_v60  ;;  %v2570_v28 = vpop.f32.mrb[206].mxu0  ;;  %v4927_v53 = vmax.f32 %v3876_v7, 0.0  ;;  %v3882_v36 = vadd.f32 %v3881_v21, %v8486_v61  ;;  %v3883_v26 = vpop.f32.mrb[206].mxu1  ;;  %v10516_v49 = vsel %vm6450_vm8, %v10481_v25, %v10315_v20 }
 0x478   :  { %v4928_v51 = vmax.f32 %v2567_v17, 0.0  ;;  %v2571_v24 = vadd.f32 %v2570_v28, %v8480_v59  ;;  %v2572_v47 = vpop.f32.mrb[207].mxu0  ;;  %v6146_v37 = vadd.f32 %v6145_v19, %v4926_v15  ;;  %v3884_v22 = vadd.f32 %v3883_v26, %v8410_v43  ;;  %v3885_v3 = vpop.f32.mrb[207].mxu1 }
 0x479   :  { %v4929_v40 = vmax.f32 %v2569_v27, 0.0  ;;  %v2573_v31 = vadd.f32 %v2572_v47, %v8482_v60  ;;  %v6183_v45 = vadd.f32 %v6182_v62, %v4927_v53  ;;  %v4930_v41 = vmax.f32 %v3880_v33, 0.0 }
 0x47a   :  { %v6073_v42 = vadd.f32 %v6072_v0, %v4928_v51  ;;  %v4932_v4 = vmax.f32 %v2571_v24, 0.0  ;;  %v4931_v57 = vmax.f32 %v3882_v36, 0.0  ;;  %v4934_v29 = vmax.f32 %v3884_v22, 0.0 }
 0x47b   :  { %v6110_v13 = vadd.f32 %v6109_v56, %v4929_v40  ;;  %v4933_v5 = vmax.f32 %v2573_v31, 0.0  ;;  %v6147_v39 = vadd.f32 %v6146_v37, %v4930_v41  ;;  %v3886_v38 = vadd.f32 %v3885_v3, %v8486_v61 }
 0x47c   :  { %v6074_v14 = vadd.f32 %v6073_v42, %v4932_v4  ;;  %v6184_v44 = vadd.f32 %v6183_v45, %v4931_v57  ;;  %v10521_v30 = vsel %vm6450_vm8, %v10479_v58, %v10341_v16  ;;  %v10525_v52 = vsel %vm6450_vm8, %v6435_v12, %v10346_v6 }
 0x47d   :  { %v6111_v54 = vadd.f32 %v6110_v13, %v4933_v5  ;;  %v2576_v55 = vpop.f32.mrb[208].mxu0  ;;  %v6148_v50 = vadd.f32 %v6147_v39, %v4934_v29  ;;  %v4935_v63 = vmax.f32 %v3886_v38, 0.0  ;;  %v3889_v1 = vpop.f32.mrb[208].mxu1 }
 0x47e   :  { %v2577_v48 = vadd.f32 %v2576_v55, %v8480_v59  ;;  %v2578_v2 = vpop.f32.mrb[209].mxu0  ;;  %v3890_v20 = vadd.f32 %v3889_v1, %v8410_v43  ;;  %v3891_v25 = vpop.f32.mrb[209].mxu1 }
 0x47f   :  { %v2579_v34 = vadd.f32 %v2578_v2, %v8482_v60  ;;  %v2580_v35 = vpop.f32.mrb[210].mxu0  ;;  %v6185_v16 = vadd.f32 %v6184_v44, %v4935_v63  ;;  %v3892_v58 = vadd.f32 %v3891_v25, %v8486_v61  ;;  %v3893_v0 = vpop.f32.mrb[210].mxu1 }
 0x480   :  { %v4936_v9 = vmax.f32 %v2577_v48, 0.0  ;;  %v2581_v10 = vadd.f32 %v2580_v35, %v8480_v59  ;;  %v2582_v8 = vpop.f32.mrb[211].mxu0  ;;  %v4938_v11 = vmax.f32 %v3890_v20, 0.0  ;;  %v3894_v6 = vadd.f32 %v3893_v0, %v8410_v43  ;;  %v3895_v12 = vpop.f32.mrb[211].mxu1 }
 0x481   :  { %v4937_v56 = vmax.f32 %v2579_v34, 0.0  ;;  %v2583_v23 = vadd.f32 %v2582_v8, %v8482_v60  ;;  %v4939_v7 = vmax.f32 %v3892_v58, 0.0  ;;  %v3896_v46 = vadd.f32 %v3895_v12, %v8486_v61 }
 0x482   :  { %v6075_v17 = vadd.f32 %v6074_v14, %v4936_v9  ;;  %v4940_v18 = vmax.f32 %v2581_v10, 0.0  ;;  %v6149_v19 = vadd.f32 %v6148_v50, %v4938_v11  ;;  %v4942_v62 = vmax.f32 %v3894_v6, 0.0 }
 0x483   :  { %v6112_v15 = vadd.f32 %v6111_v54, %v4937_v56  ;;  %v4941_v21 = vmax.f32 %v2583_v23, 0.0  ;;  %v6186_v27 = vadd.f32 %v6185_v16, %v4939_v7  ;;  %v4943_v28 = vmax.f32 %v3896_v46, 0.0 }
 0x484   :  { %v6076_v53 = vadd.f32 %v6075_v17, %v4940_v18  ;;  %v6150_v33 = vadd.f32 %v6149_v19, %v4942_v62 }
 0x485   :  { %v6113_v36 = vadd.f32 %v6112_v15, %v4941_v21  ;;  %v2586_v26 = vpop.f32.mrb[212].mxu0  ;;  %v6187_v51 = vadd.f32 %v6186_v27, %v4943_v28  ;;  %v3899_v24 = vpop.f32.mrb[212].mxu1 }
 0x486   :  { %v2587_v47 = vadd.f32 %v2586_v26, %v8480_v59  ;;  %v2588_v37 = vpop.f32.mrb[213].mxu0  ;;  %v3900_v22 = vadd.f32 %v3899_v24, %v8410_v43  ;;  %v3901_v3 = vpop.f32.mrb[213].mxu1 }
 0x487   :  { %v2589_v40 = vadd.f32 %v2588_v37, %v8482_v60  ;;  %v2590_v31 = vpop.f32.mrb[214].mxu0  ;;  %v3902_v45 = vadd.f32 %v3901_v3, %v8486_v61  ;;  %v3903_v41 = vpop.f32.mrb[214].mxu1 }
 0x488   :  { %v4944_v42 = vmax.f32 %v2587_v47, 0.0  ;;  %v2591_v4 = vadd.f32 %v2590_v31, %v8480_v59  ;;  %v2592_v57 = vpop.f32.mrb[215].mxu0  ;;  %v4946_v29 = vmax.f32 %v3900_v22, 0.0  ;;  %v3904_v13 = vadd.f32 %v3903_v41, %v8410_v43  ;;  %v3905_v5 = vpop.f32.mrb[215].mxu1 }
 0x489   :  { %v4945_v39 = vmax.f32 %v2589_v40, 0.0  ;;  %v2593_v38 = vadd.f32 %v2592_v57, %v8482_v60  ;;  %v4947_v14 = vmax.f32 %v3902_v45, 0.0  ;;  %v3906_v44 = vadd.f32 %v3905_v5, %v8486_v61 }
 0x48a   :  { %v6077_v54 = vadd.f32 %v6076_v53, %v4944_v42  ;;  %v4948_v55 = vmax.f32 %v2591_v4, 0.0  ;;  %v6151_v50 = vadd.f32 %v6150_v33, %v4946_v29  ;;  %v4950_v63 = vmax.f32 %v3904_v13, 0.0 }
 0x48b   :  { %v6114_v1 = vadd.f32 %v6113_v36, %v4945_v39  ;;  %v4949_v48 = vmax.f32 %v2593_v38, 0.0  ;;  %v6188_v2 = vadd.f32 %v6187_v51, %v4947_v14  ;;  %v4951_v20 = vmax.f32 %v3906_v44, 0.0 }
 0x48c   :  { %v6078_v25 = vadd.f32 %v6077_v54, %v4948_v55  ;;  %v6152_v34 = vadd.f32 %v6151_v50, %v4950_v63 }
 0x48d   :  { %v6115_v35 = vadd.f32 %v6114_v1, %v4949_v48  ;;  %v2596_v16 = vpop.f32.mrb[216].mxu0  ;;  %v6189_v58 = vadd.f32 %v6188_v2, %v4951_v20  ;;  %v3909_v0 = vpop.f32.mrb[216].mxu1 }
 0x48e   :  { %v2597_v9 = vadd.f32 %v2596_v16, %v8480_v59  ;;  %v2598_v10 = vpop.f32.mrb[217].mxu0  ;;  %v3910_v8 = vadd.f32 %v3909_v0, %v8410_v43  ;;  %v3911_v11 = vpop.f32.mrb[217].mxu1 }
 0x48f   :  { %v2599_v6 = vadd.f32 %v2598_v10, %v8482_v60  ;;  %v2600_v12 = vpop.f32.mrb[218].mxu0  ;;  %v3912_v56 = vadd.f32 %v3911_v11, %v8486_v61  ;;  %v3913_v23 = vpop.f32.mrb[218].mxu1 }
 0x490   :  { %v4952_v7 = vmax.f32 %v2597_v9, 0.0  ;;  %v2601_v46 = vadd.f32 %v2600_v12, %v8480_v59  ;;  %v2602_v17 = vpop.f32.mrb[219].mxu0  ;;  %v4954_v18 = vmax.f32 %v3910_v8, 0.0  ;;  %v3914_v19 = vadd.f32 %v3913_v23, %v8410_v43  ;;  %v3915_v62 = vpop.f32.mrb[219].mxu1 }
 0x491   :  { %v4953_v15 = vmax.f32 %v2599_v6, 0.0  ;;  %v2603_v21 = vadd.f32 %v2602_v17, %v8482_v60  ;;  %v4955_v27 = vmax.f32 %v3912_v56, 0.0  ;;  %v3916_v28 = vadd.f32 %v3915_v62, %v8486_v61 }
 0x492   :  { %v6079_v53 = vadd.f32 %v6078_v25, %v4952_v7  ;;  %v4956_v33 = vmax.f32 %v2601_v46, 0.0  ;;  %v6153_v36 = vadd.f32 %v6152_v34, %v4954_v18  ;;  %v4958_v26 = vmax.f32 %v3914_v19, 0.0 }
 0x493   :  { %v6116_v51 = vadd.f32 %v6115_v35, %v4953_v15  ;;  %v4957_v24 = vmax.f32 %v2603_v21, 0.0  ;;  %v6190_v47 = vadd.f32 %v6189_v58, %v4955_v27  ;;  %v4959_v37 = vmax.f32 %v3916_v28, 0.0 }
 0x494   :  { %v6080_v22 = vadd.f32 %v6079_v53, %v4956_v33  ;;  %v6154_v3 = vadd.f32 %v6153_v36, %v4958_v26 }
 0x495   :  { %v6117_v40 = vadd.f32 %v6116_v51, %v4957_v24  ;;  %v2606_v31 = vpop.f32.mrb[220].mxu0  ;;  %v6191_v45 = vadd.f32 %v6190_v47, %v4959_v37  ;;  %v3919_v41 = vpop.f32.mrb[220].mxu1 }
 0x496   :  { %v2607_v42 = vadd.f32 %v2606_v31, %v8480_v59  ;;  %v2608_v4 = vpop.f32.mrb[221].mxu0  ;;  %v3920_v57 = vadd.f32 %v3919_v41, %v8410_v43  ;;  %v3921_v29 = vpop.f32.mrb[221].mxu1 }
 0x497   :  { %v2609_v13 = vadd.f32 %v2608_v4, %v8482_v60  ;;  %v2610_v5 = vpop.f32.mrb[222].mxu0  ;;  %v3922_v39 = vadd.f32 %v3921_v29, %v8486_v61  ;;  %v3923_v38 = vpop.f32.mrb[222].mxu1 }
 0x498   :  { %v4960_v14 = vmax.f32 %v2607_v42, 0.0  ;;  %v2611_v44 = vadd.f32 %v2610_v5, %v8480_v59  ;;  %v2612_v54 = vpop.f32.mrb[223].mxu0  ;;  %v4962_v55 = vmax.f32 %v3920_v57, 0.0  ;;  %v3924_v50 = vadd.f32 %v3923_v38, %v8410_v43  ;;  %v3925_v63 = vpop.f32.mrb[223].mxu1 }
 0x499   :  { %v4961_v1 = vmax.f32 %v2609_v13, 0.0  ;;  %v2613_v48 = vadd.f32 %v2612_v54, %v8482_v60  ;;  %v4963_v2 = vmax.f32 %v3922_v39, 0.0  ;;  %v3926_v20 = vadd.f32 %v3925_v63, %v8486_v61 }
 0x49a   :  { %v6081_v25 = vadd.f32 %v6080_v22, %v4960_v14  ;;  %v4964_v34 = vmax.f32 %v2611_v44, 0.0  ;;  %v6155_v35 = vadd.f32 %v6154_v3, %v4962_v55  ;;  %v4966_v16 = vmax.f32 %v3924_v50, 0.0 }
 0x49b   :  { %v6118_v58 = vadd.f32 %v6117_v40, %v4961_v1  ;;  %v4965_v0 = vmax.f32 %v2613_v48, 0.0  ;;  %v6192_v9 = vadd.f32 %v6191_v45, %v4963_v2  ;;  %v4967_v10 = vmax.f32 %v3926_v20, 0.0 }
 0x49c   :  { %v6082_v8 = vadd.f32 %v6081_v25, %v4964_v34  ;;  %v6156_v11 = vadd.f32 %v6155_v35, %v4966_v16 }
 0x49d   :  { %v6119_v6 = vadd.f32 %v6118_v58, %v4965_v0  ;;  %v2616_v12 = vpop.f32.mrb[224].mxu0  ;;  %v6193_v56 = vadd.f32 %v6192_v9, %v4967_v10  ;;  %v3929_v23 = vpop.f32.mrb[224].mxu1 }
 0x49e   :  { %v2617_v7 = vadd.f32 %v2616_v12, %v8480_v59  ;;  %v2618_v46 = vpop.f32.mrb[225].mxu0  ;;  %v3930_v17 = vadd.f32 %v3929_v23, %v8410_v43  ;;  %v3931_v18 = vpop.f32.mrb[225].mxu1 }
 0x49f   :  { %v2619_v19 = vadd.f32 %v2618_v46, %v8482_v60  ;;  %v2620_v62 = vpop.f32.mrb[226].mxu0  ;;  %v3932_v15 = vadd.f32 %v3931_v18, %v8486_v61  ;;  %v3933_v21 = vpop.f32.mrb[226].mxu1 }
 0x4a0   :  { %v4968_v27 = vmax.f32 %v2617_v7, 0.0  ;;  %v2621_v28 = vadd.f32 %v2620_v62, %v8480_v59  ;;  %v2622_v53 = vpop.f32.mrb[227].mxu0  ;;  %v4970_v33 = vmax.f32 %v3930_v17, 0.0  ;;  %v3934_v36 = vadd.f32 %v3933_v21, %v8410_v43  ;;  %v3935_v26 = vpop.f32.mrb[227].mxu1 }
 0x4a1   :  { %v4969_v51 = vmax.f32 %v2619_v19, 0.0  ;;  %v2623_v24 = vadd.f32 %v2622_v53, %v8482_v60  ;;  %v4971_v47 = vmax.f32 %v3932_v15, 0.0  ;;  %v3936_v37 = vadd.f32 %v3935_v26, %v8486_v61 }
 0x4a2   :  { %v6083_v22 = vadd.f32 %v6082_v8, %v4968_v27  ;;  %v4972_v3 = vmax.f32 %v2621_v28, 0.0  ;;  %v6157_v40 = vadd.f32 %v6156_v11, %v4970_v33  ;;  %v4974_v31 = vmax.f32 %v3934_v36, 0.0 }
 0x4a3   :  { %v6120_v45 = vadd.f32 %v6119_v6, %v4969_v51  ;;  %v4973_v41 = vmax.f32 %v2623_v24, 0.0  ;;  %v6194_v42 = vadd.f32 %v6193_v56, %v4971_v47  ;;  %v4975_v4 = vmax.f32 %v3936_v37, 0.0 }
 0x4a4   :  { %v6084_v57 = vadd.f32 %v6083_v22, %v4972_v3  ;;  %v6158_v29 = vadd.f32 %v6157_v40, %v4974_v31 }
 0x4a5   :  { %v6121_v13 = vadd.f32 %v6120_v45, %v4973_v41  ;;  %v2626_v5 = vpop.f32.mrb[228].mxu0  ;;  %v6195_v39 = vadd.f32 %v6194_v42, %v4975_v4  ;;  %v3939_v38 = vpop.f32.mrb[228].mxu1 }
 0x4a6   :  { %v2627_v14 = vadd.f32 %v2626_v5, %v8480_v59  ;;  %v2628_v44 = vpop.f32.mrb[229].mxu0  ;;  %v3940_v54 = vadd.f32 %v3939_v38, %v8410_v43  ;;  %v3941_v55 = vpop.f32.mrb[229].mxu1 }
 0x4a7   :  { %v2629_v50 = vadd.f32 %v2628_v44, %v8482_v60  ;;  %v2630_v63 = vpop.f32.mrb[230].mxu0  ;;  %v3942_v1 = vadd.f32 %v3941_v55, %v8486_v61  ;;  %v3943_v48 = vpop.f32.mrb[230].mxu1 }
 0x4a8   :  { %v4976_v2 = vmax.f32 %v2627_v14, 0.0  ;;  %v2631_v20 = vadd.f32 %v2630_v63, %v8480_v59  ;;  %v2632_v25 = vpop.f32.mrb[231].mxu0  ;;  %v4978_v34 = vmax.f32 %v3940_v54, 0.0  ;;  %v3944_v35 = vadd.f32 %v3943_v48, %v8410_v43  ;;  %v3945_v16 = vpop.f32.mrb[231].mxu1 }
 0x4a9   :  { %v4977_v58 = vmax.f32 %v2629_v50, 0.0  ;;  %v2633_v0 = vadd.f32 %v2632_v25, %v8482_v60  ;;  %v4979_v9 = vmax.f32 %v3942_v1, 0.0  ;;  %v3946_v10 = vadd.f32 %v3945_v16, %v8486_v61 }
 0x4aa   :  { %v6085_v8 = vadd.f32 %v6084_v57, %v4976_v2  ;;  %v4980_v11 = vmax.f32 %v2631_v20, 0.0  ;;  %v6159_v6 = vadd.f32 %v6158_v29, %v4978_v34  ;;  %v4982_v12 = vmax.f32 %v3944_v35, 0.0 }
 0x4ab   :  { %v6122_v56 = vadd.f32 %v6121_v13, %v4977_v58  ;;  %v4981_v23 = vmax.f32 %v2633_v0, 0.0  ;;  %v6196_v7 = vadd.f32 %v6195_v39, %v4979_v9  ;;  %v4983_v46 = vmax.f32 %v3946_v10, 0.0 }
 0x4ac   :  { %v6086_v17 = vadd.f32 %v6085_v8, %v4980_v11  ;;  %v6160_v18 = vadd.f32 %v6159_v6, %v4982_v12 }
 0x4ad   :  { %v6123_v19 = vadd.f32 %v6122_v56, %v4981_v23  ;;  %v2636_v62 = vpop.f32.mrb[232].mxu0  ;;  %v6197_v15 = vadd.f32 %v6196_v7, %v4983_v46  ;;  %v3949_v21 = vpop.f32.mrb[232].mxu1 }
 0x4ae   :  { %v2637_v27 = vadd.f32 %v2636_v62, %v8480_v59  ;;  %v2638_v28 = vpop.f32.mrb[233].mxu0  ;;  %v3950_v53 = vadd.f32 %v3949_v21, %v8410_v43  ;;  %v3951_v33 = vpop.f32.mrb[233].mxu1 }
 0x4af   :  { %v2639_v36 = vadd.f32 %v2638_v28, %v8482_v60  ;;  %v2640_v26 = vpop.f32.mrb[234].mxu0  ;;  %v3952_v51 = vadd.f32 %v3951_v33, %v8486_v61  ;;  %v3953_v24 = vpop.f32.mrb[234].mxu1 }
 0x4b0   :  { %v4984_v47 = vmax.f32 %v2637_v27, 0.0  ;;  %v2641_v37 = vadd.f32 %v2640_v26, %v8480_v59  ;;  %v2642_v22 = vpop.f32.mrb[235].mxu0  ;;  %v4986_v3 = vmax.f32 %v3950_v53, 0.0  ;;  %v3954_v40 = vadd.f32 %v3953_v24, %v8410_v43  ;;  %v3955_v31 = vpop.f32.mrb[235].mxu1 }
 0x4b1   :  { %v4985_v45 = vmax.f32 %v2639_v36, 0.0  ;;  %v2643_v41 = vadd.f32 %v2642_v22, %v8482_v60  ;;  %v4987_v42 = vmax.f32 %v3952_v51, 0.0  ;;  %v3956_v4 = vadd.f32 %v3955_v31, %v8486_v61 }
 0x4b2   :  { %v6087_v57 = vadd.f32 %v6086_v17, %v4984_v47  ;;  %v4988_v29 = vmax.f32 %v2641_v37, 0.0  ;;  %v6161_v13 = vadd.f32 %v6160_v18, %v4986_v3  ;;  %v4990_v5 = vmax.f32 %v3954_v40, 0.0 }
 0x4b3   :  { %v6124_v39 = vadd.f32 %v6123_v19, %v4985_v45  ;;  %v4989_v38 = vmax.f32 %v2643_v41, 0.0  ;;  %v6198_v14 = vadd.f32 %v6197_v15, %v4987_v42  ;;  %v4991_v44 = vmax.f32 %v3956_v4, 0.0 }
 0x4b4   :  { %v6088_v54 = vadd.f32 %v6087_v57, %v4988_v29  ;;  %v6162_v55 = vadd.f32 %v6161_v13, %v4990_v5 }
 0x4b5   :  { %v6125_v50 = vadd.f32 %v6124_v39, %v4989_v38  ;;  %v2646_v63 = vpop.f32.mrb[236].mxu0  ;;  %v6199_v1 = vadd.f32 %v6198_v14, %v4991_v44  ;;  %v3959_v48 = vpop.f32.mrb[236].mxu1 }
 0x4b6   :  { %v2647_v2 = vadd.f32 %v2646_v63, %v8480_v59  ;;  %v2648_v20 = vpop.f32.mrb[237].mxu0  ;;  %v3960_v25 = vadd.f32 %v3959_v48, %v8410_v43  ;;  %v3961_v34 = vpop.f32.mrb[237].mxu1 }
 0x4b7   :  { %v2649_v35 = vadd.f32 %v2648_v20, %v8482_v60  ;;  %v2650_v16 = vpop.f32.mrb[238].mxu0  ;;  %v3962_v58 = vadd.f32 %v3961_v34, %v8486_v61  ;;  %v3963_v0 = vpop.f32.mrb[238].mxu1 }
 0x4b8   :  { %v4992_v9 = vmax.f32 %v2647_v2, 0.0  ;;  %v2651_v10 = vadd.f32 %v2650_v16, %v8480_v59  ;;  %v2652_v8 = vpop.f32.mrb[239].mxu0  ;;  %v4994_v11 = vmax.f32 %v3960_v25, 0.0  ;;  %v3964_v6 = vadd.f32 %v3963_v0, %v8410_v43  ;;  %v3965_v12 = vpop.f32.mrb[239].mxu1 }
 0x4b9   :  { %v4993_v56 = vmax.f32 %v2649_v35, 0.0  ;;  %v2653_v23 = vadd.f32 %v2652_v8, %v8482_v60  ;;  %v4995_v7 = vmax.f32 %v3962_v58, 0.0  ;;  %v3966_v46 = vadd.f32 %v3965_v12, %v8486_v61 }
 0x4ba   :  { %v6089_v17 = vadd.f32 %v6088_v54, %v4992_v9  ;;  %v4996_v18 = vmax.f32 %v2651_v10, 0.0  ;;  %v6163_v19 = vadd.f32 %v6162_v55, %v4994_v11  ;;  %v4998_v62 = vmax.f32 %v3964_v6, 0.0 }
 0x4bb   :  { %v6126_v15 = vadd.f32 %v6125_v50, %v4993_v56  ;;  %v4997_v21 = vmax.f32 %v2653_v23, 0.0  ;;  %v6200_v27 = vadd.f32 %v6199_v1, %v4995_v7  ;;  %v4999_v28 = vmax.f32 %v3966_v46, 0.0 }
 0x4bc   :  { %v6090_v53 = vadd.f32 %v6089_v17, %v4996_v18  ;;  %v6164_v33 = vadd.f32 %v6163_v19, %v4998_v62 }
 0x4bd   :  { %v6127_v36 = vadd.f32 %v6126_v15, %v4997_v21  ;;  %v2656_v26 = vpop.f32.mrb[240].mxu0  ;;  %v6201_v51 = vadd.f32 %v6200_v27, %v4999_v28  ;;  %v3969_v24 = vpop.f32.mrb[240].mxu1 }
 0x4be   :  { %v2657_v47 = vadd.f32 %v2656_v26, %v8480_v59  ;;  %v2658_v37 = vpop.f32.mrb[241].mxu0  ;;  %v3970_v22 = vadd.f32 %v3969_v24, %v8410_v43  ;;  %v3971_v3 = vpop.f32.mrb[241].mxu1 }
 0x4bf   :  { %v2659_v40 = vadd.f32 %v2658_v37, %v8482_v60  ;;  %v2660_v31 = vpop.f32.mrb[242].mxu0  ;;  %v3972_v45 = vadd.f32 %v3971_v3, %v8486_v61  ;;  %v3973_v41 = vpop.f32.mrb[242].mxu1 }
 0x4c0   :  { %v5000_v42 = vmax.f32 %v2657_v47, 0.0  ;;  %v2661_v4 = vadd.f32 %v2660_v31, %v8480_v59  ;;  %v2662_v57 = vpop.f32.mrb[243].mxu0  ;;  %v5002_v29 = vmax.f32 %v3970_v22, 0.0  ;;  %v3974_v13 = vadd.f32 %v3973_v41, %v8410_v43  ;;  %v3975_v5 = vpop.f32.mrb[243].mxu1 }
 0x4c1   :  { %v5001_v39 = vmax.f32 %v2659_v40, 0.0  ;;  %v2663_v38 = vadd.f32 %v2662_v57, %v8482_v60  ;;  %v5003_v14 = vmax.f32 %v3972_v45, 0.0  ;;  %v3976_v44 = vadd.f32 %v3975_v5, %v8486_v61 }
 0x4c2   :  { %v6091_v54 = vadd.f32 %v6090_v53, %v5000_v42  ;;  %v5004_v55 = vmax.f32 %v2661_v4, 0.0  ;;  %v6165_v50 = vadd.f32 %v6164_v33, %v5002_v29  ;;  %v5006_v63 = vmax.f32 %v3974_v13, 0.0 }
 0x4c3   :  { %v6128_v1 = vadd.f32 %v6127_v36, %v5001_v39  ;;  %v5005_v48 = vmax.f32 %v2663_v38, 0.0  ;;  %v6202_v2 = vadd.f32 %v6201_v51, %v5003_v14  ;;  %v5007_v20 = vmax.f32 %v3976_v44, 0.0 }
 0x4c4   :  { %v6092_v25 = vadd.f32 %v6091_v54, %v5004_v55  ;;  %v6166_v34 = vadd.f32 %v6165_v50, %v5006_v63 }
 0x4c5   :  { %v6129_v35 = vadd.f32 %v6128_v1, %v5005_v48  ;;  %v2666_v16 = vpop.f32.mrb[244].mxu0  ;;  %v6203_v58 = vadd.f32 %v6202_v2, %v5007_v20  ;;  %v3979_v0 = vpop.f32.mrb[244].mxu1 }
 0x4c6   :  { %v2667_v9 = vadd.f32 %v2666_v16, %v8480_v59  ;;  %v2668_v10 = vpop.f32.mrb[245].mxu0  ;;  %v3980_v8 = vadd.f32 %v3979_v0, %v8410_v43  ;;  %v3981_v11 = vpop.f32.mrb[245].mxu1 }
 0x4c7   :  { %v2669_v6 = vadd.f32 %v2668_v10, %v8482_v60  ;;  %v2670_v12 = vpop.f32.mrb[246].mxu0  ;;  %v3982_v56 = vadd.f32 %v3981_v11, %v8486_v61  ;;  %v3983_v23 = vpop.f32.mrb[246].mxu1 }
 0x4c8   :  { %v5008_v7 = vmax.f32 %v2667_v9, 0.0  ;;  %v2671_v46 = vadd.f32 %v2670_v12, %v8480_v59  ;;  %v2672_v17 = vpop.f32.mrb[247].mxu0  ;;  %v5010_v18 = vmax.f32 %v3980_v8, 0.0  ;;  %v3984_v19 = vadd.f32 %v3983_v23, %v8410_v43  ;;  %v3985_v62 = vpop.f32.mrb[247].mxu1 }
 0x4c9   :  { %v5009_v15 = vmax.f32 %v2669_v6, 0.0  ;;  %v2673_v21 = vadd.f32 %v2672_v17, %v8482_v60  ;;  %v5011_v27 = vmax.f32 %v3982_v56, 0.0  ;;  %v3986_v28 = vadd.f32 %v3985_v62, %v8486_v61 }
 0x4ca   :  { %v6093_v53 = vadd.f32 %v6092_v25, %v5008_v7  ;;  %v5012_v33 = vmax.f32 %v2671_v46, 0.0  ;;  %v6167_v36 = vadd.f32 %v6166_v34, %v5010_v18  ;;  %v5014_v26 = vmax.f32 %v3984_v19, 0.0 }
 0x4cb   :  { %v6130_v51 = vadd.f32 %v6129_v35, %v5009_v15  ;;  %v5013_v24 = vmax.f32 %v2673_v21, 0.0  ;;  %v6204_v47 = vadd.f32 %v6203_v58, %v5011_v27  ;;  %v5015_v37 = vmax.f32 %v3986_v28, 0.0 }
 0x4cc   :  { %v6094_v22 = vadd.f32 %v6093_v53, %v5012_v33  ;;  %v6168_v3 = vadd.f32 %v6167_v36, %v5014_v26 }
 0x4cd   :  { %v6131_v40 = vadd.f32 %v6130_v51, %v5013_v24  ;;  %v2676_v31 = vpop.f32.mrb[248].mxu0  ;;  %v6205_v45 = vadd.f32 %v6204_v47, %v5015_v37  ;;  %v3989_v41 = vpop.f32.mrb[248].mxu1 }
 0x4ce   :  { %v2677_v42 = vadd.f32 %v2676_v31, %v8480_v59  ;;  %v2678_v4 = vpop.f32.mrb[249].mxu0  ;;  %v3990_v57 = vadd.f32 %v3989_v41, %v8410_v43  ;;  %v3991_v29 = vpop.f32.mrb[249].mxu1 }
 0x4cf   :  { %v2679_v13 = vadd.f32 %v2678_v4, %v8482_v60  ;;  %v2680_v5 = vpop.f32.mrb[250].mxu0  ;;  %v3992_v39 = vadd.f32 %v3991_v29, %v8486_v61  ;;  %v3993_v38 = vpop.f32.mrb[250].mxu1 }
 0x4d0   :  { %v5016_v14 = vmax.f32 %v2677_v42, 0.0  ;;  %v2681_v44 = vadd.f32 %v2680_v5, %v8480_v59  ;;  %v2682_v54 = vpop.f32.mrb[251].mxu0  ;;  %v5018_v55 = vmax.f32 %v3990_v57, 0.0  ;;  %v3994_v50 = vadd.f32 %v3993_v38, %v8410_v43  ;;  %v3995_v63 = vpop.f32.mrb[251].mxu1 }
 0x4d1   :  { %v5017_v1 = vmax.f32 %v2679_v13, 0.0  ;;  %v2683_v48 = vadd.f32 %v2682_v54, %v8482_v60  ;;  %v5019_v2 = vmax.f32 %v3992_v39, 0.0  ;;  %v3996_v20 = vadd.f32 %v3995_v63, %v8486_v61 }
 0x4d2   :  { %v6095_v25 = vadd.f32 %v6094_v22, %v5016_v14  ;;  %v5020_v34 = vmax.f32 %v2681_v44, 0.0  ;;  %v6169_v35 = vadd.f32 %v6168_v3, %v5018_v55  ;;  %v5022_v16 = vmax.f32 %v3994_v50, 0.0 }
 0x4d3   :  { %v6132_v58 = vadd.f32 %v6131_v40, %v5017_v1  ;;  %v5021_v0 = vmax.f32 %v2683_v48, 0.0  ;;  %v6206_v9 = vadd.f32 %v6205_v45, %v5019_v2  ;;  %v5023_v10 = vmax.f32 %v3996_v20, 0.0 }
 0x4d4   :  { %v6096_v8 = vadd.f32 %v6095_v25, %v5020_v34  ;;  %v6170_v11 = vadd.f32 %v6169_v35, %v5022_v16 }
 0x4d5   :  { %v6133_v6 = vadd.f32 %v6132_v58, %v5021_v0  ;;  %v6207_v12 = vadd.f32 %v6206_v9, %v5023_v10  ;;  %v2686_v56 = vpop.f32.mrb[252].mxu0  ;;  %v3999_v23 = vpop.f32.mrb[252].mxu1 }
 0x4d6   :  { %v2687_v7 = vadd.f32 %v2686_v56, %v8480_v59  ;;  %v4000_v46 = vadd.f32 %v3999_v23, %v8410_v43  ;;  %v2688_v17 = vpop.f32.mrb[253].mxu0  ;;  %v4001_v18 = vpop.f32.mrb[253].mxu1 }
 0x4d7   :  { %v2689_v19 = vadd.f32 %v2688_v17, %v8482_v60  ;;  %v4002_v62 = vadd.f32 %v4001_v18, %v8486_v61  ;;  %v2690_v15 = vpop.f32.mrb[254].mxu0  ;;  %v4003_v21 = vpop.f32.mrb[254].mxu1 }
 0x4d8   :  { %v5024_v27 = vmax.f32 %v2687_v7, 0.0  ;;  %v5026_v28 = vmax.f32 %v4000_v46, 0.0  ;;  %v2691_v53 = vadd.f32 %v2690_v15, %v8480_v59  ;;  %v4004_v33 = vadd.f32 %v4003_v21, %v8410_v43  ;;  %v2692_v36 = vpop.f32.mrb[255].mxu0  ;;  %v4005_v26 = vpop.f32.mrb[255].mxu1  ;;  %v8090_v21 = vld [vmem:[%s10832_s3 + $0x200] ss:$16 sps:$4 sm:$0xff]  }
 0x4d9   :  { %v5025_v51 = vmax.f32 %v2689_v19, 0.0  ;;  %v5027_v24 = vmax.f32 %v4002_v62, 0.0  ;;  %v2693_v47 = vadd.f32 %v2692_v36, %v8482_v60  ;;  %v4006_v37 = vadd.f32 %v4005_v26, %v8486_v61  ;;  %v8107_v36 = vld [vmem:[%s10832_s3 + $0x24c] ss:$16 sps:$4 sm:$0xff]   ;;  %v8102_v26 = vld [vmem:[%s10832_s3 + $0x240] ss:$16 sps:$4 sm:$0xff]  }
 0x4da   :  { %v6097_v22 = vadd.f32 %v6096_v8, %v5024_v27  ;;  %v6171_v3 = vadd.f32 %v6170_v11, %v5026_v28  ;;  %v5028_v40 = vmax.f32 %v2691_v53, 0.0  ;;  %v5030_v31 = vmax.f32 %v4004_v33, 0.0  ;;  %v8093_v27 = vld [vmem:[%s10832_s3 + $0x208] ss:$16 sps:$4 sm:$0xff]   ;;  %v8104_v33 = vld [vmem:[%s10832_s3 + $0x244] ss:$16 sps:$4 sm:$0xff]  }
 0x4db   :  { %v6134_v45 = vadd.f32 %v6133_v6, %v5025_v51  ;;  %v6208_v41 = vadd.f32 %v6207_v12, %v5027_v24  ;;  %v5029_v42 = vmax.f32 %v2693_v47, 0.0  ;;  %v5031_v4 = vmax.f32 %v4006_v37, 0.0  ;;  %v8099_v53 = vld [vmem:[%s10832_s3 + $0x228] ss:$16 sps:$4 sm:$0xff]   ;;  %v8110_v24 = vld [vmem:[%s10832_s3 + $0x264] ss:$16 sps:$4 sm:$0xff]  }
 0x4dc   :  { %v6098_v57 = vadd.f32 %v6097_v22, %v5028_v40  ;;  %v6172_v59 = vadd.f32 %v6171_v3, %v5030_v31  ;;  %v8105_v51 = vld [vmem:[%s10832_s3 + $0x248] ss:$16 sps:$4 sm:$0xff]   ;;  %v8113_v47 = vld [vmem:[%s10832_s3 + $0x26c] ss:$16 sps:$4 sm:$0xff]   ;;  %v8108_v37 = vld [vmem:[%s10832_s3 + $0x260] ss:$16 sps:$4 sm:$0xff]  }
 0x4dd   :  { %v6135_v29 = vadd.f32 %v6134_v45, %v5029_v42  ;;  %v6209_v43 = vadd.f32 %v6208_v41, %v5031_v4  ;;  %v8111_v22 = vld [vmem:[%s10832_s3 + $0x268] ss:$16 sps:$4 sm:$0xff]   ;;  %v8116_v3 = vld [vmem:[%s10832_s3 + $0x284] ss:$16 sps:$4 sm:$0xff]   ;;  %v8119_v40 = vld [vmem:[%s10832_s3 + $0x28c] ss:$16 sps:$4 sm:$0xff]  }
 0x4de   :  { %v6099_v13 = vrot.slane %v6098_v57, 4  ;;  %v6173_v5 = vrot.slane %v6172_v59, 4  ;;  %v8114_v31 = vld [vmem:[%s10832_s3 + $0x280] ss:$16 sps:$4 sm:$0xff]   ;;  %v8117_v45 = vld [vmem:[%s10832_s3 + $0x288] ss:$16 sps:$4 sm:$0xff]  }
 0x4df   :  { %v6136_v39 = vrot.slane %v6135_v29, 4  ;;  %v6210_v38 = vrot.slane %v6209_v43, 4  ;;  %v8122_v41 = vld [vmem:[%s10832_s3 + $0x2a4] ss:$16 sps:$4 sm:$0xff]   ;;  %v8125_v42 = vld [vmem:[%s10832_s3 + $0x2ac] ss:$16 sps:$4 sm:$0xff]  }
 0x4e0   :  { %v6100_v14 = vadd.f32 %v6099_v13, %v6098_v57  ;;  %v6174_v60 = vadd.f32 %v6173_v5, %v6172_v59  ;;  %v8120_v4 = vld [vmem:[%s10832_s3 + $0x2a0] ss:$16 sps:$4 sm:$0xff]   ;;  %v8123_v57 = vld [vmem:[%s10832_s3 + $0x2a8] ss:$16 sps:$4 sm:$0xff]   ;;  %v8128_v59 = vld [vmem:[%s10832_s3 + $0x2c4] ss:$16 sps:$4 sm:$0xff]  }
 0x4e1   :  { %v6137_v44 = vadd.f32 %v6136_v39, %v6135_v29  ;;  %v6211_v61 = vadd.f32 %v6210_v38, %v6209_v43  ;;  %v8131_v29 = vld [vmem:[%s10832_s3 + $0x2cc] ss:$16 sps:$4 sm:$0xff]   ;;  %v8126_v43 = vld [vmem:[%s10832_s3 + $0x2c0] ss:$16 sps:$4 sm:$0xff]   ;;  %v8129_v13 = vld [vmem:[%s10832_s3 + $0x2c8] ss:$16 sps:$4 sm:$0xff]  }
 0x4e2   :  { %v6101_v54 = vrot.slane %v6100_v14, 2  ;;  %v6175_v55 = vrot.slane %v6174_v60, 2  ;;  %v8134_v5 = vld [vmem:[%s10832_s3 + $0x2e4] ss:$16 sps:$4 sm:$0xff]   ;;  %v8137_v39 = vld [vmem:[%s10832_s3 + $0x2ec] ss:$16 sps:$4 sm:$0xff]  }
 0x4e3   :  { %v6138_v50 = vrot.slane %v6137_v44, 2  ;;  %v6212_v63 = vrot.slane %v6211_v61, 2  ;;  %v8132_v38 = vld [vmem:[%s10832_s3 + $0x2e0] ss:$16 sps:$4 sm:$0xff]  }
 0x4e4   :  { %v6102_v1 = vadd.f32 %v6101_v54, %v6100_v14  ;;  %v6176_v48 = vadd.f32 %v6175_v55, %v6174_v60  ;;  %v8135_v14 = vld [vmem:[%s10832_s3 + $0x2e8] ss:$16 sps:$4 sm:$0xff]   ;;  %v8140_v60 = vld [vmem:[%s10832_s3 + $0x304] ss:$16 sps:$4 sm:$0xff]  }
 0x4e5   :  { %v6139_v2 = vadd.f32 %v6138_v50, %v6137_v44  ;;  %v6213_v20 = vadd.f32 %v6212_v63, %v6211_v61  ;;  %v8143_v44 = vld [vmem:[%s10832_s3 + $0x30c] ss:$16 sps:$4 sm:$0xff]   ;;  %v8138_v61 = vld [vmem:[%s10832_s3 + $0x300] ss:$16 sps:$4 sm:$0xff]   ;;  %v8141_v54 = vld [vmem:[%s10832_s3 + $0x308] ss:$16 sps:$4 sm:$0xff]  }
 0x4e6   :  { %v6103_v25 = vrot.slane %v6102_v1, 1  ;;  %v6177_v34 = vrot.slane %v6176_v48, 1  ;;  %v8146_v55 = vld [vmem:[%s10832_s3 + $0x324] ss:$16 sps:$4 sm:$0xff]   ;;  %v8149_v50 = vld [vmem:[%s10832_s3 + $0x32c] ss:$16 sps:$4 sm:$0xff]  }
 0x4e7   :  { %v6140_v35 = vrot.slane %v6139_v2, 1  ;;  %v6214_v16 = vrot.slane %v6213_v20, 1  ;;  %v8144_v63 = vld [vmem:[%s10832_s3 + $0x320] ss:$16 sps:$4 sm:$0xff]  }
 0x4e8   :  { %v6104_v58 = vadd.f32 %v6103_v25, %v6102_v1  ;;  %v6178_v0 = vadd.f32 %v6177_v34, %v6176_v48  ;;  %v8147_v1 = vld [vmem:[%s10832_s3 + $0x328] ss:$16 sps:$4 sm:$0xff]   ;;  %v8152_v48 = vld [vmem:[%s10832_s3 + $0x344] ss:$16 sps:$4 sm:$0xff]  }
 0x4e9   :  { %v6141_v9 = vadd.f32 %v6140_v35, %v6139_v2  ;;  %v6215_v10 = vadd.f32 %v6214_v16, %v6213_v20  ;;  %v8155_v2 = vld [vmem:[%s10832_s3 + $0x34c] ss:$16 sps:$4 sm:$0xff]   ;;  %v8150_v20 = vld [vmem:[%s10832_s3 + $0x340] ss:$16 sps:$4 sm:$0xff]   ;;  %v8153_v25 = vld [vmem:[%s10832_s3 + $0x348] ss:$16 sps:$4 sm:$0xff]  }
 0x4ea   :  { %v6244_v8 = vpack.c.bf16 %v6104_v58, %v6104_v58  ;;  %v6246_v11 = vpack.c.bf16 %v6178_v0, %v6178_v0  ;;  %v8158_v34 = vld [vmem:[%s10832_s3 + $0x364] ss:$16 sps:$4 sm:$0xff]   ;;  %v8161_v35 = vld [vmem:[%s10832_s3 + $0x36c] ss:$16 sps:$4 sm:$0xff]   ;;  %v8156_v16 = vld [vmem:[%s10832_s3 + $0x360] ss:$16 sps:$4 sm:$0xff]  }
 0x4eb   :  { %v6245_v6 = vpack.c.bf16 %v6141_v9, %v6141_v9  ;;  %v6247_v12 = vpack.c.bf16 %v6215_v10, %v6215_v10  ;;  %v8159_v58 = vld [vmem:[%s10832_s3 + $0x368] ss:$16 sps:$4 sm:$0xff]   ;;  %v8164_v0 = vld [vmem:[%s10832_s3 + $0x384] ss:$16 sps:$4 sm:$0xff]   ;;  %v8167_v9 = vld [vmem:[%s10832_s3 + $0x38c] ss:$16 sps:$4 sm:$0xff]  }
 0x4ec   :  { %v6436_v56 = vunpack.c.l.b16 %v6244_v8  ;;  %v6438_v23 = vunpack.c.l.b16 %v6246_v11  ;;  %v8162_v10 = vld [vmem:[%s10832_s3 + $0x380] ss:$16 sps:$4 sm:$0xff]   ;;  %v8165_v8 = vld [vmem:[%s10832_s3 + $0x388] ss:$16 sps:$4 sm:$0xff]   ;;  %v8170_v11 = vld [vmem:[%s10832_s3 + $0x3a4] ss:$16 sps:$4 sm:$0xff]  }
 0x4ed   :  { %v6437_v7 = vunpack.c.l.b16 %v6245_v6  ;;  %v6439_v46 = vunpack.c.l.b16 %v6247_v12  ;;  %v8173_v6 = vld [vmem:[%s10832_s3 + $0x3ac] ss:$16 sps:$4 sm:$0xff]   ;;  %v8168_v12 = vld [vmem:[%s10832_s3 + $0x3a0] ss:$16 sps:$4 sm:$0xff]  }
 0x4ee   :  { %v6453_v17 = vsel %vm6452_vm9, %v6436_v56, %v10503_v32  ;;  %v10625_v18 = vsel %vm6452_vm9, %v6438_v23, %v10521_v30  ;;  %v8098_v32 = vld [vmem:[%s10832_s3 + $0x224] ss:$16 sps:$4 sm:$0xff]   ;;  %v8171_v56 = vld [vmem:[%s10832_s3 + $0x3a8] ss:$16 sps:$4 sm:$0xff]  }
 0x4ef   :  { %v6460_v19 = vsel %vm6452_vm9, %v6437_v7, %v10516_v49  ;;  %v6474_v62 = vsel %vm6452_vm9, %v6439_v46, %v10525_v52  ;;  %v6475_v28 = vpack.c.b16 %v6453_v17, %v6453_v17  ;;  %v8101_v49 = vld [vmem:[%s10832_s3 + $0x22c] ss:$16 sps:$4 sm:$0xff]   ;;  %v8096_v52 = vld [vmem:[%s10832_s3 + $0x220] ss:$16 sps:$4 sm:$0xff]   ;;  %v8176_v23 = vld [vmem:[%s10832_s3 + $0x3c4] ss:$16 sps:$4 sm:$0xff]  }
 0x4f0   :  { %v6476_v15 = vpack.c.b16 %v6460_v19, %v6460_v19  ;;  %v6478_v30 = vpack.c.b16 %v6474_v62, %v6474_v62  ;;  %v8179_v7 = vld [vmem:[%s10832_s3 + $0x3cc] ss:$16 sps:$4 sm:$0xff]   ;;  %v8174_v46 = vld [vmem:[%s10832_s3 + $0x3c0] ss:$16 sps:$4 sm:$0xff]   ;;  %v8177_v17 = vld [vmem:[%s10832_s3 + $0x3c8] ss:$16 sps:$4 sm:$0xff]  }
 0x4f1   :  { %v8182_v19 = vld [vmem:[%s10832_s3 + $0x3e4] ss:$16 sps:$4 sm:$0xff]   ;;  %v8185_v62 = vld [vmem:[%s10832_s3 + $0x3ec] ss:$16 sps:$4 sm:$0xff]  }
 0x4f2   :  { %7155 = vmatprep.mubr.bf16.mxu0 %v6476_v15  ;;  %7237 = vmatprep.mubr.bf16.mxu1 %v6476_v15  ;;  %v8180_v15 = vld [vmem:[%s10832_s3 + $0x3e0] ss:$16 sps:$4 sm:$0xff]  }
 0x4f3   :  { %7156 = vmatmul.mubr.bf16.vlgmr.msra.gmra.mrb[0].mxu0 %v6475_v28  ;;  %7238 = vmatmul.mubr.bf16.vlgmr.msra.gmra.mrb[0].mxu1 %v6475_v28 }
 0x4f4   :  { %7165 = vmatpush1.bf16.msra.mxu0 %v8090_v21  ;;  %7247 = vmatpush1.bf16.msra.mxu1 %v8093_v27  ;;  %v8183_v21 = vld [vmem:[%s10832_s3 + $0x3e8] ss:$16 sps:$4 sm:$0xff]   ;;  %v6477_v27 = vpack.c.b16 %v10625_v18, %v10625_v18  ;;  %s8186_s3 = scalar_lea.vmem %s7312_s11, 256 }
 0x4f5   :  { %7196 = vmatprep.mubr.bf16.mxu0 %v6478_v30  ;;  %7278 = vmatprep.mubr.bf16.mxu1 %v6478_v30  ;;  %p8187_p0 = scmp.ne.s32.totalorder %s7312_s11, %s8186_s3  ;;  %p8192_p2 = scmp.lt.s32.totalorder %s8186_s3, %s8186_s3 }
 0x4f6   :  { %7166 = vmatprep.subr.bf16.mxu0 %v8098_v32  ;;  %7248 = vmatprep.subr.bf16.mxu1 %v8101_v49 }
 0x4f7   :  { %p8193_p3 = por %p8192_p2, %p8191_p1 }
 0x4f8   :  { %7167 = vmatpush1.bf16.msra.mxu0 %v8096_v52  ;;  %7249 = vmatpush1.bf16.msra.mxu1 %v8099_v53 }
 0x4f9   :  { %7168 = vmatprep.subr.bf16.mxu0 %v8104_v33  ;;  %7250 = vmatprep.subr.bf16.mxu1 %v8107_v36  ;;  %p8194_p4 = pnand %p8193_p3, %p8187_p0 }
 0x4fc   :  { %7169 = vmatpush1.bf16.msra.mxu0 %v8102_v26  ;;  %7251 = vmatpush1.bf16.msra.mxu1 %v8105_v51 }
 0x4fd   :  { %7170 = vmatprep.subr.bf16.mxu0 %v8110_v24  ;;  %7252 = vmatprep.subr.bf16.mxu1 %v8113_v47 }
 0x500   :  { %7171 = vmatpush1.bf16.msra.mxu0 %v8108_v37  ;;  %7253 = vmatpush1.bf16.msra.mxu1 %v8111_v22 }
 0x501   :  { %7172 = vmatprep.subr.bf16.mxu0 %v8116_v3  ;;  %7254 = vmatprep.subr.bf16.mxu1 %v8119_v40 }
 0x504   :  { %7173 = vmatpush1.bf16.msra.mxu0 %v8114_v31  ;;  %7255 = vmatpush1.bf16.msra.mxu1 %v8117_v45 }
 0x505   :  { %7174 = vmatprep.subr.bf16.mxu0 %v8122_v41  ;;  %7256 = vmatprep.subr.bf16.mxu1 %v8125_v42 }
 0x508   :  { %7175 = vmatpush1.bf16.msra.mxu0 %v8120_v4  ;;  %7257 = vmatpush1.bf16.msra.mxu1 %v8123_v57 }
 0x509   :  { %7176 = vmatprep.subr.bf16.mxu0 %v8128_v59  ;;  %7258 = vmatprep.subr.bf16.mxu1 %v8131_v29 }
 0x50c   :  { %7177 = vmatpush1.bf16.msra.mxu0 %v8126_v43  ;;  %7259 = vmatpush1.bf16.msra.mxu1 %v8129_v13 }
 0x50d   :  { %7178 = vmatprep.subr.bf16.mxu0 %v8134_v5  ;;  %7260 = vmatprep.subr.bf16.mxu1 %v8137_v39 }
 0x510   :  { %7179 = vmatpush1.bf16.msra.mxu0 %v8132_v38  ;;  %7261 = vmatpush1.bf16.msra.mxu1 %v8135_v14 }
 0x511   :  { %7180 = vmatprep.subr.bf16.mxu0 %v8140_v60  ;;  %7262 = vmatprep.subr.bf16.mxu1 %v8143_v44 }
 0x514   :  { %7181 = vmatpush1.bf16.msra.mxu0 %v8138_v61  ;;  %7263 = vmatpush1.bf16.msra.mxu1 %v8141_v54 }
 0x515   :  { %7182 = vmatprep.subr.bf16.mxu0 %v8146_v55  ;;  %7264 = vmatprep.subr.bf16.mxu1 %v8149_v50 }
 0x518   :  { %7183 = vmatpush1.bf16.msra.mxu0 %v8144_v63  ;;  %7265 = vmatpush1.bf16.msra.mxu1 %v8147_v1 }
 0x519   :  { %7184 = vmatprep.subr.bf16.mxu0 %v8152_v48  ;;  %7266 = vmatprep.subr.bf16.mxu1 %v8155_v2 }
 0x51c   :  { %7185 = vmatpush1.bf16.msra.mxu0 %v8150_v20  ;;  %7267 = vmatpush1.bf16.msra.mxu1 %v8153_v25 }
 0x51d   :  { %7186 = vmatprep.subr.bf16.mxu0 %v8158_v34  ;;  %7268 = vmatprep.subr.bf16.mxu1 %v8161_v35 }
 0x520   :  { %7187 = vmatpush1.bf16.msra.mxu0 %v8156_v16  ;;  %7269 = vmatpush1.bf16.msra.mxu1 %v8159_v58 }
 0x521   :  { %7188 = vmatprep.subr.bf16.mxu0 %v8164_v0  ;;  %7270 = vmatprep.subr.bf16.mxu1 %v8167_v9 }
 0x524   :  { %7189 = vmatpush1.bf16.msra.mxu0 %v8162_v10  ;;  %7271 = vmatpush1.bf16.msra.mxu1 %v8165_v8 }
 0x525   :  { %7190 = vmatprep.subr.bf16.mxu0 %v8170_v11  ;;  %7272 = vmatprep.subr.bf16.mxu1 %v8173_v6 }
 0x528   :  { %7191 = vmatpush1.bf16.msra.mxu0 %v8168_v12  ;;  %7273 = vmatpush1.bf16.msra.mxu1 %v8171_v56 }
 0x529   :  { %7192 = vmatprep.subr.bf16.mxu0 %v8176_v23  ;;  %7274 = vmatprep.subr.bf16.mxu1 %v8179_v7 }
 0x52c   :  { %7193 = vmatpush1.bf16.msra.mxu0 %v8174_v46  ;;  %7275 = vmatpush1.bf16.msra.mxu1 %v8177_v17 }
 0x52d   :  { %7194 = vmatprep.subr.bf16.mxu0 %v8182_v19  ;;  %7276 = vmatprep.subr.bf16.mxu1 %v8185_v62 }
 0x530   :  { %7195 = vmatpush1.bf16.msra.mxu0 %v8180_v15  ;;  %7277 = vmatpush1.bf16.msra.mxu1 %v8183_v21 }
 0x533   :  { %7197 = vmatmul.mubr.bf16.vlgmr.msra.gmra.mrb[0].mxu0 %v6477_v27  ;;  %7279 = vmatmul.mubr.bf16.vlgmr.msra.gmra.mrb[0].mxu1 %v6477_v27 }
 0x606   :  { %v7198_v28 = vpop.f32.mrb[0].mxu0  ;;  %v7280_v32 = vpop.f32.mrb[0].mxu1 }
 0x607   :  { %v7200_v49 = vpop.f32.mrb[1].mxu0  ;;  %v7282_v30 = vpop.f32.mrb[1].mxu1 }
 0x608   :  { %v7841_v52 = vpack.c.bf16 %v7200_v49, %v7198_v28  ;;  %v7842_v53 = vpack.c.bf16 %v7282_v30, %v7280_v32  ;;  %v7202_v33 = vpop.f32.mrb[2].mxu0  ;;  %v7284_v36 = vpop.f32.mrb[2].mxu1 }
 0x609   :  { %v7203_v26 = vpop.f32.mrb[3].mxu0  ;;  %v7285_v51 = vpop.f32.mrb[3].mxu1 }
 0x60a   :  { %7303 = vst [vmem:[#allocation2] sm:$0xff] %v7841_v52  ;;  %7304 = vst [vmem:[#allocation2 + $0x8] sm:$0xff] %v7842_v53 }
 0x60b   :  { %8197 = shalt.err (!%p8194_p4)
}
 0x60c   :  { %s8198_s14 = scalar_lea.hbm %s10833_s4, 256 }
 0x60d   :  { %p8199_p5 = scmp.ne.s32.totalorder %s10833_s4, %s8198_s14  ;;  %p8202_p6 = scmp.lt.u32.totalorder %s8198_s14, %s10833_s4 }
 0x60f   :  { %p8204_p7 = pnand %p8202_p6, %p8199_p5 }
 0x611   :  { %8207 = shalt.err (!%p8204_p7)
}
 0x612   :  { %7314 = dma.vmem_to_hbm [thread:$0]  %s7312_s11, 256, %s10833_s4, [#allocation3]  }
 0x613   :  { %8208 = dma.done.wait [#allocation3], 256  }
 0x614   :  { %8209 = vsyncadd [#allocation3], 4294967040 }
 0x615   :  { %7318 = vsyncpa [#allocation3], 1 }

</bundles_post_ra>
